<compile_context>
chip_gen: v7x
topology: tpu7x:2x2x1
jax: 0.10.0
libtpu: 0.0.40
codegen_flags: <defaults>
</compile_context>

<pallas_src>
import math

import numpy as np
import jax
import jax.numpy as jnp
from jax import lax
from jax.experimental import pallas as pl
from jax.experimental.pallas import tpu as pltpu

EPS = 1e-5  # PyTorch BatchNorm default eps
HIGHEST = jax.lax.Precision.HIGHEST  # only used by the pure-JAX reference


# ----------------------------- in-kernel helpers -----------------------------

def _dw3x3_bn_relu(x, w9, shift):
    """Depthwise 3x3 (stride 1, pad 1, BN scale pre-folded into taps) + shift + ReLU.

    x:     (H, W, C) float32 value (NHWC tile, C on lanes, W on sublanes)
    w9:    (9, C) depthwise taps (already scaled by folded BN scale), row = kh*3+kw
    shift: (C,) folded BN shift

    H taps: free leading-axis slices of an H-padded copy.
    W taps: ONE pltpu.roll (XLU) per direction on the padded tile + edge mask,
    so there are no sublane-unaligned slices and only 2 rolls per call.
    """
    H, W, C = x.shape
    zrow = jnp.zeros((1, W, C), jnp.float32)
    xp = jnp.concatenate([zrow, x, zrow], axis=0)            # (H+2, W, C)

    col = lax.broadcasted_iota(jnp.int32, (H + 2, W, C), 1)  # W index
    # kw=0 tap reads x[w-1]: roll(+1), invalid at w=0 (wrapped column) -> mask
    xl = pltpu.roll(xp, shift=1, axis=1) * (col > 0).astype(jnp.float32)
    # kw=2 tap reads x[w+1]: roll(W-1), invalid at w=W-1 -> mask
    xr = pltpu.roll(xp, shift=W - 1, axis=1) * (col < W - 1).astype(jnp.float32)
    taps = (xl, xp, xr)                                      # indexed by kw

    acc = jnp.zeros((H, W, C), jnp.float32)
    for kh in range(3):
        for kw in range(3):
            acc = acc + taps[kw][kh:kh + H] * w9[kh * 3 + kw]
    return jnp.maximum(acc + shift, 0.0)


def _spp_decoder_kernel(
    x_ref, llf_ref, wup_ref,
    w1x1_ref, b1x1_ref,
    wdwa_ref, bdwa_ref,
    wdwb_ref, bdwb_ref,
    wpwa_ref, wpwb_ref, bpw1_ref,
    wdw2_ref, bdw2_ref,
    wpw2_ref, bpw2_ref,
    o_ref,
):
    f32, bf16 = jnp.float32, jnp.bfloat16
    _, Hi, Wi, Cx = x_ref.shape
    _, Ho, Wo, Cl = llf_ref.shape
    red = w1x1_ref.shape[1]
    Cm = wpwa_ref.shape[1]          # sep1 output channels (256)
    Co = wpw2_ref.shape[1]          # sep2 output channels (256)

    # --- bilinear upsample (align_corners=True) as ONE MXU matmul ------------
    # wup = kron(wh, ww): x_up[h*Wo+w, c] = sum_{i,j} wh[h,i] * ww[w,j] * x[i,j,c]
    x2 = x_ref[0].reshape(Hi * Wi, Cx)
    x_up = jnp.dot(wup_ref[...], x2.astype(bf16),
                   preferred_element_type=f32)                      # (Ho*Wo, Cx)

    # --- low-level branch: 1x1 conv (BN scale folded) + shift + ReLU ---------
    l2 = llf_ref[0].reshape(Ho * Wo, Cl)
    lred = jnp.dot(l2.astype(bf16), w1x1_ref[...],
                   preferred_element_type=f32)                      # (Ho*Wo, red)
    lred = jnp.maximum(lred + b1x1_ref[0], 0.0)

    # --- sep1 depthwise over the two channel groups (implicit channel concat) -
    ya = _dw3x3_bn_relu(x_up.reshape(Ho, Wo, Cx), wdwa_ref[...], bdwa_ref[0])
    yb = _dw3x3_bn_relu(lred.reshape(Ho, Wo, red), wdwb_ref[...], bdwb_ref[0])

    # --- sep1 pointwise: split-K matmul over the two groups + shift + ReLU ---
    z1 = jnp.dot(ya.reshape(Ho * Wo, Cx).astype(bf16), wpwa_ref[...],
                 preferred_element_type=f32)
    z1 = z1 + jnp.dot(yb.reshape(Ho * Wo, red).astype(bf16), wpwb_ref[...],
                      preferred_element_type=f32)
    z1 = jnp.maximum(z1 + bpw1_ref[0], 0.0)                         # (Ho*Wo, Cm)

    # --- sep2: depthwise + shift + ReLU -> pointwise + shift + ReLU ----------
    y2 = _dw3x3_bn_relu(z1.reshape(Ho, Wo, Cm), wdw2_ref[...], bdw2_ref[0])
    z2 = jnp.dot(y2.reshape(Ho * Wo, Cm).astype(bf16), wpw2_ref[...],
                 preferred_element_type=f32)
    z2 = jnp.maximum(z2 + bpw2_ref[0], 0.0)                         # (Ho*Wo, Co)

    o_ref[...] = z2.reshape(1, Ho, Wo, Co).astype(o_ref.dtype)      # lane-dense store


# ----------------------------- wrapper (glue) -----------------------------

def _bilinear_matrix(li, lo):
    """(lo, li) interpolation matrix for align_corners=True bilinear resize."""
    m = np.zeros((lo, li), dtype=np.float32)
    if lo == 1:
        m[0, 0] = 1.0
        return m
    scale = (li - 1) / (lo - 1)
    for o in range(lo):
        src = o * scale
        i0 = min(int(math.floor(src)), li - 1)
        i1 = min(i0 + 1, li - 1)
        f = src - i0
        m[o, i0] += 1.0 - f
        m[o, i1] += f
    return m


def spp_decoder_forward(x_nchw, llf_nchw, p):
    """SPPDecoder forward. NCHW inputs (PyTorch layout); returns NHWC output."""
    x = jnp.transpose(x_nchw, (0, 2, 3, 1)).astype(jnp.float32)      # (N,Hi,Wi,Cx)
    llf = jnp.transpose(llf_nchw, (0, 2, 3, 1)).astype(jnp.float32)  # (N,Ho,Wo,Cl)
    N, Hi, Wi, Cx = x.shape
    _, Ho, Wo, Cl = llf.shape
    red = p['conv_w_oi'].shape[0]
    Cm = p['pw1_oi'].shape[0]          # 256
    Co = p['pw2_oi'].shape[0]          # 256
    bf16 = jnp.bfloat16

    # Fused 2-D bilinear weight (Ho*Wo, Hi*Wi); K = Hi*Wi (64 at test shapes).
    wup = jnp.asarray(np.kron(_bilinear_matrix(Hi, Ho), _bilinear_matrix(Wi, Wo)),
                      dtype=bf16)

    # Parameter re-layout (glue, O(weights)): fold BN scales into the conv
    # weights, split sep1 depthwise/pointwise params into the x-group (first Cx
    # concat channels) and the llf-group (last `red`), pre-cast MXU weights to
    # bf16.
    w1x1 = (p['conv_w_oi'].T * p['bn_scale'][None, :]).astype(bf16)      # (Cl, red)
    wdw1 = (p['dw1'] * p['sdw1'][:, None, None]).transpose(1, 2, 0)
    wdw1 = wdw1.reshape(9, Cx + red)                                      # (9, Ccat)
    wpw1 = (p['pw1_oi'].T * p['spw1'][None, :]).astype(bf16)             # (Ccat, Cm)
    wdwa, wdwb = wdw1[:, :Cx], wdw1[:, Cx:]
    wpwa, wpwb = wpw1[:Cx, :], wpw1[Cx:, :]
    bdwa, bdwb = p['bdw1'][:Cx], p['bdw1'][Cx:]
    wdw2 = (p['dw2'] * p['sdw2'][:, None, None]).transpose(1, 2, 0).reshape(9, Cm)
    wpw2 = (p['pw2_oi'].T * p['spw2'][None, :]).astype(bf16)             # (Cm, Co)

    row2 = lambda v: v[None, :]

    def c2(shape):  # grid-invariant 2-D operand (constant block index)
        return pl.BlockSpec(shape, lambda n: (0, 0))

    out = pl.pallas_call(
        _spp_decoder_kernel,
        out_shape=jax.ShapeDtypeStruct((N, Ho, Wo, Co), jnp.float32),
        grid=(N,),
        in_specs=[
            pl.BlockSpec((1, Hi, Wi, Cx), lambda n: (n, 0, 0, 0)),
            pl.BlockSpec((1, Ho, Wo, Cl), lambda n: (n, 0, 0, 0)),
            c2((Ho * Wo, Hi * Wi)),
            c2((Cl, red)), c2((1, red)),
            c2((9, Cx)), c2((1, Cx)),
            c2((9, red)), c2((1, red)),
            c2((Cx, Cm)), c2((red, Cm)), c2((1, Cm)),
            c2((9, Cm)), c2((1, Cm)),
            c2((Cm, Co)), c2((1, Co)),
        ],
        out_specs=pl.BlockSpec((1, Ho, Wo, Co), lambda n: (n, 0, 0, 0)),
        compiler_params=pltpu.CompilerParams(
            dimension_semantics=("parallel",),
            vmem_limit_bytes=32 * 1024 * 1024),
    )(
        x, llf, wup,
        w1x1, row2(p['bn_shift']),
        wdwa, row2(bdwa),
        wdwb, row2(bdwb),
        wpwa, wpwb, row2(p['bpw1']),
        wdw2, row2(p['bdw2']),
        wpw2, row2(p['bpw2']),
    )
    return out  # NHWC


# ----------------------------- parameters -----------------------------

def _bn_fold(key, c):
    k1, k2, k3, k4 = jax.random.split(key, 4)
    gamma = 1.0 + 0.1 * jax.random.normal(k1, (c,), jnp.float32)
    beta = 0.1 * jax.random.normal(k2, (c,), jnp.float32)
    mean = 0.1 * jax.random.normal(k3, (c,), jnp.float32)
    var = jax.random.uniform(k4, (c,), jnp.float32, 0.5, 1.5)
    scale = gamma / jnp.sqrt(var + EPS)
    shift = beta - mean * scale
    return scale, shift


def init_params(key, in_channels, reduced=48):
    c1 = 256 + reduced
    ks = jax.random.split(key, 10)
    p = {}
    p['conv_w_oi'] = 0.1 * jax.random.normal(ks[0], (reduced, in_channels), jnp.float32)
    p['bn_scale'], p['bn_shift'] = _bn_fold(ks[1], reduced)
    # sep1: depthwise (c1) + pointwise (c1 -> 256)
    p['dw1'] = 0.1 * jax.random.normal(ks[2], (c1, 3, 3), jnp.float32)
    p['sdw1'], p['bdw1'] = _bn_fold(ks[3], c1)
    p['pw1_oi'] = 0.05 * jax.random.normal(ks[4], (256, c1), jnp.float32)
    p['spw1'], p['bpw1'] = _bn_fold(ks[5], 256)
    # sep2: depthwise (256) + pointwise (256 -> 256)
    p['dw2'] = 0.1 * jax.random.normal(ks[6], (256, 3, 3), jnp.float32)
    p['sdw2'], p['bdw2'] = _bn_fold(ks[7], 256)
    p['pw2_oi'] = 0.05 * jax.random.normal(ks[8], (256, 256), jnp.float32)
    p['spw2'], p['bpw2'] = _bn_fold(ks[9], 256)
    return p


# ----------------------------- pure-JAX reference (f32 HIGHEST) ---------------

def _ref_sep(x, dw_c33, sdw, bdw, pw_oi, spw, bpw):
    C = x.shape[1]
    y = lax.conv_general_dilated(x, dw_c33[:, None, :, :], (1, 1), ((1, 1), (1, 1)),
                                 feature_group_count=C,
                                 dimension_numbers=('NCHW', 'OIHW', 'NCHW'),
                                 precision=HIGHEST)
    y = jnp.maximum(y * sdw[None, :, None, None] + bdw[None, :, None, None], 0.0)
    z = lax.conv_general_dilated(y, pw_oi[:, :, None, None], (1, 1), ((0, 0), (0, 0)),
                                 dimension_numbers=('NCHW', 'OIHW', 'NCHW'),
                                 precision=HIGHEST)
    return jnp.maximum(z * spw[None, :, None, None] + bpw[None, :, None, None], 0.0)


def _ref_forward(x, llf, p):
    H, W = llf.shape[2], llf.shape[3]
    wh = _bilinear_matrix(x.shape[2], H)
    ww = _bilinear_matrix(x.shape[3], W)
    xu = jnp.einsum('oh,nchw->ncow', wh, x, precision=HIGHEST)
    xu = jnp.einsum('pw,ncow->ncop', ww, xu, precision=HIGHEST)
    l = lax.conv_general_dilated(llf, p['conv_w_oi'][:, :, None, None], (1, 1),
                                 ((0, 0), (0, 0)),
                                 dimension_numbers=('NCHW', 'OIHW', 'NCHW'),
                                 precision=HIGHEST)
    l = jnp.maximum(l * p['bn_scale'][None, :, None, None]
                    + p['bn_shift'][None, :, None, None], 0.0)
    c = jnp.concatenate([xu, l], axis=1)
    c = _ref_sep(c, p['dw1'], p['sdw1'], p['bdw1'], p['pw1_oi'], p['spw1'], p['bpw1'])
    c = _ref_sep(c, p['dw2'], p['sdw2'], p['bdw2'], p['pw2_oi'], p['spw2'], p['bpw2'])
    return c


# ----------------------------- main -----------------------------

if __name__ == "__main__":
    key = jax.random.PRNGKey(0)
    k_x, k_l, k_p = jax.random.split(key, 3)

    in_channels, reduced = 32, 48
    # x channels must be 256 (sep1 expects 256 + reduced after concat)
    x = jax.random.normal(k_x, (2, 256, 8, 8), jnp.float32)              # NCHW ASPP feature
    llf = jax.random.normal(k_l, (2, in_channels, 16, 16), jnp.float32)  # NCHW low-level feature
    params = init_params(k_p, in_channels, reduced)

    fwd = jax.jit(spp_decoder_forward)
    out_nhwc = jax.block_until_ready(fwd(x, llf, params))
    out_nchw = jnp.transpose(out_nhwc, (0, 3, 1, 2))

    ref = jax.block_until_ready(_ref_forward(x, llf, params))
    assert out_nchw.shape == ref.shape == (2, 256, 16, 16)
    # Kernel uses bf16 MXU operands (f32 accumulation); reference is f32 HIGHEST.
    err = float(np.max(np.abs(np.asarray(out_nchw) - np.asarray(ref))))
    assert np.allclose(np.asarray(out_nchw), np.asarray(ref), rtol=2e-2, atol=2e-2), err

    print("KERNEL_OK")
</pallas_src>

<mosaic_0001>
module attributes {stable_mosaic.version = 11 : i64} {
  func.func @_spp_decoder_kernel(%arg0: i32, %arg1: memref<1x8x8x256xf32, #tpu.memory_space<vmem>>, %arg2: memref<1x16x16x32xf32, #tpu.memory_space<vmem>>, %arg3: memref<256x64xbf16, #tpu.memory_space<vmem>>, %arg4: memref<32x48xbf16, #tpu.memory_space<vmem>>, %arg5: memref<1x48xf32, #tpu.memory_space<vmem>>, %arg6: memref<9x256xf32, #tpu.memory_space<vmem>>, %arg7: memref<1x256xf32, #tpu.memory_space<vmem>>, %arg8: memref<9x48xf32, #tpu.memory_space<vmem>>, %arg9: memref<1x48xf32, #tpu.memory_space<vmem>>, %arg10: memref<256x256xbf16, #tpu.memory_space<vmem>>, %arg11: memref<48x256xbf16, #tpu.memory_space<vmem>>, %arg12: memref<1x256xf32, #tpu.memory_space<vmem>>, %arg13: memref<9x256xf32, #tpu.memory_space<vmem>>, %arg14: memref<1x256xf32, #tpu.memory_space<vmem>>, %arg15: memref<256x256xbf16, #tpu.memory_space<vmem>>, %arg16: memref<1x256xf32, #tpu.memory_space<vmem>>, %arg17: memref<1x16x16x256xf32, #tpu.memory_space<vmem>>) attributes {dimension_semantics = [#tpu.dimension_semantics<parallel>], iteration_bounds = array<i64: 2>, scalar_prefetch = 0 : i64, scratch_operands = 0 : i64, tpu.core_type = #tpu.core_type<tc>, window_params = [{transform_indices = @transform_0, window_bounds = array<i64: 1, 8, 8, 256>}, {transform_indices = @transform_1, window_bounds = array<i64: 1, 16, 16, 32>}, {pipeline_mode = #tpu.pipeline_mode<synchronous>, transform_indices = @transform_2, window_bounds = array<i64: 256, 64>}, {pipeline_mode = #tpu.pipeline_mode<synchronous>, transform_indices = @transform_3, window_bounds = array<i64: 32, 48>}, {pipeline_mode = #tpu.pipeline_mode<synchronous>, transform_indices = @transform_4, window_bounds = array<i64: 1, 48>}, {pipeline_mode = #tpu.pipeline_mode<synchronous>, transform_indices = @transform_5, window_bounds = array<i64: 9, 256>}, {pipeline_mode = #tpu.pipeline_mode<synchronous>, transform_indices = @transform_6, window_bounds = array<i64: 1, 256>}, {pipeline_mode = #tpu.pipeline_mode<synchronous>, transform_indices = @transform_7, window_bounds = array<i64: 9, 48>}, {pipeline_mode = #tpu.pipeline_mode<synchronous>, transform_indices = @transform_8, window_bounds = array<i64: 1, 48>}, {pipeline_mode = #tpu.pipeline_mode<synchronous>, transform_indices = @transform_9, window_bounds = array<i64: 256, 256>}, {pipeline_mode = #tpu.pipeline_mode<synchronous>, transform_indices = @transform_10, window_bounds = array<i64: 48, 256>}, {pipeline_mode = #tpu.pipeline_mode<synchronous>, transform_indices = @transform_11, window_bounds = array<i64: 1, 256>}, {pipeline_mode = #tpu.pipeline_mode<synchronous>, transform_indices = @transform_12, window_bounds = array<i64: 9, 256>}, {pipeline_mode = #tpu.pipeline_mode<synchronous>, transform_indices = @transform_13, window_bounds = array<i64: 1, 256>}, {pipeline_mode = #tpu.pipeline_mode<synchronous>, transform_indices = @transform_14, window_bounds = array<i64: 256, 256>}, {pipeline_mode = #tpu.pipeline_mode<synchronous>, transform_indices = @transform_15, window_bounds = array<i64: 1, 256>}, {transform_indices = @transform_16, window_bounds = array<i64: 1, 16, 16, 256>}]} {
    %c0 = arith.constant 0 : index
    %c0_0 = arith.constant 0 : index
    %c0_1 = arith.constant 0 : index
    %c0_2 = arith.constant 0 : index
    %0 = vector.load %arg1[%c0, %c0_0, %c0_1, %c0_2] : memref<1x8x8x256xf32, #tpu.memory_space<vmem>>, vector<1x8x8x256xf32>
    %1 = vector.shape_cast %0 : vector<1x8x8x256xf32> to vector<8x8x256xf32>
    %2 = vector.shape_cast %1 : vector<8x8x256xf32> to vector<64x256xf32>
    %c0_3 = arith.constant 0 : index
    %c0_4 = arith.constant 0 : index
    %3 = vector.load %arg3[%c0_3, %c0_4] : memref<256x64xbf16, #tpu.memory_space<vmem>>, vector<256x64xbf16>
    %4 = arith.truncf %2 : vector<64x256xf32> to vector<64x256xbf16>
    %cst = arith.constant dense<0.000000e+00> : vector<256x256xf32>
    %5 = tpu.matmul %3, %4, %cst {dimension_numbers = #tpu.dot_dimension_numbers<[1], [0], [0], [1], [0, 0, 1, 1], [], []>} : vector<256x64xbf16>, vector<64x256xbf16>, vector<256x256xf32> -> vector<256x256xf32>
    %c0_5 = arith.constant 0 : index
    %c0_6 = arith.constant 0 : index
    %c0_7 = arith.constant 0 : index
    %c0_8 = arith.constant 0 : index
    %6 = vector.load %arg2[%c0_5, %c0_6, %c0_7, %c0_8] : memref<1x16x16x32xf32, #tpu.memory_space<vmem>>, vector<1x16x16x32xf32>
    %7 = vector.shape_cast %6 : vector<1x16x16x32xf32> to vector<16x16x32xf32>
    %8 = vector.shape_cast %7 : vector<16x16x32xf32> to vector<256x32xf32>
    %9 = arith.truncf %8 : vector<256x32xf32> to vector<256x32xbf16>
    %c0_9 = arith.constant 0 : index
    %c0_10 = arith.constant 0 : index
    %10 = vector.load %arg4[%c0_9, %c0_10] : memref<32x48xbf16, #tpu.memory_space<vmem>>, vector<32x48xbf16>
    %cst_11 = arith.constant dense<0.000000e+00> : vector<256x48xf32>
    %11 = tpu.matmul %9, %10, %cst_11 {dimension_numbers = #tpu.dot_dimension_numbers<[1], [0], [0], [1], [0, 0, 1, 1], [], []>} : vector<256x32xbf16>, vector<32x48xbf16>, vector<256x48xf32> -> vector<256x48xf32>
    %c0_12 = arith.constant 0 : index
    %c0_13 = arith.constant 0 : index
    %12 = vector.load %arg5[%c0_12, %c0_13] : memref<1x48xf32, #tpu.memory_space<vmem>>, vector<1x48xf32>
    %13 = vector.shape_cast %12 : vector<1x48xf32> to vector<48xf32>
    %14 = vector.shape_cast %13 : vector<48xf32> to vector<1x48xf32>
    %15 = vector.broadcast %14 : vector<1x48xf32> to vector<256x48xf32>
    %16 = arith.addf %11, %15 : vector<256x48xf32>
    %cst_14 = arith.constant 0.000000e+00 : f32
    %17 = vector.broadcast %cst_14 : f32 to vector<256x48xf32>
    %18 = arith.maximumf %16, %17 : vector<256x48xf32>
    %19 = vector.shape_cast %5 : vector<256x256xf32> to vector<16x16x256xf32>
    %c0_15 = arith.constant 0 : index
    %c0_16 = arith.constant 0 : index
    %20 = vector.load %arg6[%c0_15, %c0_16] : memref<9x256xf32, #tpu.memory_space<vmem>>, vector<9x256xf32>
    %c0_17 = arith.constant 0 : index
    %c0_18 = arith.constant 0 : index
    %21 = vector.load %arg7[%c0_17, %c0_18] : memref<1x256xf32, #tpu.memory_space<vmem>>, vector<1x256xf32>
    %22 = vector.shape_cast %21 : vector<1x256xf32> to vector<256xf32>
    %cst_19 = arith.constant 0.000000e+00 : f32
    %23 = vector.broadcast %cst_19 : f32 to vector<1x16x256xf32>
    %24 = tpu.concatenate %23, %19, %23 in 0 : vector<1x16x256xf32>, vector<16x16x256xf32>, vector<1x16x256xf32> -> vector<18x16x256xf32>
    %25 = tpu.iota {dimensions = array<i32: 1>} : vector<18x16x256xi32>
    %c1_i32 = arith.constant 1 : i32
    %26 = tpu.dynamic_rotate %24 by %c1_i32 dim 1 : vector<18x16x256xf32>, i32 -> vector<18x16x256xf32>
    %c0_i32 = arith.constant 0 : i32
    %27 = vector.broadcast %c0_i32 : i32 to vector<18x16x256xi32>
    %28 = arith.cmpi sgt, %25, %27 : vector<18x16x256xi32>
    %29 = arith.extui %28 : vector<18x16x256xi1> to vector<18x16x256xi32>
    %30 = arith.sitofp %29 : vector<18x16x256xi32> to vector<18x16x256xf32>
    %31 = arith.mulf %26, %30 : vector<18x16x256xf32>
    %c15_i32 = arith.constant 15 : i32
    %32 = tpu.dynamic_rotate %24 by %c15_i32 dim 1 : vector<18x16x256xf32>, i32 -> vector<18x16x256xf32>
    %c15_i32_20 = arith.constant 15 : i32
    %33 = vector.broadcast %c15_i32_20 : i32 to vector<18x16x256xi32>
    %34 = arith.cmpi slt, %25, %33 : vector<18x16x256xi32>
    %35 = arith.extui %34 : vector<18x16x256xi1> to vector<18x16x256xi32>
    %36 = arith.sitofp %35 : vector<18x16x256xi32> to vector<18x16x256xf32>
    %37 = arith.mulf %32, %36 : vector<18x16x256xf32>
    %cst_21 = arith.constant 0.000000e+00 : f32
    %38 = vector.broadcast %cst_21 : f32 to vector<16x16x256xf32>
    %39 = vector.extract_strided_slice %31 {offsets = [0, 0, 0], sizes = [16, 16, 256], strides = [1, 1, 1]} : vector<18x16x256xf32> to vector<16x16x256xf32>
    %40 = vector.extract_strided_slice %20 {offsets = [0, 0], sizes = [1, 256], strides = [1, 1]} : vector<9x256xf32> to vector<1x256xf32>
    %41 = vector.shape_cast %40 : vector<1x256xf32> to vector<256xf32>
    %42 = vector.shape_cast %41 : vector<256xf32> to vector<1x1x256xf32>
    %43 = vector.broadcast %42 : vector<1x1x256xf32> to vector<16x16x256xf32>
    %44 = arith.mulf %39, %43 : vector<16x16x256xf32>
    %45 = arith.addf %38, %44 : vector<16x16x256xf32>
    %46 = vector.extract_strided_slice %24 {offsets = [0, 0, 0], sizes = [16, 16, 256], strides = [1, 1, 1]} : vector<18x16x256xf32> to vector<16x16x256xf32>
    %47 = vector.extract_strided_slice %20 {offsets = [1, 0], sizes = [1, 256], strides = [1, 1]} : vector<9x256xf32> to vector<1x256xf32>
    %48 = vector.shape_cast %47 : vector<1x256xf32> to vector<256xf32>
    %49 = vector.shape_cast %48 : vector<256xf32> to vector<1x1x256xf32>
    %50 = vector.broadcast %49 : vector<1x1x256xf32> to vector<16x16x256xf32>
    %51 = arith.mulf %46, %50 : vector<16x16x256xf32>
    %52 = arith.addf %45, %51 : vector<16x16x256xf32>
    %53 = vector.extract_strided_slice %37 {offsets = [0, 0, 0], sizes = [16, 16, 256], strides = [1, 1, 1]} : vector<18x16x256xf32> to vector<16x16x256xf32>
    %54 = vector.extract_strided_slice %20 {offsets = [2, 0], sizes = [1, 256], strides = [1, 1]} : vector<9x256xf32> to vector<1x256xf32>
    %55 = vector.shape_cast %54 : vector<1x256xf32> to vector<256xf32>
    %56 = vector.shape_cast %55 : vector<256xf32> to vector<1x1x256xf32>
    %57 = vector.broadcast %56 : vector<1x1x256xf32> to vector<16x16x256xf32>
    %58 = arith.mulf %53, %57 : vector<16x16x256xf32>
    %59 = arith.addf %52, %58 : vector<16x16x256xf32>
    %60 = vector.extract_strided_slice %31 {offsets = [1, 0, 0], sizes = [16, 16, 256], strides = [1, 1, 1]} : vector<18x16x256xf32> to vector<16x16x256xf32>
    %61 = vector.extract_strided_slice %20 {offsets = [3, 0], sizes = [1, 256], strides = [1, 1]} : vector<9x256xf32> to vector<1x256xf32>
    %62 = vector.shape_cast %61 : vector<1x256xf32> to vector<256xf32>
    %63 = vector.shape_cast %62 : vector<256xf32> to vector<1x1x256xf32>
    %64 = vector.broadcast %63 : vector<1x1x256xf32> to vector<16x16x256xf32>
    %65 = arith.mulf %60, %64 : vector<16x16x256xf32>
    %66 = arith.addf %59, %65 : vector<16x16x256xf32>
    %67 = vector.extract_strided_slice %24 {offsets = [1, 0, 0], sizes = [16, 16, 256], strides = [1, 1, 1]} : vector<18x16x256xf32> to vector<16x16x256xf32>
    %68 = vector.extract_strided_slice %20 {offsets = [4, 0], sizes = [1, 256], strides = [1, 1]} : vector<9x256xf32> to vector<1x256xf32>
    %69 = vector.shape_cast %68 : vector<1x256xf32> to vector<256xf32>
    %70 = vector.shape_cast %69 : vector<256xf32> to vector<1x1x256xf32>
    %71 = vector.broadcast %70 : vector<1x1x256xf32> to vector<16x16x256xf32>
    %72 = arith.mulf %67, %71 : vector<16x16x256xf32>
    %73 = arith.addf %66, %72 : vector<16x16x256xf32>
    %74 = vector.extract_strided_slice %37 {offsets = [1, 0, 0], sizes = [16, 16, 256], strides = [1, 1, 1]} : vector<18x16x256xf32> to vector<16x16x256xf32>
    %75 = vector.extract_strided_slice %20 {offsets = [5, 0], sizes = [1, 256], strides = [1, 1]} : vector<9x256xf32> to vector<1x256xf32>
    %76 = vector.shape_cast %75 : vector<1x256xf32> to vector<256xf32>
    %77 = vector.shape_cast %76 : vector<256xf32> to vector<1x1x256xf32>
    %78 = vector.broadcast %77 : vector<1x1x256xf32> to vector<16x16x256xf32>
    %79 = arith.mulf %74, %78 : vector<16x16x256xf32>
    %80 = arith.addf %73, %79 : vector<16x16x256xf32>
    %81 = vector.extract_strided_slice %31 {offsets = [2, 0, 0], sizes = [16, 16, 256], strides = [1, 1, 1]} : vector<18x16x256xf32> to vector<16x16x256xf32>
    %82 = vector.extract_strided_slice %20 {offsets = [6, 0], sizes = [1, 256], strides = [1, 1]} : vector<9x256xf32> to vector<1x256xf32>
    %83 = vector.shape_cast %82 : vector<1x256xf32> to vector<256xf32>
    %84 = vector.shape_cast %83 : vector<256xf32> to vector<1x1x256xf32>
    %85 = vector.broadcast %84 : vector<1x1x256xf32> to vector<16x16x256xf32>
    %86 = arith.mulf %81, %85 : vector<16x16x256xf32>
    %87 = arith.addf %80, %86 : vector<16x16x256xf32>
    %88 = vector.extract_strided_slice %24 {offsets = [2, 0, 0], sizes = [16, 16, 256], strides = [1, 1, 1]} : vector<18x16x256xf32> to vector<16x16x256xf32>
    %89 = vector.extract_strided_slice %20 {offsets = [7, 0], sizes = [1, 256], strides = [1, 1]} : vector<9x256xf32> to vector<1x256xf32>
    %90 = vector.shape_cast %89 : vector<1x256xf32> to vector<256xf32>
    %91 = vector.shape_cast %90 : vector<256xf32> to vector<1x1x256xf32>
    %92 = vector.broadcast %91 : vector<1x1x256xf32> to vector<16x16x256xf32>
    %93 = arith.mulf %88, %92 : vector<16x16x256xf32>
    %94 = arith.addf %87, %93 : vector<16x16x256xf32>
    %95 = vector.extract_strided_slice %37 {offsets = [2, 0, 0], sizes = [16, 16, 256], strides = [1, 1, 1]} : vector<18x16x256xf32> to vector<16x16x256xf32>
    %96 = vector.extract_strided_slice %20 {offsets = [8, 0], sizes = [1, 256], strides = [1, 1]} : vector<9x256xf32> to vector<1x256xf32>
    %97 = vector.shape_cast %96 : vector<1x256xf32> to vector<256xf32>
    %98 = vector.shape_cast %97 : vector<256xf32> to vector<1x1x256xf32>
    %99 = vector.broadcast %98 : vector<1x1x256xf32> to vector<16x16x256xf32>
    %100 = arith.mulf %95, %99 : vector<16x16x256xf32>
    %101 = arith.addf %94, %100 : vector<16x16x256xf32>
    %102 = vector.shape_cast %22 : vector<256xf32> to vector<1x1x256xf32>
    %103 = vector.broadcast %102 : vector<1x1x256xf32> to vector<16x16x256xf32>
    %104 = arith.addf %101, %103 : vector<16x16x256xf32>
    %cst_22 = arith.constant 0.000000e+00 : f32
    %105 = vector.broadcast %cst_22 : f32 to vector<16x16x256xf32>
    %106 = arith.maximumf %104, %105 : vector<16x16x256xf32>
    %107 = vector.shape_cast %18 : vector<256x48xf32> to vector<16x16x48xf32>
    %c0_23 = arith.constant 0 : index
    %c0_24 = arith.constant 0 : index
    %108 = vector.load %arg8[%c0_23, %c0_24] : memref<9x48xf32, #tpu.memory_space<vmem>>, vector<9x48xf32>
    %c0_25 = arith.constant 0 : index
    %c0_26 = arith.constant 0 : index
    %109 = vector.load %arg9[%c0_25, %c0_26] : memref<1x48xf32, #tpu.memory_space<vmem>>, vector<1x48xf32>
    %110 = vector.shape_cast %109 : vector<1x48xf32> to vector<48xf32>
    %cst_27 = arith.constant 0.000000e+00 : f32
    %111 = vector.broadcast %cst_27 : f32 to vector<1x16x48xf32>
    %112 = tpu.concatenate %111, %107, %111 in 0 : vector<1x16x48xf32>, vector<16x16x48xf32>, vector<1x16x48xf32> -> vector<18x16x48xf32>
    %113 = tpu.iota {dimensions = array<i32: 1>} : vector<18x16x48xi32>
    %c1_i32_28 = arith.constant 1 : i32
    %114 = tpu.dynamic_rotate %112 by %c1_i32_28 dim 1 : vector<18x16x48xf32>, i32 -> vector<18x16x48xf32>
    %c0_i32_29 = arith.constant 0 : i32
    %115 = vector.broadcast %c0_i32_29 : i32 to vector<18x16x48xi32>
    %116 = arith.cmpi sgt, %113, %115 : vector<18x16x48xi32>
    %117 = arith.extui %116 : vector<18x16x48xi1> to vector<18x16x48xi32>
    %118 = arith.sitofp %117 : vector<18x16x48xi32> to vector<18x16x48xf32>
    %119 = arith.mulf %114, %118 : vector<18x16x48xf32>
    %c15_i32_30 = arith.constant 15 : i32
    %120 = tpu.dynamic_rotate %112 by %c15_i32_30 dim 1 : vector<18x16x48xf32>, i32 -> vector<18x16x48xf32>
    %c15_i32_31 = arith.constant 15 : i32
    %121 = vector.broadcast %c15_i32_31 : i32 to vector<18x16x48xi32>
    %122 = arith.cmpi slt, %113, %121 : vector<18x16x48xi32>
    %123 = arith.extui %122 : vector<18x16x48xi1> to vector<18x16x48xi32>
    %124 = arith.sitofp %123 : vector<18x16x48xi32> to vector<18x16x48xf32>
    %125 = arith.mulf %120, %124 : vector<18x16x48xf32>
    %cst_32 = arith.constant 0.000000e+00 : f32
    %126 = vector.broadcast %cst_32 : f32 to vector<16x16x48xf32>
    %127 = vector.extract_strided_slice %119 {offsets = [0, 0, 0], sizes = [16, 16, 48], strides = [1, 1, 1]} : vector<18x16x48xf32> to vector<16x16x48xf32>
    %128 = vector.extract_strided_slice %108 {offsets = [0, 0], sizes = [1, 48], strides = [1, 1]} : vector<9x48xf32> to vector<1x48xf32>
    %129 = vector.shape_cast %128 : vector<1x48xf32> to vector<48xf32>
    %130 = vector.shape_cast %129 : vector<48xf32> to vector<1x1x48xf32>
    %131 = vector.broadcast %130 : vector<1x1x48xf32> to vector<16x16x48xf32>
    %132 = arith.mulf %127, %131 : vector<16x16x48xf32>
    %133 = arith.addf %126, %132 : vector<16x16x48xf32>
    %134 = vector.extract_strided_slice %112 {offsets = [0, 0, 0], sizes = [16, 16, 48], strides = [1, 1, 1]} : vector<18x16x48xf32> to vector<16x16x48xf32>
    %135 = vector.extract_strided_slice %108 {offsets = [1, 0], sizes = [1, 48], strides = [1, 1]} : vector<9x48xf32> to vector<1x48xf32>
    %136 = vector.shape_cast %135 : vector<1x48xf32> to vector<48xf32>
    %137 = vector.shape_cast %136 : vector<48xf32> to vector<1x1x48xf32>
    %138 = vector.broadcast %137 : vector<1x1x48xf32> to vector<16x16x48xf32>
    %139 = arith.mulf %134, %138 : vector<16x16x48xf32>
    %140 = arith.addf %133, %139 : vector<16x16x48xf32>
    %141 = vector.extract_strided_slice %125 {offsets = [0, 0, 0], sizes = [16, 16, 48], strides = [1, 1, 1]} : vector<18x16x48xf32> to vector<16x16x48xf32>
    %142 = vector.extract_strided_slice %108 {offsets = [2, 0], sizes = [1, 48], strides = [1, 1]} : vector<9x48xf32> to vector<1x48xf32>
    %143 = vector.shape_cast %142 : vector<1x48xf32> to vector<48xf32>
    %144 = vector.shape_cast %143 : vector<48xf32> to vector<1x1x48xf32>
    %145 = vector.broadcast %144 : vector<1x1x48xf32> to vector<16x16x48xf32>
    %146 = arith.mulf %141, %145 : vector<16x16x48xf32>
    %147 = arith.addf %140, %146 : vector<16x16x48xf32>
    %148 = vector.extract_strided_slice %119 {offsets = [1, 0, 0], sizes = [16, 16, 48], strides = [1, 1, 1]} : vector<18x16x48xf32> to vector<16x16x48xf32>
    %149 = vector.extract_strided_slice %108 {offsets = [3, 0], sizes = [1, 48], strides = [1, 1]} : vector<9x48xf32> to vector<1x48xf32>
    %150 = vector.shape_cast %149 : vector<1x48xf32> to vector<48xf32>
    %151 = vector.shape_cast %150 : vector<48xf32> to vector<1x1x48xf32>
    %152 = vector.broadcast %151 : vector<1x1x48xf32> to vector<16x16x48xf32>
    %153 = arith.mulf %148, %152 : vector<16x16x48xf32>
    %154 = arith.addf %147, %153 : vector<16x16x48xf32>
    %155 = vector.extract_strided_slice %112 {offsets = [1, 0, 0], sizes = [16, 16, 48], strides = [1, 1, 1]} : vector<18x16x48xf32> to vector<16x16x48xf32>
    %156 = vector.extract_strided_slice %108 {offsets = [4, 0], sizes = [1, 48], strides = [1, 1]} : vector<9x48xf32> to vector<1x48xf32>
    %157 = vector.shape_cast %156 : vector<1x48xf32> to vector<48xf32>
    %158 = vector.shape_cast %157 : vector<48xf32> to vector<1x1x48xf32>
    %159 = vector.broadcast %158 : vector<1x1x48xf32> to vector<16x16x48xf32>
    %160 = arith.mulf %155, %159 : vector<16x16x48xf32>
    %161 = arith.addf %154, %160 : vector<16x16x48xf32>
    %162 = vector.extract_strided_slice %125 {offsets = [1, 0, 0], sizes = [16, 16, 48], strides = [1, 1, 1]} : vector<18x16x48xf32> to vector<16x16x48xf32>
    %163 = vector.extract_strided_slice %108 {offsets = [5, 0], sizes = [1, 48], strides = [1, 1]} : vector<9x48xf32> to vector<1x48xf32>
    %164 = vector.shape_cast %163 : vector<1x48xf32> to vector<48xf32>
    %165 = vector.shape_cast %164 : vector<48xf32> to vector<1x1x48xf32>
    %166 = vector.broadcast %165 : vector<1x1x48xf32> to vector<16x16x48xf32>
    %167 = arith.mulf %162, %166 : vector<16x16x48xf32>
    %168 = arith.addf %161, %167 : vector<16x16x48xf32>
    %169 = vector.extract_strided_slice %119 {offsets = [2, 0, 0], sizes = [16, 16, 48], strides = [1, 1, 1]} : vector<18x16x48xf32> to vector<16x16x48xf32>
    %170 = vector.extract_strided_slice %108 {offsets = [6, 0], sizes = [1, 48], strides = [1, 1]} : vector<9x48xf32> to vector<1x48xf32>
    %171 = vector.shape_cast %170 : vector<1x48xf32> to vector<48xf32>
    %172 = vector.shape_cast %171 : vector<48xf32> to vector<1x1x48xf32>
    %173 = vector.broadcast %172 : vector<1x1x48xf32> to vector<16x16x48xf32>
    %174 = arith.mulf %169, %173 : vector<16x16x48xf32>
    %175 = arith.addf %168, %174 : vector<16x16x48xf32>
    %176 = vector.extract_strided_slice %112 {offsets = [2, 0, 0], sizes = [16, 16, 48], strides = [1, 1, 1]} : vector<18x16x48xf32> to vector<16x16x48xf32>
    %177 = vector.extract_strided_slice %108 {offsets = [7, 0], sizes = [1, 48], strides = [1, 1]} : vector<9x48xf32> to vector<1x48xf32>
    %178 = vector.shape_cast %177 : vector<1x48xf32> to vector<48xf32>
    %179 = vector.shape_cast %178 : vector<48xf32> to vector<1x1x48xf32>
    %180 = vector.broadcast %179 : vector<1x1x48xf32> to vector<16x16x48xf32>
    %181 = arith.mulf %176, %180 : vector<16x16x48xf32>
    %182 = arith.addf %175, %181 : vector<16x16x48xf32>
    %183 = vector.extract_strided_slice %125 {offsets = [2, 0, 0], sizes = [16, 16, 48], strides = [1, 1, 1]} : vector<18x16x48xf32> to vector<16x16x48xf32>
    %184 = vector.extract_strided_slice %108 {offsets = [8, 0], sizes = [1, 48], strides = [1, 1]} : vector<9x48xf32> to vector<1x48xf32>
    %185 = vector.shape_cast %184 : vector<1x48xf32> to vector<48xf32>
    %186 = vector.shape_cast %185 : vector<48xf32> to vector<1x1x48xf32>
    %187 = vector.broadcast %186 : vector<1x1x48xf32> to vector<16x16x48xf32>
    %188 = arith.mulf %183, %187 : vector<16x16x48xf32>
    %189 = arith.addf %182, %188 : vector<16x16x48xf32>
    %190 = vector.shape_cast %110 : vector<48xf32> to vector<1x1x48xf32>
    %191 = vector.broadcast %190 : vector<1x1x48xf32> to vector<16x16x48xf32>
    %192 = arith.addf %189, %191 : vector<16x16x48xf32>
    %cst_33 = arith.constant 0.000000e+00 : f32
    %193 = vector.broadcast %cst_33 : f32 to vector<16x16x48xf32>
    %194 = arith.maximumf %192, %193 : vector<16x16x48xf32>
    %195 = vector.shape_cast %106 : vector<16x16x256xf32> to vector<256x256xf32>
    %196 = arith.truncf %195 : vector<256x256xf32> to vector<256x256xbf16>
    %c0_34 = arith.constant 0 : index
    %c0_35 = arith.constant 0 : index
    %197 = vector.load %arg10[%c0_34, %c0_35] : memref<256x256xbf16, #tpu.memory_space<vmem>>, vector<256x256xbf16>
    %cst_36 = arith.constant dense<0.000000e+00> : vector<256x256xf32>
    %198 = tpu.matmul %196, %197, %cst_36 {dimension_numbers = #tpu.dot_dimension_numbers<[1], [0], [0], [1], [0, 0, 1, 1], [], []>} : vector<256x256xbf16>, vector<256x256xbf16>, vector<256x256xf32> -> vector<256x256xf32>
    %199 = vector.shape_cast %194 : vector<16x16x48xf32> to vector<256x48xf32>
    %200 = arith.truncf %199 : vector<256x48xf32> to vector<256x48xbf16>
    %c0_37 = arith.constant 0 : index
    %c0_38 = arith.constant 0 : index
    %201 = vector.load %arg11[%c0_37, %c0_38] : memref<48x256xbf16, #tpu.memory_space<vmem>>, vector<48x256xbf16>
    %cst_39 = arith.constant dense<0.000000e+00> : vector<256x256xf32>
    %202 = tpu.matmul %200, %201, %cst_39 {dimension_numbers = #tpu.dot_dimension_numbers<[1], [0], [0], [1], [0, 0, 1, 1], [], []>} : vector<256x48xbf16>, vector<48x256xbf16>, vector<256x256xf32> -> vector<256x256xf32>
    %203 = arith.addf %198, %202 : vector<256x256xf32>
    %c0_40 = arith.constant 0 : index
    %c0_41 = arith.constant 0 : index
    %204 = vector.load %arg12[%c0_40, %c0_41] : memref<1x256xf32, #tpu.memory_space<vmem>>, vector<1x256xf32>
    %205 = vector.shape_cast %204 : vector<1x256xf32> to vector<256xf32>
    %206 = vector.shape_cast %205 : vector<256xf32> to vector<1x256xf32>
    %207 = vector.broadcast %206 : vector<1x256xf32> to vector<256x256xf32>
    %208 = arith.addf %203, %207 : vector<256x256xf32>
    %cst_42 = arith.constant 0.000000e+00 : f32
    %209 = vector.broadcast %cst_42 : f32 to vector<256x256xf32>
    %210 = arith.maximumf %208, %209 : vector<256x256xf32>
    %211 = vector.shape_cast %210 : vector<256x256xf32> to vector<16x16x256xf32>
    %c0_43 = arith.constant 0 : index
    %c0_44 = arith.constant 0 : index
    %212 = vector.load %arg13[%c0_43, %c0_44] : memref<9x256xf32, #tpu.memory_space<vmem>>, vector<9x256xf32>
    %c0_45 = arith.constant 0 : index
    %c0_46 = arith.constant 0 : index
    %213 = vector.load %arg14[%c0_45, %c0_46] : memref<1x256xf32, #tpu.memory_space<vmem>>, vector<1x256xf32>
    %214 = vector.shape_cast %213 : vector<1x256xf32> to vector<256xf32>
    %cst_47 = arith.constant 0.000000e+00 : f32
    %215 = vector.broadcast %cst_47 : f32 to vector<1x16x256xf32>
    %216 = tpu.concatenate %215, %211, %215 in 0 : vector<1x16x256xf32>, vector<16x16x256xf32>, vector<1x16x256xf32> -> vector<18x16x256xf32>
    %217 = tpu.iota {dimensions = array<i32: 1>} : vector<18x16x256xi32>
    %c1_i32_48 = arith.constant 1 : i32
    %218 = tpu.dynamic_rotate %216 by %c1_i32_48 dim 1 : vector<18x16x256xf32>, i32 -> vector<18x16x256xf32>
    %c0_i32_49 = arith.constant 0 : i32
    %219 = vector.broadcast %c0_i32_49 : i32 to vector<18x16x256xi32>
    %220 = arith.cmpi sgt, %217, %219 : vector<18x16x256xi32>
    %221 = arith.extui %220 : vector<18x16x256xi1> to vector<18x16x256xi32>
    %222 = arith.sitofp %221 : vector<18x16x256xi32> to vector<18x16x256xf32>
    %223 = arith.mulf %218, %222 : vector<18x16x256xf32>
    %c15_i32_50 = arith.constant 15 : i32
    %224 = tpu.dynamic_rotate %216 by %c15_i32_50 dim 1 : vector<18x16x256xf32>, i32 -> vector<18x16x256xf32>
    %c15_i32_51 = arith.constant 15 : i32
    %225 = vector.broadcast %c15_i32_51 : i32 to vector<18x16x256xi32>
    %226 = arith.cmpi slt, %217, %225 : vector<18x16x256xi32>
    %227 = arith.extui %226 : vector<18x16x256xi1> to vector<18x16x256xi32>
    %228 = arith.sitofp %227 : vector<18x16x256xi32> to vector<18x16x256xf32>
    %229 = arith.mulf %224, %228 : vector<18x16x256xf32>
    %cst_52 = arith.constant 0.000000e+00 : f32
    %230 = vector.broadcast %cst_52 : f32 to vector<16x16x256xf32>
    %231 = vector.extract_strided_slice %223 {offsets = [0, 0, 0], sizes = [16, 16, 256], strides = [1, 1, 1]} : vector<18x16x256xf32> to vector<16x16x256xf32>
    %232 = vector.extract_strided_slice %212 {offsets = [0, 0], sizes = [1, 256], strides = [1, 1]} : vector<9x256xf32> to vector<1x256xf32>
    %233 = vector.shape_cast %232 : vector<1x256xf32> to vector<256xf32>
    %234 = vector.shape_cast %233 : vector<256xf32> to vector<1x1x256xf32>
    %235 = vector.broadcast %234 : vector<1x1x256xf32> to vector<16x16x256xf32>
    %236 = arith.mulf %231, %235 : vector<16x16x256xf32>
    %237 = arith.addf %230, %236 : vector<16x16x256xf32>
    %238 = vector.extract_strided_slice %216 {offsets = [0, 0, 0], sizes = [16, 16, 256], strides = [1, 1, 1]} : vector<18x16x256xf32> to vector<16x16x256xf32>
    %239 = vector.extract_strided_slice %212 {offsets = [1, 0], sizes = [1, 256], strides = [1, 1]} : vector<9x256xf32> to vector<1x256xf32>
    %240 = vector.shape_cast %239 : vector<1x256xf32> to vector<256xf32>
    %241 = vector.shape_cast %240 : vector<256xf32> to vector<1x1x256xf32>
    %242 = vector.broadcast %241 : vector<1x1x256xf32> to vector<16x16x256xf32>
    %243 = arith.mulf %238, %242 : vector<16x16x256xf32>
    %244 = arith.addf %237, %243 : vector<16x16x256xf32>
    %245 = vector.extract_strided_slice %229 {offsets = [0, 0, 0], sizes = [16, 16, 256], strides = [1, 1, 1]} : vector<18x16x256xf32> to vector<16x16x256xf32>
    %246 = vector.extract_strided_slice %212 {offsets = [2, 0], sizes = [1, 256], strides = [1, 1]} : vector<9x256xf32> to vector<1x256xf32>
    %247 = vector.shape_cast %246 : vector<1x256xf32> to vector<256xf32>
    %248 = vector.shape_cast %247 : vector<256xf32> to vector<1x1x256xf32>
    %249 = vector.broadcast %248 : vector<1x1x256xf32> to vector<16x16x256xf32>
    %250 = arith.mulf %245, %249 : vector<16x16x256xf32>
    %251 = arith.addf %244, %250 : vector<16x16x256xf32>
    %252 = vector.extract_strided_slice %223 {offsets = [1, 0, 0], sizes = [16, 16, 256], strides = [1, 1, 1]} : vector<18x16x256xf32> to vector<16x16x256xf32>
    %253 = vector.extract_strided_slice %212 {offsets = [3, 0], sizes = [1, 256], strides = [1, 1]} : vector<9x256xf32> to vector<1x256xf32>
    %254 = vector.shape_cast %253 : vector<1x256xf32> to vector<256xf32>
    %255 = vector.shape_cast %254 : vector<256xf32> to vector<1x1x256xf32>
    %256 = vector.broadcast %255 : vector<1x1x256xf32> to vector<16x16x256xf32>
    %257 = arith.mulf %252, %256 : vector<16x16x256xf32>
    %258 = arith.addf %251, %257 : vector<16x16x256xf32>
    %259 = vector.extract_strided_slice %216 {offsets = [1, 0, 0], sizes = [16, 16, 256], strides = [1, 1, 1]} : vector<18x16x256xf32> to vector<16x16x256xf32>
    %260 = vector.extract_strided_slice %212 {offsets = [4, 0], sizes = [1, 256], strides = [1, 1]} : vector<9x256xf32> to vector<1x256xf32>
    %261 = vector.shape_cast %260 : vector<1x256xf32> to vector<256xf32>
    %262 = vector.shape_cast %261 : vector<256xf32> to vector<1x1x256xf32>
    %263 = vector.broadcast %262 : vector<1x1x256xf32> to vector<16x16x256xf32>
    %264 = arith.mulf %259, %263 : vector<16x16x256xf32>
    %265 = arith.addf %258, %264 : vector<16x16x256xf32>
    %266 = vector.extract_strided_slice %229 {offsets = [1, 0, 0], sizes = [16, 16, 256], strides = [1, 1, 1]} : vector<18x16x256xf32> to vector<16x16x256xf32>
    %267 = vector.extract_strided_slice %212 {offsets = [5, 0], sizes = [1, 256], strides = [1, 1]} : vector<9x256xf32> to vector<1x256xf32>
    %268 = vector.shape_cast %267 : vector<1x256xf32> to vector<256xf32>
    %269 = vector.shape_cast %268 : vector<256xf32> to vector<1x1x256xf32>
    %270 = vector.broadcast %269 : vector<1x1x256xf32> to vector<16x16x256xf32>
    %271 = arith.mulf %266, %270 : vector<16x16x256xf32>
    %272 = arith.addf %265, %271 : vector<16x16x256xf32>
    %273 = vector.extract_strided_slice %223 {offsets = [2, 0, 0], sizes = [16, 16, 256], strides = [1, 1, 1]} : vector<18x16x256xf32> to vector<16x16x256xf32>
    %274 = vector.extract_strided_slice %212 {offsets = [6, 0], sizes = [1, 256], strides = [1, 1]} : vector<9x256xf32> to vector<1x256xf32>
    %275 = vector.shape_cast %274 : vector<1x256xf32> to vector<256xf32>
    %276 = vector.shape_cast %275 : vector<256xf32> to vector<1x1x256xf32>
    %277 = vector.broadcast %276 : vector<1x1x256xf32> to vector<16x16x256xf32>
    %278 = arith.mulf %273, %277 : vector<16x16x256xf32>
    %279 = arith.addf %272, %278 : vector<16x16x256xf32>
    %280 = vector.extract_strided_slice %216 {offsets = [2, 0, 0], sizes = [16, 16, 256], strides = [1, 1, 1]} : vector<18x16x256xf32> to vector<16x16x256xf32>
    %281 = vector.extract_strided_slice %212 {offsets = [7, 0], sizes = [1, 256], strides = [1, 1]} : vector<9x256xf32> to vector<1x256xf32>
    %282 = vector.shape_cast %281 : vector<1x256xf32> to vector<256xf32>
    %283 = vector.shape_cast %282 : vector<256xf32> to vector<1x1x256xf32>
    %284 = vector.broadcast %283 : vector<1x1x256xf32> to vector<16x16x256xf32>
    %285 = arith.mulf %280, %284 : vector<16x16x256xf32>
    %286 = arith.addf %279, %285 : vector<16x16x256xf32>
    %287 = vector.extract_strided_slice %229 {offsets = [2, 0, 0], sizes = [16, 16, 256], strides = [1, 1, 1]} : vector<18x16x256xf32> to vector<16x16x256xf32>
    %288 = vector.extract_strided_slice %212 {offsets = [8, 0], sizes = [1, 256], strides = [1, 1]} : vector<9x256xf32> to vector<1x256xf32>
    %289 = vector.shape_cast %288 : vector<1x256xf32> to vector<256xf32>
    %290 = vector.shape_cast %289 : vector<256xf32> to vector<1x1x256xf32>
    %291 = vector.broadcast %290 : vector<1x1x256xf32> to vector<16x16x256xf32>
    %292 = arith.mulf %287, %291 : vector<16x16x256xf32>
    %293 = arith.addf %286, %292 : vector<16x16x256xf32>
    %294 = vector.shape_cast %214 : vector<256xf32> to vector<1x1x256xf32>
    %295 = vector.broadcast %294 : vector<1x1x256xf32> to vector<16x16x256xf32>
    %296 = arith.addf %293, %295 : vector<16x16x256xf32>
    %cst_53 = arith.constant 0.000000e+00 : f32
    %297 = vector.broadcast %cst_53 : f32 to vector<16x16x256xf32>
    %298 = arith.maximumf %296, %297 : vector<16x16x256xf32>
    %299 = vector.shape_cast %298 : vector<16x16x256xf32> to vector<256x256xf32>
    %300 = arith.truncf %299 : vector<256x256xf32> to vector<256x256xbf16>
    %c0_54 = arith.constant 0 : index
    %c0_55 = arith.constant 0 : index
    %301 = vector.load %arg15[%c0_54, %c0_55] : memref<256x256xbf16, #tpu.memory_space<vmem>>, vector<256x256xbf16>
    %cst_56 = arith.constant dense<0.000000e+00> : vector<256x256xf32>
    %302 = tpu.matmul %300, %301, %cst_56 {dimension_numbers = #tpu.dot_dimension_numbers<[1], [0], [0], [1], [0, 0, 1, 1], [], []>} : vector<256x256xbf16>, vector<256x256xbf16>, vector<256x256xf32> -> vector<256x256xf32>
    %c0_57 = arith.constant 0 : index
    %c0_58 = arith.constant 0 : index
    %303 = vector.load %arg16[%c0_57, %c0_58] : memref<1x256xf32, #tpu.memory_space<vmem>>, vector<1x256xf32>
    %304 = vector.shape_cast %303 : vector<1x256xf32> to vector<256xf32>
    %305 = vector.shape_cast %304 : vector<256xf32> to vector<1x256xf32>
    %306 = vector.broadcast %305 : vector<1x256xf32> to vector<256x256xf32>
    %307 = arith.addf %302, %306 : vector<256x256xf32>
    %cst_59 = arith.constant 0.000000e+00 : f32
    %308 = vector.broadcast %cst_59 : f32 to vector<256x256xf32>
    %309 = arith.maximumf %307, %308 : vector<256x256xf32>
    %310 = vector.shape_cast %309 : vector<256x256xf32> to vector<1x16x16x256xf32>
    %c0_60 = arith.constant 0 : index
    %c0_61 = arith.constant 0 : index
    %c0_62 = arith.constant 0 : index
    %c0_63 = arith.constant 0 : index
    %311 = vector.load %arg17[%c0_60, %c0_61, %c0_62, %c0_63] : memref<1x16x16x256xf32, #tpu.memory_space<vmem>>, vector<1x16x16x256xf32>
    tpu.vector_store %arg17[%c0_60, %c0_61, %c0_62, %c0_63], %310 {strides = array<i32>} : memref<1x16x16x256xf32, #tpu.memory_space<vmem>>, vector<1x16x16x256xf32>,
    return
  }
  func.func @transform_0(%arg0: i32) -> (i32, i32, i32, i32) {
    %c0_i32 = arith.constant 0 : i32
    %c0_i32_0 = arith.constant 0 : i32
    %c0_i32_1 = arith.constant 0 : i32
    %c0_i32_2 = arith.constant 0 : i32
    return %arg0, %c0_i32, %c0_i32_0, %c0_i32_1 : i32, i32, i32, i32
  }
  func.func @transform_1(%arg0: i32) -> (i32, i32, i32, i32) {
    %c0_i32 = arith.constant 0 : i32
    %c0_i32_0 = arith.constant 0 : i32
    %c0_i32_1 = arith.constant 0 : i32
    %c0_i32_2 = arith.constant 0 : i32
    return %arg0, %c0_i32, %c0_i32_0, %c0_i32_1 : i32, i32, i32, i32
  }
  func.func @transform_2(%arg0: i32) -> (i32, i32) {
    %c0_i32 = arith.constant 0 : i32
    %c0_i32_0 = arith.constant 0 : i32
    %c0_i32_1 = arith.constant 0 : i32
    return %c0_i32, %c0_i32_0 : i32, i32
  }
  func.func @transform_3(%arg0: i32) -> (i32, i32) {
    %c0_i32 = arith.constant 0 : i32
    %c0_i32_0 = arith.constant 0 : i32
    %c0_i32_1 = arith.constant 0 : i32
    return %c0_i32, %c0_i32_0 : i32, i32
  }
  func.func @transform_4(%arg0: i32) -> (i32, i32) {
    %c0_i32 = arith.constant 0 : i32
    %c0_i32_0 = arith.constant 0 : i32
    %c0_i32_1 = arith.constant 0 : i32
    return %c0_i32, %c0_i32_0 : i32, i32
  }
  func.func @transform_5(%arg0: i32) -> (i32, i32) {
    %c0_i32 = arith.constant 0 : i32
    %c0_i32_0 = arith.constant 0 : i32
    %c0_i32_1 = arith.constant 0 : i32
    return %c0_i32, %c0_i32_0 : i32, i32
  }
  func.func @transform_6(%arg0: i32) -> (i32, i32) {
    %c0_i32 = arith.constant 0 : i32
    %c0_i32_0 = arith.constant 0 : i32
    %c0_i32_1 = arith.constant 0 : i32
    return %c0_i32, %c0_i32_0 : i32, i32
  }
  func.func @transform_7(%arg0: i32) -> (i32, i32) {
    %c0_i32 = arith.constant 0 : i32
    %c0_i32_0 = arith.constant 0 : i32
    %c0_i32_1 = arith.constant 0 : i32
    return %c0_i32, %c0_i32_0 : i32, i32
  }
  func.func @transform_8(%arg0: i32) -> (i32, i32) {
    %c0_i32 = arith.constant 0 : i32
    %c0_i32_0 = arith.constant 0 : i32
    %c0_i32_1 = arith.constant 0 : i32
    return %c0_i32, %c0_i32_0 : i32, i32
  }
  func.func @transform_9(%arg0: i32) -> (i32, i32) {
    %c0_i32 = arith.constant 0 : i32
    %c0_i32_0 = arith.constant 0 : i32
    %c0_i32_1 = arith.constant 0 : i32
    return %c0_i32, %c0_i32_0 : i32, i32
  }
  func.func @transform_10(%arg0: i32) -> (i32, i32) {
    %c0_i32 = arith.constant 0 : i32
    %c0_i32_0 = arith.constant 0 : i32
    %c0_i32_1 = arith.constant 0 : i32
    return %c0_i32, %c0_i32_0 : i32, i32
  }
  func.func @transform_11(%arg0: i32) -> (i32, i32) {
    %c0_i32 = arith.constant 0 : i32
    %c0_i32_0 = arith.constant 0 : i32
    %c0_i32_1 = arith.constant 0 : i32
    return %c0_i32, %c0_i32_0 : i32, i32
  }
  func.func @transform_12(%arg0: i32) -> (i32, i32) {
    %c0_i32 = arith.constant 0 : i32
    %c0_i32_0 = arith.constant 0 : i32
    %c0_i32_1 = arith.constant 0 : i32
    return %c0_i32, %c0_i32_0 : i32, i32
  }
  func.func @transform_13(%arg0: i32) -> (i32, i32) {
    %c0_i32 = arith.constant 0 : i32
    %c0_i32_0 = arith.constant 0 : i32
    %c0_i32_1 = arith.constant 0 : i32
    return %c0_i32, %c0_i32_0 : i32, i32
  }
  func.func @transform_14(%arg0: i32) -> (i32, i32) {
    %c0_i32 = arith.constant 0 : i32
    %c0_i32_0 = arith.constant 0 : i32
    %c0_i32_1 = arith.constant 0 : i32
    return %c0_i32, %c0_i32_0 : i32, i32
  }
  func.func @transform_15(%arg0: i32) -> (i32, i32) {
    %c0_i32 = arith.constant 0 : i32
    %c0_i32_0 = arith.constant 0 : i32
    %c0_i32_1 = arith.constant 0 : i32
    return %c0_i32, %c0_i32_0 : i32, i32
  }
  func.func @transform_16(%arg0: i32) -> (i32, i32, i32, i32) {
    %c0_i32 = arith.constant 0 : i32
    %c0_i32_0 = arith.constant 0 : i32
    %c0_i32_1 = arith.constant 0 : i32
    %c0_i32_2 = arith.constant 0 : i32
    return %arg0, %c0_i32, %c0_i32_0, %c0_i32_1 : i32, i32, i32, i32
  }
}

</mosaic_0001>

<bundles_post_ra>
// kernel: spp_decoder_forward.1
= control target key start
LH: loop header
LB: loop body
LE: loop exit
PB: predicated region body
PF: predicated region fallthrough
CT: control target
= control target key end

     0   :  { %s16376_s0 = inlined_call_operand.vmem [shape: f32[2,8,8,256], index: 0, kind: input, shape index: {}]   ;;  %s16377_s1 = inlined_call_operand.vmem [shape: f32[2,16,16,32], index: 1, kind: input, shape index: {}]   ;;  %s16378_s2 = inlined_call_operand.vmem [shape: bf16[256,64], index: 2, kind: input, shape index: {}]   ;;  %s16379_s3 = inlined_call_operand.vmem [shape: bf16[32,48], index: 3, kind: input, shape index: {}]   ;;  %s16380_s4 = inlined_call_operand.vmem [shape: f32[1,48], index: 4, kind: input, shape index: {}]   ;;  %s16381_s5 = inlined_call_operand.vmem [shape: f32[9,256], index: 5, kind: input, shape index: {}]   ;;  %s16382_s6 = inlined_call_operand.vmem [shape: f32[1,256], index: 6, kind: input, shape index: {}]   ;;  %s16383_s7 = inlined_call_operand.vmem [shape: f32[9,48], index: 7, kind: input, shape index: {}]   ;;  %s16384_s8 = inlined_call_operand.vmem [shape: f32[1,48], index: 8, kind: input, shape index: {}]   ;;  %s16385_s9 = inlined_call_operand.vmem [shape: bf16[256,256], index: 9, kind: input, shape index: {}]   ;;  %s16386_s10 = inlined_call_operand.vmem [shape: bf16[48,256], index: 10, kind: input, shape index: {}]   ;;  %s16387_s11 = inlined_call_operand.vmem [shape: f32[1,256], index: 11, kind: input, shape index: {}]   ;;  %s16388_s12 = inlined_call_operand.vmem [shape: f32[9,256], index: 12, kind: input, shape index: {}]   ;;  %s16389_s13 = inlined_call_operand.vmem [shape: f32[1,256], index: 13, kind: input, shape index: {}]   ;;  %s16390_s14 = inlined_call_operand.vmem [shape: bf16[256,256], index: 14, kind: input, shape index: {}]   ;;  %s16391_s15 = inlined_call_operand.vmem [shape: f32[1,256], index: 15, kind: input, shape index: {}]   ;;  %s16392_s16 = inlined_call_operand.hbm [shape: f32[2,16,16,256], index: 16, kind: output, shape index: {}]  }
   0x1   :  { %16828 = sst [smem:[#allocation145_spill]] %s16376_s0 }
   0x2   :  { %16829 = sst [smem:[#allocation146_spill]] %s16377_s1 }
   0x3   :  { %16830 = sst [smem:[#allocation147_spill]] %s16378_s2 }
   0x4   :  { %21 = vsyncpa [#allocation3], 0 }
   0x5   :  { %23 = vsyncpa [#allocation3 + $0x1], 0  ;;  %s7734_s21 = smov 0   ;;  %s7736_s22 = smov 0  }
   0x6   :  { %s7738_s23 = smov 0   ;;  %s7740_s24 = smov 0  }
   0x7 LB: > { %16831 = sst [smem:[#allocation5_spill]] %s7638_s23  ;;  %s7755_s25 = sadd.s32 4294967295, %s7642_s24   ;;  %s7642_s24 = sphi %s7740_s24, %s18778_s24   ;;  %s7638_s23 = sphi %s7738_s23, %s18775_s23   ;;  %s7634_s22 = sphi %s7736_s22, %s18777_s22   ;;  %s7630_s21 = sphi %s7734_s21, %s18776_s21  }
   0x8   : > { %s7120_s26 = sadd.s32 4294967294, %s7642_s24   ;;  %s7759_s27 = sadd.s32 1, %s7642_s24  }
   0x9   : > { %s382_s28 = sadd.s32 1, %s7638_s23  ;;  %s379_s29 = ssub.s32 %s7642_s24, %s7759_s27 }
   0xa   : > { %p392_p0 = scmp.ne.s32.totalorder %s7638_s23, %s7634_s22  ;;  %p380_p1 = scmp.eq.s32.totalorder %s379_s29, 0 }
   0xb   : > { %p393_p2 = scmp.eq.s32.totalorder %s7755_s25, 1  ;;  %p398_p3 = scmp.ne.s32.totalorder %s7634_s22, %s7630_s21 }
   0xc   : > { %p399_p4 = scmp.eq.s32.totalorder %s7120_s26, 1  ;;  %p7123_p7 = scmp.ge.s32.totalorder %s7642_s24, 1 }
   0xd   : > { %s7770_s30 = scalar_select %p380_p1, %s7638_s23, %s382_s28  }
   0xe   : > { %p7772_p5 = por %p393_p2, %p392_p0  ;;  %p7776_p6 = por %p399_p4, %p398_p3 }
   0xf   : > { %16832 = sst [smem:[#allocation6_spill]] %s7770_s30  ;;  %p475_p8 = scmp.lt.s32.totalorder %s7642_s24, 3 }
  0x11   : > { %p476_p9 = pnand %p7123_p7, %p475_p8 }
  0x13   : > { %479 = sbr.rel (%p476_p9) target bundleno = 1602 (0x642), region = 84 }
  0x1a   : > { %v7443_v0 = vld [vmem:[%s16379_s3] sm:$0xff]   ;;  %p530_p10 = scmp.lt.s32.totalorder %s7755_s25, 1  ;;  %v7444_v1 = vld [vmem:[%s16379_s3 + $0x8] sm:$0xff]   ;;  %v16394_v2 = vmov 0   ;;  %s16835_s1 = sld [smem:[#allocation146_spill]]  ;;  %vm990_vm0 = vcmask 261120  }
  0x1b   : > { %7300 = vmatprep.subr.bf16.mxu1 %v7443_v0  ;;  %758 = vmatprep.mubr.bf16.mxu0 %v16394_v2  ;;  %s16836_s20 = sld [smem:[#allocation145_spill]]  ;;  %v7454_v51 = vld [vmem:[%s16386_s10] ss:$8 sps:$4 sm:$0xff]   ;;  %v7456_v52 = vld [vmem:[%s16386_s10 + $0x4] ss:$8 sps:$4 sm:$0xff]   ;;  %s16837_s2 = sld [smem:[#allocation147_spill]] }
  0x1c   : > { %s531_s28 = scalar_select %p530_p10, %s7755_s25, 1  ;;  %7301 = vmatpush3.bf16.msra.mxu1 %v7443_v0  ;;  %v7459_v56 = vld [vmem:[%s16386_s10 + $0x10] ss:$8 sps:$4 sm:$0xff]   ;;  %v7461_v57 = vld [vmem:[%s16386_s10 + $0x14] ss:$8 sps:$4 sm:$0xff]   ;;  %vm677_vm1 = vcmask 523264  }
  0x1d   : > { %7302 = vmatprep.subr.bf16.mxu1 %v7444_v1  ;;  %vm3992_vm6 = vcmask 392192  }
  0x1e   : > { %s7280_s29 = sshll.u32 %s531_s28, 8  ;;  %s7279_s23 = sshll.u32 %s531_s28, 7 }
  0x1f   : > { %s527_s28 = sand.u32 1, %s7634_s22  }
  0x20   : > { %s7794_s18 = scalar_lea.vmem %s16835_s1, %s7280_s29  ;;  %7303 = vmatpush3.bf16.msra.mxu1 %v7444_v1  ;;  %s7124_s30 = sshll.u32 %s527_s28, 9 }
  0x21   : > { %v919_v3 = vld [vmem:[%s7794_s18] sm:$0xff]  ;;  %v920_v4 = vld [vmem:[%s7794_s18 + $0x8] sm:$0xff]  ;;  %v921_v5 = vld [vmem:[%s7794_s18 + $0x10] sm:$0xff]  ;;  %s7812_s26 = scalar_lea.vmem %s16836_s20, %s7279_s23  ;;  %4041 = vmatprep.subr.bf16.mxu1 %v7456_v52  ;;  %s16183_s19 = scalar_lea.vmem [#allocation2], %s7124_s30 }
  0x22   : > { %v951_v6 = vpack.c.bf16 %v920_v4, %v919_v3  ;;  %v922_v7 = vld [vmem:[%s7794_s18 + $0x18] sm:$0xff]  ;;  %v923_v8 = vld [vmem:[%s7794_s18 + $0x20] sm:$0xff]  ;;  %v924_v9 = vld [vmem:[%s7794_s18 + $0x28] sm:$0xff]  ;;  %s7281_s20 = sshll.u32 %s7755_s25, 13  ;;  %s16335_s25 = scalar_lea.sflag [#allocation3], %s527_s28 }
  0x23   : > { %v952_v10 = vpack.c.bf16 %v922_v7, %v921_v5  ;;  %v953_v11 = vpack.c.bf16 %v924_v9, %v923_v8  ;;  %v925_v12 = vld [vmem:[%s7794_s18 + $0x30] sm:$0xff]  ;;  %v926_v13 = vld [vmem:[%s7794_s18 + $0x38] sm:$0xff]  ;;  %v927_v14 = vld [vmem:[%s7794_s18 + $0x40] sm:$0xff]  ;;  %s16326_s23 = scalar_lea.hbm %s16392_s16, %s7281_s20 }
  0x24   : > { %7304 = vmatprep.mubr.msk.bf16.mxu1 %vm990_vm0, %v951_v6  ;;  %v928_v15 = vld [vmem:[%s7794_s18 + $0x48] sm:$0xff]  ;;  %v954_v16 = vpack.c.bf16 %v926_v13, %v925_v12  ;;  %v929_v19 = vld [vmem:[%s7794_s18 + $0x50] sm:$0xff]  ;;  %v930_v20 = vld [vmem:[%s7794_s18 + $0x58] sm:$0xff] }
  0x25   : > { %7305 = vmatmul.mubr.msk.bf16.vlgmr.msra.gmra.mrb[0].mxu1 %vm990_vm0, %v952_v10  ;;  %v955_v17 = vpack.c.bf16 %v928_v15, %v927_v14  ;;  %v542_v18 = vld [vmem:[%s7812_s26 + $0x8] sm:$0xff]  ;;  %v544_v21 = vld [vmem:[%s7812_s26 + $0x18] sm:$0xff]  ;;  %v541_v22 = vld [vmem:[%s7812_s26] sm:$0xff]  ;;  %v956_v38 = vpack.c.bf16 %v930_v20, %v929_v19 }
  0x26   : > { %7308 = vmatprep.mubr.msk.bf16.mxu1 %vm990_vm0, %v953_v11  ;;  %v543_v23 = vld [vmem:[%s7812_s26 + $0x10] sm:$0xff]  ;;  %v590_v24 = vpack.c.bf16 %v544_v21, %v542_v18  ;;  %v546_v26 = vld [vmem:[%s7812_s26 + $0x28] sm:$0xff]  ;;  %v548_v27 = vld [vmem:[%s7812_s26 + $0x38] sm:$0xff]  ;;  %4042 = vmatpush1.bf16.msra.mxu1 %v7454_v51 }
  0x27   : > { %v589_v25 = vpack.c.bf16 %v543_v23, %v541_v22  ;;  %v545_v28 = vld [vmem:[%s7812_s26 + $0x20] sm:$0xff]  ;;  %v592_v29 = vpack.c.bf16 %v548_v27, %v546_v26  ;;  %v547_v30 = vld [vmem:[%s7812_s26 + $0x30] sm:$0xff]  ;;  %v550_v31 = vld [vmem:[%s7812_s26 + $0x48] sm:$0xff]  ;;  %4043 = vmatprep.subr.bf16.mxu1 %v7461_v57 }
  0x28   : > { %v552_v32 = vld [vmem:[%s7812_s26 + $0x58] sm:$0xff]  ;;  %v931_v33 = vld [vmem:[%s7794_s18 + $0x60] sm:$0xff]  ;;  %v932_v34 = vld [vmem:[%s7794_s18 + $0x68] sm:$0xff]  ;;  %726 = vmatprep.subr.bf16.mxu0 %v590_v24  ;;  %v591_v35 = vpack.c.bf16 %v547_v30, %v545_v28 }
  0x29   : > { %727 = vmatpush1.bf16.msra.mxu0 %v589_v25  ;;  %v549_v36 = vld [vmem:[%s7812_s26 + $0x40] sm:$0xff]  ;;  %v551_v37 = vld [vmem:[%s7812_s26 + $0x50] sm:$0xff]  ;;  %v594_v39 = vpack.c.bf16 %v552_v32, %v550_v31  ;;  %v554_v40 = vld [vmem:[%s7812_s26 + $0x68] sm:$0xff]  ;;  %v957_v41 = vpack.c.bf16 %v932_v34, %v931_v33 }
  0x2a   : > { %728 = vmatprep.subr.bf16.mxu0 %v592_v29  ;;  %v556_v42 = vld [vmem:[%s7812_s26 + $0x78] sm:$0xff]  ;;  %v933_v43 = vld [vmem:[%s7794_s18 + $0x70] sm:$0xff]  ;;  %v593_v45 = vpack.c.bf16 %v551_v37, %v549_v36  ;;  %v553_v46 = vld [vmem:[%s7812_s26 + $0x60] sm:$0xff]  ;;  %4044 = vmatpush1.bf16.msra.mxu1 %v7459_v56 }
  0x2b   : > { %v934_v44 = vld [vmem:[%s7794_s18 + $0x78] sm:$0xff]  ;;  %v935_v47 = vld [vmem:[%s7794_s18 + $0x80] sm:$0xff]  ;;  %v596_v48 = vpack.c.bf16 %v556_v42, %v554_v40  ;;  %v555_v49 = vld [vmem:[%s7812_s26 + $0x70] sm:$0xff]  ;;  %v7645_v40 = vmov 0.0   ;;  %s7646_s26 = smov [#allocation2]  }
  0x2c   : > { %v936_v50 = vld [vmem:[%s7794_s18 + $0x88] sm:$0xff]  ;;  %v595_v53 = vpack.c.bf16 %v555_v49, %v553_v46  ;;  %v958_v54 = vpack.c.bf16 %v934_v44, %v933_v43  ;;  %v7445_v58 = vld [vmem:[%s16837_s2] sm:$0xff]   ;;  %v937_v59 = vld [vmem:[%s7794_s18 + $0x90] sm:$0xff]  ;;  %s7584_s20 = sshll.u32 %s7646_s26, 4  ;;  %s7585_s20 = int_to_ptr.vmem [resolvable:$false] %s7584_s20 }
  0x2d   : > { %7309 = vmatmul.mubr.msk.bf16.gmra.mrb[4].mxu1 %vm990_vm0, %v954_v16  ;;  %729 = vmatpush1.bf16.msra.mxu0 %v591_v35  ;;  %v959_v55 = vpack.c.bf16 %v936_v50, %v935_v47  ;;  %v938_v60 = vld [vmem:[%s7794_s18 + $0x98] sm:$0xff]  ;;  %v939_v61 = vld [vmem:[%s7794_s18 + $0xa0] sm:$0xff]  ;;  %v940_v62 = vld [vmem:[%s7794_s18 + $0xa8] sm:$0xff]  ;;  %v1237_v35 = vlaneseq  ;;  %s7586_s29 = scalar_lea.vmem %s7585_s20, 16384 }
  0x2e   : > { %7312 = vmatprep.mubr.msk.bf16.mxu1 %vm990_vm0, %v955_v17  ;;  %730 = vmatprep.subr.bf16.mxu0 %v594_v39  ;;  %v960_v63 = vpack.c.bf16 %v938_v60, %v937_v59  ;;  %v7446_v0 = vld [vmem:[%s16837_s2 + $0x8] sm:$0xff]   ;;  %v961_v1 = vpack.c.bf16 %v940_v62, %v939_v61  ;;  %v941_v3 = vld [vmem:[%s7794_s18 + $0xb0] sm:$0xff]  ;;  %v942_v4 = vld [vmem:[%s7794_s18 + $0xb8] sm:$0xff] }
  0x2f   : > { %v943_v5 = vld [vmem:[%s7794_s18 + $0xc0] sm:$0xff]  ;;  %v944_v6 = vld [vmem:[%s7794_s18 + $0xc8] sm:$0xff]  ;;  %v962_v7 = vpack.c.bf16 %v942_v4, %v941_v3  ;;  %v7447_v8 = vld [vmem:[%s16837_s2 + $0x10] sm:$0xff]   ;;  %v7966_v36 = vshrl.u32 %v1237_v35, 7 }
  0x30   : > { %v963_v9 = vpack.c.bf16 %v944_v6, %v943_v5  ;;  %v945_v10 = vld [vmem:[%s7794_s18 + $0xd0] sm:$0xff]  ;;  %v946_v11 = vld [vmem:[%s7794_s18 + $0xd8] sm:$0xff]  ;;  %v947_v12 = vld [vmem:[%s7794_s18 + $0xe0] sm:$0xff] }
  0x31   : > { %731 = vmatpush1.bf16.msra.mxu0 %v593_v45  ;;  %v948_v13 = vld [vmem:[%s7794_s18 + $0xe8] sm:$0xff]  ;;  %v964_v14 = vpack.c.bf16 %v946_v11, %v945_v10  ;;  %v7448_v15 = vld [vmem:[%s16837_s2 + $0x18] sm:$0xff]   ;;  %v949_v17 = vld [vmem:[%s7794_s18 + $0xf0] sm:$0xff]  ;;  %v1239_v37 = vadd.s32 8, %v7966_v36  ;;  %vm1369_vm2 = vcmp.gt.s32.totalorder %v7966_v36, 0  ;;  %v7974_v39 = vsub.s32 1, %v7966_v36 }
  0x32   : > { %732 = vmatprep.subr.bf16.mxu0 %v596_v48  ;;  %v965_v16 = vpack.c.bf16 %v948_v13, %v947_v12  ;;  %v950_v18 = vld [vmem:[%s7794_s18 + $0xf8] sm:$0xff]  ;;  %v7449_v20 = vld [vmem:[%s16837_s2 + $0x20] sm:$0xff]   ;;  %v7450_v21 = vld [vmem:[%s16837_s2 + $0x28] sm:$0xff]   ;;  %v7985_v44 = vsub.s32 2, %v7966_v36  ;;  %v8017_v57 = vsub.s32 3, %v7966_v36  ;;  %v8028_v4 = vsub.s32 6, %v7966_v36 }
  0x33   : > { %v966_v19 = vpack.c.bf16 %v950_v18, %v949_v17  ;;  %v7451_v22 = vld [vmem:[%s16837_s2 + $0x30] sm:$0xff]   ;;  %v7452_v23 = vld [vmem:[%s16837_s2 + $0x38] sm:$0xff]   ;;  %v7453_v24 = vld [vmem:[%s16837_s2 + $0x40] sm:$0xff]   ;;  %16839 = vst [vmem:[#allocation8_spill] sm:$0xff] %v7974_v39  ;;  %vm1571_vm3 = vcmp.lt.s32.totalorder %v1239_v37, 15  ;;  %vm1304_vm4 = vcmp.lt.s32.totalorder %v7966_v36, 1 }
  0x34   : > { %v7457_v25 = vld [vmem:[%s16837_s2 + $0x48] sm:$0xff]   ;;  %v7458_v26 = vld [vmem:[%s16837_s2 + $0x50] sm:$0xff]   ;;  %v7462_v27 = vld [vmem:[%s16837_s2 + $0x58] sm:$0xff]   ;;  %16841 = vst [vmem:[#allocation10_spill] sm:$0xff] %v7985_v44  ;;  %v7993_v47 = vsel %vm1571_vm3, 1.0, %v7645_v40  ;;  %vm1505_vm5 = vcmp.lt.s32.totalorder %v7966_v36, 7 }
  0x35   : > { %7313 = vmatmul.mubr.msk.bf16.gmra.mrb[8].mxu1 %vm990_vm0, %v956_v38  ;;  %733 = vmatpush1.bf16.msra.mxu0 %v595_v53  ;;  %v7463_v28 = vld [vmem:[%s16837_s2 + $0x60] sm:$0xff]   ;;  %v7464_v31 = vld [vmem:[%s16837_s2 + $0x68] sm:$0xff]   ;;  %v7468_v32 = vld [vmem:[%s16837_s2 + $0x70] sm:$0xff]   ;;  %v7971_v38 = vsub.s32 0, %v7966_v36  ;;  %16843 = vst [vmem:[#allocation12_spill] sm:$0xff] %v7993_v47  ;;  %v8001_v51 = vmul.f32 0.0, %v7993_v47 }
  0x36   : > { %7316 = vmatprep.mubr.msk.bf16.mxu1 %vm990_vm0, %v957_v41  ;;  %v7465_v29 = vld [vmem:[%s16386_s10 + $0x20] ss:$8 sps:$4 sm:$0xff]   ;;  %v7467_v30 = vld [vmem:[%s16386_s10 + $0x24] ss:$8 sps:$4 sm:$0xff]   ;;  %v7469_v33 = vld [vmem:[%s16837_s2 + $0x78] sm:$0xff]   ;;  %v7976_v41 = vsel %vm1369_vm2, 1.0, %v7645_v40 }
  0x37   : > { %4045 = vmatprep.subr.bf16.mxu1 %v7467_v30  ;;  %v7472_v34 = vld [vmem:[%s16385_s9 + $0x4] ss:$8 sps:$4 sm:$0xff]   ;;  %16838 = vst [vmem:[#allocation7_spill] sm:$0xff] %v7971_v38  ;;  %16840 = vst [vmem:[#allocation9_spill] sm:$0xff] %v7976_v41  ;;  %v7988_v45 = vmul.f32 0.0, %v7976_v41  ;;  %s7046_s18 = sshll.u32 %s16183_s19, 4  ;;  %s16328_s18 = int_to_ptr.vmem [resolvable:$true] %s7046_s18 }
  0x38   : > { %7145 = vmatmul.mubr.msk.bf16.vlgmr.msra.gmra.mrb[0].mxu0 %vm677_vm1, %v7445_v58  ;;  %4046 = vmatpush1.bf16.msra.mxu1 %v7465_v29  ;;  %v3001_v42 = vld [vmem:[%s16383_s7] sm:$0xff]  ;;  %16844 = vst [vmem:[#allocation13_spill] sm:$0xff] %v8001_v51  ;;  %16847 = vst [vmem:[#allocation16_spill] sm:$0xff] %v8017_v57  ;;  %v8020_v58 = vsub.s32 5, %v7966_v36  ;;  %s7580_s30 = scalar_lea.vmem %s16328_s18, 8192  ;;  %p7587_p0 = scmp.lt.s32.totalorder %s16328_s18, %s7585_s20 }
  0x39   : > { %768 = vmatprep.mubr.bf16.mxu0 %v16394_v2  ;;  %4394 = vmatprep.subr.bf16.mxu1 %v7472_v34  ;;  %v7982_v43 = vrot.slane %v3001_v42, %v7971_v38  ;;  %16842 = vst [vmem:[#allocation11_spill] sm:$0xff] %v7988_v45  ;;  %v7991_v46 = vrot.slane %v3001_v42, %v7974_v39  ;;  %v8008_v53 = vld [vmem:[%s16380_s4] ss:$0 sm:$0xff]  ;;  %16849 = vst [vmem:[#allocation18_spill] sm:$0xff] %v8028_v4  ;;  %v8067_v34 = vld [vmem:[%s16383_s7 + $0x8] ss:$0 sm:$0xff]  ;;  %p7581_p11 = scmp.ne.s32.totalorder %s16328_s18, %s7580_s30  ;;  %p7588_p1 = scmp.lt.s32.totalorder %s7586_s29, %s7580_s30 }
  0x3a   : > { %v7998_v50 = vrot.slane %v3001_v42, %v7985_v44  ;;  %16848 = vst [vmem:[#allocation17_spill] sm:$0xff] %v8020_v58 }
  0x3b   : > { %v3201_v48 = vmul.f32 0.0, %v7982_v43  ;;  %v3268_v49 = vmul.f32 0.0, %v7991_v46  ;;  %v3200_v52 = vmul.f32 %v7982_v43, %v7988_v45  ;;  %p7582_p12 = pnand %p7581_p11, %p7772_p5  ;;  %p7589_p2 = por %p7588_p1, %p7587_p0 }
  0x3d   : > { %7317 = vmatmul.mubr.msk.bf16.gmra.mrb[12].mxu1 %vm990_vm0, %v958_v54  ;;  %v8011_v54 = vsub.s32 4, %v7966_v36  ;;  %v3300_v59 = vadd.f32 %v3268_v49, %v3201_v48  ;;  %v3299_v62 = vadd.f32 %v3268_v49, %v3200_v52  ;;  %p7583_p13 = pneg %p7582_p12 }
  0x3e   : > { %7320 = vmatprep.mubr.msk.bf16.mxu1 %vm990_vm0, %v959_v55  ;;  %v8014_v55 = vsub.s32 7, %v7966_v36 }
  0x3f   : > { %16845 = vst [vmem:[#allocation14_spill] sm:$0xff] %v8011_v54  ;;  %v8031_v6 = vrot.slane %v3001_v42, %v8011_v54  ;;  %p7590_p3 = pnand %p7589_p2, %p7583_p13 }
  0x40   : > { %7146 = vmatmul.mubr.msk.bf16.gmra.mrb[4].mxu0 %vm677_vm1, %v7446_v0  ;;  %16846 = vst [vmem:[#allocation15_spill] sm:$0xff] %v8014_v55  ;;  %v3336_v0 = vmul.f32 %v7998_v50, %v8001_v51 }
  0x41   : > { %778 = vmatprep.mubr.bf16.mxu0 %v16394_v2 }
  0x42   : > { %v3368_v13 = vadd.f32 %v3336_v0, %v3300_v59 }
  0x45   : > { %7321 = vmatmul.mubr.msk.bf16.gmra.mrb[16].mxu1 %vm990_vm0, %v960_v63  ;;  %v3335_v63 = vmul.f32 0.0, %v7998_v50 }
  0x46   : > { %7324 = vmatprep.mubr.msk.bf16.mxu1 %vm990_vm0, %v961_v1 }
  0x47   : > { %v8040_v12 = vadd.f32 %v3335_v63, %v3299_v62 }
  0x48   : > { %7147 = vmatmul.mubr.msk.bf16.gmra.mrb[8].mxu0 %vm677_vm1, %v7447_v8 }
  0x49   : > { %788 = vmatprep.mubr.bf16.mxu0 %v16394_v2 }
  0x4d   : > { %7325 = vmatmul.mubr.msk.bf16.gmra.mrb[20].mxu1 %vm990_vm0, %v962_v7  ;;  %v8034_v7 = vrot.slane %v3001_v42, %v8014_v55 }
  0x4e   : > { %7328 = vmatprep.mubr.msk.bf16.mxu1 %vm990_vm0, %v963_v9 }
  0x4f   : > { %16850 = vst [vmem:[#allocation19_spill] sm:$0xff] %v8034_v7 }
  0x50   : > { %7148 = vmatmul.mubr.msk.bf16.gmra.mrb[12].mxu0 %vm677_vm1, %v7448_v15  ;;  %v8046_v15 = vrot.slane %v3001_v42, %v8020_v58 }
  0x51   : > { %798 = vmatprep.mubr.bf16.mxu0 %v16394_v2 }
  0x55   : > { %7329 = vmatmul.mubr.msk.bf16.gmra.mrb[24].mxu1 %vm990_vm0, %v964_v14  ;;  %v8043_v14 = vrot.slane %v3001_v42, %v8017_v57 }
  0x56   : > { %7332 = vmatprep.mubr.msk.bf16.mxu1 %vm990_vm0, %v965_v16 }
  0x58   : > { %7149 = vmatmul.mubr.msk.bf16.gmra.mrb[16].mxu0 %vm677_vm1, %v7449_v20 }
  0x59   : > { %808 = vmatprep.mubr.bf16.mxu0 %v16394_v2 }
  0x5d   : > { %7333 = vmatmul.mubr.msk.bf16.gmra.mrb[28].mxu1 %vm990_vm0, %v966_v19  ;;  %v8050_v19 = vrot.slane %v3001_v42, %v8028_v4 }
  0x5e   : > { %4073 = vmatprep.mubr.bf16.mxu1 %v16394_v2 }
  0x60   : > { %7150 = vmatmul.mubr.msk.bf16.gmra.mrb[20].mxu0 %vm677_vm1, %v7450_v21 }
  0x61   : > { %818 = vmatprep.mubr.bf16.mxu0 %v16394_v2 }
  0x68   : > { %7151 = vmatmul.mubr.msk.bf16.gmra.mrb[24].mxu0 %vm677_vm1, %v7451_v22 }
  0x69   : > { %828 = vmatprep.mubr.bf16.mxu0 %v16394_v2 }
  0x70   : > { %7152 = vmatmul.mubr.msk.bf16.gmra.mrb[28].mxu0 %vm677_vm1, %v7452_v23 }
  0x71   : > { %838 = vmatprep.mubr.bf16.mxu0 %v16394_v2 }
  0x78   : > { %7153 = vmatmul.mubr.msk.bf16.gmra.mrb[32].mxu0 %vm677_vm1, %v7453_v24 }
  0x79   : > { %848 = vmatprep.mubr.bf16.mxu0 %v16394_v2 }
  0x80   : > { %7154 = vmatmul.mubr.msk.bf16.gmra.mrb[36].mxu0 %vm677_vm1, %v7457_v25 }
  0x81   : > { %858 = vmatprep.mubr.bf16.mxu0 %v16394_v2 }
  0x88   : > { %7155 = vmatmul.mubr.msk.bf16.gmra.mrb[40].mxu0 %vm677_vm1, %v7458_v26 }
  0x89   : > { %868 = vmatprep.mubr.bf16.mxu0 %v16394_v2 }
  0x90   : > { %7156 = vmatmul.mubr.msk.bf16.gmra.mrb[44].mxu0 %vm677_vm1, %v7462_v27 }
  0x91   : > { %878 = vmatprep.mubr.bf16.mxu0 %v16394_v2 }
  0x98   : > { %7157 = vmatmul.mubr.msk.bf16.gmra.mrb[48].mxu0 %vm677_vm1, %v7463_v28 }
  0x99   : > { %888 = vmatprep.mubr.bf16.mxu0 %v16394_v2 }
  0xa0   : > { %7158 = vmatmul.mubr.msk.bf16.gmra.mrb[52].mxu0 %vm677_vm1, %v7464_v31 }
  0xa1   : > { %898 = vmatprep.mubr.bf16.mxu0 %v16394_v2 }
  0xa8   : > { %7159 = vmatmul.mubr.msk.bf16.gmra.mrb[56].mxu0 %vm677_vm1, %v7468_v32 }
  0xa9   : > { %908 = vmatprep.mubr.bf16.mxu0 %v16394_v2 }
  0xb0   : > { %7160 = vmatmul.mubr.msk.bf16.gmra.mrb[60].mxu0 %vm677_vm1, %v7469_v33 }
  0xf8   : > { %v7306_v56 = vpop.f32.mrb[0].mxu1 }
  0xf9   : > { %v1082_v60 = vadd.f32 %v7306_v56, %v8008_v53  ;;  %v1073_v61 = vpop.f32.mrb[1].mxu1 }
  0xfa   : > { %v1074_v1 = vadd.f32 %v8008_v53, %v1073_v61  ;;  %v7307_v3 = vpop.f32.mrb[2].mxu1 }
  0xfb   : > { %v1202_v5 = vmax.f32 %v1082_v60, 0.0  ;;  %v1085_v8 = vadd.f32 %v7307_v3, %v8008_v53  ;;  %v1076_v9 = vpop.f32.mrb[3].mxu1 }
  0xfc   : > { %v1200_v10 = vmax.f32 %v1074_v1, 0.0  ;;  %v1077_v11 = vadd.f32 %v8008_v53, %v1076_v9 }
  0xfd   : > { %v3005_v16 = vrot.slane %v1202_v5, 7  ;;  %v3101_v17 = vrot.slane %v1202_v5, 1  ;;  %v3271_v18 = vmul.f32 %v7991_v46, %v1202_v5  ;;  %v8053_v20 = vmul.f32 %v8031_v6, %v1202_v5 }
  0xfe   : > { %v8056_v21 = vmul.f32 %v8034_v7, %v1202_v5  ;;  %v1203_v22 = vmax.f32 %v1085_v8, 0.0  ;;  %v1201_v23 = vmax.f32 %v1077_v11, 0.0  ;;  %v3004_v24 = vrot.slane %v1200_v10, 7 }
  0xff   : > { %v3100_v25 = vrot.slane %v1200_v10, 1  ;;  %v3269_v26 = vmul.f32 %v7991_v46, %v1200_v10  ;;  %v3471_v27 = vmul.f32 %v8031_v6, %v1200_v10 }
 0x100   : > { %v7310_v28 = vpop.f32.mrb[4].mxu1  ;;  %v3021_v29 = vrot.slane %v1203_v22, 7  ;;  %v3117_v30 = vrot.slane %v1203_v22, 1  ;;  %v3272_v31 = vmul.f32 %v7991_v46, %v1203_v22  ;;  %v8062_v32 = vmul.f32 %v8031_v6, %v1203_v22 }
 0x101   : > { %v1089_v33 = vpop.f32.mrb[5].mxu1  ;;  %v8070_v35 = vmul.f32 %v8034_v7, %v1203_v22  ;;  %v3020_v37 = vrot.slane %v1201_v23, 7  ;;  %v3116_v40 = vrot.slane %v1201_v23, 1  ;;  %v3270_v42 = vmul.f32 %v7991_v46, %v1201_v23 }
 0x102   : > { %v7311_v48 = vpop.f32.mrb[6].mxu1  ;;  %v3037_v49 = vsel %vm1304_vm4, %v3005_v16, %v3021_v29  ;;  %v3053_v52 = vsel %vm1304_vm4, %v3021_v29, %v3005_v16  ;;  %v8079_v56 = vsel %vm1505_vm5, %v3101_v17, %v3117_v30  ;;  %v3149_v59 = vsel %vm1505_vm5, %v3117_v30, %v3101_v17 }
 0x103   : > { %v1092_v60 = vpop.f32.mrb[7].mxu1  ;;  %v3070_v61 = vmul.f32 %v7976_v41, %v3053_v52  ;;  %v8085_v62 = vmul.f32 %v7993_v47, %v3149_v59  ;;  %v3205_v63 = vmul.f32 %v7982_v43, %v3037_v49  ;;  %v3339_v0 = vmul.f32 %v7998_v50, %v8079_v56 }
 0x104   : > { %v8092_v1 = vmul.f32 %v8067_v34, %v8079_v56  ;;  %v3036_v3 = vsel %vm1304_vm4, %v3004_v24, %v3020_v37  ;;  %v3052_v5 = vsel %vm1304_vm4, %v3020_v37, %v3004_v24  ;;  %v3132_v8 = vsel %vm1505_vm5, %v3100_v25, %v3116_v40 }
 0x105   : > { %v3204_v9 = vmul.f32 %v7982_v43, %v3070_v61  ;;  %v3304_v10 = vadd.f32 %v3272_v31, %v3205_v63  ;;  %v3340_v11 = vmul.f32 %v7998_v50, %v8085_v62  ;;  %v3068_v16 = vmul.f32 %v7976_v41, %v3052_v5 }
 0x106   : > { %v3148_v17 = vsel %vm1505_vm5, %v3116_v40, %v3100_v25  ;;  %v3203_v22 = vmul.f32 %v7982_v43, %v3036_v3  ;;  %v3337_v29 = vmul.f32 %v7998_v50, %v3132_v8  ;;  %v3404_v24 = vmul.f32 %v8043_v14, %v3036_v3 }
 0x107   : > { %v3303_v30 = vadd.f32 %v3271_v18, %v3204_v9  ;;  %v8109_v37 = vadd.f32 %v3340_v11, %v3304_v10  ;;  %v3165_v52 = vmul.f32 %v7993_v47, %v3148_v17  ;;  %v3202_v31 = vmul.f32 %v7982_v43, %v3068_v16 }
 0x108   : > { %v7314_v59 = vpop.f32.mrb[8].mxu1  ;;  %v3302_v63 = vadd.f32 %v3270_v42, %v3203_v22  ;;  %v3403_v5 = vmul.f32 %v8043_v14, %v3068_v16  ;;  %v3405_v2 = vmul.f32 %v8043_v14, %v3070_v61  ;;  %v3406_v25 = vmul.f32 %v8043_v14, %v3037_v49 }
 0x109   : > { %v8116_v40 = vpop.f32.mrb[9].mxu1  ;;  %v8118_v55 = vadd.f32 %v3339_v0, %v3303_v30  ;;  %v3301_v3 = vadd.f32 %v3269_v26, %v3202_v31  ;;  %v3338_v18 = vmul.f32 %v7998_v50, %v3165_v52  ;;  %v3436_v9 = vadd.f32 %v3404_v24, %v3368_v13 }
 0x10a   : > { %v8121_v10 = vpop.f32.mrb[10].mxu1  ;;  %v3435_v11 = vadd.f32 %v3403_v5, %v8040_v12  ;;  %v3472_v42 = vmul.f32 %v8031_v6, %v1201_v23  ;;  %v3539_v16 = vmul.f32 %v8046_v15, %v3132_v8  ;;  %v3540_v17 = vmul.f32 %v8046_v15, %v3165_v52 }
 0x10b   : > { %v8127_v22 = vpop.f32.mrb[11].mxu1  ;;  %v3369_v4 = vadd.f32 %v3337_v29, %v3301_v3  ;;  %v3370_v51 = vadd.f32 %v3338_v18, %v3302_v63  ;;  %v3607_v0 = vmul.f32 %v8050_v19, %v3070_v61  ;;  %v3608_v26 = vmul.f32 %v8050_v19, %v3037_v49 }
 0x10c   : > { %v3503_v30 = vadd.f32 %v3471_v27, %v3435_v11  ;;  %v3504_v13 = vadd.f32 %v3472_v42, %v3436_v9  ;;  %v3743_v24 = vmul.f32 %v8067_v34, %v8085_v62  ;;  %v1098_v12 = vadd.f32 %v7310_v28, %v8008_v53 }
 0x10d   : > { %v8134_v23 = vadd.f32 %v3405_v2, %v3369_v4  ;;  %v3438_v8 = vadd.f32 %v3406_v25, %v3370_v51  ;;  %v1090_v52 = vadd.f32 %v8008_v53, %v1089_v33  ;;  %v1101_v31 = vadd.f32 %v7311_v48, %v8008_v53 }
 0x10e   : > { %v3571_v29 = vadd.f32 %v3539_v16, %v3503_v30  ;;  %v3572_v63 = vadd.f32 %v3540_v17, %v3504_v13  ;;  %v8138_v5 = vmax.f32 %v1098_v12, 0.0  ;;  %v1093_v49 = vadd.f32 %v8008_v53, %v1092_v60 }
 0x10f   : > { %v8142_v27 = vadd.f32 %v8062_v32, %v3438_v8  ;;  %v8144_v61 = vmax.f32 %v1090_v52, 0.0  ;;  %v8146_v3 = vmax.f32 %v1101_v31, 0.0  ;;  %v1114_v2 = vadd.f32 %v7314_v59, %v8008_v53 }
 0x110   : > { %v8149_v51 = vpop.f32.mrb[12].mxu1  ;;  %v3639_v4 = vadd.f32 %v3607_v0, %v3571_v29  ;;  %v3640_v28 = vadd.f32 %v3608_v26, %v3572_v63  ;;  %v3007_v33 = vrot.slane %v8138_v5, 7  ;;  %v16402_v48 = vrot.slane %v8138_v5, 1 }
 0x111   : > { %v8153_v25 = vpop.f32.mrb[13].mxu1  ;;  %v8157_v32 = vmul.f32 %v7991_v46, %v8138_v5  ;;  %v8161_v60 = vmul.f32 %v8031_v6, %v8138_v5  ;;  %v8165_v59 = vmul.f32 %v8034_v7, %v8138_v5  ;;  %v3006_v18 = vrot.slane %v8144_v61, 7 }
 0x112   : > { %v8168_v9 = vpop.f32.mrb[14].mxu1  ;;  %v8171_v11 = vadd.f32 %v8056_v21, %v3639_v4  ;;  %v3707_v42 = vadd.f32 %v8070_v35, %v3640_v28  ;;  %v8177_v17 = vmul.f32 %v7991_v46, %v8144_v61  ;;  %v8183_v26 = vmul.f32 %v8031_v6, %v8144_v61 }
 0x113   : > { %16851 = vst [vmem:[#allocation20_spill] sm:$0xff] %v8161_v60  ;;  %16852 = vst [vmem:[#allocation21_spill] sm:$0xff] %v8165_v59  ;;  %v8179_v0 = vpop.f32.mrb[15].mxu1  ;;  %v8187_v30 = vmul.f32 %v8034_v7, %v8144_v61  ;;  %v3023_v21 = vrot.slane %v8146_v3, 7  ;;  %v16403_v35 = vrot.slane %v8146_v3, 1  ;;  %v3276_v12 = vmul.f32 %v7991_v46, %v8146_v3 }
 0x114   : > { %16853 = vst [vmem:[#allocation22_spill] sm:$0xff] %v8183_v26  ;;  %v8191_v13 = vadd.f32 %v3743_v24, %v3707_v42  ;;  %v8197_v8 = vmul.f32 %v8031_v6, %v8146_v3  ;;  %v8201_v52 = vmul.f32 %v8034_v7, %v8146_v3  ;;  %v8215_v63 = vmax.f32 %v1093_v49, 0.0 }
 0x115   : > { %v8205_v31 = vsel %vm1304_vm4, %v3007_v33, %v3023_v21  ;;  %v3055_v29 = vsel %vm1304_vm4, %v3023_v21, %v3007_v33  ;;  %v3151_v24 = vsel %vm1505_vm5, %v16403_v35, %v16402_v48  ;;  %v16860_v38 = vrot.slane %v8144_v61, 1 }
 0x116   : > { %16854 = vst [vmem:[#allocation23_spill] sm:$0xff] %v8197_v8  ;;  %16855 = vst [vmem:[#allocation24_spill] sm:$0xff] %v8201_v52  ;;  %v8218_v4 = vmul.f32 %v7976_v41, %v3055_v29  ;;  %v8221_v28 = vmul.f32 %v7993_v47, %v3151_v24  ;;  %v3209_v42 = vmul.f32 %v7982_v43, %v8205_v31  ;;  %v3022_v21 = vrot.slane %v8215_v63, 7 }
 0x117   : > { %16856 = vst [vmem:[#allocation25_spill] sm:$0xff] %v8205_v31  ;;  %v3410_v33 = vmul.f32 %v8043_v14, %v8205_v31  ;;  %v3274_v49 = vmul.f32 %v7991_v46, %v8215_v63  ;;  %v3476_v29 = vmul.f32 %v8031_v6, %v8215_v63  ;;  %v8261_v54 = vmul.f32 %v8034_v7, %v8215_v63 }
 0x118   : > { %16857 = vst [vmem:[#allocation26_spill] sm:$0xff] %v8218_v4  ;;  %16858 = vst [vmem:[#allocation27_spill] sm:$0xff] %v8221_v28  ;;  %v8233_v48 = vpop.f32.mrb[16].mxu1  ;;  %v8237_v24 = vmul.f32 %v7982_v43, %v8218_v4  ;;  %v3308_v35 = vadd.f32 %v3276_v12, %v3209_v42  ;;  %v3344_v58 = vmul.f32 %v7998_v50, %v8221_v28  ;;  %v16861_v12 = vrot.slane %v8215_v63, 1 }
 0x119   : > { %v8243_v57 = vmul.f32 %v8043_v14, %v8218_v4  ;;  %v8245_v16 = vpop.f32.mrb[17].mxu1  ;;  %v8249_v44 = vsel %vm1304_vm4, %v3006_v18, %v3022_v21  ;;  %v3054_v45 = vsel %vm1304_vm4, %v3022_v21, %v3006_v18 }
 0x11a   : > { %v3150_v42 = vsel %vm1505_vm5, %v16861_v12, %v16860_v38  ;;  %v8263_v39 = vpop.f32.mrb[18].mxu1  ;;  %v8265_v60 = vadd.f32 %v3344_v58, %v3308_v35  ;;  %v8268_v59 = vmul.f32 %v7976_v41, %v3054_v45  ;;  %v3207_v21 = vmul.f32 %v7982_v43, %v8249_v44 }
 0x11b   : > { %16859 = vst [vmem:[#allocation28_spill] sm:$0xff] %v8243_v57  ;;  %v8271_v18 = vmul.f32 %v7993_v47, %v3150_v42  ;;  %v8275_v52 = vpop.f32.mrb[19].mxu1  ;;  %v3408_v38 = vmul.f32 %v8043_v14, %v8249_v44  ;;  %v8279_v12 = vmax.f32 %v1114_v2, 0.0  ;;  %v1106_v58 = vadd.f32 %v8008_v53, %v8116_v40 }
 0x11c   : > { %v1117_v45 = vadd.f32 %v8121_v10, %v8008_v53  ;;  %v8287_v35 = vmul.f32 %v7982_v43, %v8268_v59  ;;  %v3306_v42 = vadd.f32 %v3274_v49, %v3207_v21  ;;  %v8293_v57 = vmul.f32 %v8043_v14, %v8268_v59 }
 0x11d   : > { %16862 = vst [vmem:[#allocation29_spill] sm:$0xff] %v8279_v12  ;;  %v3342_v8 = vmul.f32 %v7998_v50, %v8271_v18  ;;  %v3440_v2 = vadd.f32 %v3408_v38, %v8109_v37  ;;  %v3544_v40 = vmul.f32 %v8046_v15, %v8271_v18  ;;  %v3009_v28 = vrot.slane %v8279_v12, 7 }
 0x11e   : > { %v8302_v49 = vmul.f32 %v7991_v46, %v8279_v12  ;;  %v8306_v21 = vmul.f32 %v8031_v6, %v8279_v12  ;;  %v8310_v4 = vmul.f32 %v8034_v7, %v8279_v12  ;;  %v8312_v38 = vmax.f32 %v1106_v58, 0.0 }
 0x11f   : > { %v3374_v31 = vadd.f32 %v3342_v8, %v3306_v42  ;;  %v3508_v37 = vadd.f32 %v3476_v29, %v3440_v2  ;;  %v8314_v26 = vmax.f32 %v1117_v45, 0.0  ;;  %v1109_v8 = vadd.f32 %v8008_v53, %v8127_v22 }
 0x120   : > { %16863 = vst [vmem:[#allocation30_spill] sm:$0xff] %v8302_v49  ;;  %16864 = vst [vmem:[#allocation31_spill] sm:$0xff] %v8306_v21  ;;  %v8318_v42 = vpop.f32.mrb[20].mxu1  ;;  %v1130_v49 = vadd.f32 %v8149_v51, %v8008_v53  ;;  %v1122_v21 = vadd.f32 %v8008_v53, %v8153_v25  ;;  %v1133_v29 = vadd.f32 %v8168_v9, %v8008_v53  ;;  %v3008_v2 = vrot.slane %v8312_v38, 7 }
 0x121   : > { %16865 = vst [vmem:[#allocation32_spill] sm:$0xff] %v8310_v4  ;;  %16866 = vst [vmem:[#allocation33_spill] sm:$0xff] %v8312_v38  ;;  %v8320_v10 = vadd.f32 %v3410_v33, %v3374_v31  ;;  %v8328_v58 = vpop.f32.mrb[21].mxu1  ;;  %v8330_v45 = vadd.f32 %v3544_v40, %v3508_v37  ;;  %v8336_v31 = vmul.f32 %v7991_v46, %v8312_v38  ;;  %v3025_v9 = vrot.slane %v8314_v26, 7 }
 0x122   : > { %16867 = vst [vmem:[#allocation34_spill] sm:$0xff] %v8314_v26  ;;  %16868 = vst [vmem:[#allocation35_spill] sm:$0xff] %v8318_v42  ;;  %v8338_v33 = vpop.f32.mrb[22].mxu1  ;;  %v8342_v51 = vmul.f32 %v8031_v6, %v8312_v38  ;;  %v8346_v25 = vmul.f32 %v8034_v7, %v8312_v38  ;;  %v3280_v22 = vmul.f32 %v7991_v46, %v8314_v26  ;;  %v8376_v42 = vmax.f32 %v1130_v49, 0.0 }
 0x123   : > { %16869 = vst [vmem:[#allocation36_spill] sm:$0xff] %v8320_v10  ;;  %16870 = vst [vmem:[#allocation37_spill] sm:$0xff] %v8328_v58  ;;  %v8350_v37 = vpop.f32.mrb[23].mxu1  ;;  %v8356_v4 = vmul.f32 %v8031_v6, %v8314_v26  ;;  %v3057_v40 = vsel %vm1304_vm4, %v3025_v9, %v3009_v28  ;;  %v16881_v58 = vrot.slane %v8314_v26, 1 }
 0x124   : > { %16871 = vst [vmem:[#allocation38_spill] sm:$0xff] %v8330_v45  ;;  %16872 = vst [vmem:[#allocation39_spill] sm:$0xff] %v8336_v31  ;;  %v16889_v45 = vrot.slane %v8312_v38, 1  ;;  %v16904_v38 = vrot.slane %v8144_v61, 1 }
 0x125   : > { %16873 = vst [vmem:[#allocation40_spill] sm:$0xff] %v8338_v33  ;;  %16874 = vst [vmem:[#allocation41_spill] sm:$0xff] %v8342_v51  ;;  %v8360_v51 = vmul.f32 %v8034_v7, %v8314_v26  ;;  %v8362_v33 = vmax.f32 %v1109_v8, 0.0 }
 0x126   : > { %16875 = vst [vmem:[#allocation42_spill] sm:$0xff] %v8346_v25  ;;  %16876 = vst [vmem:[#allocation43_spill] sm:$0xff] %v8350_v37  ;;  %v8366_v25 = vsel %vm1304_vm4, %v3009_v28, %v3025_v9  ;;  %v16880_v37 = vrot.slane %v8279_v12, 1 }
 0x127   : > { %16877 = vst [vmem:[#allocation44_spill] sm:$0xff] %v8356_v4  ;;  %16878 = vst [vmem:[#allocation45_spill] sm:$0xff] %v8360_v51  ;;  %v8379_v51 = vmul.f32 %v7976_v41, %v3057_v40  ;;  %v3213_v10 = vmul.f32 %v7982_v43, %v8366_v25  ;;  %v3414_v28 = vmul.f32 %v8043_v14, %v8366_v25  ;;  %v3024_v9 = vrot.slane %v8362_v33, 7 }
 0x128   : > { %16879 = vst [vmem:[#allocation46_spill] sm:$0xff] %v8366_v25  ;;  %v3153_v4 = vsel %vm1505_vm5, %v16881_v58, %v16880_v37  ;;  %16882 = vst [vmem:[#allocation47_spill] sm:$0xff] %v8376_v42  ;;  %v3278_v49 = vmul.f32 %v7991_v46, %v8362_v33  ;;  %v3480_v58 = vmul.f32 %v8031_v6, %v8362_v33  ;;  %v8404_v26 = vpop.f32.mrb[24].mxu1 }
 0x129   : > { %16883 = vst [vmem:[#allocation48_spill] sm:$0xff] %v8379_v51  ;;  %v8382_v8 = vmul.f32 %v7993_v47, %v3153_v4  ;;  %v8396_v4 = vmul.f32 %v7982_v43, %v8379_v51  ;;  %v3312_v40 = vadd.f32 %v3280_v22, %v3213_v10  ;;  %v8402_v25 = vmul.f32 %v8043_v14, %v8379_v51 }
 0x12a   : > { %16887 = vst [vmem:[#allocation52_spill] sm:$0xff] %v8404_v26  ;;  %v8408_v12 = vsel %vm1304_vm4, %v3008_v2, %v3024_v9  ;;  %v3056_v31 = vsel %vm1304_vm4, %v3024_v9, %v3008_v2  ;;  %v16890_v10 = vrot.slane %v8362_v33, 1 }
 0x12b   : > { %16884 = vst [vmem:[#allocation49_spill] sm:$0xff] %v8382_v8  ;;  %16885 = vst [vmem:[#allocation50_spill] sm:$0xff] %v8396_v4  ;;  %v3348_v37 = vmul.f32 %v7998_v50, %v8382_v8  ;;  %v8420_v8 = vmul.f32 %v8034_v7, %v8362_v33  ;;  %v8427_v51 = vmul.f32 %v7976_v41, %v3056_v31 }
 0x12c   : > { %16886 = vst [vmem:[#allocation51_spill] sm:$0xff] %v8402_v25  ;;  %16888 = vst [vmem:[#allocation53_spill] sm:$0xff] %v8408_v12  ;;  %v3152_v22 = vsel %vm1505_vm5, %v16890_v10, %v16889_v45  ;;  %v8422_v25 = vpop.f32.mrb[25].mxu1  ;;  %v3211_v9 = vmul.f32 %v7982_v43, %v8408_v12  ;;  %v3412_v45 = vmul.f32 %v8043_v14, %v8408_v12  ;;  %v3011_v10 = vrot.slane %v8376_v42, 7 }
 0x12d   : > { %16891 = vst [vmem:[#allocation54_spill] sm:$0xff] %v8420_v8  ;;  %16892 = vst [vmem:[#allocation55_spill] sm:$0xff] %v8422_v25  ;;  %v8424_v26 = vadd.f32 %v3348_v37, %v3312_v40  ;;  %v8430_v2 = vmul.f32 %v7993_v47, %v3152_v22  ;;  %v8434_v4 = vpop.f32.mrb[26].mxu1  ;;  %v8442_v40 = vmul.f32 %v7991_v46, %v8376_v42  ;;  %v8459_v25 = vld [vmem:[%s16384_s8] ss:$0 sm:$0xff] }
 0x12e   : > { %16893 = vst [vmem:[#allocation56_spill] sm:$0xff] %v8427_v51  ;;  %16895 = vst [vmem:[#allocation58_spill] sm:$0xff] %v8434_v4  ;;  %v8444_v31 = vpop.f32.mrb[27].mxu1  ;;  %v8448_v37 = vmul.f32 %v7982_v43, %v8427_v51  ;;  %v3310_v22 = vadd.f32 %v3278_v49, %v3211_v9  ;;  %v8454_v8 = vmul.f32 %v8043_v14, %v8427_v51  ;;  %v8474_v51 = vmax.f32 %v1133_v29, 0.0 }
 0x12f   : > { %16894 = vst [vmem:[#allocation57_spill] sm:$0xff] %v8430_v2  ;;  %16896 = vst [vmem:[#allocation59_spill] sm:$0xff] %v8442_v40  ;;  %v3346_v4 = vmul.f32 %v7998_v50, %v8430_v2  ;;  %v3444_v40 = vadd.f32 %v3412_v45, %v8265_v60  ;;  %v8466_v49 = vmul.f32 %v8031_v6, %v8376_v42 }
 0x130   : > { %16897 = vst [vmem:[#allocation60_spill] sm:$0xff] %v8444_v31  ;;  %16898 = vst [vmem:[#allocation61_spill] sm:$0xff] %v8448_v37  ;;  %v3548_v31 = vmul.f32 %v8046_v15, %v8430_v2  ;;  %v8470_v9 = vmul.f32 %v8034_v7, %v8376_v42  ;;  %v1125_v37 = vadd.f32 %v8008_v53, %v8179_v0 }
 0x131   : > { %16899 = vst [vmem:[#allocation62_spill] sm:$0xff] %v8454_v8  ;;  %16900 = vst [vmem:[#allocation63_spill] sm:$0xff] %v8466_v49  ;;  %v3378_v12 = vadd.f32 %v3346_v4, %v3310_v22  ;;  %v8472_v8 = vmax.f32 %v1122_v21, 0.0  ;;  %v3512_v60 = vadd.f32 %v3480_v58, %v3444_v40  ;;  %v3774_v45 = vadd.f32 %v8092_v1, %v8171_v11  ;;  %v8498_v11 = vpop.f32.mrb[28].mxu1 }
 0x132   : > { %16901 = vst [vmem:[#allocation64_spill] sm:$0xff] %v8470_v9  ;;  %16902 = vst [vmem:[#allocation65_spill] sm:$0xff] %v8474_v51  ;;  %v3813_v2 = vadd.f32 %v8459_v25, %v8191_v13  ;;  %v16903_v49 = vrot.slane %v8215_v63, 1  ;;  %v3284_v58 = vmul.f32 %v7991_v46, %v8474_v51  ;;  %v8518_v40 = vmul.f32 %v8031_v6, %v8474_v51 }
 0x133   : > { %v8490_v29 = vadd.f32 %v3414_v28, %v3378_v12  ;;  %v3010_v4 = vrot.slane %v8472_v8, 7  ;;  %v8496_v1 = vmul.f32 %v7991_v46, %v8472_v8  ;;  %16905 = vst [vmem:[#allocation66_spill] sm:$0xff] %v8498_v11  ;;  %v8500_v13 = vadd.f32 %v3548_v31, %v3512_v60 }
 0x134   : > { %v8488_v21 = vsel %vm1505_vm5, %v16904_v38, %v16903_v49  ;;  %v8504_v61 = vmul.f32 %v8031_v6, %v8472_v8  ;;  %v8508_v63 = vmul.f32 %v8034_v7, %v8472_v8  ;;  %v3027_v12 = vrot.slane %v8474_v51, 7  ;;  %v8511_v38 = vpop.f32.mrb[29].mxu1  ;;  %16909 = vst [vmem:[#allocation70_spill] sm:$0xff] %v8518_v40 }
 0x135   : > { %16908 = vst [vmem:[#allocation69_spill] sm:$0xff] %v8511_v38  ;;  %v8522_v31 = vmul.f32 %v8034_v7, %v8474_v51  ;;  %v8524_v22 = vpop.f32.mrb[30].mxu1  ;;  %v8532_v0 = vmax.f32 %v1125_v37, 0.0  ;;  %v3812_v28 = vadd.f32 %v8459_v25, %v3774_v45  ;;  %v16915_v9 = vrot.slane %v8376_v42, 1 }
 0x136   : > { %16906 = vst [vmem:[#allocation67_spill] sm:$0xff] %v8504_v61  ;;  %16907 = vst [vmem:[#allocation68_spill] sm:$0xff] %v8508_v63  ;;  %v8528_v49 = vsel %vm1304_vm4, %v3011_v10, %v3027_v12  ;;  %v3059_v60 = vsel %vm1304_vm4, %v3027_v12, %v3011_v10  ;;  %v8535_v38 = vpop.f32.mrb[31].mxu1 }
 0x137   : > { %16910 = vst [vmem:[#allocation71_spill] sm:$0xff] %v8522_v31  ;;  %16911 = vst [vmem:[#allocation72_spill] sm:$0xff] %v8524_v22  ;;  %v8538_v11 = vmul.f32 %v7976_v41, %v3059_v60  ;;  %v16916_v22 = vrot.slane %v8474_v51, 1  ;;  %v3217_v31 = vmul.f32 %v7982_v43, %v8528_v49  ;;  %v3418_v10 = vmul.f32 %v8043_v14, %v8528_v49 }
 0x138   : > { %16912 = vst [vmem:[#allocation73_spill] sm:$0xff] %v8528_v49  ;;  %16913 = vst [vmem:[#allocation74_spill] sm:$0xff] %v8535_v38  ;;  %v3026_v45 = vrot.slane %v8532_v0, 7  ;;  %v3282_v60 = vmul.f32 %v7991_v46, %v8532_v0  ;;  %v3844_v51 = vmax.f32 %v3812_v28, 0.0 }
 0x139   : > { %16914 = vst [vmem:[#allocation75_spill] sm:$0xff] %v8538_v11  ;;  %v3155_v40 = vsel %vm1505_vm5, %v16916_v22, %v16915_v9  ;;  %v8559_v38 = vmul.f32 %v7982_v43, %v8538_v11  ;;  %v3316_v9 = vadd.f32 %v3284_v58, %v3217_v31  ;;  %v8563_v22 = vmul.f32 %v8043_v14, %v8538_v11 }
 0x13a   : > { %v8551_v37 = vmul.f32 %v7993_v47, %v3155_v40  ;;  %v3484_v40 = vmul.f32 %v8031_v6, %v8532_v0  ;;  %v8571_v12 = vsel %vm1304_vm4, %v3010_v4, %v3026_v45  ;;  %v3058_v61 = vsel %vm1304_vm4, %v3026_v45, %v3010_v4 }
 0x13b   : > { %16918 = vst [vmem:[#allocation77_spill] sm:$0xff] %v8559_v38  ;;  %16919 = vst [vmem:[#allocation78_spill] sm:$0xff] %v8563_v22  ;;  %v16921_v38 = vrot.slane %v8472_v8, 1  ;;  %v16922_v58 = vrot.slane %v8532_v0, 1  ;;  %v8582_v22 = vmul.f32 %v7976_v41, %v3058_v61  ;;  %v3416_v42 = vmul.f32 %v8043_v14, %v8571_v12 }
 0x13c   : > { %16917 = vst [vmem:[#allocation76_spill] sm:$0xff] %v8551_v37  ;;  %v3352_v49 = vmul.f32 %v7998_v50, %v8551_v37  ;;  %16920 = vst [vmem:[#allocation79_spill] sm:$0xff] %v8571_v12  ;;  %v3215_v37 = vmul.f32 %v7982_v43, %v8571_v12  ;;  %v8595_v45 = vmul.f32 %v8034_v7, %v8532_v0 }
 0x13d   : > { %v3154_v31 = vsel %vm1505_vm5, %v16922_v58, %v16921_v38  ;;  %v3845_v38 = vmax.f32 %v3813_v2, 0.0  ;;  %v8599_v61 = vmul.f32 %v7982_v43, %v8582_v22  ;;  %v8605_v63 = vmul.f32 %v8043_v14, %v8582_v22 }
 0x13e   : > { %v8585_v11 = vmul.f32 %v7993_v47, %v3154_v31  ;;  %v8591_v4 = vadd.f32 %v3352_v49, %v3316_v9  ;;  %16923 = vst [vmem:[#allocation80_spill] sm:$0xff] %v8595_v45  ;;  %v3314_v58 = vadd.f32 %v3282_v60, %v3215_v37  ;;  %v7470_v49 = vld [vmem:[%s16385_s9] ss:$8 sps:$4 sm:$0xff]   ;;  %v3448_v9 = vadd.f32 %v3416_v42, %v8424_v26  ;;  %v7475_v37 = vld [vmem:[%s16385_s9 + $0x14] ss:$8 sps:$4 sm:$0xff]  }
 0x13f   : > { %16924 = vst [vmem:[#allocation81_spill] sm:$0xff] %v8605_v63  ;;  %v3940_v28 = vpack.c.bf16 %v3845_v38, %v3844_v51  ;;  %v3305_v60 = vadd.f32 %v8177_v17, %v8287_v35  ;;  %v3341_v63 = vmul.f32 %v7998_v50, %v8488_v21  ;;  %v3505_v12 = vadd.f32 %v8053_v20, %v8134_v23 }
 0x140   : > { %v3350_v31 = vmul.f32 %v7998_v50, %v8585_v11  ;;  %v3552_v2 = vmul.f32 %v8046_v15, %v8585_v11  ;;  %v3541_v26 = vmul.f32 %v8046_v15, %v8079_v56  ;;  %v3516_v42 = vadd.f32 %v3484_v40, %v3448_v9  ;;  %v7473_v56 = vld [vmem:[%s16385_s9 + $0x10] ss:$8 sps:$4 sm:$0xff]  }
 0x141   : > { %7192 = vmatmul.mubr.msk.bf16.vlgmr.msra.gmra.mrb[32].mxu1 %vm3992_vm6, %v3940_v28  ;;  %v3542_v51 = vmul.f32 %v8046_v15, %v8085_v62  ;;  %v8629_v38 = vmul.f32 %v8046_v15, %v8488_v21  ;;  %v3609_v17 = vmul.f32 %v8050_v19, %v8268_v59  ;;  %v16925_v20 = vmov 0  }
 0x142   : > { %v3382_v45 = vadd.f32 %v3350_v31, %v3314_v58  ;;  %4395 = vmatpush1.bf16.msra.mxu1 %v7470_v49  ;;  %4083 = vmatprep.mubr.bf16.mxu1 %v16925_v20  ;;  %v8639_v23 = vadd.f32 %v3341_v63, %v3305_v60  ;;  %v3573_v40 = vadd.f32 %v3541_v26, %v3505_v12  ;;  %v8657_v49 = vpop.f32.mrb[0].mxu0  ;;  %v16928_v28 = vrot.slane %v8138_v5, 1 }
 0x143   : > { %v8641_v62 = vadd.f32 %v3552_v2, %v3516_v42  ;;  %4396 = vmatprep.subr.bf16.mxu1 %v7475_v37  ;;  %v3574_v58 = vadd.f32 %v3542_v51, %v8142_v27  ;;  %v3610_v59 = vmul.f32 %v8050_v19, %v8249_v44  ;;  %v3745_v63 = vmul.f32 %v8067_v34, %v8271_v18  ;;  %v7481_v51 = vld [vmem:[%s16385_s9 + $0x34] ss:$8 sps:$4 sm:$0xff]  }
 0x144   : > { %v8633_v35 = vadd.f32 %v3418_v10, %v3382_v45  ;;  %v3744_v10 = vmul.f32 %v8067_v34, %v8488_v21  ;;  %v7478_v45 = vld [vmem:[%s16385_s9 + $0x24] ss:$8 sps:$4 sm:$0xff]   ;;  %v3641_v31 = vadd.f32 %v3609_v17, %v3573_v40  ;;  %v1146_v12 = vadd.f32 %v8233_v48, %v8008_v53  ;;  %16926 = vst [vmem:[#allocation82_spill] sm:$0xff] %v8657_v49  ;;  %v8671_v48 = vpop.f32.mrb[1].mxu0 }
 0x145   : > { %v1138_v27 = vadd.f32 %v8008_v53, %v8245_v16  ;;  %v3642_v44 = vadd.f32 %v3610_v59, %v3574_v58  ;;  %v1149_v21 = vadd.f32 %v8263_v39, %v8008_v53  ;;  %v1141_v9 = vadd.f32 %v8008_v53, %v8275_v52  ;;  %16929 = vst [vmem:[#allocation83_spill] sm:$0xff] %v8671_v48  ;;  %v7476_v39 = vld [vmem:[%s16385_s9 + $0x20] ss:$8 sps:$4 sm:$0xff]  }
 0x146   : > { %v16927_v2 = vrot.slane %v8146_v3, 1  ;;  %v3708_v16 = vadd.f32 %v8187_v30, %v3641_v31  ;;  %4397 = vmatpush1.bf16.msra.mxu1 %v7473_v56  ;;  %v8674_v37 = vmax.f32 %v1146_v12, 0.0  ;;  %v8683_v5 = vadd.f32 %v8157_v32, %v8237_v24  ;;  %v8685_v3 = vpop.f32.mrb[2].mxu0  ;;  %v7479_v12 = vld [vmem:[%s16385_s9 + $0x30] ss:$8 sps:$4 sm:$0xff]  }
 0x147   : > { %v8676_v60 = vmax.f32 %v1138_v27, 0.0  ;;  %16931 = vst [vmem:[#allocation85_spill] sm:$0xff] %v8685_v3  ;;  %v3709_v52 = vadd.f32 %v8261_v54, %v3642_v44  ;;  %v8688_v26 = vmax.f32 %v1149_v21, 0.0  ;;  %v8690_v30 = vmax.f32 %v1141_v9, 0.0  ;;  %4398 = vmatprep.subr.bf16.mxu1 %v7478_v45 }
 0x148   : > { %v8669_v18 = vsel %vm1505_vm5, %v16928_v28, %v16927_v2  ;;  %16930 = vst [vmem:[#allocation84_spill] sm:$0xff] %v8674_v37  ;;  %v3776_v17 = vadd.f32 %v3744_v10, %v3708_v16  ;;  %v3013_v32 = vrot.slane %v8674_v37, 7  ;;  %v16442_v24 = vrot.slane %v8674_v37, 1  ;;  %v7484_v2 = vld [vmem:[%s16385_s9 + $0x44] ss:$8 sps:$4 sm:$0xff]  }
 0x149   : > { %v3343_v42 = vmul.f32 %v7998_v50, %v8669_v18  ;;  %v8701_v54 = vmul.f32 %v7991_v46, %v8674_v37  ;;  %v3777_v56 = vadd.f32 %v3745_v63, %v3709_v52  ;;  %v8705_v40 = vmul.f32 %v8031_v6, %v8674_v37 }
 0x14a   : > { %v8709_v58 = vmul.f32 %v8034_v7, %v8674_v37  ;;  %v3012_v59 = vrot.slane %v8676_v60, 7  ;;  %v3814_v10 = vadd.f32 %v8459_v25, %v3776_v17  ;;  %v8716_v31 = vmul.f32 %v7991_v46, %v8676_v60  ;;  %4399 = vmatpush1.bf16.msra.mxu1 %v7476_v39 }
 0x14b   : > { %16932 = vst [vmem:[#allocation86_spill] sm:$0xff] %v8701_v54  ;;  %16933 = vst [vmem:[#allocation87_spill] sm:$0xff] %v8705_v40  ;;  %v8720_v63 = vmul.f32 %v8031_v6, %v8676_v60  ;;  %v3815_v27 = vadd.f32 %v8459_v25, %v3777_v56  ;;  %v8728_v44 = vmul.f32 %v8034_v7, %v8676_v60  ;;  %v3029_v21 = vrot.slane %v8688_v26, 7 }
 0x14c   : > { %16934 = vst [vmem:[#allocation88_spill] sm:$0xff] %v8709_v58  ;;  %v16443_v9 = vrot.slane %v8688_v26, 1  ;;  %4400 = vmatprep.subr.bf16.mxu1 %v7481_v51  ;;  %v3846_v28 = vmax.f32 %v3814_v10, 0.0  ;;  %v3288_v16 = vmul.f32 %v7991_v46, %v8688_v26  ;;  %v8739_v39 = vmul.f32 %v8031_v6, %v8688_v26 }
 0x14d   : > { %16935 = vst [vmem:[#allocation89_spill] sm:$0xff] %v8720_v63  ;;  %16936 = vst [vmem:[#allocation90_spill] sm:$0xff] %v8728_v44  ;;  %v8743_v52 = vmul.f32 %v8034_v7, %v8688_v26  ;;  %v3847_v17 = vmax.f32 %v3815_v27, 0.0  ;;  %v8747_v51 = vsel %vm1304_vm4, %v3013_v32, %v3029_v21  ;;  %v3061_v56 = vsel %vm1304_vm4, %v3029_v21, %v3013_v32  ;;  %v16949_v63 = vld [vmem:[#allocation25_spill] sm:$0xff] }
 0x14e   : > { %16937 = vst [vmem:[#allocation91_spill] sm:$0xff] %v8739_v39  ;;  %16939 = vst [vmem:[#allocation93_spill] sm:$0xff] %v8747_v51  ;;  %v3157_v10 = vsel %vm1505_vm5, %v16443_v9, %v16442_v24  ;;  %v8758_v45 = vmul.f32 %v7976_v41, %v3061_v56  ;;  %v3221_v27 = vmul.f32 %v7982_v43, %v8747_v51  ;;  %4401 = vmatpush1.bf16.msra.mxu1 %v7479_v12  ;;  %v7482_v56 = vld [vmem:[%s16385_s9 + $0x40] ss:$8 sps:$4 sm:$0xff]  }
 0x14f   : > { %16938 = vst [vmem:[#allocation92_spill] sm:$0xff] %v8743_v52  ;;  %v8761_v3 = vmul.f32 %v7993_v47, %v3157_v10  ;;  %v3422_v48 = vmul.f32 %v8043_v14, %v8747_v51  ;;  %v3941_v32 = vpack.c.bf16 %v3847_v17, %v3846_v28  ;;  %v3028_v21 = vrot.slane %v8690_v30, 7  ;;  %4402 = vmatprep.subr.bf16.mxu1 %v7484_v2  ;;  %v7487_v17 = vld [vmem:[%s16385_s9 + $0x54] ss:$8 sps:$4 sm:$0xff]  }
 0x150   : > { %16940 = vst [vmem:[#allocation94_spill] sm:$0xff] %v8758_v45  ;;  %v16444_v49 = vrot.slane %v8690_v30, 1  ;;  %v3286_v24 = vmul.f32 %v7991_v46, %v8690_v30  ;;  %v8776_v10 = vmul.f32 %v7982_v43, %v8758_v45  ;;  %v3320_v9 = vadd.f32 %v3288_v16, %v3221_v27 }
 0x151   : > { %16941 = vst [vmem:[#allocation95_spill] sm:$0xff] %v8761_v3  ;;  %v3356_v12 = vmul.f32 %v7998_v50, %v8761_v3  ;;  %v8782_v28 = vmul.f32 %v8043_v14, %v8758_v45  ;;  %7193 = vmatmul.mubr.msk.bf16.gmra.mrb[36].mxu1 %vm3992_vm6, %v3941_v32  ;;  %v8790_v2 = vsel %vm1304_vm4, %v3012_v59, %v3028_v21  ;;  %v16944_v27 = vrot.slane %v8676_v60, 1  ;;  %v16948_v45 = vld [vmem:[#allocation26_spill] sm:$0xff] }
 0x152   : > { %16942 = vst [vmem:[#allocation96_spill] sm:$0xff] %v8776_v10  ;;  %v3060_v16 = vsel %vm1304_vm4, %v3028_v21, %v3012_v59  ;;  %v3488_v58 = vmul.f32 %v8031_v6, %v8690_v30  ;;  %v3219_v59 = vmul.f32 %v7982_v43, %v8790_v2  ;;  %4093 = vmatprep.mubr.bf16.mxu1 %v16925_v20 }
 0x153   : > { %16943 = vst [vmem:[#allocation97_spill] sm:$0xff] %v8782_v28  ;;  %v3156_v40 = vsel %vm1505_vm5, %v16444_v49, %v16944_v27  ;;  %v8802_v52 = vadd.f32 %v3356_v12, %v3320_v9  ;;  %v8805_v32 = vmul.f32 %v7976_v41, %v3060_v16  ;;  %v3420_v21 = vmul.f32 %v8043_v14, %v8790_v2 }
 0x154   : > { %v8808_v39 = vmul.f32 %v7993_v47, %v3156_v40  ;;  %v8817_v27 = vmul.f32 %v8034_v7, %v8690_v30  ;;  %v8820_v9 = vadd.f32 %v3343_v42, %v8683_v5  ;;  %v3439_v12 = vadd.f32 %v8293_v57, %v8118_v55  ;;  %4403 = vmatpush1.bf16.msra.mxu1 %v7482_v56  ;;  %v7485_v40 = vld [vmem:[%s16385_s9 + $0x50] ss:$8 sps:$4 sm:$0xff]   ;;  %v7490_v55 = vld [vmem:[%s16385_s9 + $0x64] ss:$8 sps:$4 sm:$0xff]   ;;  %v8840_v57 = vpop.f32.mrb[3].mxu0 }
 0x155   : > { %v8829_v16 = vmul.f32 %v7982_v43, %v8805_v32  ;;  %v3318_v49 = vadd.f32 %v3286_v24, %v3219_v59  ;;  %v8835_v5 = vmul.f32 %v8043_v14, %v8805_v32  ;;  %4404 = vmatprep.subr.bf16.mxu1 %v7487_v17  ;;  %16946 = vst [vmem:[#allocation99_spill] sm:$0xff] %v8840_v57  ;;  %v16947_v24 = vld [vmem:[#allocation22_spill] sm:$0xff] }
 0x156   : > { %v3354_v28 = vmul.f32 %v7998_v50, %v8808_v39  ;;  %v3452_v42 = vadd.f32 %v3420_v21, %v8591_v4  ;;  %v3556_v56 = vmul.f32 %v8046_v15, %v8808_v39  ;;  %v3507_v59 = vadd.f32 %v16947_v24, %v3439_v12  ;;  %v16950_v21 = vld [vmem:[#allocation27_spill] sm:$0xff]  ;;  %v16952_v24 = vld [vmem:[#allocation33_spill] sm:$0xff] }
 0x157   : > { %16945 = vst [vmem:[#allocation98_spill] sm:$0xff] %v8835_v5  ;;  %v3545_v3 = vmul.f32 %v8046_v15, %v8669_v18  ;;  %v3611_v17 = vmul.f32 %v8050_v19, %v16948_v45  ;;  %v3612_v5 = vmul.f32 %v8050_v19, %v16949_v63  ;;  %v3746_v57 = vmul.f32 %v8067_v34, %v8669_v18  ;;  %v7488_v45 = vld [vmem:[%s16385_s9 + $0x60] ss:$8 sps:$4 sm:$0xff]   ;;  %v8866_v63 = vpop.f32.mrb[4].mxu0 }
 0x158   : > { %v3386_v51 = vadd.f32 %v3354_v28, %v3318_v49  ;;  %v3520_v54 = vadd.f32 %v3488_v58, %v3452_v42  ;;  %v3575_v4 = vadd.f32 %v8629_v38, %v3507_v59  ;;  %v3747_v10 = vmul.f32 %v8067_v34, %v16950_v21  ;;  %4405 = vmatpush1.bf16.msra.mxu1 %v7485_v40  ;;  %v16956_v38 = vld [vmem:[#allocation38_spill] sm:$0xff]  ;;  %v16957_v28 = vld [vmem:[#allocation61_spill] sm:$0xff]  ;;  %v16958_v42 = vld [vmem:[#allocation39_spill] sm:$0xff]  ;;  %v8877_v40 = vpop.f32.mrb[5].mxu0 }
 0x159   : > { %v16951_v12 = vrot.slane %v8362_v33, 1  ;;  %v16953_v44 = vrot.slane %v16952_v24, 1  ;;  %16954 = vst [vmem:[#allocation22_spill] sm:$0xff] %v8866_v63  ;;  %v3644_v58 = vadd.f32 %v3612_v5, %v16956_v38  ;;  %v3309_v59 = vadd.f32 %v16958_v42, %v16957_v28  ;;  %4406 = vmatprep.subr.bf16.mxu1 %v7490_v55  ;;  %16959 = vst [vmem:[#allocation25_spill] sm:$0xff] %v8877_v40  ;;  %v16961_v63 = vld [vmem:[#allocation36_spill] sm:$0xff]  ;;  %v16962_v5 = vld [vmem:[#allocation23_spill] sm:$0xff] }
 0x15a   : > { %v8868_v18 = vadd.f32 %v3422_v48, %v3386_v51  ;;  %v3643_v24 = vadd.f32 %v3611_v17, %v3575_v4  ;;  %v16960_v48 = vld [vmem:[#allocation28_spill] sm:$0xff]  ;;  %v3510_v38 = vadd.f32 %v16962_v5, %v16961_v63  ;;  %v3546_v37 = vmul.f32 %v8046_v15, %v16950_v21  ;;  %v16968_v63 = vld [vmem:[#allocation53_spill] sm:$0xff] }
 0x15b   : > { %v3136_v49 = vsel %vm1505_vm5, %v16953_v44, %v16951_v12  ;;  %v7493_v44 = vld [vmem:[%s16385_s9 + $0x74] ss:$8 sps:$4 sm:$0xff]   ;;  %v8879_v12 = vadd.f32 %v3556_v56, %v3520_v54  ;;  %v3441_v51 = vadd.f32 %v16960_v48, %v8639_v23  ;;  %v16964_v28 = vld [vmem:[#allocation24_spill] sm:$0xff]  ;;  %v3614_v5 = vmul.f32 %v8050_v19, %v16968_v63 }
 0x15c   : > { %16955 = vst [vmem:[#allocation26_spill] sm:$0xff] %v8868_v18  ;;  %v3345_v33 = vmul.f32 %v7998_v50, %v3136_v49  ;;  %v8885_v18 = vpop.f32.mrb[6].mxu0  ;;  %v3711_v42 = vadd.f32 %v16964_v28, %v3644_v58  ;;  %v8893_v40 = vmul.f32 %v8046_v15, %v3136_v49  ;;  %v16965_v54 = vld [vmem:[#allocation21_spill] sm:$0xff]  ;;  %v16966_v17 = vld [vmem:[#allocation20_spill] sm:$0xff]  ;;  %4407 = vmatpush1.bf16.msra.mxu1 %v7488_v45  ;;  %v16970_v45 = vld [vmem:[#allocation35_spill] sm:$0xff] }
 0x15d   : > { %16963 = vst [vmem:[#allocation27_spill] sm:$0xff] %v8885_v18  ;;  %v3710_v56 = vadd.f32 %v16965_v54, %v3643_v24  ;;  %v3509_v4 = vadd.f32 %v16966_v17, %v3441_v51  ;;  %v16967_v23 = vld [vmem:[#allocation56_spill] sm:$0xff]  ;;  %v7491_v58 = vld [vmem:[%s16385_s9 + $0x70] ss:$8 sps:$4 sm:$0xff]   ;;  %v3578_v21 = vadd.f32 %v3546_v37, %v3510_v38  ;;  %4408 = vmatprep.subr.bf16.mxu1 %v7493_v44 }
 0x15e   : > { %v8888_v55 = vadd.f32 %v3345_v33, %v3309_v59  ;;  %v3613_v48 = vmul.f32 %v8050_v19, %v16967_v23  ;;  %v3779_v59 = vadd.f32 %v3747_v10, %v3711_v42  ;;  %v3748_v33 = vmul.f32 %v8067_v34, %v3136_v49  ;;  %v16969_v28 = vld [vmem:[#allocation57_spill] sm:$0xff]  ;;  %v7496_v51 = vld [vmem:[%s16385_s9 + $0x84] ss:$8 sps:$4 sm:$0xff]  }
 0x15f   : > { %v3749_v24 = vmul.f32 %v8067_v34, %v16969_v28  ;;  %v3778_v54 = vadd.f32 %v3746_v57, %v3710_v56  ;;  %v3577_v17 = vadd.f32 %v3545_v3, %v3509_v4  ;;  %v1162_v23 = vadd.f32 %v16970_v45, %v8008_v53  ;;  %v16971_v63 = vld [vmem:[#allocation37_spill] sm:$0xff]  ;;  %v16972_v49 = vld [vmem:[#allocation40_spill] sm:$0xff]  ;;  %v16973_v34 = vld [vmem:[#allocation43_spill] sm:$0xff] }
 0x160   : > { %v1154_v18 = vadd.f32 %v8008_v53, %v16971_v63  ;;  %v3817_v37 = vadd.f32 %v8459_v25, %v3779_v59  ;;  %v3646_v10 = vadd.f32 %v3614_v5, %v3578_v21  ;;  %v1165_v38 = vadd.f32 %v16972_v49, %v8008_v53  ;;  %4409 = vmatpush1.bf16.msra.mxu1 %v7491_v58  ;;  %v7494_v56 = vld [vmem:[%s16385_s9 + $0x80] ss:$8 sps:$4 sm:$0xff]   ;;  %v16975_v5 = vld [vmem:[#allocation54_spill] sm:$0xff] }
 0x161   : > { %v1157_v44 = vadd.f32 %v8008_v53, %v16973_v34  ;;  %v3816_v42 = vadd.f32 %v8459_v25, %v3778_v54  ;;  %v3645_v28 = vadd.f32 %v3613_v48, %v3577_v17  ;;  %v8920_v57 = vmax.f32 %v1162_v23, 0.0  ;;  %4410 = vmatprep.subr.bf16.mxu1 %v7496_v51  ;;  %v7499_v53 = vld [vmem:[%s16385_s9 + $0x94] ss:$8 sps:$4 sm:$0xff]   ;;  %v8938_v23 = vpop.f32.mrb[7].mxu0 }
 0x162   : > { %v8922_v3 = vmax.f32 %v1154_v18, 0.0  ;;  %v3849_v4 = vmax.f32 %v3817_v37, 0.0  ;;  %v3713_v59 = vadd.f32 %v16975_v5, %v3646_v10  ;;  %v8928_v21 = vmax.f32 %v1165_v38, 0.0  ;;  %v16977_v18 = vld [vmem:[#allocation42_spill] sm:$0xff]  ;;  %16978 = vst [vmem:[#allocation61_spill] sm:$0xff] %v8938_v23 }
 0x163   : > { %16974 = vst [vmem:[#allocation33_spill] sm:$0xff] %v8920_v57  ;;  %v8930_v45 = vmax.f32 %v1157_v44, 0.0  ;;  %v3848_v48 = vmax.f32 %v3816_v42, 0.0  ;;  %v3712_v54 = vadd.f32 %v16977_v18, %v3645_v28  ;;  %v3015_v58 = vrot.slane %v8920_v57, 7 }
 0x164   : > { %16976 = vst [vmem:[#allocation38_spill] sm:$0xff] %v8928_v21  ;;  %v16455_v17 = vrot.slane %v8920_v57, 1  ;;  %v3781_v63 = vadd.f32 %v3749_v24, %v3713_v59  ;;  %v8942_v37 = vmul.f32 %v7991_v46, %v8920_v57  ;;  %v8946_v51 = vmul.f32 %v8031_v6, %v8920_v57  ;;  %4411 = vmatpush1.bf16.msra.mxu1 %v7494_v56  ;;  %v7497_v24 = vld [vmem:[%s16385_s9 + $0x90] ss:$8 sps:$4 sm:$0xff]   ;;  %v7502_v56 = vld [vmem:[%s16385_s9 + $0xa4] ss:$8 sps:$4 sm:$0xff]  }
 0x165   : > { %v8950_v10 = vmul.f32 %v8034_v7, %v8920_v57  ;;  %v3942_v49 = vpack.c.bf16 %v3849_v4, %v3848_v48  ;;  %v3780_v38 = vadd.f32 %v3748_v33, %v3712_v54  ;;  %v3014_v34 = vrot.slane %v8922_v3, 7  ;;  %4412 = vmatprep.subr.bf16.mxu1 %v7499_v53 }
 0x166   : > { %16979 = vst [vmem:[#allocation39_spill] sm:$0xff] %v8942_v37  ;;  %16980 = vst [vmem:[#allocation28_spill] sm:$0xff] %v8946_v51  ;;  %v3819_v42 = vadd.f32 %v8459_v25, %v3781_v63  ;;  %v8960_v28 = vmul.f32 %v7991_v46, %v8922_v3  ;;  %v8964_v5 = vmul.f32 %v8031_v6, %v8922_v3  ;;  %v3031_v59 = vrot.slane %v8928_v21, 7  ;;  %v7500_v51 = vld [vmem:[%s16385_s9 + $0xa0] ss:$8 sps:$4 sm:$0xff]   ;;  %v17002_v37 = vld [vmem:[#allocation50_spill] sm:$0xff] }
 0x167   : > { %16981 = vst [vmem:[#allocation36_spill] sm:$0xff] %v8950_v10  ;;  %v8968_v33 = vmul.f32 %v8034_v7, %v8922_v3  ;;  %7194 = vmatmul.mubr.msk.bf16.gmra.mrb[40].mxu1 %vm3992_vm6, %v3942_v49  ;;  %v3818_v4 = vadd.f32 %v8459_v25, %v3780_v38  ;;  %v3292_v18 = vmul.f32 %v7991_v46, %v8928_v21  ;;  %v3030_v49 = vrot.slane %v8930_v45, 7 }
 0x168   : > { %16982 = vst [vmem:[#allocation23_spill] sm:$0xff] %v8964_v5  ;;  %4103 = vmatprep.mubr.bf16.mxu1 %v16925_v20  ;;  %v3851_v54 = vmax.f32 %v3819_v42, 0.0  ;;  %v8982_v53 = vmul.f32 %v8031_v6, %v8928_v21  ;;  %v8986_v63 = vmul.f32 %v8034_v7, %v8928_v21  ;;  %v8991_v44 = vsel %vm1304_vm4, %v3015_v58, %v3031_v59  ;;  %v16998_v5 = vld [vmem:[#allocation34_spill] sm:$0xff] }
 0x169   : > { %16983 = vst [vmem:[#allocation24_spill] sm:$0xff] %v8968_v33  ;;  %v3850_v38 = vmax.f32 %v3818_v4, 0.0  ;;  %16986 = vst [vmem:[#allocation56_spill] sm:$0xff] %v8991_v44  ;;  %v3063_v48 = vsel %vm1304_vm4, %v3031_v59, %v3015_v58  ;;  %v16987_v42 = vrot.slane %v8928_v21, 1  ;;  %4413 = vmatpush1.bf16.msra.mxu1 %v7497_v24  ;;  %v3225_v58 = vmul.f32 %v7982_v43, %v8991_v44  ;;  %v7505_v24 = vld [vmem:[%s16385_s9 + $0xb4] ss:$8 sps:$4 sm:$0xff]  }
 0x16a   : > { %16984 = vst [vmem:[#allocation21_spill] sm:$0xff] %v8982_v53  ;;  %16985 = vst [vmem:[#allocation20_spill] sm:$0xff] %v8986_v63  ;;  %v9005_v4 = vmul.f32 %v7976_v41, %v3063_v48  ;;  %v3426_v59 = vmul.f32 %v8043_v14, %v8991_v44  ;;  %4414 = vmatprep.subr.bf16.mxu1 %v7502_v56  ;;  %v16459_v48 = vrot.slane %v8930_v45, 1  ;;  %v16994_v44 = vrot.slane %v8922_v3, 1  ;;  %v17004_v21 = vld [vmem:[#allocation62_spill] sm:$0xff] }
 0x16b   : > { %v3159_v23 = vsel %vm1505_vm5, %v16987_v42, %v16455_v17  ;;  %v3943_v42 = vpack.c.bf16 %v3851_v54, %v3850_v38  ;;  %v9019_v17 = vsel %vm1304_vm4, %v3014_v34, %v3030_v49  ;;  %v3324_v63 = vadd.f32 %v3292_v18, %v3225_v58  ;;  %v7503_v58 = vld [vmem:[%s16385_s9 + $0xb0] ss:$8 sps:$4 sm:$0xff]  }
 0x16c   : > { %16988 = vst [vmem:[#allocation53_spill] sm:$0xff] %v9005_v4  ;;  %v9008_v53 = vmul.f32 %v7993_v47, %v3159_v23  ;;  %16990 = vst [vmem:[#allocation35_spill] sm:$0xff] %v9019_v17  ;;  %v3062_v23 = vsel %vm1304_vm4, %v3030_v49, %v3014_v34  ;;  %v9026_v10 = vmul.f32 %v7982_v43, %v9005_v4 }
 0x16d   : > { %v9032_v54 = vmul.f32 %v8043_v14, %v9005_v4  ;;  %v9035_v38 = vmul.f32 %v7976_v41, %v3062_v23  ;;  %v3158_v34 = vsel %vm1505_vm5, %v16459_v48, %v16994_v44  ;;  %v3223_v18 = vmul.f32 %v7982_v43, %v9019_v17  ;;  %4415 = vmatpush1.bf16.msra.mxu1 %v7500_v51  ;;  %v7508_v51 = vld [vmem:[%s16385_s9 + $0xc4] ss:$8 sps:$4 sm:$0xff]  }
 0x16e   : > { %16989 = vst [vmem:[#allocation57_spill] sm:$0xff] %v9008_v53  ;;  %16991 = vst [vmem:[#allocation37_spill] sm:$0xff] %v9026_v10  ;;  %v3360_v56 = vmul.f32 %v7998_v50, %v9008_v53  ;;  %v3290_v49 = vmul.f32 %v7991_v46, %v8930_v45  ;;  %v3424_v53 = vmul.f32 %v8043_v14, %v9019_v17  ;;  %4416 = vmatprep.subr.bf16.mxu1 %v7505_v24  ;;  %v17003_v10 = vld [vmem:[#allocation30_spill] sm:$0xff]  ;;  %v17005_v17 = vld [vmem:[#allocation48_spill] sm:$0xff] }
 0x16f   : > { %16992 = vst [vmem:[#allocation40_spill] sm:$0xff] %v9032_v54  ;;  %16993 = vst [vmem:[#allocation43_spill] sm:$0xff] %v9035_v38  ;;  %v9053_v54 = vmul.f32 %v7993_v47, %v3158_v34  ;;  %v3492_v44 = vmul.f32 %v8031_v6, %v8930_v45  ;;  %7195 = vmatmul.mubr.msk.bf16.gmra.mrb[44].mxu1 %vm3992_vm6, %v3943_v42  ;;  %v9069_v34 = vmul.f32 %v8043_v14, %v9035_v38 }
 0x170   : > { %v9050_v23 = vadd.f32 %v3360_v56, %v3324_v63  ;;  %v9065_v63 = vmul.f32 %v7982_v43, %v9035_v38  ;;  %v3322_v56 = vadd.f32 %v3290_v49, %v3223_v18  ;;  %v9073_v48 = vmul.f32 %v8034_v7, %v8930_v45  ;;  %4113 = vmatprep.mubr.bf16.mxu1 %v16925_v20  ;;  %v17000_v49 = vld [vmem:[#allocation29_spill] sm:$0xff] }
 0x171   : > { %16995 = vst [vmem:[#allocation54_spill] sm:$0xff] %v9053_v54  ;;  %16996 = vst [vmem:[#allocation42_spill] sm:$0xff] %v9069_v34  ;;  %v3358_v24 = vmul.f32 %v7998_v50, %v9053_v54  ;;  %v3456_v33 = vadd.f32 %v3424_v53, %v8802_v52  ;;  %v3560_v42 = vmul.f32 %v8046_v15, %v9053_v54  ;;  %v16999_v18 = vrot.slane %v16998_v5, 1  ;;  %v7506_v5 = vld [vmem:[%s16385_s9 + $0xc0] ss:$8 sps:$4 sm:$0xff]   ;;  %v17007_v38 = vld [vmem:[#allocation41_spill] sm:$0xff] }
 0x172   : > { %16997 = vst [vmem:[#allocation100_spill] sm:$0xff] %v9073_v48  ;;  %v17001_v4 = vrot.slane %v17000_v49, 1  ;;  %v3311_v48 = vadd.f32 %v17003_v10, %v17002_v37  ;;  %v3443_v52 = vadd.f32 %v17004_v21, %v8820_v9  ;;  %4417 = vmatpush1.bf16.msra.mxu1 %v7503_v58  ;;  %v9106_v21 = vld [vmem:[%s16383_s7 + $0x8] ss:$0 sm:$0xff] }
 0x173   : > { %v3390_v54 = vadd.f32 %v3358_v24, %v3322_v56  ;;  %v3524_v49 = vadd.f32 %v3492_v44, %v3456_v33  ;;  %4418 = vmatprep.subr.bf16.mxu1 %v7508_v51  ;;  %v17008_v56 = vld [vmem:[#allocation49_spill] sm:$0xff] }
 0x174   : > { %v3137_v34 = vsel %vm1505_vm5, %v17001_v4, %v16999_v18  ;;  %v3615_v4 = vmul.f32 %v8050_v19, %v17005_v17  ;;  %v17006_v18 = vld [vmem:[#allocation46_spill] sm:$0xff]  ;;  %v3511_v9 = vadd.f32 %v17007_v38, %v3443_v52  ;;  %v3751_v33 = vmul.f32 %v9106_v21, %v17008_v56 }
 0x175   : > { %v3347_v57 = vmul.f32 %v7998_v50, %v3137_v34  ;;  %v3549_v53 = vmul.f32 %v8046_v15, %v3137_v34  ;;  %v3616_v37 = vmul.f32 %v8050_v19, %v17006_v18  ;;  %v3750_v58 = vmul.f32 %v9106_v21, %v3137_v34 }
 0x176   : > { %v9111_v44 = vadd.f32 %v3426_v59, %v3390_v54  ;;  %v9113_v17 = vadd.f32 %v3560_v42, %v3524_v49  ;;  %v3579_v24 = vadd.f32 %v8893_v40, %v3511_v9  ;;  %v3313_v34 = vadd.f32 %v8496_v1, %v8599_v61  ;;  %v17011_v59 = vld [vmem:[#allocation51_spill] sm:$0xff]  ;;  %4419 = vmatpush1.bf16.msra.mxu1 %v7506_v5  ;;  %v17012_v42 = vld [vmem:[#allocation45_spill] sm:$0xff] }
 0x177   : > { %v9100_v10 = vadd.f32 %v3347_v57, %v3311_v48  ;;  %v3648_v51 = vadd.f32 %v3616_v37, %v8500_v13  ;;  %v17009_v57 = vrot.slane %v8532_v0, 1  ;;  %v17010_v48 = vrot.slane %v8472_v8, 1  ;;  %v17013_v0 = vld [vmem:[#allocation44_spill] sm:$0xff]  ;;  %v17014_v1 = vld [vmem:[#allocation31_spill] sm:$0xff] }
 0x178   : > { %v3445_v54 = vadd.f32 %v17011_v59, %v8888_v55  ;;  %v3514_v49 = vadd.f32 %v17013_v0, %v8490_v29  ;;  %v3550_v8 = vmul.f32 %v8046_v15, %v17008_v56  ;;  %v3647_v40 = vadd.f32 %v3615_v4, %v3579_v24  ;;  %v9150_v24 = vld [vmem:[%s16380_s4] ss:$0 sm:$0xff] }
 0x179   : > { %v3138_v38 = vsel %vm1505_vm5, %v17010_v48, %v17009_v57  ;;  %v3715_v13 = vadd.f32 %v17012_v42, %v3648_v51  ;;  %v3617_v55 = vmul.f32 %v8050_v19, %v8582_v22  ;;  %v17015_v51 = vld [vmem:[#allocation79_spill] sm:$0xff]  ;;  %v17016_v48 = vld [vmem:[#allocation32_spill] sm:$0xff]  ;;  %v3753_v4 = vmul.f32 %v9106_v21, %v8585_v11 }
 0x17a   : > { %v3349_v52 = vmul.f32 %v7998_v50, %v3138_v38  ;;  %v9134_v18 = vmul.f32 %v8046_v15, %v3138_v38  ;;  %v3513_v61 = vadd.f32 %v17014_v1, %v3445_v54  ;;  %v3582_v9 = vadd.f32 %v3550_v8, %v3514_v49 }
 0x17b   : > { %v3783_v5 = vadd.f32 %v3751_v33, %v3715_v13  ;;  %v3618_v57 = vmul.f32 %v8050_v19, %v17015_v51  ;;  %v3752_v29 = vmul.f32 %v9106_v21, %v3138_v38  ;;  %v3714_v56 = vadd.f32 %v17016_v48, %v3647_v40  ;;  %v9154_v33 = vpop.f32.mrb[8].mxu0  ;;  %v17019_v38 = vld [vmem:[#allocation55_spill] sm:$0xff]  ;;  %v17023_v40 = vld [vmem:[#allocation60_spill] sm:$0xff] }
 0x17c   : > { %v9136_v37 = vadd.f32 %v3349_v52, %v3313_v34  ;;  %v3581_v59 = vadd.f32 %v3549_v53, %v3513_v61  ;;  %v17017_v34 = vld [vmem:[#allocation52_spill] sm:$0xff]  ;;  %17018 = vst [vmem:[#allocation34_spill] sm:$0xff] %v9154_v33  ;;  %v1170_v42 = vadd.f32 %v9150_v24, %v17019_v38  ;;  %v17020_v53 = vld [vmem:[#allocation58_spill] sm:$0xff]  ;;  %v9161_v11 = vpop.f32.mrb[9].mxu0  ;;  %v1173_v1 = vadd.f32 %v9150_v24, %v17023_v40  ;;  %v17045_v33 = vld [vmem:[#allocation59_spill] sm:$0xff] }
 0x17d   : > { %v1178_v22 = vadd.f32 %v9150_v24, %v17017_v34  ;;  %v3821_v52 = vadd.f32 %v8459_v25, %v3783_v5  ;;  %v3650_v54 = vadd.f32 %v3618_v57, %v3582_v9  ;;  %v1181_v13 = vadd.f32 %v9150_v24, %v17020_v53  ;;  %17021 = vst [vmem:[#allocation29_spill] sm:$0xff] %v9161_v11  ;;  %v9167_v61 = vpop.f32.mrb[10].mxu0  ;;  %v17025_v5 = vld [vmem:[#allocation80_spill] sm:$0xff]  ;;  %v17044_v11 = vld [vmem:[#allocation77_spill] sm:$0xff] }
 0x17e   : > { %v3782_v0 = vadd.f32 %v3750_v58, %v3714_v56  ;;  %v3649_v49 = vadd.f32 %v3617_v55, %v3581_v59  ;;  %17024 = vst [vmem:[#allocation30_spill] sm:$0xff] %v9167_v61  ;;  %v9170_v57 = vmax.f32 %v1170_v42, 0.0  ;;  %v9174_v34 = vpop.f32.mrb[11].mxu0  ;;  %v7509_v58 = vld [vmem:[%s16385_s9 + $0xd0] ss:$8 sps:$4 sm:$0xff]   ;;  %v17028_v56 = vld [vmem:[#allocation68_spill] sm:$0xff] }
 0x17f   : > { %v9163_v8 = vmax.f32 %v1178_v22, 0.0  ;;  %v3853_v51 = vmax.f32 %v3821_v52, 0.0  ;;  %v3717_v9 = vadd.f32 %v17025_v5, %v3650_v54  ;;  %v9172_v48 = vmax.f32 %v1181_v13, 0.0  ;;  %17027 = vst [vmem:[#allocation48_spill] sm:$0xff] %v9174_v34  ;;  %v7511_v54 = vld [vmem:[%s16385_s9 + $0xd4] ss:$8 sps:$4 sm:$0xff]  }
 0x180   : > { %v3820_v55 = vadd.f32 %v8459_v25, %v3782_v0  ;;  %v3716_v59 = vadd.f32 %v17028_v56, %v3649_v49  ;;  %v3016_v40 = vrot.slane %v9170_v57, 7  ;;  %4420 = vmatprep.subr.bf16.mxu1 %v7511_v54  ;;  %v9207_v56 = vmul.f32 %v8031_v6, %v9170_v57  ;;  %v17040_v61 = vld [vmem:[#allocation65_spill] sm:$0xff] }
 0x181   : > { %17022 = vst [vmem:[#allocation50_spill] sm:$0xff] %v9163_v8  ;;  %17026 = vst [vmem:[#allocation62_spill] sm:$0xff] %v9172_v48  ;;  %v3017_v22 = vrot.slane %v9163_v8, 7  ;;  %v3785_v38 = vadd.f32 %v3753_v4, %v3717_v9  ;;  %v9188_v42 = vmul.f32 %v7991_v46, %v9163_v8  ;;  %v9192_v53 = vmul.f32 %v8031_v6, %v9163_v8 }
 0x182   : > { %v9196_v13 = vmul.f32 %v8034_v7, %v9163_v8  ;;  %v3852_v0 = vmax.f32 %v3820_v55, 0.0  ;;  %v3784_v49 = vadd.f32 %v3752_v29, %v3716_v59  ;;  %v9203_v9 = vmul.f32 %v7991_v46, %v9170_v57  ;;  %17032 = vst [vmem:[#allocation51_spill] sm:$0xff] %v9207_v56  ;;  %4421 = vmatpush1.bf16.msra.mxu1 %v7509_v58 }
 0x183   : > { %17029 = vst [vmem:[#allocation46_spill] sm:$0xff] %v9188_v42  ;;  %17030 = vst [vmem:[#allocation41_spill] sm:$0xff] %v9192_v53  ;;  %v3823_v4 = vadd.f32 %v8459_v25, %v3785_v38  ;;  %v9211_v52 = vmul.f32 %v8034_v7, %v9170_v57  ;;  %v3033_v59 = vrot.slane %v9172_v48, 7  ;;  %v16468_v54 = vrot.slane %v9172_v48, 1 }
 0x184   : > { %17031 = vst [vmem:[#allocation49_spill] sm:$0xff] %v9196_v13  ;;  %v3944_v29 = vpack.c.bf16 %v3853_v51, %v3852_v0  ;;  %v3822_v55 = vadd.f32 %v8459_v25, %v3784_v49  ;;  %v3296_v5 = vmul.f32 %v7991_v46, %v9172_v48  ;;  %v9220_v53 = vmul.f32 %v8031_v6, %v9172_v48 }
 0x185   : > { %17033 = vst [vmem:[#allocation45_spill] sm:$0xff] %v9211_v52  ;;  %v3855_v38 = vmax.f32 %v3823_v4, 0.0  ;;  %v9224_v34 = vmul.f32 %v8034_v7, %v9172_v48  ;;  %v9229_v58 = vsel %vm1304_vm4, %v3017_v22, %v3033_v59  ;;  %v3065_v0 = vsel %vm1304_vm4, %v3033_v59, %v3017_v22 }
 0x186   : > { %17034 = vst [vmem:[#allocation44_spill] sm:$0xff] %v9220_v53  ;;  %7196 = vmatmul.mubr.msk.bf16.gmra.mrb[48].mxu1 %vm3992_vm6, %v3944_v29  ;;  %v3854_v51 = vmax.f32 %v3822_v55, 0.0  ;;  %17036 = vst [vmem:[#allocation79_spill] sm:$0xff] %v9229_v58  ;;  %v17037_v49 = vrot.slane %v9163_v8, 1  ;;  %v9241_v53 = vmul.f32 %v7976_v41, %v3065_v0  ;;  %v3229_v55 = vmul.f32 %v7982_v43, %v9229_v58 }
 0x187   : > { %17035 = vst [vmem:[#allocation31_spill] sm:$0xff] %v9224_v34  ;;  %4123 = vmatprep.mubr.bf16.mxu1 %v16925_v20  ;;  %v3430_v22 = vmul.f32 %v8043_v14, %v9229_v58  ;;  %v9250_v13 = vmax.f32 %v1173_v1, 0.0  ;;  %v17041_v34 = vrot.slane %v17040_v61, 1 }
 0x188   : > { %v3161_v4 = vsel %vm1505_vm5, %v16468_v54, %v17037_v49  ;;  %17038 = vst [vmem:[#allocation32_spill] sm:$0xff] %v9241_v53  ;;  %v3945_v59 = vpack.c.bf16 %v3855_v38, %v3854_v51  ;;  %v17042_v49 = vld [vmem:[#allocation47_spill] sm:$0xff]  ;;  %v9262_v56 = vmul.f32 %v7982_v43, %v9241_v53  ;;  %v3328_v42 = vadd.f32 %v3296_v5, %v3229_v55  ;;  %v17049_v55 = vld [vmem:[#allocation81_spill] sm:$0xff] }
 0x189   : > { %v9244_v29 = vmul.f32 %v7993_v47, %v3161_v4  ;;  %v17043_v54 = vrot.slane %v17042_v49, 1  ;;  %v3315_v4 = vadd.f32 %v17045_v33, %v17044_v11  ;;  %v9268_v1 = vmul.f32 %v8043_v14, %v9241_v53 }
 0x18a   : > { %17046 = vst [vmem:[#allocation55_spill] sm:$0xff] %v9262_v56  ;;  %v3032_v61 = vrot.slane %v9250_v13, 7  ;;  %v3496_v33 = vmul.f32 %v8031_v6, %v9250_v13  ;;  %v9280_v5 = vmul.f32 %v8034_v7, %v9250_v13  ;;  %v3447_v49 = vadd.f32 %v17049_v55, %v9100_v10  ;;  %v17054_v56 = vld [vmem:[#allocation67_spill] sm:$0xff] }
 0x18b   : > { %17039 = vst [vmem:[#allocation52_spill] sm:$0xff] %v9244_v29  ;;  %v3139_v0 = vsel %vm1505_vm5, %v17043_v54, %v17041_v34  ;;  %v3364_v38 = vmul.f32 %v7998_v50, %v9244_v29  ;;  %17047 = vst [vmem:[#allocation58_spill] sm:$0xff] %v9268_v1  ;;  %v3294_v34 = vmul.f32 %v7991_v46, %v9250_v13  ;;  %v17051_v29 = vrot.slane %v9170_v57, 1 }
 0x18c   : > { %17048 = vst [vmem:[#allocation60_spill] sm:$0xff] %v9280_v5  ;;  %v3351_v54 = vmul.f32 %v7998_v50, %v3139_v0  ;;  %v9287_v51 = vsel %vm1304_vm4, %v3016_v40, %v3032_v61  ;;  %v3064_v1 = vsel %vm1304_vm4, %v3032_v61, %v3016_v40  ;;  %v3553_v58 = vmul.f32 %v8046_v15, %v3139_v0 }
 0x18d   : > { %v9276_v11 = vadd.f32 %v3364_v38, %v3328_v42  ;;  %17050 = vst [vmem:[#allocation80_spill] sm:$0xff] %v9287_v51  ;;  %v17052_v42 = vrot.slane %v9250_v13, 1  ;;  %v9299_v53 = vmul.f32 %v7976_v41, %v3064_v1  ;;  %v3227_v55 = vmul.f32 %v7982_v43, %v9287_v51  ;;  %v17056_v1 = vld [vmem:[#allocation73_spill] sm:$0xff] }
 0x18e   : > { %v3428_v40 = vmul.f32 %v8043_v14, %v9287_v51  ;;  %7197 = vmatmul.mubr.msk.bf16.gmra.mrb[52].mxu1 %vm3992_vm6, %v3945_v59  ;;  %v9309_v61 = vadd.f32 %v3351_v54, %v3315_v4  ;;  %v3620_v48 = vmul.f32 %v8050_v19, %v17056_v1  ;;  %v17061_v51 = vld [vmem:[#allocation76_spill] sm:$0xff] }
 0x18f   : > { %v3160_v38 = vsel %vm1505_vm5, %v17052_v42, %v17051_v29  ;;  %17053 = vst [vmem:[#allocation68_spill] sm:$0xff] %v9299_v53  ;;  %v3515_v29 = vadd.f32 %v17054_v56, %v3447_v49  ;;  %v17055_v42 = vld [vmem:[#allocation75_spill] sm:$0xff]  ;;  %v9320_v5 = vmul.f32 %v7982_v43, %v9299_v53  ;;  %v3326_v52 = vadd.f32 %v3294_v34, %v3227_v55 }
 0x190   : > { %v9302_v10 = vmul.f32 %v7993_v47, %v3160_v38  ;;  %v3619_v8 = vmul.f32 %v8050_v19, %v17055_v42  ;;  %v9316_v38 = vpop.f32.mrb[12].mxu0  ;;  %v9326_v4 = vmul.f32 %v8043_v14, %v9299_v53  ;;  %4133 = vmatprep.mubr.bf16.mxu1 %v16925_v20  ;;  %v3460_v54 = vadd.f32 %v3428_v40, %v9050_v23 }
 0x191   : > { %17057 = vst [vmem:[#allocation65_spill] sm:$0xff] %v9316_v38  ;;  %v9329_v56 = vpop.f32.mrb[13].mxu0  ;;  %v3583_v42 = vadd.f32 %v9134_v18, %v3515_v29  ;;  %v3652_v34 = vadd.f32 %v3620_v48, %v8641_v62  ;;  %v3754_v38 = vmul.f32 %v9106_v21, %v3139_v0  ;;  %v17062_v53 = vrot.slane %v8690_v30, 1  ;;  %v17065_v62 = vld [vmem:[#allocation71_spill] sm:$0xff] }
 0x192   : > { %v3362_v59 = vmul.f32 %v7998_v50, %v9302_v10  ;;  %17058 = vst [vmem:[#allocation47_spill] sm:$0xff] %v9326_v4  ;;  %17059 = vst [vmem:[#allocation77_spill] sm:$0xff] %v9329_v56  ;;  %v3564_v49 = vmul.f32 %v8046_v15, %v9302_v10  ;;  %v9336_v55 = vpop.f32.mrb[14].mxu0  ;;  %v3755_v4 = vmul.f32 %v9106_v21, %v17061_v51  ;;  %v17063_v56 = vrot.slane %v8676_v60, 1  ;;  %v7512_v0 = vld [vmem:[%s16385_s9 + $0xe0] ss:$8 sps:$4 sm:$0xff]  }
 0x193   : > { %17060 = vst [vmem:[#allocation59_spill] sm:$0xff] %v9336_v55  ;;  %v9347_v40 = vpop.f32.mrb[15].mxu0  ;;  %v3528_v18 = vadd.f32 %v3496_v33, %v3460_v54  ;;  %v3651_v29 = vadd.f32 %v3619_v8, %v3583_v42  ;;  %v3719_v48 = vadd.f32 %v17065_v62, %v3652_v34  ;;  %v7514_v60 = vld [vmem:[%s16385_s9 + $0xe4] ss:$8 sps:$4 sm:$0xff]   ;;  %v17067_v33 = vld [vmem:[#allocation78_spill] sm:$0xff]  ;;  %v3554_v34 = vmul.f32 %v8046_v15, %v17061_v51 }
 0x194   : > { %v3394_v1 = vadd.f32 %v3362_v59, %v3326_v52  ;;  %v3140_v23 = vsel %vm1505_vm5, %v17063_v56, %v17062_v53  ;;  %17064 = vst [vmem:[#allocation81_spill] sm:$0xff] %v9347_v40  ;;  %v3317_v52 = vadd.f32 %v8716_v31, %v8829_v16  ;;  %v3449_v8 = vadd.f32 %v17067_v33, %v9136_v37  ;;  %v17068_v59 = vld [vmem:[#allocation70_spill] sm:$0xff]  ;;  %v17070_v31 = vld [vmem:[#allocation64_spill] sm:$0xff] }
 0x195   : > { %v3353_v53 = vmul.f32 %v7998_v50, %v3140_v23  ;;  %v3518_v56 = vadd.f32 %v17068_v59, %v8633_v35  ;;  %v9365_v54 = vadd.f32 %v3564_v49, %v3528_v18  ;;  %v3718_v16 = vadd.f32 %v17070_v31, %v3651_v29  ;;  %4422 = vmatprep.subr.bf16.mxu1 %v7514_v60 }
 0x196   : > { %v9358_v30 = vadd.f32 %v3430_v22, %v3394_v1  ;;  %v3787_v42 = vadd.f32 %v3755_v4, %v3719_v48  ;;  %v17071_v22 = vld [vmem:[#allocation63_spill] sm:$0xff]  ;;  %v9374_v40 = vmul.f32 %v8046_v15, %v3140_v23  ;;  %v3621_v37 = vmul.f32 %v8050_v19, %v8805_v32  ;;  %4423 = vmatpush1.bf16.msra.mxu1 %v7512_v0 }
 0x197   : > { %17069 = vst [vmem:[#allocation75_spill] sm:$0xff] %v9365_v54  ;;  %v9370_v62 = vadd.f32 %v3353_v53, %v3317_v52  ;;  %v3517_v1 = vadd.f32 %v17071_v22, %v3449_v8  ;;  %v3786_v35 = vadd.f32 %v3754_v38, %v3718_v16  ;;  %v3586_v18 = vadd.f32 %v3554_v34, %v3518_v56  ;;  %v17072_v52 = vld [vmem:[#allocation66_spill] sm:$0xff]  ;;  %v17073_v38 = vld [vmem:[#allocation69_spill] sm:$0xff]  ;;  %v17074_v56 = vld [vmem:[#allocation72_spill] sm:$0xff] }
 0x198   : > { %17066 = vst [vmem:[#allocation67_spill] sm:$0xff] %v9358_v30  ;;  %v3825_v49 = vadd.f32 %v8459_v25, %v3787_v42  ;;  %v3622_v4 = vmul.f32 %v8050_v19, %v8790_v2  ;;  %v3756_v29 = vmul.f32 %v9106_v21, %v3140_v23  ;;  %v3757_v48 = vmul.f32 %v9106_v21, %v8808_v39  ;;  %v17078_v34 = vld [vmem:[#allocation84_spill] sm:$0xff] }
 0x199   : > { %v3585_v51 = vadd.f32 %v3553_v58, %v3517_v1  ;;  %v1194_v60 = vadd.f32 %v9150_v24, %v17072_v52  ;;  %v3824_v53 = vadd.f32 %v8459_v25, %v3786_v35  ;;  %v1186_v33 = vadd.f32 %v9150_v24, %v17073_v38  ;;  %v17075_v58 = vld [vmem:[#allocation74_spill] sm:$0xff] }
 0x19a   : > { %v3857_v32 = vmax.f32 %v3825_v49, 0.0  ;;  %v3654_v0 = vadd.f32 %v3622_v4, %v3586_v18  ;;  %v1197_v2 = vadd.f32 %v9150_v24, %v17074_v56  ;;  %v1189_v23 = vadd.f32 %v9150_v24, %v17075_v58  ;;  %v17088_v56 = vld [vmem:[#allocation86_spill] sm:$0xff] }
 0x19b   : > { %v3653_v8 = vadd.f32 %v3621_v37, %v3585_v51  ;;  %v1230_v59 = vmax.f32 %v1194_v60, 0.0  ;;  %v3856_v31 = vmax.f32 %v3824_v53, 0.0  ;;  %v9394_v16 = vmax.f32 %v1186_v33, 0.0  ;;  %v17080_v37 = vld [vmem:[#allocation90_spill] sm:$0xff]  ;;  %v9433_v33 = vld [vmem:[%s16384_s8] ss:$0 sm:$0xff] }
 0x19c   : > { %v3721_v39 = vadd.f32 %v8817_v27, %v3654_v0  ;;  %v17077_v42 = vrot.slane %v8688_v26, 1  ;;  %v17079_v22 = vrot.slane %v17078_v34, 1  ;;  %v1231_v38 = vmax.f32 %v1197_v2, 0.0 }
 0x19d   : > { %17076 = vst [vmem:[#allocation73_spill] sm:$0xff] %v9394_v16  ;;  %v3720_v35 = vadd.f32 %v17080_v37, %v3653_v8  ;;  %v3019_v49 = vrot.slane %v1230_v59, 7  ;;  %v3115_v18 = vrot.slane %v1230_v59, 1  ;;  %v9406_v4 = vmul.f32 %v8031_v6, %v1230_v59 }
 0x19e   : > { %v9402_v1 = vsel %vm1505_vm5, %v17079_v22, %v17077_v42  ;;  %v3946_v24 = vpack.c.bf16 %v3857_v32, %v3856_v31  ;;  %v3789_v51 = vadd.f32 %v3757_v48, %v3721_v39  ;;  %v9409_v27 = vmul.f32 %v8034_v7, %v1230_v59  ;;  %v17087_v59 = vld [vmem:[#allocation96_spill] sm:$0xff]  ;;  %v17089_v31 = vld [vmem:[#allocation98_spill] sm:$0xff] }
 0x19f   : > { %17081 = vst [vmem:[#allocation76_spill] sm:$0xff] %v9406_v4  ;;  %v3018_v26 = vrot.slane %v9394_v16, 7  ;;  %v3788_v52 = vadd.f32 %v3756_v29, %v3720_v35  ;;  %v9415_v53 = vmul.f32 %v7991_v46, %v9394_v16  ;;  %v9419_v0 = vmul.f32 %v8031_v6, %v9394_v16 }
 0x1a0   : > { %17082 = vst [vmem:[#allocation71_spill] sm:$0xff] %v9409_v27  ;;  %7198 = vmatmul.mubr.msk.bf16.gmra.mrb[56].mxu1 %vm3992_vm6, %v3946_v24  ;;  %v3827_v48 = vadd.f32 %v8459_v25, %v3789_v51  ;;  %v9425_v32 = vmul.f32 %v8034_v7, %v9394_v16  ;;  %v9427_v29 = vmax.f32 %v1189_v23, 0.0  ;;  %v3319_v58 = vadd.f32 %v17088_v56, %v17087_v59  ;;  %v9450_v51 = vpop.f32.mrb[16].mxu0 }
 0x1a1   : > { %17083 = vst [vmem:[#allocation78_spill] sm:$0xff] %v9415_v53  ;;  %17084 = vst [vmem:[#allocation70_spill] sm:$0xff] %v9419_v0  ;;  %4143 = vmatprep.mubr.bf16.mxu1 %v16925_v20  ;;  %v3826_v8 = vadd.f32 %v9433_v33, %v3788_v52  ;;  %v3355_v25 = vmul.f32 %v7998_v50, %v9402_v1  ;;  %v3451_v2 = vadd.f32 %v17089_v31, %v9309_v61  ;;  %v17157_v53 = vld [vmem:[#allocation13_spill] sm:$0xff] }
 0x1a2   : > { %17085 = vst [vmem:[#allocation64_spill] sm:$0xff] %v9425_v32  ;;  %17086 = vst [vmem:[#allocation63_spill] sm:$0xff] %v9427_v29  ;;  %v3859_v23 = vmax.f32 %v3827_v48, 0.0  ;;  %v3035_v39 = vrot.slane %v1231_v38, 7  ;;  %v3131_v42 = vrot.slane %v1231_v38, 1  ;;  %v9443_v34 = vmul.f32 %v8031_v6, %v1231_v38 }
 0x1a3   : > { %v3858_v22 = vmax.f32 %v3826_v8, 0.0  ;;  %v9446_v37 = vmul.f32 %v8034_v7, %v1231_v38  ;;  %v3034_v35 = vrot.slane %v9427_v29, 7  ;;  %17092 = vst [vmem:[#allocation72_spill] sm:$0xff] %v9450_v51  ;;  %v9462_v8 = vpop.f32.mrb[17].mxu0  ;;  %v17106_v4 = vrot.slane %v9427_v29, 1 }
 0x1a4   : > { %17090 = vst [vmem:[#allocation66_spill] sm:$0xff] %v9443_v34  ;;  %v3051_v52 = vsel %vm1304_vm4, %v3019_v49, %v3035_v39  ;;  %v3067_v61 = vsel %vm1304_vm4, %v3035_v39, %v3019_v49  ;;  %v9458_v48 = vsel %vm1505_vm5, %v3115_v18, %v3131_v42  ;;  %v3163_v38 = vsel %vm1505_vm5, %v3131_v42, %v3115_v18  ;;  %v9469_v60 = vpop.f32.mrb[18].mxu0 }
 0x1a5   : > { %17091 = vst [vmem:[#allocation69_spill] sm:$0xff] %v9446_v37  ;;  %17093 = vst [vmem:[#allocation74_spill] sm:$0xff] %v9458_v48  ;;  %v3947_v59 = vpack.c.bf16 %v3859_v23, %v3858_v22  ;;  %v3098_v56 = vmul.f32 %v7976_v41, %v3067_v61  ;;  %v9466_v31 = vmul.f32 %v7993_v47, %v3163_v38  ;;  %v9484_v42 = vpop.f32.mrb[19].mxu0  ;;  %v7517_v22 = vld [vmem:[%s16385_s9 + $0xf4] ss:$8 sps:$4 sm:$0xff]   ;;  %v17122_v37 = vld [vmem:[#allocation92_spill] sm:$0xff] }
 0x1a6   : > { %17094 = vst [vmem:[#allocation84_spill] sm:$0xff] %v9462_v8  ;;  %v3434_v24 = vmul.f32 %v8043_v14, %v3051_v52  ;;  %17096 = vst [vmem:[#allocation96_spill] sm:$0xff] %v9469_v60  ;;  %v9473_v49 = vmul.f32 %v8046_v15, %v9458_v48  ;;  %v9476_v39 = vmul.f32 %v8050_v19, %v3051_v52  ;;  %4424 = vmatprep.subr.bf16.mxu1 %v7517_v22  ;;  %v17111_v60 = vld [vmem:[#allocation89_spill] sm:$0xff]  ;;  %v17114_v8 = vld [vmem:[#allocation95_spill] sm:$0xff] }
 0x1a7   : > { %17095 = vst [vmem:[#allocation90_spill] sm:$0xff] %v9466_v31  ;;  %v9480_v18 = vsel %vm1304_vm4, %v3018_v26, %v3034_v35  ;;  %v3066_v23 = vsel %vm1304_vm4, %v3034_v35, %v3018_v26  ;;  %17100 = vst [vmem:[#allocation102_spill] sm:$0xff] %v9484_v42  ;;  %v9490_v61 = vmul.f32 %v8043_v14, %v3098_v56  ;;  %v7515_v26 = vld [vmem:[%s16385_s9 + $0xf0] ss:$8 sps:$4 sm:$0xff]   ;;  %v17105_v35 = vrot.slane %v9394_v16, 1 }
 0x1a8   : > { %17097 = vst [vmem:[#allocation86_spill] sm:$0xff] %v9473_v49  ;;  %17098 = vst [vmem:[#allocation98_spill] sm:$0xff] %v9476_v39  ;;  %v9494_v52 = vmul.f32 %v8046_v15, %v9466_v31  ;;  %v9497_v38 = vmul.f32 %v8050_v19, %v3098_v56  ;;  %v9500_v49 = vmul.f32 %v7976_v41, %v3066_v23  ;;  %7199 = vmatmul.mubr.msk.bf16.gmra.mrb[60].mxu1 %vm3992_vm6, %v3947_v59  ;;  %v17153_v31 = vld [vmem:[#allocation11_spill] sm:$0xff] }
 0x1a9   : > { %17099 = vst [vmem:[#allocation101_spill] sm:$0xff] %v9480_v18  ;;  %17101 = vst [vmem:[#allocation103_spill] sm:$0xff] %v9490_v61  ;;  %v3162_v34 = vsel %vm1505_vm5, %v17106_v4, %v17105_v35  ;;  %v3231_v56 = vmul.f32 %v7982_v43, %v9480_v18  ;;  %v3298_v23 = vmul.f32 %v7991_v46, %v9427_v29  ;;  %4153 = vmatprep.mubr.bf16.mxu1 %v16925_v20 }
 0x1aa   : > { %17102 = vst [vmem:[#allocation104_spill] sm:$0xff] %v9494_v52  ;;  %17103 = vst [vmem:[#allocation105_spill] sm:$0xff] %v9497_v38  ;;  %v3432_v52 = vmul.f32 %v8043_v14, %v9480_v18  ;;  %v9519_v61 = vmul.f32 %v7993_v47, %v3162_v34  ;;  %v9523_v59 = vmul.f32 %v7982_v43, %v9500_v49  ;;  %4425 = vmatpush1.bf16.msra.mxu1 %v7515_v26 }
 0x1ab   : > { %17104 = vst [vmem:[#allocation106_spill] sm:$0xff] %v9500_v49  ;;  %v9527_v27 = vmul.f32 %v8043_v14, %v9500_v49  ;;  %v3500_v4 = vmul.f32 %v8031_v6, %v9427_v29  ;;  %v3330_v46 = vadd.f32 %v3298_v23, %v3231_v56  ;;  %v9535_v34 = vmul.f32 %v8034_v7, %v9427_v29  ;;  %v17113_v23 = vld [vmem:[#allocation93_spill] sm:$0xff] }
 0x1ac   : > { %17107 = vst [vmem:[#allocation107_spill] sm:$0xff] %v9519_v61  ;;  %17108 = vst [vmem:[#allocation108_spill] sm:$0xff] %v9523_v59  ;;  %v3464_v35 = vadd.f32 %v3432_v52, %v9276_v11  ;;  %v3387_v42 = vadd.f32 %v3355_v25, %v3319_v58  ;;  %v3366_v43 = vmul.f32 %v7998_v50, %v9519_v61  ;;  %v17112_v11 = vld [vmem:[#allocation94_spill] sm:$0xff]  ;;  %v17116_v26 = vrot.slane %v8922_v3, 1  ;;  %v17121_v3 = vld [vmem:[#allocation91_spill] sm:$0xff] }
 0x1ad   : > { %17109 = vst [vmem:[#allocation109_spill] sm:$0xff] %v9527_v27  ;;  %17110 = vst [vmem:[#allocation110_spill] sm:$0xff] %v9535_v34  ;;  %v3568_v14 = vmul.f32 %v8046_v15, %v9519_v61  ;;  %v3519_v38 = vadd.f32 %v17111_v60, %v3451_v2  ;;  %v3557_v6 = vmul.f32 %v8046_v15, %v9402_v1  ;;  %v17115_v2 = vrot.slane %v8930_v45, 1  ;;  %v17156_v34 = vld [vmem:[#allocation17_spill] sm:$0xff] }
 0x1ae   : > { %v3532_v56 = vadd.f32 %v3500_v4, %v3464_v35  ;;  %v3623_v52 = vmul.f32 %v8050_v19, %v17112_v11  ;;  %v3624_v58 = vmul.f32 %v8050_v19, %v17113_v23  ;;  %v3758_v25 = vmul.f32 %v9106_v21, %v9402_v1  ;;  %v17120_v23 = vld [vmem:[#allocation26_spill] sm:$0xff] }
 0x1af   : > { %v3398_v22 = vadd.f32 %v3366_v43, %v3330_v46  ;;  %v3587_v7 = vadd.f32 %v9374_v40, %v3519_v38  ;;  %v3759_v60 = vmul.f32 %v9106_v21, %v17114_v8  ;;  %v3142_v4 = vsel %vm1505_vm5, %v17116_v26, %v17115_v2  ;;  %v17119_v43 = vld [vmem:[#allocation97_spill] sm:$0xff] }
 0x1b0   : > { %v9559_v35 = vadd.f32 %v3568_v14, %v3532_v56  ;;  %v3656_v11 = vadd.f32 %v3624_v58, %v8879_v12  ;;  %v3321_v1 = vadd.f32 %v8960_v28, %v9065_v63  ;;  %v3357_v46 = vmul.f32 %v7998_v50, %v3142_v4  ;;  %v17123_v63 = vld [vmem:[#allocation88_spill] sm:$0xff] }
 0x1b1   : > { %v9565_v40 = vadd.f32 %v3434_v24, %v3398_v22  ;;  %v3655_v38 = vadd.f32 %v3623_v52, %v3587_v7  ;;  %v3453_v45 = vadd.f32 %v17119_v43, %v9370_v62  ;;  %v3522_v51 = vadd.f32 %v17121_v3, %v17120_v23  ;;  %v17124_v24 = vld [vmem:[#allocation87_spill] sm:$0xff]  ;;  %v17128_v23 = vld [vmem:[#allocation38_spill] sm:$0xff] }
 0x1b2   : > { %17117 = vst [vmem:[#allocation89_spill] sm:$0xff] %v9559_v35  ;;  %v3723_v2 = vadd.f32 %v17122_v37, %v3656_v11  ;;  %v9572_v14 = vadd.f32 %v3357_v46, %v3321_v1  ;;  %v3558_v12 = vmul.f32 %v8046_v15, %v17114_v8  ;;  %v3559_v28 = vmul.f32 %v8046_v15, %v3142_v4  ;;  %v17125_v7 = vld [vmem:[#allocation43_spill] sm:$0xff]  ;;  %v17127_v11 = vld [vmem:[#allocation54_spill] sm:$0xff] }
 0x1b3   : > { %17118 = vst [vmem:[#allocation94_spill] sm:$0xff] %v9565_v40  ;;  %v3722_v56 = vadd.f32 %v17123_v63, %v3655_v38  ;;  %v3521_v58 = vadd.f32 %v17124_v24, %v3453_v45  ;;  %v3625_v52 = vmul.f32 %v8050_v19, %v17125_v7  ;;  %v17126_v62 = vld [vmem:[#allocation35_spill] sm:$0xff]  ;;  %v3760_v37 = vmul.f32 %v9106_v21, %v3142_v4  ;;  %v17130_v38 = vld [vmem:[#allocation33_spill] sm:$0xff] }
 0x1b4   : > { %v3626_v22 = vmul.f32 %v8050_v19, %v17126_v62  ;;  %v3791_v26 = vadd.f32 %v3759_v60, %v3723_v2  ;;  %v3590_v43 = vadd.f32 %v3558_v12, %v3522_v51  ;;  %v3761_v1 = vmul.f32 %v9106_v21, %v17127_v11  ;;  %v17132_v24 = vld [vmem:[#allocation37_spill] sm:$0xff]  ;;  %v17133_v7 = vld [vmem:[#allocation39_spill] sm:$0xff]  ;;  %v17134_v2 = vld [vmem:[#allocation42_spill] sm:$0xff]  ;;  %v9603_v11 = vpop.f32.mrb[20].mxu0 }
 0x1b5   : > { %v3790_v8 = vadd.f32 %v3758_v25, %v3722_v56  ;;  %v3589_v46 = vadd.f32 %v3557_v6, %v3521_v58  ;;  %v17129_v3 = vrot.slane %v17128_v23, 1  ;;  %v17131_v63 = vrot.slane %v17130_v38, 1  ;;  %v17135_v58 = vld [vmem:[#allocation53_spill] sm:$0xff]  ;;  %17136 = vst [vmem:[#allocation93_spill] sm:$0xff] %v9603_v11  ;;  %v17146_v11 = vld [vmem:[#allocation8_spill] sm:$0xff] }
 0x1b6   : > { %v3323_v40 = vadd.f32 %v17133_v7, %v17132_v24  ;;  %v3829_v60 = vadd.f32 %v9433_v33, %v3791_v26  ;;  %v3658_v51 = vadd.f32 %v3626_v22, %v3590_v43  ;;  %v3455_v12 = vadd.f32 %v17134_v2, %v3387_v42  ;;  %v17138_v22 = vld [vmem:[#allocation23_spill] sm:$0xff]  ;;  %v17143_v2 = vld [vmem:[#allocation57_spill] sm:$0xff] }
 0x1b7   : > { %v3143_v45 = vsel %vm1505_vm5, %v17131_v63, %v17129_v3  ;;  %v3828_v25 = vadd.f32 %v9433_v33, %v3790_v8  ;;  %v3657_v6 = vadd.f32 %v3625_v52, %v3589_v46  ;;  %v3627_v62 = vmul.f32 %v8050_v19, %v17135_v58  ;;  %v17137_v3 = vld [vmem:[#allocation100_spill] sm:$0xff]  ;;  %v9609_v63 = vpop.f32.mrb[21].mxu0 }
 0x1b8   : > { %v3359_v4 = vmul.f32 %v7998_v50, %v3143_v45  ;;  %v9599_v56 = vmul.f32 %v8046_v15, %v3143_v45  ;;  %v3861_v23 = vmax.f32 %v3829_v60, 0.0  ;;  %v3725_v38 = vadd.f32 %v17137_v3, %v3658_v51  ;;  %17139 = vst [vmem:[#allocation95_spill] sm:$0xff] %v9609_v63  ;;  %v17140_v8 = vld [vmem:[#allocation24_spill] sm:$0xff]  ;;  %v9618_v60 = vld [vmem:[%s16381_s5] sm:$0xff]  ;;  %v9620_v51 = vpop.f32.mrb[22].mxu0 }
 0x1b9   : > { %v3523_v43 = vadd.f32 %v17138_v22, %v3455_v12  ;;  %v3860_v42 = vmax.f32 %v3828_v25, 0.0  ;;  %v3724_v52 = vadd.f32 %v17140_v8, %v3657_v6  ;;  %v17141_v46 = vld [vmem:[#allocation56_spill] sm:$0xff]  ;;  %v3762_v7 = vmul.f32 %v9106_v21, %v3143_v45  ;;  %17142 = vst [vmem:[#allocation97_spill] sm:$0xff] %v9620_v51  ;;  %v17144_v25 = vld [vmem:[#allocation82_spill] sm:$0xff]  ;;  %v9627_v8 = vpop.f32.mrb[23].mxu0 }
 0x1ba   : > { %v9606_v26 = vadd.f32 %v3359_v4, %v3323_v40  ;;  %v3628_v24 = vmul.f32 %v8050_v19, %v17141_v46  ;;  %v3793_v40 = vadd.f32 %v3761_v1, %v3725_v38  ;;  %v3763_v12 = vmul.f32 %v9106_v21, %v17143_v2  ;;  %17145 = vst [vmem:[#allocation26_spill] sm:$0xff] %v9627_v8 }
 0x1bb   : > { %v3591_v4 = vadd.f32 %v3559_v28, %v3523_v43  ;;  %v1240_v58 = vrot.slane %v17144_v25, 7  ;;  %v3948_v6 = vpack.c.bf16 %v3861_v23, %v3860_v42  ;;  %v3792_v3 = vadd.f32 %v3760_v37, %v3724_v52  ;;  %v17147_v28 = vld [vmem:[#allocation14_spill] sm:$0xff]  ;;  %v9641_v37 = vld [vmem:[%s16381_s5 + $0x8] sm:$0xff]  ;;  %v17151_v52 = vld [vmem:[#allocation85_spill] sm:$0xff] }
 0x1bc   : > { %v3660_v22 = vadd.f32 %v3628_v24, %v9113_v17  ;;  %v1441_v45 = vrot.slane %v17144_v25, 1  ;;  %v3831_v46 = vadd.f32 %v9433_v33, %v3793_v40  ;;  %v9632_v1 = vrot.slane %v9618_v60, %v17146_v11  ;;  %v17148_v23 = vld [vmem:[#allocation20_spill] sm:$0xff]  ;;  %v17152_v42 = vld [vmem:[#allocation7_spill] sm:$0xff] }
 0x1bd   : > { %v3659_v63 = vadd.f32 %v3627_v62, %v3591_v4  ;;  %v9636_v38 = vrot.slane %v9618_v60, %v17147_v28  ;;  %7200 = vmatmul.mubr.msk.bf16.gmra.mrb[64].mxu1 %vm3992_vm6, %v3948_v6  ;;  %v3830_v17 = vadd.f32 %v9433_v33, %v3792_v3  ;;  %v17149_v62 = vld [vmem:[#allocation83_spill] sm:$0xff]  ;;  %v17150_v40 = vld [vmem:[#allocation36_spill] sm:$0xff]  ;;  %v9668_v0 = vrot.slane %v9618_v60, %v17152_v42 }
 0x1be   : > { %v3727_v43 = vadd.f32 %v17148_v23, %v3660_v22  ;;  %4163 = vmatprep.mubr.bf16.mxu1 %v16925_v20  ;;  %v3863_v24 = vmax.f32 %v3831_v46, 0.0  ;;  %v1788_v8 = vmul.f32 %v9632_v1, %v17144_v25  ;;  %v9658_v22 = vrot.slane %v9641_v37, %v17146_v11 }
 0x1bf   : > { %v3726_v4 = vadd.f32 %v17150_v40, %v3659_v63  ;;  %v9654_v51 = vmul.f32 %v9636_v38, %v17144_v25  ;;  %v3862_v6 = vmax.f32 %v3830_v17, 0.0  ;;  %v9662_v23 = vrot.slane %v9641_v37, %v17147_v28 }
 0x1c0   : > { %v3795_v3 = vadd.f32 %v3763_v12, %v3727_v43  ;;  %v1272_v63 = vrot.slane %v17151_v52, 7  ;;  %v1473_v40 = vrot.slane %v17151_v52, 1  ;;  %v9673_v17 = vmul.f32 %v9658_v22, %v17149_v62 }
 0x1c1   : > { %v3794_v46 = vadd.f32 %v3762_v7, %v3726_v4  ;;  %v3949_v25 = vpack.c.bf16 %v3863_v24, %v3862_v6  ;;  %v9677_v43 = vmul.f32 %v9662_v23, %v17149_v62  ;;  %v1650_v48 = vmul.f32 %v9668_v0, %v17153_v31 }
 0x1c2   : > { %v3833_v12 = vadd.f32 %v9433_v33, %v3795_v3  ;;  %v1305_v4 = vsel %vm1304_vm4, %v1240_v58, %v1272_v63  ;;  %v1337_v28 = vsel %vm1304_vm4, %v1272_v63, %v1240_v58  ;;  %v1506_v24 = vsel %vm1505_vm5, %v1441_v45, %v1473_v40 }
 0x1c3   : > { %v3832_v7 = vadd.f32 %v9433_v33, %v3794_v46  ;;  %v1377_v3 = vmul.f32 %v7976_v41, %v1337_v28  ;;  %v1538_v11 = vsel %vm1505_vm5, %v1473_v40, %v1441_v45  ;;  %v1652_v35 = vmul.f32 0.0, %v9668_v0  ;;  %v17154_v45 = vld [vmem:[#allocation10_spill] sm:$0xff] }
 0x1c4   : > { %v3865_v6 = vmax.f32 %v3833_v12, 0.0  ;;  %v1580_v46 = vmul.f32 %v7993_v47, %v1538_v11  ;;  %v1656_v27 = vmul.f32 %v9668_v0, %v1305_v4  ;;  %v1786_v63 = vmul.f32 0.0, %v9632_v1  ;;  %v17155_v12 = vld [vmem:[#allocation16_spill] sm:$0xff] }
 0x1c5   : > { %v3864_v39 = vmax.f32 %v3832_v7, 0.0  ;;  %7201 = vmatmul.mubr.msk.bf16.gmra.mrb[68].mxu1 %vm3992_vm6, %v3949_v25  ;;  %v1654_v58 = vmul.f32 %v9668_v0, %v1377_v3  ;;  %v1790_v28 = vmul.f32 %v9632_v1, %v17151_v52  ;;  %v9701_v40 = vrot.slane %v9618_v60, %v17154_v45 }
 0x1c6   : > { %4173 = vmatprep.mubr.bf16.mxu1 %v16925_v20  ;;  %v9706_v7 = vrot.slane %v9618_v60, %v17155_v12  ;;  %v2194_v25 = vmul.f32 %v9636_v38, %v17151_v52  ;;  %v9712_v32 = vrot.slane %v9618_v60, %v17156_v34  ;;  %v1848_v55 = vadd.f32 %v1786_v63, %v1650_v48 }
 0x1c7   : > { %v3950_v11 = vpack.c.bf16 %v3865_v6, %v3864_v39  ;;  %v1850_v61 = vadd.f32 %v1786_v63, %v1652_v35  ;;  %v1852_v18 = vadd.f32 %v1788_v8, %v1654_v58  ;;  %v1854_v49 = vadd.f32 %v1790_v28, %v1656_v27  ;;  %v17159_v63 = vld [vmem:[#allocation18_spill] sm:$0xff] }
 0x1c8   : > { %v1920_v30 = vmul.f32 0.0, %v9701_v40  ;;  %v1922_v39 = vmul.f32 %v9701_v40, %v17157_v53  ;;  %v1924_v6 = vmul.f32 %v9701_v40, %v1506_v24  ;;  %v1926_v59 = vmul.f32 %v9701_v40, %v1580_v46 }
 0x1c9   : > { %v2056_v16 = vmul.f32 %v9706_v7, %v1377_v3  ;;  %v2058_v52 = vmul.f32 %v9706_v7, %v1305_v4  ;;  %v2328_v29 = vmul.f32 %v9712_v32, %v1506_v24  ;;  %v2330_v48 = vmul.f32 %v9712_v32, %v1580_v46 }
 0x1ca   : > { %v1984_v35 = vadd.f32 %v1920_v30, %v1848_v55  ;;  %v1986_v8 = vadd.f32 %v1922_v39, %v1850_v61  ;;  %v9723_v27 = vadd.f32 %v1924_v6, %v1852_v18  ;;  %v9725_v58 = vadd.f32 %v1926_v59, %v1854_v49  ;;  %v17163_v55 = vld [vmem:[#allocation40_spill] sm:$0xff]  ;;  %v17164_v59 = vld [vmem:[#allocation21_spill] sm:$0xff] }
 0x1cb   : > { %v9729_v28 = vrot.slane %v9618_v60, %v17159_v63  ;;  %v17161_v54 = vrot.slane %v9250_v13, 1  ;;  %v17162_v3 = vrot.slane %v9170_v57, 1  ;;  %v3325_v24 = vadd.f32 %v9203_v9, %v9320_v5  ;;  %v17165_v13 = vld [vmem:[#allocation28_spill] sm:$0xff] }
 0x1cc   : > { %17158 = vst [vmem:[#allocation91_spill] sm:$0xff] %v9723_v27  ;;  %v3457_v30 = vadd.f32 %v17163_v55, %v9572_v14  ;;  %v2120_v18 = vadd.f32 %v2056_v16, %v1984_v35  ;;  %v2122_v49 = vadd.f32 %v2058_v52, %v1986_v8  ;;  %v3526_v46 = vadd.f32 %v17164_v59, %v9111_v44  ;;  %v17166_v9 = vld [vmem:[#allocation68_spill] sm:$0xff] }
 0x1cd   : > { %17160 = vst [vmem:[#allocation92_spill] sm:$0xff] %v9729_v28  ;;  %v3144_v4 = vsel %vm1505_vm5, %v17162_v3, %v17161_v54  ;;  %7202 = vmatmul.mubr.msk.bf16.gmra.mrb[72].mxu1 %vm3992_vm6, %v3950_v11  ;;  %v3562_v54 = vmul.f32 %v8046_v15, %v17143_v2  ;;  %v3629_v5 = vmul.f32 %v8050_v19, %v17166_v9  ;;  %v17167_v44 = vld [vmem:[#allocation80_spill] sm:$0xff]  ;;  %v9763_v3 = vpop.f32.mrb[24].mxu0 }
 0x1ce   : > { %v3361_v61 = vmul.f32 %v7998_v50, %v3144_v4  ;;  %v3525_v57 = vadd.f32 %v17165_v13, %v3457_v30  ;;  %v9749_v39 = vmul.f32 %v8046_v15, %v3144_v4  ;;  %4183 = vmatprep.mubr.bf16.mxu1 %v16925_v20  ;;  %v2256_v16 = vadd.f32 %v9654_v51, %v2120_v18  ;;  %v17170_v51 = vld [vmem:[#allocation99_spill] sm:$0xff]  ;;  %v9771_v18 = vpop.f32.mrb[25].mxu0 }
 0x1cf   : > { %v2258_v14 = vadd.f32 %v2194_v25, %v2122_v49  ;;  %v3630_v11 = vmul.f32 %v8050_v19, %v17167_v44  ;;  %v3594_v35 = vadd.f32 %v3562_v54, %v3526_v46  ;;  %v3764_v2 = vmul.f32 %v9106_v21, %v3144_v4  ;;  %17168 = vst [vmem:[#allocation88_spill] sm:$0xff] %v9763_v3 }
 0x1d0   : > { %v9755_v6 = vadd.f32 %v3361_v61, %v3325_v24  ;;  %v3593_v52 = vadd.f32 %v9599_v56, %v3525_v57  ;;  %v3765_v8 = vmul.f32 %v9106_v21, %v9302_v10  ;;  %v9765_v55 = vadd.f32 %v2328_v29, %v2256_v16  ;;  %17171 = vst [vmem:[#allocation43_spill] sm:$0xff] %v9771_v18  ;;  %v9778_v10 = vpop.f32.mrb[26].mxu0 }
 0x1d1   : > { %v9767_v30 = vadd.f32 %v2330_v48, %v2258_v14  ;;  %v1273_v25 = vrot.slane %v17170_v51, 7  ;;  %v1474_v24 = vrot.slane %v17170_v51, 1  ;;  %v3662_v56 = vadd.f32 %v3630_v11, %v3594_v35  ;;  %17172 = vst [vmem:[#allocation35_spill] sm:$0xff] %v9778_v10  ;;  %v9796_v9 = vpop.f32.mrb[27].mxu0  ;;  %v17179_v14 = vld [vmem:[#allocation60_spill] sm:$0xff] }
 0x1d2   : > { %17169 = vst [vmem:[#allocation87_spill] sm:$0xff] %v9765_v55  ;;  %v3661_v49 = vadd.f32 %v3629_v5, %v3593_v52  ;;  %v9775_v4 = vrot.slane %v9641_v37, %v17152_v42  ;;  %v1787_v21 = vmul.f32 0.0, %v9658_v22  ;;  %v17173_v29 = vrot.slane %v17149_v62, 7  ;;  %17177 = vst [vmem:[#allocation54_spill] sm:$0xff] %v9796_v9  ;;  %v17178_v5 = vld [vmem:[#allocation45_spill] sm:$0xff] }
 0x1d3   : > { %v17175_v46 = vrot.slane %v17149_v62, 1  ;;  %v3729_v44 = vadd.f32 %v17179_v14, %v3662_v56  ;;  %v9811_v56 = vrot.slane %v9641_v37, %v17154_v45  ;;  %v9835_v9 = vrot.slane %v9641_v37, %v17156_v34 }
 0x1d4   : > { %v1306_v48 = vsel %vm1304_vm4, %v17173_v29, %v1273_v25  ;;  %v17174_v61 = vmov %v17173_v29  ;;  %v3728_v16 = vadd.f32 %v17178_v5, %v3661_v49  ;;  %v1651_v35 = vmul.f32 %v9775_v4, %v17153_v31 }
 0x1d5   : > { %v1338_v59 = vsel %vm1304_vm4, %v1273_v25, %v17174_v61  ;;  %v1507_v13 = vsel %vm1505_vm5, %v17175_v46, %v1474_v24  ;;  %v17176_v57 = vmov %v17175_v46  ;;  %v1653_v25 = vmul.f32 0.0, %v9775_v4 }
 0x1d6   : > { %v1539_v54 = vsel %vm1505_vm5, %v1474_v24, %v17176_v57  ;;  %v1378_v11 = vmul.f32 %v7976_v41, %v1338_v59  ;;  %v1657_v62 = vmul.f32 %v9775_v4, %v1306_v48  ;;  %v1791_v24 = vmul.f32 %v9658_v22, %v17170_v51 }
 0x1d7   : > { %v1581_v52 = vmul.f32 %v7993_v47, %v1539_v54  ;;  %v3796_v29 = vadd.f32 %v3764_v2, %v3728_v16  ;;  %v3797_v61 = vadd.f32 %v3765_v8, %v3729_v44  ;;  %v1849_v59 = vadd.f32 %v1787_v21, %v1651_v35 }
 0x1d8   : > { %v1655_v49 = vmul.f32 %v9775_v4, %v1378_v11  ;;  %v1851_v46 = vadd.f32 %v1787_v21, %v1653_v25  ;;  %v1855_v57 = vadd.f32 %v1791_v24, %v1657_v62  ;;  %v9815_v54 = vrot.slane %v9641_v37, %v17155_v12 }
 0x1d9   : > { %v3834_v5 = vadd.f32 %v9433_v33, %v3796_v29  ;;  %v3835_v14 = vadd.f32 %v9433_v33, %v3797_v61  ;;  %v1921_v8 = vmul.f32 0.0, %v9811_v56  ;;  %v1923_v16 = vmul.f32 %v9811_v56, %v17157_v53 }
 0x1da   : > { %v1853_v2 = vadd.f32 %v9673_v17, %v1655_v49  ;;  %v1925_v44 = vmul.f32 %v9811_v56, %v1507_v13  ;;  %v1927_v21 = vmul.f32 %v9811_v56, %v1581_v52  ;;  %v2057_v35 = vmul.f32 %v9815_v54, %v1378_v11 }
 0x1db   : > { %v3866_v25 = vmax.f32 %v3834_v5, 0.0  ;;  %v3867_v62 = vmax.f32 %v3835_v14, 0.0  ;;  %v1985_v24 = vadd.f32 %v1921_v8, %v1849_v59  ;;  %v2059_v29 = vmul.f32 %v9815_v54, %v1306_v48  ;;  %v17181_v48 = vld [vmem:[#allocation22_spill] sm:$0xff] }
 0x1dc   : > { %v1987_v12 = vadd.f32 %v1923_v16, %v1851_v46  ;;  %v9827_v61 = vadd.f32 %v1925_v44, %v1853_v2  ;;  %v9829_v17 = vadd.f32 %v1927_v21, %v1855_v57  ;;  %v2195_v49 = vmul.f32 %v9662_v23, %v17170_v51  ;;  %v17183_v16 = vld [vmem:[#allocation15_spill] sm:$0xff]  ;;  %v17185_v21 = vld [vmem:[#allocation25_spill] sm:$0xff] }
 0x1dd   : > { %v3951_v45 = vpack.c.bf16 %v3867_v62, %v3866_v25  ;;  %v2121_v27 = vadd.f32 %v2057_v35, %v1985_v24  ;;  %v9839_v11 = vrot.slane %v9641_v37, %v17159_v63  ;;  %v1242_v46 = vrot.slane %v17181_v48, 7  ;;  %v17189_v62 = vld [vmem:[#allocation27_spill] sm:$0xff] }
 0x1de   : > { %17180 = vst [vmem:[#allocation38_spill] sm:$0xff] %v9827_v61  ;;  %v2123_v59 = vadd.f32 %v2059_v29, %v1987_v12  ;;  %v1443_v5 = vrot.slane %v17181_v48, 1  ;;  %v1792_v57 = vmul.f32 %v9632_v1, %v17181_v48  ;;  %v2329_v14 = vmul.f32 %v9835_v9, %v1507_v13 }
 0x1df   : > { %7203 = vmatmul.mubr.msk.bf16.gmra.mrb[76].mxu1 %vm3992_vm6, %v3951_v45  ;;  %v2257_v51 = vadd.f32 %v9677_v43, %v2121_v27  ;;  %v2331_v2 = vmul.f32 %v9835_v9, %v1581_v52  ;;  %v9851_v8 = vmul.f32 %v9636_v38, %v17181_v48  ;;  %v9855_v44 = vrot.slane %v9618_v60, %v17183_v16 }
 0x1e0   : > { %v2259_v12 = vadd.f32 %v2195_v49, %v2123_v59  ;;  %v1243_v35 = vrot.slane %v17185_v21, 7  ;;  %4193 = vmatprep.mubr.bf16.mxu1 %v16925_v20  ;;  %v9864_v45 = vmul.f32 %v9658_v22, %v17185_v21  ;;  %v9868_v27 = vmul.f32 %v9662_v23, %v17185_v21  ;;  %v9889_v59 = vld [vmem:[%s16381_s5 + $0x10] ss:$0 sm:$0xff] }
 0x1e1   : > { %17182 = vst [vmem:[#allocation33_spill] sm:$0xff] %v9851_v8  ;;  %17184 = vst [vmem:[#allocation37_spill] sm:$0xff] %v9855_v44  ;;  %v9860_v43 = vadd.f32 %v2329_v14, %v2257_v51  ;;  %v9872_v60 = vrot.slane %v9641_v37, %v17183_v16  ;;  %v9878_v52 = vmul.f32 %v9855_v44, %v17181_v48  ;;  %v1274_v24 = vrot.slane %v17189_v62, 7 }
 0x1e2   : > { %17186 = vst [vmem:[#allocation39_spill] sm:$0xff] %v9868_v27  ;;  %v9874_v13 = vadd.f32 %v2331_v2, %v2259_v12  ;;  %v1475_v29 = vrot.slane %v17189_v62, 1  ;;  %17190 = vst [vmem:[#allocation100_spill] sm:$0xff] %v9889_v59  ;;  %v1794_v37 = vmul.f32 %v9632_v1, %v17189_v62  ;;  %v2198_v48 = vmul.f32 %v9636_v38, %v17189_v62 }
 0x1e3   : > { %17187 = vst [vmem:[#allocation42_spill] sm:$0xff] %v9872_v60  ;;  %17188 = vst [vmem:[#allocation53_spill] sm:$0xff] %v9878_v52  ;;  %v9884_v49 = vmul.f32 %v9872_v60, %v17185_v21  ;;  %v2602_v51 = vmul.f32 %v9855_v44, %v17189_v62  ;;  %v1307_v14 = vsel %vm1304_vm4, %v1242_v46, %v1274_v24  ;;  %v9932_v52 = vpop.f32.mrb[28].mxu0 }
 0x1e4   : > { %v1339_v2 = vsel %vm1304_vm4, %v1274_v24, %v1242_v46  ;;  %v1508_v12 = vsel %vm1505_vm5, %v1443_v5, %v1475_v29  ;;  %v1540_v25 = vsel %vm1505_vm5, %v1475_v29, %v1443_v5  ;;  %v1660_v34 = vmul.f32 %v9668_v0, %v1307_v14  ;;  %17196 = vst [vmem:[#allocation82_spill] sm:$0xff] %v9932_v52 }
 0x1e5   : > { %v1381_v16 = vmul.f32 %v7976_v41, %v1339_v2  ;;  %v1584_v63 = vmul.f32 %v7993_v47, %v1540_v25  ;;  %v1928_v62 = vmul.f32 %v9701_v40, %v1508_v12  ;;  %v2062_v8 = vmul.f32 %v9706_v7, %v1307_v14 }
 0x1e6   : > { %v9911_v10 = vmul.f32 %v9712_v32, %v1508_v12  ;;  %v2466_v46 = vmul.f32 %v9729_v28, %v1307_v14  ;;  %v9915_v24 = vmul.f32 %v9889_v59, %v1508_v12  ;;  %v1858_v29 = vadd.f32 %v1794_v37, %v1660_v34  ;;  %v17195_v34 = vld [vmem:[#allocation61_spill] sm:$0xff] }
 0x1e7   : > { %v1658_v5 = vmul.f32 %v9668_v0, %v1381_v16  ;;  %v1930_v2 = vmul.f32 %v9701_v40, %v1584_v63  ;;  %v9920_v25 = vmul.f32 %v9706_v7, %v1381_v16  ;;  %v2126_v18 = vadd.f32 %v2062_v8, %v9725_v58 }
 0x1e8   : > { %17191 = vst [vmem:[#allocation23_spill] sm:$0xff] %v9911_v10  ;;  %17192 = vst [vmem:[#allocation24_spill] sm:$0xff] %v9915_v24  ;;  %v2334_v3 = vmul.f32 %v9712_v32, %v1584_v63  ;;  %v9925_v27 = vmul.f32 %v9729_v28, %v1381_v16  ;;  %v2530_v14 = vadd.f32 %v2466_v46, %v9767_v30  ;;  %v1275_v37 = vrot.slane %v17195_v34, 7  ;;  %v9937_v16 = vpop.f32.mrb[29].mxu0 }
 0x1e9   : > { %17193 = vst [vmem:[#allocation56_spill] sm:$0xff] %v9920_v25  ;;  %v1856_v10 = vadd.f32 %v1792_v57, %v1658_v5  ;;  %v9928_v12 = vadd.f32 %v1930_v2, %v1858_v29  ;;  %v2736_v24 = vmul.f32 %v9889_v59, %v1584_v63  ;;  %v2262_v61 = vadd.f32 %v2198_v48, %v2126_v18  ;;  %v9949_v57 = vpop.f32.mrb[30].mxu0 }
 0x1ea   : > { %17194 = vst [vmem:[#allocation57_spill] sm:$0xff] %v9925_v27  ;;  %v2664_v25 = vadd.f32 %v2602_v51, %v2530_v14  ;;  %v16512_v58 = vrot.slane %v17195_v34, 1  ;;  %v1795_v8 = vmul.f32 %v9658_v22, %v17195_v34  ;;  %17197 = vst [vmem:[#allocation20_spill] sm:$0xff] %v9937_v16  ;;  %v9943_v30 = vsel %vm1304_vm4, %v1243_v35, %v1275_v37 }
 0x1eb   : > { %v9939_v28 = vadd.f32 %v1928_v62, %v1856_v10  ;;  %v1340_v63 = vsel %vm1304_vm4, %v1275_v37, %v1243_v35  ;;  %v2199_v18 = vmul.f32 %v9662_v23, %v17195_v34  ;;  %17199 = vst [vmem:[#allocation36_spill] sm:$0xff] %v9949_v57  ;;  %v9951_v48 = vadd.f32 %v2334_v3, %v2262_v61  ;;  %v9964_v35 = vpop.f32.mrb[31].mxu0  ;;  %v17208_v37 = vld [vmem:[#allocation50_spill] sm:$0xff] }
 0x1ec   : > { %v9953_v51 = vadd.f32 %v2736_v24, %v2664_v25  ;;  %v9956_v46 = vmul.f32 %v7976_v41, %v1340_v63  ;;  %v17202_v10 = vrot.slane %v17185_v21, 1  ;;  %17203 = vst [vmem:[#allocation21_spill] sm:$0xff] %v9964_v35  ;;  %v1661_v3 = vmul.f32 %v9775_v4, %v9943_v30  ;;  %v17206_v25 = vld [vmem:[#allocation62_spill] sm:$0xff] }
 0x1ed   : > { %17198 = vst [vmem:[#allocation83_spill] sm:$0xff] %v9939_v28  ;;  %17200 = vst [vmem:[#allocation85_spill] sm:$0xff] %v9951_v48  ;;  %v2063_v61 = vmul.f32 %v9815_v54, %v9943_v30  ;;  %v9975_v24 = vmul.f32 %v9872_v60, %v17195_v34  ;;  %v17207_v14 = vrot.slane %v17206_v25, 1  ;;  %v17209_v63 = vrot.slane %v17208_v37, 1  ;;  %v17212_v25 = vld [vmem:[#allocation47_spill] sm:$0xff] }
 0x1ee   : > { %17201 = vst [vmem:[#allocation40_spill] sm:$0xff] %v9953_v51  ;;  %v1541_v62 = vsel %vm1505_vm5, %v16512_v58, %v17202_v10  ;;  %v9979_v29 = vmul.f32 %v9775_v4, %v9956_v46  ;;  %v9983_v2 = vmul.f32 %v9815_v54, %v9956_v46  ;;  %v17211_v58 = vld [vmem:[#allocation46_spill] sm:$0xff]  ;;  %v1859_v35 = vadd.f32 %v1795_v8, %v1661_v3  ;;  %v17216_v51 = vld [vmem:[#allocation52_spill] sm:$0xff] }
 0x1ef   : > { %v9967_v5 = vmul.f32 %v7993_v47, %v1541_v62  ;;  %17204 = vst [vmem:[#allocation28_spill] sm:$0xff] %v9975_v24  ;;  %v3145_v10 = vsel %vm1505_vm5, %v17209_v63, %v17207_v14  ;;  %v17210_v62 = vld [vmem:[#allocation55_spill] sm:$0xff]  ;;  %v2127_v16 = vadd.f32 %v2063_v61, %v9829_v17  ;;  %v3459_v37 = vadd.f32 %v17212_v25, %v9606_v26  ;;  %v17213_v14 = vld [vmem:[#allocation32_spill] sm:$0xff] }
 0x1f0   : > { %17205 = vst [vmem:[#allocation68_spill] sm:$0xff] %v9983_v2  ;;  %v3327_v28 = vadd.f32 %v17211_v58, %v17210_v62  ;;  %v3363_v48 = vmul.f32 %v7998_v50, %v3145_v10  ;;  %v10002_v59 = vmul.f32 %v8046_v15, %v3145_v10  ;;  %v3631_v58 = vmul.f32 %v8050_v19, %v17213_v14  ;;  %v17214_v63 = vld [vmem:[#allocation79_spill] sm:$0xff]  ;;  %v10013_v61 = vld [vmem:[%s16383_s7 + $0x8] ss:$0 sm:$0xff] }
 0x1f1   : > { %v1931_v57 = vmul.f32 %v9811_v56, %v9967_v5  ;;  %v2335_v52 = vmul.f32 %v9835_v9, %v9967_v5  ;;  %v2263_v3 = vadd.f32 %v2199_v18, %v2127_v16  ;;  %v3632_v17 = vmul.f32 %v8050_v19, %v17214_v63  ;;  %v17215_v25 = vld [vmem:[#allocation51_spill] sm:$0xff] }
 0x1f2   : > { %v3766_v62 = vmul.f32 %v10013_v61, %v3145_v10  ;;  %v10016_v26 = vadd.f32 %v3363_v48, %v3327_v28  ;;  %v3527_v2 = vadd.f32 %v17215_v25, %v3459_v37  ;;  %v3767_v14 = vmul.f32 %v10013_v61, %v17216_v51  ;;  %v17219_v18 = vld [vmem:[#allocation75_spill] sm:$0xff] }
 0x1f3   : > { %v10006_v8 = vadd.f32 %v1931_v57, %v1859_v35  ;;  %v17217_v57 = vld [vmem:[#allocation34_spill] sm:$0xff]  ;;  %v10022_v16 = vadd.f32 %v2335_v52, %v2263_v3  ;;  %v3664_v63 = vadd.f32 %v3632_v17, %v17219_v18  ;;  %v17223_v52 = vld [vmem:[#allocation29_spill] sm:$0xff]  ;;  %v17224_v3 = vld [vmem:[#allocation31_spill] sm:$0xff] }
 0x1f4   : > { %v1244_v35 = vrot.slane %v17217_v57, 7  ;;  %v10028_v55 = vmul.f32 %v9632_v1, %v17217_v57  ;;  %v3595_v28 = vadd.f32 %v9749_v39, %v3527_v2  ;;  %v10033_v48 = vmul.f32 %v9636_v38, %v17217_v57 }
 0x1f5   : > { %17218 = vst [vmem:[#allocation80_spill] sm:$0xff] %v10022_v16  ;;  %v10037_v10 = vmul.f32 %v9855_v44, %v17217_v57  ;;  %v1245_v37 = vrot.slane %v17223_v52, 7  ;;  %v3731_v17 = vadd.f32 %v17224_v3, %v3664_v63  ;;  %v10044_v18 = vmul.f32 %v9658_v22, %v17223_v52 }
 0x1f6   : > { %17220 = vst [vmem:[#allocation99_spill] sm:$0xff] %v10028_v55  ;;  %17221 = vst [vmem:[#allocation45_spill] sm:$0xff] %v10033_v48  ;;  %v10048_v39 = vmul.f32 %v9662_v23, %v17223_v52  ;;  %v3663_v2 = vadd.f32 %v3631_v58, %v3595_v28  ;;  %v10052_v27 = vmul.f32 %v9872_v60, %v17223_v52  ;;  %v17228_v48 = vld [vmem:[#allocation30_spill] sm:$0xff]  ;;  %v17230_v58 = vld [vmem:[#allocation49_spill] sm:$0xff] }
 0x1f7   : > { %17222 = vst [vmem:[#allocation60_spill] sm:$0xff] %v10037_v10  ;;  %17225 = vst [vmem:[#allocation22_spill] sm:$0xff] %v10044_v18  ;;  %v1276_v10 = vrot.slane %v17228_v48, 7  ;;  %v3799_v63 = vadd.f32 %v3767_v14, %v3731_v17  ;;  %v1798_v3 = vmul.f32 %v9632_v1, %v17228_v48  ;;  %v2202_v25 = vmul.f32 %v9636_v38, %v17228_v48 }
 0x1f8   : > { %17226 = vst [vmem:[#allocation25_spill] sm:$0xff] %v10048_v39  ;;  %17227 = vst [vmem:[#allocation27_spill] sm:$0xff] %v10052_v27  ;;  %v10062_v16 = vmul.f32 %v9855_v44, %v17228_v48  ;;  %v3730_v28 = vadd.f32 %v17230_v58, %v3663_v2  ;;  %v17232_v14 = vrot.slane %v17217_v57, 1  ;;  %v17233_v17 = vrot.slane %v17228_v48, 1 }
 0x1f9   : > { %v10067_v39 = vsel %vm1304_vm4, %v1244_v35, %v1276_v10  ;;  %v1341_v55 = vsel %vm1304_vm4, %v1276_v10, %v1244_v35  ;;  %v3837_v18 = vadd.f32 %v9433_v33, %v3799_v63  ;;  %v17236_v10 = vld [vmem:[#allocation48_spill] sm:$0xff] }
 0x1fa   : > { %17229 = vst [vmem:[#allocation61_spill] sm:$0xff] %v10062_v16  ;;  %17231 = vst [vmem:[#allocation62_spill] sm:$0xff] %v10067_v39  ;;  %v1542_v27 = vsel %vm1505_vm5, %v17233_v17, %v17232_v14  ;;  %v10079_v16 = vmul.f32 %v7976_v41, %v1341_v55  ;;  %v1664_v58 = vmul.f32 %v9668_v0, %v10067_v39  ;;  %v1277_v57 = vrot.slane %v17236_v10, 7 }
 0x1fb   : > { %v10082_v2 = vmul.f32 %v7993_v47, %v1542_v27  ;;  %v3798_v24 = vadd.f32 %v3766_v62, %v3730_v28  ;;  %v2066_v35 = vmul.f32 %v9706_v7, %v10067_v39  ;;  %v3869_v14 = vmax.f32 %v3837_v18, 0.0 }
 0x1fc   : > { %17234 = vst [vmem:[#allocation50_spill] sm:$0xff] %v10079_v16  ;;  %v10092_v63 = vmul.f32 %v9668_v0, %v10079_v16  ;;  %v1862_v55 = vadd.f32 %v1798_v3, %v1664_v58  ;;  %v10099_v62 = vmul.f32 %v9706_v7, %v10079_v16  ;;  %v10108_v39 = vsel %vm1304_vm4, %v1245_v37, %v1277_v57 }
 0x1fd   : > { %17235 = vst [vmem:[#allocation55_spill] sm:$0xff] %v10082_v2  ;;  %v1934_v27 = vmul.f32 %v9701_v40, %v10082_v2  ;;  %v3836_v17 = vadd.f32 %v9433_v33, %v3798_v24  ;;  %v2130_v28 = vadd.f32 %v2066_v35, %v9928_v12  ;;  %v2338_v48 = vmul.f32 %v9712_v32, %v10082_v2 }
 0x1fe   : > { %17237 = vst [vmem:[#allocation46_spill] sm:$0xff] %v10092_v63  ;;  %17238 = vst [vmem:[#allocation47_spill] sm:$0xff] %v10099_v62  ;;  %v1342_v3 = vsel %vm1304_vm4, %v1277_v57, %v1245_v37  ;;  %v17240_v24 = vrot.slane %v17223_v52, 1  ;;  %v17241_v58 = vrot.slane %v17236_v10, 1  ;;  %v1799_v57 = vmul.f32 %v9658_v22, %v17236_v10 }
 0x1ff   : > { %v10104_v18 = vadd.f32 %v1934_v27, %v1862_v55  ;;  %17239 = vst [vmem:[#allocation32_spill] sm:$0xff] %v10108_v39  ;;  %v3868_v12 = vmax.f32 %v3836_v17, 0.0  ;;  %v2266_v35 = vadd.f32 %v2202_v25, %v2130_v28  ;;  %v10119_v2 = vmul.f32 %v7976_v41, %v1342_v3 }
 0x200   : > { %v1543_v62 = vsel %vm1505_vm5, %v17241_v58, %v17240_v24  ;;  %v1665_v27 = vmul.f32 %v9775_v4, %v10108_v39  ;;  %v2067_v37 = vmul.f32 %v9815_v54, %v10108_v39  ;;  %v2203_v24 = vmul.f32 %v9662_v23, %v17236_v10 }
 0x201   : > { %17242 = vst [vmem:[#allocation79_spill] sm:$0xff] %v10119_v2  ;;  %v10122_v55 = vmul.f32 %v7993_v47, %v1543_v62  ;;  %v3952_v17 = vpack.c.bf16 %v3869_v14, %v3868_v12  ;;  %v10132_v25 = vadd.f32 %v2338_v48, %v2266_v35  ;;  %v10136_v28 = vmul.f32 %v9775_v4, %v10119_v2  ;;  %v17248_v14 = vld [vmem:[#allocation63_spill] sm:$0xff]  ;;  %v17250_v35 = vld [vmem:[#allocation73_spill] sm:$0xff] }
 0x202   : > { %v1863_v3 = vadd.f32 %v1799_v57, %v1665_v27  ;;  %v10142_v58 = vmul.f32 %v9815_v54, %v10119_v2  ;;  %v2131_v16 = vadd.f32 %v2067_v37, %v10006_v8  ;;  %v10150_v48 = vmul.f32 %v9872_v60, %v17236_v10  ;;  %v17252_v57 = vld [vmem:[#allocation108_spill] sm:$0xff]  ;;  %v17254_v8 = vld [vmem:[#allocation58_spill] sm:$0xff] }
 0x203   : > { %17243 = vst [vmem:[#allocation51_spill] sm:$0xff] %v10122_v55  ;;  %17244 = vst [vmem:[#allocation52_spill] sm:$0xff] %v10132_v25  ;;  %v1935_v62 = vmul.f32 %v9811_v56, %v10122_v55  ;;  %v2339_v63 = vmul.f32 %v9835_v9, %v10122_v55  ;;  %7204 = vmatmul.mubr.msk.bf16.gmra.mrb[80].mxu1 %vm3992_vm6, %v3952_v17  ;;  %v17249_v12 = vrot.slane %v17248_v14, 1  ;;  %v17251_v25 = vrot.slane %v17250_v35, 1  ;;  %v10162_v55 = vpop.f32.mrb[32].mxu0  ;;  %v17257_v35 = vld [vmem:[#allocation44_spill] sm:$0xff] }
 0x204   : > { %17245 = vst [vmem:[#allocation75_spill] sm:$0xff] %v10136_v28  ;;  %17246 = vst [vmem:[#allocation31_spill] sm:$0xff] %v10142_v58  ;;  %v17253_v58 = vld [vmem:[#allocation78_spill] sm:$0xff]  ;;  %v3461_v37 = vadd.f32 %v17254_v8, %v9755_v6  ;;  %v2267_v2 = vadd.f32 %v2203_v24, %v2131_v16  ;;  %4203 = vmatprep.mubr.bf16.mxu1 %v16925_v20  ;;  %v10170_v52 = vpop.f32.mrb[33].mxu0 }
 0x205   : > { %17247 = vst [vmem:[#allocation49_spill] sm:$0xff] %v10150_v48  ;;  %v3146_v27 = vsel %vm1505_vm5, %v17251_v25, %v17249_v12  ;;  %v3329_v39 = vadd.f32 %v17253_v58, %v17252_v57  ;;  %17255 = vst [vmem:[#allocation48_spill] sm:$0xff] %v10162_v55  ;;  %v10164_v17 = vadd.f32 %v1935_v62, %v1863_v3  ;;  %v17256_v48 = vld [vmem:[#allocation67_spill] sm:$0xff]  ;;  %v17259_v25 = vld [vmem:[#allocation41_spill] sm:$0xff]  ;;  %v10180_v24 = vpop.f32.mrb[34].mxu0 }
 0x206   : > { %v3365_v14 = vmul.f32 %v7998_v50, %v3146_v27  ;;  %v3530_v28 = vadd.f32 %v17257_v35, %v17256_v48  ;;  %17258 = vst [vmem:[#allocation63_spill] sm:$0xff] %v10170_v52  ;;  %v3529_v12 = vadd.f32 %v17259_v25, %v3461_v37  ;;  %v3566_v58 = vmul.f32 %v8046_v15, %v17216_v51  ;;  %v17260_v62 = vld [vmem:[#allocation106_spill] sm:$0xff]  ;;  %v17263_v48 = vld [vmem:[#allocation101_spill] sm:$0xff]  ;;  %v10189_v37 = vpop.f32.mrb[35].mxu0  ;;  %v17265_v35 = vld [vmem:[#allocation107_spill] sm:$0xff] }
 0x207   : > { %v10176_v6 = vmul.f32 %v8046_v15, %v3146_v27  ;;  %v3633_v16 = vmul.f32 %v8050_v19, %v17260_v62  ;;  %17261 = vst [vmem:[#allocation73_spill] sm:$0xff] %v10180_v24  ;;  %v10182_v3 = vadd.f32 %v2339_v63, %v2267_v2  ;;  %v3634_v57 = vmul.f32 %v8050_v19, %v17263_v48  ;;  %v17266_v62 = vld [vmem:[#allocation65_spill] sm:$0xff] }
 0x208   : > { %v10184_v50 = vadd.f32 %v3365_v14, %v3329_v39  ;;  %v3768_v8 = vmul.f32 %v10013_v61, %v3146_v27  ;;  %17264 = vst [vmem:[#allocation78_spill] sm:$0xff] %v10189_v37  ;;  %v3597_v51 = vadd.f32 %v10002_v59, %v3529_v12  ;;  %v3598_v15 = vadd.f32 %v3566_v58, %v3530_v28  ;;  %v17270_v14 = vld [vmem:[#allocation77_spill] sm:$0xff] }
 0x209   : > { %17262 = vst [vmem:[#allocation108_spill] sm:$0xff] %v10182_v3  ;;  %v3769_v25 = vmul.f32 %v10013_v61, %v17265_v35  ;;  %v1246_v52 = vrot.slane %v17266_v62, 7  ;;  %v10198_v39 = vmul.f32 %v9632_v1, %v17266_v62  ;;  %v10202_v63 = vmul.f32 %v9636_v38, %v17266_v62  ;;  %v17300_v3 = vld [vmem:[#allocation69_spill] sm:$0xff] }
 0x20a   : > { %v10206_v27 = vmul.f32 %v9855_v44, %v17266_v62  ;;  %v3665_v59 = vadd.f32 %v3633_v16, %v3597_v51  ;;  %v3666_v28 = vadd.f32 %v3634_v57, %v3598_v15  ;;  %v1247_v12 = vrot.slane %v17270_v14, 7  ;;  %v17275_v16 = vld [vmem:[#allocation64_spill] sm:$0xff]  ;;  %v17276_v51 = vld [vmem:[#allocation110_spill] sm:$0xff] }
 0x20b   : > { %17267 = vst [vmem:[#allocation58_spill] sm:$0xff] %v10198_v39  ;;  %17268 = vst [vmem:[#allocation67_spill] sm:$0xff] %v10202_v63  ;;  %v10212_v48 = vmul.f32 %v9658_v22, %v17270_v14  ;;  %v10216_v35 = vmul.f32 %v9662_v23, %v17270_v14  ;;  %v10220_v2 = vmul.f32 %v9872_v60, %v17270_v14  ;;  %v17274_v63 = vld [vmem:[#allocation59_spill] sm:$0xff]  ;;  %v17280_v58 = vrot.slane %v17266_v62, 1 }
 0x20c   : > { %17269 = vst [vmem:[#allocation44_spill] sm:$0xff] %v10206_v27  ;;  %v1278_v37 = vrot.slane %v17274_v63, 7  ;;  %v3732_v57 = vadd.f32 %v17275_v16, %v3665_v59  ;;  %v3733_v15 = vadd.f32 %v17276_v51, %v3666_v28  ;;  %v1802_v24 = vmul.f32 %v9632_v1, %v17274_v63 }
 0x20d   : > { %17271 = vst [vmem:[#allocation41_spill] sm:$0xff] %v10212_v48  ;;  %17272 = vst [vmem:[#allocation106_spill] sm:$0xff] %v10216_v35  ;;  %v2206_v27 = vmul.f32 %v9636_v38, %v17274_v63  ;;  %v10238_v59 = vmul.f32 %v9855_v44, %v17274_v63  ;;  %v17281_v39 = vrot.slane %v17274_v63, 1 }
 0x20e   : > { %17273 = vst [vmem:[#allocation101_spill] sm:$0xff] %v10220_v2  ;;  %v10230_v55 = vsel %vm1304_vm4, %v1246_v52, %v1278_v37  ;;  %v1343_v35 = vsel %vm1304_vm4, %v1278_v37, %v1246_v52  ;;  %v3800_v28 = vadd.f32 %v3768_v8, %v3732_v57  ;;  %v3801_v16 = vadd.f32 %v3769_v25, %v3733_v15  ;;  %v17283_v25 = vld [vmem:[#allocation81_spill] sm:$0xff] }
 0x20f   : > { %17277 = vst [vmem:[#allocation107_spill] sm:$0xff] %v10230_v55  ;;  %17278 = vst [vmem:[#allocation77_spill] sm:$0xff] %v10238_v59  ;;  %v10241_v51 = vmul.f32 %v7976_v41, %v1343_v35  ;;  %v1544_v2 = vsel %vm1505_vm5, %v17281_v39, %v17280_v58  ;;  %v1668_v37 = vmul.f32 %v9668_v0, %v10230_v55  ;;  %v1279_v57 = vrot.slane %v17283_v25, 7 }
 0x210   : > { %v10250_v52 = vmul.f32 %v7993_v47, %v1544_v2  ;;  %v2070_v8 = vmul.f32 %v9706_v7, %v10230_v55  ;;  %v3838_v35 = vadd.f32 %v9433_v33, %v3800_v28  ;;  %v3839_v15 = vadd.f32 %v9433_v33, %v3801_v16 }
 0x211   : > { %17279 = vst [vmem:[#allocation64_spill] sm:$0xff] %v10241_v51  ;;  %v10261_v59 = vmul.f32 %v9668_v0, %v10241_v51  ;;  %v10265_v2 = vmul.f32 %v9706_v7, %v10241_v51  ;;  %v1866_v39 = vadd.f32 %v1802_v24, %v1668_v37  ;;  %v10274_v33 = vsel %vm1304_vm4, %v1247_v12, %v1279_v57 }
 0x212   : > { %17282 = vst [vmem:[#allocation110_spill] sm:$0xff] %v10250_v52  ;;  %v1938_v58 = vmul.f32 %v9701_v40, %v10250_v52  ;;  %v2134_v55 = vadd.f32 %v2070_v8, %v10104_v18  ;;  %v2342_v62 = vmul.f32 %v9712_v32, %v10250_v52  ;;  %v3870_v28 = vmax.f32 %v3838_v35, 0.0  ;;  %17286 = vst [vmem:[#allocation112_spill] sm:$0xff] %v10274_v33 }
 0x213   : > { %17284 = vst [vmem:[#allocation81_spill] sm:$0xff] %v10261_v59  ;;  %17285 = vst [vmem:[#allocation111_spill] sm:$0xff] %v10265_v2  ;;  %v3871_v63 = vmax.f32 %v3839_v15, 0.0  ;;  %v1344_v16 = vsel %vm1304_vm4, %v1279_v57, %v1247_v12  ;;  %v16537_v18 = vrot.slane %v17283_v25, 1  ;;  %v1669_v35 = vmul.f32 %v9775_v4, %v10274_v33  ;;  %v17299_v59 = vld [vmem:[#allocation70_spill] sm:$0xff] }
 0x214   : > { %v10278_v51 = vadd.f32 %v1938_v58, %v1866_v39  ;;  %v2270_v24 = vadd.f32 %v2206_v27, %v2134_v55  ;;  %v10281_v37 = vmul.f32 %v7976_v41, %v1344_v16  ;;  %v1803_v15 = vmul.f32 %v9658_v22, %v17283_v25  ;;  %v17294_v16 = vld [vmem:[#allocation109_spill] sm:$0xff] }
 0x215   : > { %v3953_v8 = vpack.c.bf16 %v3871_v63, %v3870_v28  ;;  %v2071_v2 = vmul.f32 %v9815_v54, %v10274_v33  ;;  %v17289_v12 = vrot.slane %v17270_v14, 1  ;;  %v2207_v58 = vmul.f32 %v9662_v23, %v17283_v25 }
 0x216   : > { %17287 = vst [vmem:[#allocation113_spill] sm:$0xff] %v10281_v37  ;;  %v10290_v52 = vadd.f32 %v2342_v62, %v2270_v24  ;;  %v10300_v63 = vmul.f32 %v9775_v4, %v10281_v37  ;;  %v10304_v27 = vmul.f32 %v9815_v54, %v10281_v37  ;;  %v1867_v57 = vadd.f32 %v1803_v15, %v1669_v35 }
 0x217   : > { %v1545_v55 = vsel %vm1505_vm5, %v16537_v18, %v17289_v12  ;;  %7205 = vmatmul.mubr.msk.bf16.gmra.mrb[84].mxu1 %vm3992_vm6, %v3953_v8  ;;  %v2135_v39 = vadd.f32 %v2071_v2, %v10164_v17  ;;  %v10315_v28 = vmul.f32 %v9872_v60, %v17283_v25  ;;  %v3463_v24 = vadd.f32 %v17294_v16, %v10016_v26  ;;  %v17295_v12 = vld [vmem:[#allocation89_spill] sm:$0xff]  ;;  %v17296_v8 = vld [vmem:[#allocation98_spill] sm:$0xff]  ;;  %v17301_v16 = vld [vmem:[#allocation72_spill] sm:$0xff] }
 0x218   : > { %17288 = vst [vmem:[#allocation114_spill] sm:$0xff] %v10290_v52  ;;  %17290 = vst [vmem:[#allocation115_spill] sm:$0xff] %v10300_v63  ;;  %v10308_v62 = vmul.f32 %v7993_v47, %v1545_v55  ;;  %4213 = vmatprep.mubr.bf16.mxu1 %v16925_v20  ;;  %v3668_v18 = vadd.f32 %v17296_v8, %v17295_v12  ;;  %v17297_v55 = vld [vmem:[#allocation74_spill] sm:$0xff]  ;;  %v1248_v33 = vrot.slane %v17301_v16, 7  ;;  %v17312_v12 = vld [vmem:[#allocation96_spill] sm:$0xff] }
 0x219   : > { %17291 = vst [vmem:[#allocation116_spill] sm:$0xff] %v10304_v27  ;;  %17293 = vst [vmem:[#allocation118_spill] sm:$0xff] %v10315_v28  ;;  %v3770_v35 = vmul.f32 %v10013_v61, %v17297_v55  ;;  %v2271_v2 = vadd.f32 %v2207_v58, %v2135_v39  ;;  %v17298_v52 = vld [vmem:[#allocation90_spill] sm:$0xff]  ;;  %v3531_v28 = vadd.f32 %v17299_v59, %v3463_v24  ;;  %v17322_v63 = vrot.slane %v17312_v12, 1 }
 0x21a   : > { %17292 = vst [vmem:[#allocation117_spill] sm:$0xff] %v10308_v62  ;;  %v1939_v17 = vmul.f32 %v9811_v56, %v10308_v62  ;;  %v2343_v15 = vmul.f32 %v9835_v9, %v10308_v62  ;;  %v3771_v27 = vmul.f32 %v10013_v61, %v17298_v52  ;;  %v3735_v26 = vadd.f32 %v17300_v3, %v3668_v18  ;;  %v17306_v18 = vld [vmem:[#allocation84_spill] sm:$0xff] }
 0x21b   : > { %v10338_v39 = vmul.f32 %v9632_v1, %v17301_v16  ;;  %v10342_v58 = vmul.f32 %v9636_v38, %v17301_v16  ;;  %v3599_v52 = vadd.f32 %v10176_v6, %v3531_v28  ;;  %v10347_v3 = vmul.f32 %v9855_v44, %v17301_v16  ;;  %v17311_v28 = vld [vmem:[#allocation105_spill] sm:$0xff] }
 0x21c   : > { %v2003_v8 = vadd.f32 %v1939_v17, %v1867_v57  ;;  %v10334_v55 = vadd.f32 %v2343_v15, %v2271_v2  ;;  %v3803_v59 = vadd.f32 %v3771_v27, %v3735_v26  ;;  %v1249_v24 = vrot.slane %v17306_v18, 7  ;;  %v10363_v27 = vpop.f32.mrb[36].mxu0  ;;  %v10369_v26 = vld [vmem:[%s16384_s8] ss:$0 sm:$0xff] }
 0x21d   : > { %17303 = vst [vmem:[#allocation89_spill] sm:$0xff] %v10338_v39  ;;  %17304 = vst [vmem:[#allocation98_spill] sm:$0xff] %v10342_v58  ;;  %v10353_v17 = vmul.f32 %v9658_v22, %v17306_v18  ;;  %v10357_v2 = vmul.f32 %v9662_v23, %v17306_v18  ;;  %v10361_v6 = vmul.f32 %v9872_v60, %v17306_v18  ;;  %v1280_v58 = vrot.slane %v17312_v12, 7 }
 0x21e   : > { %17302 = vst [vmem:[#allocation109_spill] sm:$0xff] %v10334_v55  ;;  %17305 = vst [vmem:[#allocation74_spill] sm:$0xff] %v10347_v3  ;;  %v3667_v15 = vadd.f32 %v17311_v28, %v3599_v52  ;;  %v3841_v57 = vadd.f32 %v10369_v26, %v3803_v59  ;;  %v1806_v39 = vmul.f32 %v9632_v1, %v17312_v12  ;;  %v17315_v28 = vld [vmem:[#allocation102_spill] sm:$0xff]  ;;  %v17317_v59 = vld [vmem:[#allocation71_spill] sm:$0xff] }
 0x21f   : > { %17307 = vst [vmem:[#allocation90_spill] sm:$0xff] %v10353_v17  ;;  %17308 = vst [vmem:[#allocation70_spill] sm:$0xff] %v10357_v2  ;;  %v10374_v2 = vpop.f32.mrb[37].mxu0  ;;  %v10382_v52 = vmul.f32 %v9855_v44, %v17312_v12  ;;  %v10390_v3 = vsel %vm1304_vm4, %v1248_v33, %v1280_v58 }
 0x220   : > { %17309 = vst [vmem:[#allocation69_spill] sm:$0xff] %v10361_v6  ;;  %17310 = vst [vmem:[#allocation84_spill] sm:$0xff] %v10363_v27  ;;  %v2210_v27 = vmul.f32 %v9636_v38, %v17312_v12  ;;  %v1281_v6 = vrot.slane %v17315_v28, 7  ;;  %v10385_v55 = vpop.f32.mrb[38].mxu0  ;;  %v3734_v17 = vadd.f32 %v17317_v59, %v3667_v15  ;;  %v3873_v62 = vmax.f32 %v3841_v57, 0.0 }
 0x221   : > { %17313 = vst [vmem:[#allocation105_spill] sm:$0xff] %v10374_v2  ;;  %17314 = vst [vmem:[#allocation119_spill] sm:$0xff] %v10382_v52  ;;  %v1345_v2 = vsel %vm1304_vm4, %v1280_v58, %v1248_v33  ;;  %v10394_v37 = vpop.f32.mrb[39].mxu0  ;;  %v17321_v52 = vrot.slane %v17301_v16, 1  ;;  %v1672_v57 = vmul.f32 %v9668_v0, %v10390_v3  ;;  %v2074_v59 = vmul.f32 %v9706_v7, %v10390_v3 }
 0x222   : > { %17316 = vst [vmem:[#allocation102_spill] sm:$0xff] %v10385_v55  ;;  %17318 = vst [vmem:[#allocation71_spill] sm:$0xff] %v10390_v3  ;;  %v10397_v48 = vmul.f32 %v7976_v41, %v1345_v2  ;;  %v3802_v55 = vadd.f32 %v3770_v35, %v3734_v17  ;;  %v10414_v58 = vsel %vm1304_vm4, %v1249_v24, %v1281_v6 }
 0x223   : > { %17319 = vst [vmem:[#allocation120_spill] sm:$0xff] %v10394_v37  ;;  %v1546_v15 = vsel %vm1505_vm5, %v17322_v63, %v17321_v52  ;;  %v1346_v2 = vsel %vm1304_vm4, %v1281_v6, %v1249_v24  ;;  %v1870_v52 = vadd.f32 %v1806_v39, %v1672_v57  ;;  %v2138_v35 = vadd.f32 %v2074_v59, %v10278_v51 }
 0x224   : > { %17320 = vst [vmem:[#allocation121_spill] sm:$0xff] %v10397_v48  ;;  %v10410_v33 = vmul.f32 %v7993_v47, %v1546_v15  ;;  %v10420_v63 = vmul.f32 %v9668_v0, %v10397_v48  ;;  %v10424_v37 = vmul.f32 %v9706_v7, %v10397_v48  ;;  %v3840_v17 = vadd.f32 %v10369_v26, %v3802_v55 }
 0x225   : > { %v10433_v24 = vmul.f32 %v7976_v41, %v1346_v2  ;;  %v2274_v6 = vadd.f32 %v2210_v27, %v2138_v35  ;;  %v16548_v39 = vrot.slane %v17315_v28, 1  ;;  %v1673_v57 = vmul.f32 %v9775_v4, %v10414_v58 }
 0x226   : > { %17323 = vst [vmem:[#allocation122_spill] sm:$0xff] %v10410_v33  ;;  %17324 = vst [vmem:[#allocation123_spill] sm:$0xff] %v10420_v63  ;;  %v1942_v15 = vmul.f32 %v9701_v40, %v10410_v33  ;;  %v2346_v3 = vmul.f32 %v9712_v32, %v10410_v33  ;;  %v1807_v51 = vmul.f32 %v9658_v22, %v17315_v28  ;;  %v3872_v59 = vmax.f32 %v3840_v17, 0.0 }
 0x227   : > { %17325 = vst [vmem:[#allocation124_spill] sm:$0xff] %v10424_v37  ;;  %v10444_v37 = vmul.f32 %v9775_v4, %v10433_v24  ;;  %v10448_v2 = vmul.f32 %v9815_v54, %v10433_v24  ;;  %v17328_v35 = vrot.slane %v17306_v18, 1 }
 0x228   : > { %v10440_v55 = vadd.f32 %v1942_v15, %v1870_v52  ;;  %v10450_v27 = vadd.f32 %v2346_v3, %v2274_v6  ;;  %v1871_v17 = vadd.f32 %v1807_v51, %v1673_v57  ;;  %v2075_v52 = vmul.f32 %v9815_v54, %v10414_v58  ;;  %v17331_v57 = vld [vmem:[#allocation66_spill] sm:$0xff] }
 0x229   : > { %17326 = vst [vmem:[#allocation125_spill] sm:$0xff] %v10448_v2  ;;  %v1547_v33 = vsel %vm1505_vm5, %v16548_v39, %v17328_v35  ;;  %v3954_v15 = vpack.c.bf16 %v3873_v62, %v3872_v59  ;;  %v2211_v2 = vmul.f32 %v9662_v23, %v17315_v28  ;;  %v10467_v3 = vmul.f32 %v9872_v60, %v17315_v28  ;;  %v17330_v35 = vld [vmem:[#allocation94_spill] sm:$0xff] }
 0x22a   : > { %17327 = vst [vmem:[#allocation126_spill] sm:$0xff] %v10450_v27  ;;  %v10461_v48 = vmul.f32 %v7993_v47, %v1547_v33  ;;  %v2139_v6 = vadd.f32 %v2075_v52, %v2003_v8  ;;  %v17329_v27 = vld [vmem:[#allocation103_spill] sm:$0xff]  ;;  %v3534_v51 = vadd.f32 %v17331_v57, %v17330_v35  ;;  %v3637_v62 = vmul.f32 %v8050_v19, %v17153_v31  ;;  %v17334_v35 = vld [vmem:[#allocation104_spill] sm:$0xff] }
 0x22b   : > { %v3465_v63 = vadd.f32 %v17329_v27, %v10184_v50  ;;  %7206 = vmatmul.mubr.msk.bf16.gmra.mrb[88].mxu1 %vm3992_vm6, %v3954_v15  ;;  %v3638_v39 = vmul.f32 0.0, %v8050_v19  ;;  %v17332_v8 = vld [vmem:[#allocation19_spill] sm:$0xff]  ;;  %v17333_v50 = vld [vmem:[#allocation76_spill] sm:$0xff]  ;;  %v3772_v31 = vmul.f32 0.0, %v10013_v61  ;;  %v10489_v15 = vld [vmem:[%s16381_s5 + $0x18] ss:$0 sm:$0xff]  ;;  %v3773_v19 = vmul.f32 %v10013_v61, %v17157_v53 }
 0x22c   : > { %v1943_v33 = vmul.f32 %v9811_v56, %v10461_v48  ;;  %v2347_v59 = vmul.f32 %v9835_v9, %v10461_v48  ;;  %v3705_v52 = vmul.f32 0.0, %v17332_v8  ;;  %v2275_v16 = vadd.f32 %v2211_v2, %v2139_v6  ;;  %4223 = vmatprep.mubr.bf16.mxu1 %v16925_v20  ;;  %v17338_v8 = vld [vmem:[#allocation86_spill] sm:$0xff] }
 0x22d   : > { %v3533_v27 = vadd.f32 %v17333_v50, %v3465_v63  ;;  %v3602_v57 = vadd.f32 %v17334_v35, %v3534_v51  ;;  %v17335_v2 = vrot.slane %v17195_v34, 1  ;;  %v17336_v20 = vrot.slane %v17185_v21, 1 }
 0x22e   : > { %v10491_v12 = vadd.f32 %v1943_v33, %v1871_v17  ;;  %v1857_v6 = vadd.f32 %v9864_v45, %v9979_v29  ;;  %v10503_v51 = vadd.f32 %v2347_v59, %v2275_v16  ;;  %v1236_v17 = vld [vmem:[%s16382_s6] sm:$0x3]  ;;  %v2465_v21 = vmul.f32 %v9839_v11, %v9956_v46  ;;  %v17339_v46 = vld [vmem:[#allocation8_spill] sm:$0xff] }
 0x22f   : > { %v1509_v63 = vsel %vm1505_vm5, %v17336_v20, %v17335_v2  ;;  %v3601_v50 = vadd.f32 %v17338_v8, %v3533_v27  ;;  %v3670_v35 = vadd.f32 %v3638_v39, %v3602_v57  ;;  %v2467_v45 = vmul.f32 %v9839_v11, %v9943_v30 }
 0x230   : > { %17337 = vst [vmem:[#allocation103_spill] sm:$0xff] %v10503_v51  ;;  %v1929_v61 = vmul.f32 %v9811_v56, %v1509_v63  ;;  %v10511_v34 = vmul.f32 %v9835_v9, %v1509_v63  ;;  %v2735_v29 = vmul.f32 %v10489_v15, %v1509_v63  ;;  %v2737_v59 = vmul.f32 %v10489_v15, %v9967_v5  ;;  %v17340_v63 = vld [vmem:[#allocation93_spill] sm:$0xff]  ;;  %v17388_v51 = vld [vmem:[#allocation88_spill] sm:$0xff] }
 0x231   : > { %v3669_v16 = vadd.f32 %v3637_v62, %v3601_v50  ;;  %v3737_v33 = vadd.f32 %v3705_v52, %v3670_v35  ;;  %v2529_v27 = vadd.f32 %v2465_v21, %v9860_v43  ;;  %v2531_v57 = vadd.f32 %v2467_v45, %v9874_v13  ;;  %v17341_v35 = vld [vmem:[#allocation28_spill] sm:$0xff] }
 0x232   : > { %v10518_v39 = vadd.f32 %v1929_v61, %v1857_v6  ;;  %v10525_v2 = vrot.slane %v1236_v17, %v17152_v42  ;;  %v10528_v20 = vrot.slane %v1236_v17, %v17339_v46  ;;  %v1250_v62 = vrot.slane %v17340_v63, 7  ;;  %v17345_v61 = vld [vmem:[#allocation95_spill] sm:$0xff] }
 0x233   : > { %v3736_v30 = vadd.f32 %v3705_v52, %v3669_v16  ;;  %v3805_v8 = vadd.f32 %v3773_v19, %v3737_v33  ;;  %v2663_v50 = vadd.f32 %v9884_v49, %v2529_v27  ;;  %v2665_v5 = vadd.f32 %v17341_v35, %v2531_v57 }
 0x234   : > { %v10536_v43 = vmul.f32 %v9632_v1, %v17340_v63  ;;  %v10540_v13 = vmul.f32 %v9636_v38, %v17340_v63  ;;  %v10545_v19 = vmul.f32 %v9855_v44, %v17340_v63  ;;  %v1251_v21 = vrot.slane %v17345_v61, 7 }
 0x235   : > { %v3804_v17 = vadd.f32 %v3772_v31, %v3736_v30  ;;  %v3843_v52 = vadd.f32 %v10369_v26, %v3805_v8  ;;  %v2799_v49 = vadd.f32 %v2735_v29, %v2663_v50  ;;  %v2801_v45 = vadd.f32 %v2737_v59, %v2665_v5  ;;  %v17349_v8 = vld [vmem:[#allocation97_spill] sm:$0xff]  ;;  %v10566_v5 = vpop.f32.mrb[40].mxu0 }
 0x236   : > { %17342 = vst [vmem:[#allocation94_spill] sm:$0xff] %v10536_v43  ;;  %17343 = vst [vmem:[#allocation66_spill] sm:$0xff] %v10540_v13  ;;  %v10551_v33 = vmul.f32 %v9658_v22, %v17345_v61  ;;  %v10556_v31 = vmul.f32 %v9662_v23, %v17345_v61  ;;  %v10560_v30 = vmul.f32 %v9872_v60, %v17345_v61  ;;  %v1282_v50 = vrot.slane %v17349_v8, 7 }
 0x237   : > { %17344 = vst [vmem:[#allocation19_spill] sm:$0xff] %v10545_v19  ;;  %v3842_v27 = vadd.f32 %v10369_v26, %v3804_v17  ;;  %v3875_v57 = vmax.f32 %v3843_v52, 0.0  ;;  %v2874_v29 = vadd.f32 %v10528_v20, %v2799_v49  ;;  %v2876_v59 = vadd.f32 %v10528_v20, %v2801_v45  ;;  %17350 = vst [vmem:[#allocation28_spill] sm:$0xff] %v10566_v5  ;;  %v10576_v49 = vpop.f32.mrb[41].mxu0 }
 0x238   : > { %17346 = vst [vmem:[#allocation76_spill] sm:$0xff] %v10551_v33  ;;  %17347 = vst [vmem:[#allocation104_spill] sm:$0xff] %v10556_v31  ;;  %v1810_v17 = vmul.f32 %v9632_v1, %v17349_v8  ;;  %v2214_v52 = vmul.f32 %v9636_v38, %v17349_v8  ;;  %v10574_v16 = vmul.f32 %v9855_v44, %v17349_v8  ;;  %v10584_v46 = vpop.f32.mrb[42].mxu0  ;;  %v17356_v13 = vrot.slane %v17340_v63, 1  ;;  %v17378_v63 = vld [vmem:[#allocation38_spill] sm:$0xff] }
 0x239   : > { %17348 = vst [vmem:[#allocation86_spill] sm:$0xff] %v10560_v30  ;;  %v3874_v26 = vmax.f32 %v3842_v27, 0.0  ;;  %17352 = vst [vmem:[#allocation127_spill] sm:$0xff] %v10576_v49  ;;  %v2938_v45 = vmax.f32 %v2874_v29, 0.0  ;;  %v2940_v6 = vmax.f32 %v2876_v59, 0.0  ;;  %v10580_v35 = vsel %vm1304_vm4, %v1250_v62, %v1282_v50  ;;  %v10597_v49 = vpop.f32.mrb[43].mxu0 }
 0x23a   : > { %17351 = vst [vmem:[#allocation95_spill] sm:$0xff] %v10574_v16  ;;  %17353 = vst [vmem:[#allocation128_spill] sm:$0xff] %v10580_v35  ;;  %v1347_v27 = vsel %vm1304_vm4, %v1282_v50, %v1250_v62  ;;  %v17357_v5 = vrot.slane %v17349_v8, 1  ;;  %v1676_v59 = vmul.f32 %v9668_v0, %v10580_v35  ;;  %v17360_v50 = vld [vmem:[#allocation26_spill] sm:$0xff]  ;;  %v17379_v8 = vld [vmem:[#allocation68_spill] sm:$0xff]  ;;  %v17435_v33 = vrot.slane %v17283_v25, 1 }
 0x23b   : > { %17354 = vst [vmem:[#allocation129_spill] sm:$0xff] %v10584_v46  ;;  %v3955_v42 = vpack.c.bf16 %v3875_v57, %v3874_v26  ;;  %v10587_v53 = vmul.f32 %v7976_v41, %v1347_v27  ;;  %17358 = vst [vmem:[#allocation131_spill] sm:$0xff] %v10597_v49  ;;  %v3877_v31 = vpack.c.bf16 %v2940_v6, %v2938_v45  ;;  %v1283_v26 = vrot.slane %v17360_v50, 7 }
 0x23c   : > { %v1548_v29 = vsel %vm1505_vm5, %v17357_v5, %v17356_v13  ;;  %v2078_v57 = vmul.f32 %v9706_v7, %v10580_v35  ;;  %v1874_v13 = vadd.f32 %v1810_v17, %v1676_v59  ;;  %v16558_v6 = vrot.slane %v17360_v50, 1 }
 0x23d   : > { %17355 = vst [vmem:[#allocation130_spill] sm:$0xff] %v10587_v53  ;;  %v10600_v62 = vmul.f32 %v7993_v47, %v1548_v29  ;;  %7207 = vmatmul.mubr.msk.bf16.gmra.mrb[92].mxu1 %vm3992_vm6, %v3955_v42  ;;  %v10608_v27 = vmul.f32 %v9668_v0, %v10587_v53  ;;  %v10612_v5 = vmul.f32 %v9706_v7, %v10587_v53  ;;  %v17364_v59 = vrot.slane %v17345_v61, 1  ;;  %v17374_v53 = vld [vmem:[#allocation29_spill] sm:$0xff] }
 0x23e   : > { %4426 = vmatprep.mubr.bf16.mxu1 %v3877_v31  ;;  %v2142_v29 = vadd.f32 %v2078_v57, %v10440_v55  ;;  %v10622_v49 = vsel %vm1304_vm4, %v1251_v21, %v1283_v26  ;;  %v1348_v17 = vsel %vm1304_vm4, %v1283_v26, %v1251_v21  ;;  %v1811_v57 = vmul.f32 %v9658_v22, %v17360_v50 }
 0x23f   : > { %17359 = vst [vmem:[#allocation132_spill] sm:$0xff] %v10600_v62  ;;  %17361 = vst [vmem:[#allocation26_spill] sm:$0xff] %v10608_v27  ;;  %v1946_v45 = vmul.f32 %v9701_v40, %v10600_v62  ;;  %v2350_v42 = vmul.f32 %v9712_v32, %v10600_v62  ;;  %v1549_v31 = vsel %vm1505_vm5, %v16558_v6, %v17364_v59  ;;  %v17373_v35 = vrot.slane %v17236_v10, 1  ;;  %v17376_v27 = vld [vmem:[#allocation75_spill] sm:$0xff] }
 0x240   : > { %17362 = vst [vmem:[#allocation133_spill] sm:$0xff] %v10612_v5  ;;  %17363 = vst [vmem:[#allocation134_spill] sm:$0xff] %v10622_v49  ;;  %v1677_v55 = vmul.f32 %v9775_v4, %v10622_v49  ;;  %v2278_v46 = vadd.f32 %v2214_v52, %v2142_v29  ;;  %v10639_v19 = vmul.f32 %v7976_v41, %v1348_v17  ;;  %v17375_v43 = vrot.slane %v17374_v53, 1  ;;  %v17382_v53 = vld [vmem:[#allocation79_spill] sm:$0xff] }
 0x241   : > { %v10636_v5 = vadd.f32 %v1946_v45, %v1874_v13  ;;  %v10642_v21 = vmul.f32 %v7993_v47, %v1549_v31  ;;  %v2079_v16 = vmul.f32 %v9815_v54, %v10622_v49  ;;  %v2215_v59 = vmul.f32 %v9662_v23, %v17360_v50 }
 0x242   : > { %17365 = vst [vmem:[#allocation135_spill] sm:$0xff] %v10639_v19  ;;  %v1875_v26 = vadd.f32 %v1811_v57, %v1677_v55  ;;  %v10650_v6 = vmul.f32 %v9872_v60, %v17360_v50  ;;  %v10652_v13 = vadd.f32 %v2350_v42, %v2278_v46  ;;  %v10656_v52 = vmul.f32 %v9775_v4, %v10639_v19  ;;  %v17370_v55 = vld [vmem:[#allocation87_spill] sm:$0xff]  ;;  %v17371_v57 = vld [vmem:[#allocation57_spill] sm:$0xff]  ;;  %v17372_v42 = vld [vmem:[#allocation40_spill] sm:$0xff] }
 0x243   : > { %17366 = vst [vmem:[#allocation136_spill] sm:$0xff] %v10642_v21  ;;  %v1947_v45 = vmul.f32 %v9811_v56, %v10642_v21  ;;  %v10662_v29 = vmul.f32 %v9815_v54, %v10639_v19  ;;  %v2143_v17 = vadd.f32 %v2079_v16, %v10491_v12  ;;  %v2351_v31 = vmul.f32 %v9835_v9, %v10642_v21  ;;  %v17377_v12 = vld [vmem:[#allocation22_spill] sm:$0xff] }
 0x244   : > { %17367 = vst [vmem:[#allocation137_spill] sm:$0xff] %v10650_v6  ;;  %17368 = vst [vmem:[#allocation138_spill] sm:$0xff] %v10652_v13  ;;  %v2528_v46 = vadd.f32 %v17371_v57, %v17370_v55  ;;  %v2875_v13 = vadd.f32 %v10525_v2, %v17372_v42  ;;  %v1861_v16 = vadd.f32 %v17377_v12, %v17376_v27  ;;  %v17380_v55 = vld [vmem:[#allocation53_spill] sm:$0xff] }
 0x245   : > { %17369 = vst [vmem:[#allocation139_spill] sm:$0xff] %v10662_v29  ;;  %v10671_v62 = vadd.f32 %v1947_v45, %v1875_v26  ;;  %v1511_v29 = vsel %vm1505_vm5, %v17375_v43, %v17373_v35  ;;  %v2125_v30 = vadd.f32 %v17379_v8, %v17378_v63  ;;  %v2279_v6 = vadd.f32 %v2215_v59, %v2143_v17  ;;  %v17381_v45 = vld [vmem:[#allocation39_spill] sm:$0xff]  ;;  %v17383_v35 = vld [vmem:[#allocation32_spill] sm:$0xff] }
 0x246   : > { %v2662_v57 = vadd.f32 %v17380_v55, %v2528_v46  ;;  %v2939_v21 = vmax.f32 %v2875_v13, 0.0  ;;  %v1933_v26 = vmul.f32 %v9811_v56, %v1511_v29  ;;  %v10687_v10 = vmul.f32 %v9835_v9, %v1511_v29  ;;  %v17385_v63 = vld [vmem:[#allocation24_spill] sm:$0xff]  ;;  %v17387_v55 = vld [vmem:[#allocation51_spill] sm:$0xff] }
 0x247   : > { %v2261_v42 = vadd.f32 %v17381_v45, %v2125_v30  ;;  %v2469_v43 = vmul.f32 %v9839_v11, %v17382_v53  ;;  %v2471_v27 = vmul.f32 %v9839_v11, %v17383_v35  ;;  %v10693_v12 = vadd.f32 %v2351_v31, %v2279_v6  ;;  %v17386_v30 = vld [vmem:[#allocation80_spill] sm:$0xff] }
 0x248   : > { %v2798_v8 = vadd.f32 %v17385_v63, %v2662_v57  ;;  %v10696_v59 = vadd.f32 %v1933_v26, %v1861_v16  ;;  %v2739_v13 = vmul.f32 %v10489_v15, %v1511_v29  ;;  %v2741_v45 = vmul.f32 %v10489_v15, %v17387_v55  ;;  %v17391_v16 = vld [vmem:[#allocation49_spill] sm:$0xff] }
 0x249   : > { %17384 = vst [vmem:[#allocation87_spill] sm:$0xff] %v10693_v12  ;;  %v2397_v17 = vadd.f32 %v10511_v34, %v2261_v42  ;;  %v2535_v46 = vadd.f32 %v2471_v27, %v17386_v30  ;;  %v1252_v53 = vrot.slane %v17388_v51, 7  ;;  %v10708_v31 = vmul.f32 %v9632_v1, %v17388_v51  ;;  %v17393_v42 = vld [vmem:[#allocation43_spill] sm:$0xff]  ;;  %v17429_v12 = vld [vmem:[#allocation92_spill] sm:$0xff] }
 0x24a   : > { %v2873_v49 = vadd.f32 %v10525_v2, %v2798_v8  ;;  %v10712_v29 = vmul.f32 %v9636_v38, %v17388_v51  ;;  %v10717_v26 = vmul.f32 %v9855_v44, %v17388_v51  ;;  %v1253_v35 = vrot.slane %v17393_v42, 7 }
 0x24b   : > { %17389 = vst [vmem:[#allocation57_spill] sm:$0xff] %v10708_v31  ;;  %v2533_v34 = vadd.f32 %v2469_v43, %v2397_v17  ;;  %v2669_v57 = vadd.f32 %v17391_v16, %v2535_v46  ;;  %v10723_v8 = vmul.f32 %v9658_v22, %v17393_v42  ;;  %v10727_v30 = vmul.f32 %v9662_v23, %v17393_v42  ;;  %v17396_v43 = vld [vmem:[#allocation27_spill] sm:$0xff] }
 0x24c   : > { %17390 = vst [vmem:[#allocation40_spill] sm:$0xff] %v10712_v29  ;;  %17392 = vst [vmem:[#allocation29_spill] sm:$0xff] %v10717_v26  ;;  %v2937_v27 = vmax.f32 %v2873_v49, 0.0  ;;  %v10732_v55 = vmul.f32 %v9872_v60, %v17393_v42  ;;  %v17398_v16 = vld [vmem:[#allocation35_spill] sm:$0xff] }
 0x24d   : > { %17394 = vst [vmem:[#allocation75_spill] sm:$0xff] %v10723_v8  ;;  %17395 = vst [vmem:[#allocation22_spill] sm:$0xff] %v10727_v30  ;;  %v2667_v17 = vadd.f32 %v17396_v43, %v2533_v34  ;;  %v2805_v46 = vadd.f32 %v2741_v45, %v2669_v57  ;;  %v1284_v6 = vrot.slane %v17398_v16, 7  ;;  %v16566_v63 = vrot.slane %v17398_v16, 1 }
 0x24e   : > { %17397 = vst [vmem:[#allocation38_spill] sm:$0xff] %v10732_v55  ;;  %v3876_v49 = vpack.c.bf16 %v2939_v21, %v2937_v27  ;;  %v1814_v29 = vmul.f32 %v9632_v1, %v17398_v16  ;;  %v2218_v26 = vmul.f32 %v9636_v38, %v17398_v16  ;;  %v17401_v57 = vrot.slane %v17388_v51, 1  ;;  %v17426_v55 = vld [vmem:[#allocation91_spill] sm:$0xff] }
 0x24f   : > { %v2803_v31 = vadd.f32 %v2739_v13, %v2667_v17  ;;  %v2880_v30 = vadd.f32 %v10528_v20, %v2805_v46  ;;  %v10743_v45 = vsel %vm1304_vm4, %v1252_v53, %v1284_v6  ;;  %v1349_v34 = vsel %vm1304_vm4, %v1284_v6, %v1252_v53 }
 0x250   : > { %17399 = vst [vmem:[#allocation68_spill] sm:$0xff] %v10743_v45  ;;  %4427 = vmatmul.mubr.bf16.vlgmr.msra.gmra.mrb[32].mxu1 %v3876_v49  ;;  %v10748_v21 = vmul.f32 %v7976_v41, %v1349_v34  ;;  %v1550_v13 = vsel %vm1505_vm5, %v16566_v63, %v17401_v57  ;;  %v1680_v27 = vmul.f32 %v9668_v0, %v10743_v45  ;;  %v10768_v49 = vpop.f32.mrb[44].mxu0 }
 0x251   : > { %v2082_v43 = vmul.f32 %v9706_v7, %v10743_v45  ;;  %v2878_v17 = vadd.f32 %v10528_v20, %v2803_v31  ;;  %v2944_v53 = vmax.f32 %v2880_v30, 0.0  ;;  %v10762_v6 = vmul.f32 %v7993_v47, %v1550_v13  ;;  %17404 = vst [vmem:[#allocation32_spill] sm:$0xff] %v10768_v49  ;;  %v10779_v30 = vpop.f32.mrb[45].mxu0 }
 0x252   : > { %17400 = vst [vmem:[#allocation53_spill] sm:$0xff] %v10748_v21  ;;  %v10766_v46 = vmul.f32 %v9855_v44, %v17398_v16  ;;  %v10772_v34 = vmul.f32 %v9668_v0, %v10748_v21  ;;  %v1878_v57 = vadd.f32 %v1814_v29, %v1680_v27  ;;  %v10776_v63 = vmul.f32 %v9706_v7, %v10748_v21  ;;  %v10786_v16 = vpop.f32.mrb[46].mxu0 }
 0x253   : > { %17402 = vst [vmem:[#allocation39_spill] sm:$0xff] %v10762_v6  ;;  %v2146_v31 = vadd.f32 %v2082_v43, %v10636_v5  ;;  %17407 = vst [vmem:[#allocation51_spill] sm:$0xff] %v10779_v30  ;;  %v2942_v13 = vmax.f32 %v2878_v17, 0.0  ;;  %v1950_v45 = vmul.f32 %v9701_v40, %v10762_v6  ;;  %v2354_v49 = vmul.f32 %v9712_v32, %v10762_v6  ;;  %v10793_v43 = vpop.f32.mrb[47].mxu0 }
 0x254   : > { %17403 = vst [vmem:[#allocation79_spill] sm:$0xff] %v10766_v46  ;;  %17405 = vst [vmem:[#allocation24_spill] sm:$0xff] %v10772_v34  ;;  %v17408_v46 = vld [vmem:[#allocation54_spill] sm:$0xff] }
 0x255   : > { %17406 = vst [vmem:[#allocation80_spill] sm:$0xff] %v10776_v63  ;;  %v1285_v51 = vrot.slane %v17408_v46, 7  ;;  %17409 = vst [vmem:[#allocation49_spill] sm:$0xff] %v10786_v16  ;;  %v2282_v29 = vadd.f32 %v2218_v26, %v2146_v31  ;;  %v1815_v63 = vmul.f32 %v9658_v22, %v17408_v46  ;;  %v2219_v5 = vmul.f32 %v9662_v23, %v17408_v46 }
 0x256   : > { %17410 = vst [vmem:[#allocation27_spill] sm:$0xff] %v10793_v43  ;;  %v3879_v17 = vpack.c.bf16 %v2944_v53, %v2942_v13  ;;  %v10795_v30 = vadd.f32 %v1950_v45, %v1878_v57  ;;  %v17414_v16 = vrot.slane %v17393_v42, 1  ;;  %v17415_v21 = vrot.slane %v17408_v46, 1  ;;  %v17425_v43 = vld [vmem:[#allocation99_spill] sm:$0xff] }
 0x257   : > { %v10799_v6 = vsel %vm1304_vm4, %v1253_v35, %v1285_v51  ;;  %v1350_v26 = vsel %vm1304_vm4, %v1285_v51, %v1253_v35  ;;  %v10803_v31 = vadd.f32 %v2354_v49, %v2282_v29  ;;  %v10823_v35 = vmul.f32 %v9872_v60, %v17408_v46  ;;  %v17418_v49 = vld [vmem:[#allocation30_spill] sm:$0xff]  ;;  %v17433_v46 = vld [vmem:[#allocation85_spill] sm:$0xff] }
 0x258   : > { %17411 = vst [vmem:[#allocation140_spill] sm:$0xff] %v10799_v6  ;;  %v10806_v27 = vmul.f32 %v7976_v41, %v1350_v26  ;;  %v1551_v45 = vsel %vm1505_vm5, %v17415_v21, %v17414_v16  ;;  %v1681_v53 = vmul.f32 %v9775_v4, %v10799_v6  ;;  %4436 = vmatprep.mubr.bf16.mxu1 %v3879_v17  ;;  %v17419_v13 = vrot.slane %v17418_v49, 1  ;;  %v17420_v29 = vld [vmem:[#allocation34_spill] sm:$0xff] }
 0x259   : > { %17412 = vst [vmem:[#allocation141_spill] sm:$0xff] %v10803_v31  ;;  %v10817_v57 = vmul.f32 %v7993_v47, %v1551_v45  ;;  %v2083_v51 = vmul.f32 %v9815_v54, %v10799_v6  ;;  %17417 = vst [vmem:[#allocation144_spill] sm:$0xff] %v10823_v35  ;;  %v17421_v26 = vrot.slane %v17420_v29, 1  ;;  %v17424_v31 = vld [vmem:[#allocation46_spill] sm:$0xff]  ;;  %v17427_v35 = vld [vmem:[#allocation56_spill] sm:$0xff] }
 0x25a   : > { %17413 = vst [vmem:[#allocation142_spill] sm:$0xff] %v10806_v27  ;;  %v10833_v21 = vmul.f32 %v9775_v4, %v10806_v27  ;;  %v1879_v17 = vadd.f32 %v1815_v63, %v1681_v53  ;;  %v10837_v45 = vmul.f32 %v9815_v54, %v10806_v27  ;;  %v1860_v34 = vadd.f32 %v17425_v43, %v17424_v31  ;;  %v17430_v43 = vld [vmem:[#allocation62_spill] sm:$0xff] }
 0x25b   : > { %17416 = vst [vmem:[#allocation143_spill] sm:$0xff] %v10817_v57  ;;  %v1510_v16 = vsel %vm1505_vm5, %v17421_v26, %v17419_v13  ;;  %v1951_v49 = vmul.f32 %v9811_v56, %v10817_v57  ;;  %v2147_v29 = vadd.f32 %v2083_v51, %v10671_v62  ;;  %v2355_v13 = vmul.f32 %v9835_v9, %v10817_v57  ;;  %v17431_v57 = vld [vmem:[#allocation100_spill] sm:$0xff] }
 0x25c   : > { %17422 = vst [vmem:[#allocation30_spill] sm:$0xff] %v10833_v21  ;;  %17423 = vst [vmem:[#allocation34_spill] sm:$0xff] %v10837_v45  ;;  %v1932_v26 = vmul.f32 %v9701_v40, %v1510_v16  ;;  %v2124_v63 = vadd.f32 %v17427_v35, %v17426_v55  ;;  %v10850_v53 = vmul.f32 %v9712_v32, %v1510_v16  ;;  %v17428_v45 = vld [vmem:[#allocation50_spill] sm:$0xff]  ;;  %v17432_v21 = vld [vmem:[#allocation33_spill] sm:$0xff] }
 0x25d   : > { %v2468_v6 = vmul.f32 %v17429_v12, %v17428_v45  ;;  %v2470_v31 = vmul.f32 %v17429_v12, %v17430_v43  ;;  %v10856_v27 = vadd.f32 %v1951_v49, %v1879_v17  ;;  %v2283_v62 = vadd.f32 %v2219_v5, %v2147_v29  ;;  %v17434_v35 = vld [vmem:[#allocation55_spill] sm:$0xff]  ;;  %v17439_v5 = vld [vmem:[#allocation41_spill] sm:$0xff] }
 0x25e   : > { %v10858_v51 = vadd.f32 %v1932_v26, %v1860_v34  ;;  %v2738_v8 = vmul.f32 %v17431_v57, %v1510_v16  ;;  %v2260_v42 = vadd.f32 %v17432_v21, %v2124_v63  ;;  %v2740_v19 = vmul.f32 %v17431_v57, %v17434_v35  ;;  %v17438_v34 = vld [vmem:[#allocation115_spill] sm:$0xff]  ;;  %v17442_v57 = vld [vmem:[#allocation61_spill] sm:$0xff]  ;;  %v17445_v35 = vld [vmem:[#allocation112_spill] sm:$0xff] }
 0x25f   : > { %v2534_v55 = vadd.f32 %v2470_v31, %v17433_v46  ;;  %v17436_v45 = vrot.slane %v17270_v14, 1  ;;  %v10871_v49 = vadd.f32 %v2355_v13, %v2283_v62  ;;  %v1865_v29 = vadd.f32 %v17439_v5, %v17438_v34  ;;  %v17440_v21 = vld [vmem:[#allocation31_spill] sm:$0xff]  ;;  %v17443_v14 = vld [vmem:[#allocation113_spill] sm:$0xff] }
 0x260   : > { %v2129_v46 = vadd.f32 %v17440_v21, %v10518_v39  ;;  %v17441_v26 = vld [vmem:[#allocation23_spill] sm:$0xff]  ;;  %v17444_v31 = vld [vmem:[#allocation25_spill] sm:$0xff]  ;;  %v17447_v21 = vld [vmem:[#allocation82_spill] sm:$0xff] }
 0x261   : > { %v1513_v17 = vsel %vm1505_vm5, %v17436_v45, %v17435_v33  ;;  %17437 = vst [vmem:[#allocation46_spill] sm:$0xff] %v10871_v49  ;;  %v2396_v63 = vadd.f32 %v17441_v26, %v2260_v42  ;;  %v2668_v43 = vadd.f32 %v17442_v57, %v2534_v55  ;;  %v2473_v33 = vmul.f32 %v9839_v11, %v17443_v14  ;;  %v17446_v42 = vld [vmem:[#allocation117_spill] sm:$0xff]  ;;  %v17448_v49 = vld [vmem:[#allocation108_spill] sm:$0xff] }
 0x262   : > { %v1937_v16 = vmul.f32 %v9811_v56, %v1513_v17  ;;  %v10881_v25 = vmul.f32 %v9835_v9, %v1513_v17  ;;  %v2265_v62 = vadd.f32 %v17444_v31, %v2129_v46  ;;  %v2475_v45 = vmul.f32 %v9839_v11, %v17445_v35  ;;  %v17450_v46 = vld [vmem:[#allocation60_spill] sm:$0xff] }
 0x263   : > { %v2743_v34 = vmul.f32 %v10489_v15, %v1513_v17  ;;  %v2532_v39 = vadd.f32 %v2468_v6, %v2396_v63  ;;  %v2804_v5 = vadd.f32 %v2740_v19, %v2668_v43  ;;  %v2745_v55 = vmul.f32 %v10489_v15, %v17446_v42  ;;  %v17454_v43 = vld [vmem:[#allocation20_spill] sm:$0xff] }
 0x264   : > { %v10885_v13 = vadd.f32 %v1937_v16, %v1865_v29  ;;  %v1254_v26 = vrot.slane %v17447_v21, 7  ;;  %v2401_v57 = vadd.f32 %v10687_v10, %v2265_v62  ;;  %v2539_v14 = vadd.f32 %v2475_v45, %v17448_v49  ;;  %v17453_v49 = vld [vmem:[#allocation118_spill] sm:$0xff] }
 0x265   : > { %v10899_v16 = vmul.f32 %v9632_v1, %v17447_v21  ;;  %v2666_v31 = vadd.f32 %v17450_v46, %v2532_v39  ;;  %v2879_v6 = vadd.f32 %v10525_v2, %v2804_v5  ;;  %v10905_v19 = vmul.f32 %v9636_v38, %v17447_v21  ;;  %v17457_v46 = vld [vmem:[#allocation101_spill] sm:$0xff] }
 0x266   : > { %v10909_v17 = vmul.f32 %v9855_v44, %v17447_v21  ;;  %v2537_v10 = vadd.f32 %v2473_v33, %v2401_v57  ;;  %v2673_v63 = vadd.f32 %v17453_v49, %v2539_v14  ;;  %v1255_v62 = vrot.slane %v17454_v43, 7  ;;  %v17459_v57 = vld [vmem:[#allocation36_spill] sm:$0xff] }
 0x267   : > { %17449 = vst [vmem:[#allocation99_spill] sm:$0xff] %v10899_v16  ;;  %17451 = vst [vmem:[#allocation91_spill] sm:$0xff] %v10905_v19  ;;  %v2802_v45 = vadd.f32 %v2738_v8, %v2666_v31  ;;  %v2943_v42 = vmax.f32 %v2879_v6, 0.0  ;;  %v10916_v39 = vmul.f32 %v9658_v22, %v17454_v43  ;;  %v10920_v5 = vmul.f32 %v9662_v23, %v17454_v43 }
 0x268   : > { %17452 = vst [vmem:[#allocation56_spill] sm:$0xff] %v10909_v17  ;;  %v2671_v29 = vadd.f32 %v17457_v46, %v2537_v10  ;;  %v2809_v19 = vadd.f32 %v2745_v55, %v2673_v63  ;;  %v10925_v33 = vmul.f32 %v9872_v60, %v17454_v43  ;;  %v1286_v14 = vrot.slane %v17459_v57, 7 }
 0x269   : > { %17455 = vst [vmem:[#allocation50_spill] sm:$0xff] %v10916_v39  ;;  %17456 = vst [vmem:[#allocation92_spill] sm:$0xff] %v10920_v5  ;;  %v2877_v8 = vadd.f32 %v10525_v2, %v2802_v45  ;;  %v1818_v6 = vmul.f32 %v9632_v1, %v17459_v57  ;;  %v2222_v49 = vmul.f32 %v9636_v38, %v17459_v57  ;;  %v17462_v31 = vrot.slane %v17447_v21, 1 }
 0x26a   : > { %17458 = vst [vmem:[#allocation62_spill] sm:$0xff] %v10925_v33  ;;  %v2807_v35 = vadd.f32 %v2743_v34, %v2671_v29  ;;  %v2884_v10 = vadd.f32 %v10528_v20, %v2809_v19  ;;  %v10937_v55 = vsel %vm1304_vm4, %v1254_v26, %v1286_v14  ;;  %v1351_v63 = vsel %vm1304_vm4, %v1286_v14, %v1254_v26 }
 0x26b   : > { %17460 = vst [vmem:[#allocation100_spill] sm:$0xff] %v10937_v55  ;;  %v2941_v46 = vmax.f32 %v2877_v8, 0.0  ;;  %v10942_v45 = vmul.f32 %v7976_v41, %v1351_v63  ;;  %v17463_v5 = vrot.slane %v17459_v57, 1  ;;  %v1684_v29 = vmul.f32 %v9668_v0, %v10937_v55 }
 0x26c   : > { %v2882_v19 = vadd.f32 %v10528_v20, %v2807_v35  ;;  %v2948_v17 = vmax.f32 %v2884_v10, 0.0  ;;  %v2086_v26 = vmul.f32 %v9706_v7, %v10937_v55 }
 0x26d   : > { %17461 = vst [vmem:[#allocation33_spill] sm:$0xff] %v10942_v45  ;;  %v1552_v34 = vsel %vm1505_vm5, %v17463_v5, %v17462_v31  ;;  %v3878_v14 = vpack.c.bf16 %v2943_v42, %v2941_v46  ;;  %v10960_v8 = vmul.f32 %v9668_v0, %v10942_v45  ;;  %v1882_v63 = vadd.f32 %v1818_v6, %v1684_v29  ;;  %v10966_v31 = vpop.f32.mrb[48].mxu0  ;;  %v17470_v29 = vld [vmem:[#allocation21_spill] sm:$0xff] }
 0x26e   : > { %v10954_v16 = vmul.f32 %v7993_v47, %v1552_v34  ;;  %v10964_v5 = vmul.f32 %v9706_v7, %v10942_v45  ;;  %17467 = vst [vmem:[#allocation41_spill] sm:$0xff] %v10966_v31  ;;  %v2946_v35 = vmax.f32 %v2882_v19, 0.0  ;;  %v2150_v34 = vadd.f32 %v2086_v26, %v10795_v30  ;;  %v10973_v46 = vpop.f32.mrb[49].mxu0 }
 0x26f   : > { %17465 = vst [vmem:[#allocation55_spill] sm:$0xff] %v10960_v8  ;;  %17468 = vst [vmem:[#allocation31_spill] sm:$0xff] %v10973_v46  ;;  %4437 = vmatmul.mubr.bf16.gmra.mrb[36].mxu1 %v3878_v14  ;;  %v10977_v6 = vmul.f32 %v9855_v44, %v17459_v57  ;;  %v1819_v19 = vmul.f32 %v9658_v22, %v17470_v29  ;;  %v10983_v55 = vpop.f32.mrb[50].mxu0  ;;  %v2223_v14 = vmul.f32 %v9662_v23, %v17470_v29  ;;  %v17487_v8 = vld [vmem:[#allocation47_spill] sm:$0xff] }
 0x270   : > { %17464 = vst [vmem:[#allocation85_spill] sm:$0xff] %v10954_v16  ;;  %17466 = vst [vmem:[#allocation115_spill] sm:$0xff] %v10964_v5  ;;  %v1954_v10 = vmul.f32 %v9701_v40, %v10954_v16  ;;  %v2358_v42 = vmul.f32 %v9712_v32, %v10954_v16  ;;  %v1287_v5 = vrot.slane %v17470_v29, 7  ;;  %v3881_v30 = vpack.c.bf16 %v2948_v17, %v2946_v35  ;;  %v10989_v46 = vpop.f32.mrb[51].mxu0 }
 0x271   : > { %17469 = vst [vmem:[#allocation23_spill] sm:$0xff] %v10977_v6  ;;  %17471 = vst [vmem:[#allocation61_spill] sm:$0xff] %v10983_v55  ;;  %v2286_v16 = vadd.f32 %v2222_v49, %v2150_v34  ;;  %v17474_v45 = vrot.slane %v17454_v43, 1  ;;  %v17475_v55 = vrot.slane %v17470_v29, 1  ;;  %v11005_v49 = vmul.f32 %v9872_v60, %v17470_v29  ;;  %v17482_v34 = vld [vmem:[#allocation65_spill] sm:$0xff] }
 0x272   : > { %v10985_v26 = vadd.f32 %v1954_v10, %v1882_v63  ;;  %17472 = vst [vmem:[#allocation113_spill] sm:$0xff] %v10989_v46  ;;  %v10993_v6 = vsel %vm1304_vm4, %v1255_v62, %v1287_v5  ;;  %v1352_v31 = vsel %vm1304_vm4, %v1287_v5, %v1255_v62  ;;  %4446 = vmatprep.mubr.bf16.mxu1 %v3881_v30  ;;  %v17483_v46 = vrot.slane %v17482_v34, 1  ;;  %v17485_v30 = vld [vmem:[#allocation58_spill] sm:$0xff] }
 0x273   : > { %17473 = vst [vmem:[#allocation25_spill] sm:$0xff] %v10993_v6  ;;  %v1553_v17 = vsel %vm1505_vm5, %v17475_v55, %v17474_v45  ;;  %17476 = vst [vmem:[#allocation112_spill] sm:$0xff] %v11005_v49  ;;  %v11007_v63 = vadd.f32 %v2358_v42, %v2286_v16  ;;  %v11010_v35 = vmul.f32 %v7976_v41, %v1352_v31  ;;  %v17480_v55 = vld [vmem:[#allocation59_spill] sm:$0xff]  ;;  %v17484_v42 = vld [vmem:[#allocation81_spill] sm:$0xff] }
 0x274   : > { %v11013_v10 = vmul.f32 %v7993_v47, %v1553_v17  ;;  %v1685_v62 = vmul.f32 %v9775_v4, %v10993_v6  ;;  %v2087_v5 = vmul.f32 %v9815_v54, %v10993_v6  ;;  %v17481_v45 = vrot.slane %v17480_v55, 1  ;;  %v17491_v49 = vld [vmem:[#allocation107_spill] sm:$0xff] }
 0x275   : > { %17477 = vst [vmem:[#allocation117_spill] sm:$0xff] %v11007_v63  ;;  %17478 = vst [vmem:[#allocation108_spill] sm:$0xff] %v11010_v35  ;;  %v1864_v31 = vadd.f32 %v17485_v30, %v17484_v42  ;;  %v17486_v63 = vld [vmem:[#allocation83_spill] sm:$0xff]  ;;  %v11031_v21 = vmul.f32 %v9775_v4, %v11010_v35  ;;  %v11037_v55 = vmul.f32 %v9815_v54, %v11010_v35  ;;  %v17494_v35 = vrot.slane %v17315_v28, 1 }
 0x276   : > { %17479 = vst [vmem:[#allocation60_spill] sm:$0xff] %v11013_v10  ;;  %v1512_v16 = vsel %vm1505_vm5, %v17483_v46, %v17481_v45  ;;  %v2128_v17 = vadd.f32 %v17487_v8, %v17486_v63  ;;  %v1883_v57 = vadd.f32 %v1819_v19, %v1685_v62  ;;  %v1955_v33 = vmul.f32 %v9811_v56, %v11013_v10  ;;  %v17489_v8 = vld [vmem:[#allocation45_spill] sm:$0xff]  ;;  %v17490_v62 = vld [vmem:[#allocation64_spill] sm:$0xff] }
 0x277   : > { %17488 = vst [vmem:[#allocation118_spill] sm:$0xff] %v11037_v55  ;;  %v2151_v46 = vadd.f32 %v2087_v5, %v10856_v27  ;;  %v2359_v45 = vmul.f32 %v9835_v9, %v11013_v10  ;;  %v1936_v34 = vmul.f32 %v9701_v40, %v1512_v16  ;;  %v11047_v19 = vmul.f32 %v9712_v32, %v1512_v16  ;;  %v17493_v10 = vld [vmem:[#allocation110_spill] sm:$0xff] }
 0x278   : > { %v2264_v63 = vadd.f32 %v17489_v8, %v2128_v17  ;;  %v11044_v42 = vadd.f32 %v1955_v33, %v1883_v57  ;;  %v2472_v30 = vmul.f32 %v17429_v12, %v17490_v62  ;;  %v2474_v55 = vmul.f32 %v17429_v12, %v17491_v49  ;;  %v11059_v17 = vld [vmem:[%s16381_s5 + $0x10] ss:$0 sm:$0xff]  ;;  %v17492_v57 = vld [vmem:[#allocation52_spill] sm:$0xff] }
 0x279   : > { %v2287_v6 = vadd.f32 %v2223_v14, %v2151_v46  ;;  %v11053_v27 = vadd.f32 %v1936_v34, %v1864_v31  ;;  %v2742_v33 = vmul.f32 %v11059_v17, %v1512_v16  ;;  %v2744_v62 = vmul.f32 %v11059_v17, %v17493_v10 }
 0x27a   : > { %v2400_v5 = vadd.f32 %v10850_v53, %v2264_v63  ;;  %v2538_v8 = vadd.f32 %v2474_v55, %v17492_v57  ;;  %v17495_v14 = vrot.slane %v17306_v18, 1  ;;  %v17496_v53 = vld [vmem:[#allocation90_spill] sm:$0xff]  ;;  %v17498_v55 = vld [vmem:[#allocation116_spill] sm:$0xff]  ;;  %v17499_v57 = vld [vmem:[#allocation77_spill] sm:$0xff]  ;;  %v2477_v18 = vmul.f32 %v9839_v11, %v10433_v24 }
 0x27b   : > { %v1869_v31 = vadd.f32 %v17496_v53, %v10444_v37  ;;  %v11073_v46 = vadd.f32 %v2359_v45, %v2287_v6  ;;  %v2133_v63 = vadd.f32 %v17498_v55, %v10696_v59  ;;  %v17500_v37 = vld [vmem:[#allocation44_spill] sm:$0xff]  ;;  %v17502_v53 = vld [vmem:[#allocation109_spill] sm:$0xff]  ;;  %v2749_v55 = vmul.f32 %v10489_v15, %v10461_v48 }
 0x27c   : > { %v1515_v49 = vsel %vm1505_vm5, %v17495_v14, %v17494_v35  ;;  %v2536_v34 = vadd.f32 %v2472_v30, %v2400_v5  ;;  %v2672_v10 = vadd.f32 %v17499_v57, %v2538_v8  ;;  %v2479_v35 = vmul.f32 %v9839_v11, %v10414_v58  ;;  %v17501_v30 = vld [vmem:[#allocation106_spill] sm:$0xff]  ;;  %v17503_v57 = vld [vmem:[#allocation48_spill] sm:$0xff] }
 0x27d   : > { %17497 = vst [vmem:[#allocation20_spill] sm:$0xff] %v11073_v46  ;;  %v1941_v16 = vmul.f32 %v9811_v56, %v1515_v49  ;;  %v11080_v28 = vmul.f32 %v9835_v9, %v1515_v49  ;;  %v2269_v5 = vadd.f32 %v17501_v30, %v2133_v63  ;;  %v2747_v14 = vmul.f32 %v10489_v15, %v1515_v49 }
 0x27e   : > { %v2670_v6 = vadd.f32 %v17500_v37, %v2536_v34  ;;  %v2808_v59 = vadd.f32 %v2744_v62, %v2672_v10  ;;  %v2543_v8 = vadd.f32 %v2479_v35, %v17502_v53  ;;  %v1256_v46 = vrot.slane %v17503_v57, 7 }
 0x27f   : > { %v11087_v45 = vadd.f32 %v1941_v16, %v1869_v31  ;;  %v2405_v39 = vadd.f32 %v10881_v25, %v2269_v5  ;;  %v16594_v58 = vrot.slane %v17503_v57, 1  ;;  %v11099_v31 = vmul.f32 %v9632_v1, %v17503_v57  ;;  %v17507_v16 = vld [vmem:[#allocation63_spill] sm:$0xff]  ;;  %v17510_v5 = vld [vmem:[#allocation69_spill] sm:$0xff] }
 0x280   : > { %v2806_v24 = vadd.f32 %v2742_v33, %v2670_v6  ;;  %v2883_v34 = vadd.f32 %v10525_v2, %v2808_v59  ;;  %v2677_v62 = vadd.f32 %v10467_v3, %v2543_v8  ;;  %v11105_v49 = vmul.f32 %v9636_v38, %v17503_v57 }
 0x281   : > { %17504 = vst [vmem:[#allocation101_spill] sm:$0xff] %v11099_v31  ;;  %v11109_v48 = vmul.f32 %v9855_v44, %v17503_v57  ;;  %v2541_v33 = vadd.f32 %v2477_v18, %v2405_v39  ;;  %v1257_v63 = vrot.slane %v17507_v16, 7  ;;  %v11116_v3 = vmul.f32 %v9658_v22, %v17507_v16  ;;  %v17512_v18 = vld [vmem:[#allocation73_spill] sm:$0xff]  ;;  %v17537_v31 = vld [vmem:[#allocation111_spill] sm:$0xff] }
 0x282   : > { %17505 = vst [vmem:[#allocation21_spill] sm:$0xff] %v11105_v49  ;;  %v2881_v25 = vadd.f32 %v10525_v2, %v2806_v24  ;;  %v2947_v35 = vmax.f32 %v2883_v34, 0.0  ;;  %v2813_v37 = vadd.f32 %v2749_v55, %v2677_v62  ;;  %v11120_v6 = vmul.f32 %v9662_v23, %v17507_v16 }
 0x283   : > { %17506 = vst [vmem:[#allocation59_spill] sm:$0xff] %v11109_v48  ;;  %17508 = vst [vmem:[#allocation65_spill] sm:$0xff] %v11116_v3  ;;  %v2675_v59 = vadd.f32 %v17510_v5, %v2541_v33  ;;  %v11125_v39 = vmul.f32 %v9872_v60, %v17507_v16  ;;  %v1288_v53 = vrot.slane %v17512_v18, 7  ;;  %v16595_v55 = vrot.slane %v17512_v18, 1 }
 0x284   : > { %17509 = vst [vmem:[#allocation81_spill] sm:$0xff] %v11120_v6  ;;  %v2945_v30 = vmax.f32 %v2881_v25, 0.0  ;;  %v2888_v8 = vadd.f32 %v10528_v20, %v2813_v37  ;;  %v1822_v24 = vmul.f32 %v9632_v1, %v17512_v18  ;;  %v2226_v34 = vmul.f32 %v9636_v38, %v17512_v18 }
 0x285   : > { %17511 = vst [vmem:[#allocation58_spill] sm:$0xff] %v11125_v39  ;;  %v2811_v25 = vadd.f32 %v2747_v14, %v2675_v59  ;;  %v11136_v33 = vsel %vm1304_vm4, %v1256_v46, %v1288_v53  ;;  %v1353_v5 = vsel %vm1304_vm4, %v1288_v53, %v1256_v46  ;;  %v1554_v49 = vsel %vm1505_vm5, %v16595_v55, %v16594_v58  ;;  %v11161_v53 = vpop.f32.mrb[52].mxu0 }
 0x286   : > { %v3880_v62 = vpack.c.bf16 %v2947_v35, %v2945_v30  ;;  %17513 = vst [vmem:[#allocation83_spill] sm:$0xff] %v11136_v33  ;;  %v2952_v10 = vmax.f32 %v2888_v8, 0.0  ;;  %v11141_v37 = vmul.f32 %v7976_v41, %v1353_v5  ;;  %v1688_v14 = vmul.f32 %v9668_v0, %v11136_v33  ;;  %17517 = vst [vmem:[#allocation107_spill] sm:$0xff] %v11161_v53  ;;  %v11172_v58 = vpop.f32.mrb[53].mxu0 }
 0x287   : > { %v2886_v35 = vadd.f32 %v10528_v20, %v2811_v25  ;;  %v11153_v30 = vmul.f32 %v7993_v47, %v1554_v49  ;;  %v2090_v46 = vmul.f32 %v9706_v7, %v11136_v33  ;;  %v11159_v59 = vmul.f32 %v9855_v44, %v17512_v18  ;;  %v17520_v49 = vld [vmem:[#allocation78_spill] sm:$0xff]  ;;  %17521 = vst [vmem:[#allocation90_spill] sm:$0xff] %v11172_v58  ;;  %v17539_v18 = vld [vmem:[#allocation71_spill] sm:$0xff] }
 0x288   : > { %17514 = vst [vmem:[#allocation47_spill] sm:$0xff] %v11141_v37  ;;  %4447 = vmatmul.mubr.bf16.gmra.mrb[40].mxu1 %v3880_v62  ;;  %v11165_v8 = vmul.f32 %v9668_v0, %v11141_v37  ;;  %v1886_v5 = vadd.f32 %v1822_v24, %v1688_v14  ;;  %v11169_v62 = vmul.f32 %v9706_v7, %v11141_v37  ;;  %v1289_v25 = vrot.slane %v17520_v49, 7 }
 0x289   : > { %17515 = vst [vmem:[#allocation45_spill] sm:$0xff] %v11153_v30  ;;  %17516 = vst [vmem:[#allocation64_spill] sm:$0xff] %v11159_v59  ;;  %v2950_v55 = vmax.f32 %v2886_v35, 0.0  ;;  %v1958_v48 = vmul.f32 %v9701_v40, %v11153_v30  ;;  %v2154_v6 = vadd.f32 %v2090_v46, %v10985_v26  ;;  %v2362_v53 = vmul.f32 %v9712_v32, %v11153_v30  ;;  %v11179_v59 = vpop.f32.mrb[54].mxu0 }
 0x28a   : > { %17518 = vst [vmem:[#allocation52_spill] sm:$0xff] %v11165_v8  ;;  %17519 = vst [vmem:[#allocation110_spill] sm:$0xff] %v11169_v62  ;;  %v11183_v24 = vsel %vm1304_vm4, %v1257_v63, %v1289_v25  ;;  %v1354_v14 = vsel %vm1304_vm4, %v1289_v25, %v1257_v63  ;;  %v16602_v62 = vrot.slane %v17520_v49, 1  ;;  %v1823_v35 = vmul.f32 %v9658_v22, %v17520_v49  ;;  %v11190_v58 = vpop.f32.mrb[55].mxu0  ;;  %v17538_v8 = vld [vmem:[#allocation121_spill] sm:$0xff] }
 0x28b   : > { %17522 = vst [vmem:[#allocation116_spill] sm:$0xff] %v11179_v59  ;;  %17523 = vst [vmem:[#allocation77_spill] sm:$0xff] %v11183_v24  ;;  %v3883_v26 = vpack.c.bf16 %v2952_v10, %v2950_v55  ;;  %v11192_v46 = vadd.f32 %v1958_v48, %v1886_v5  ;;  %v2290_v30 = vadd.f32 %v2226_v34, %v2154_v6  ;;  %v17526_v33 = vrot.slane %v17507_v16, 1 }
 0x28c   : > { %17524 = vst [vmem:[#allocation44_spill] sm:$0xff] %v11190_v58  ;;  %v11195_v59 = vmul.f32 %v7976_v41, %v1354_v14  ;;  %v1689_v25 = vmul.f32 %v9775_v4, %v11183_v24  ;;  %v2091_v58 = vmul.f32 %v9815_v54, %v11183_v24  ;;  %v2227_v48 = vmul.f32 %v9662_v23, %v17520_v49  ;;  %v17554_v24 = vld [vmem:[#allocation84_spill] sm:$0xff] }
 0x28d   : > { %v1555_v63 = vsel %vm1505_vm5, %v16602_v62, %v17526_v33  ;;  %4456 = vmatprep.mubr.bf16.mxu1 %v3883_v26  ;;  %v11209_v10 = vadd.f32 %v2362_v53, %v2290_v30  ;;  %v11225_v14 = vmul.f32 %v9872_v60, %v17520_v49  ;;  %v17531_v30 = vld [vmem:[#allocation96_spill] sm:$0xff]  ;;  %v2478_v39 = vmul.f32 %v17429_v12, %v17539_v18 }
 0x28e   : > { %17525 = vst [vmem:[#allocation106_spill] sm:$0xff] %v11195_v59  ;;  %v11212_v6 = vmul.f32 %v7993_v47, %v1555_v63  ;;  %v11216_v55 = vmul.f32 %v9775_v4, %v11195_v59  ;;  %v11220_v34 = vmul.f32 %v9815_v54, %v11195_v59  ;;  %v1887_v33 = vadd.f32 %v1823_v35, %v1689_v25  ;;  %v17533_v26 = vld [vmem:[#allocation72_spill] sm:$0xff]  ;;  %v17535_v35 = vld [vmem:[#allocation123_spill] sm:$0xff]  ;;  %v17536_v25 = vld [vmem:[#allocation89_spill] sm:$0xff] }
 0x28f   : > { %17527 = vst [vmem:[#allocation109_spill] sm:$0xff] %v11209_v10  ;;  %v2155_v5 = vadd.f32 %v2091_v58, %v11044_v42  ;;  %17530 = vst [vmem:[#allocation78_spill] sm:$0xff] %v11225_v14  ;;  %v17532_v53 = vrot.slane %v17531_v30, 1  ;;  %v17534_v63 = vrot.slane %v17533_v26, 1  ;;  %v1868_v42 = vadd.f32 %v17536_v25, %v17535_v35  ;;  %v17546_v18 = vld [vmem:[#allocation76_spill] sm:$0xff] }
 0x290   : > { %17528 = vst [vmem:[#allocation63_spill] sm:$0xff] %v11212_v6  ;;  %17529 = vst [vmem:[#allocation69_spill] sm:$0xff] %v11220_v34  ;;  %v1959_v10 = vmul.f32 %v9811_v56, %v11212_v6  ;;  %v2363_v34 = vmul.f32 %v9835_v9, %v11212_v6  ;;  %v2132_v30 = vadd.f32 %v17537_v31, %v10858_v51  ;;  %v17542_v51 = vld [vmem:[#allocation122_spill] sm:$0xff]  ;;  %v17543_v14 = vrot.slane %v17360_v50, 1  ;;  %v17548_v50 = vld [vmem:[#allocation135_spill] sm:$0xff] }
 0x291   : > { %v1514_v62 = vsel %vm1505_vm5, %v17534_v63, %v17532_v53  ;;  %v2291_v37 = vadd.f32 %v2227_v48, %v2155_v5  ;;  %v2476_v53 = vmul.f32 %v17429_v12, %v17538_v8  ;;  %v17541_v48 = vld [vmem:[#allocation67_spill] sm:$0xff]  ;;  %v2748_v31 = vmul.f32 %v11059_v17, %v17542_v51  ;;  %v17549_v51 = vld [vmem:[#allocation134_spill] sm:$0xff] }
 0x292   : > { %v1940_v58 = vmul.f32 %v9701_v40, %v1514_v62  ;;  %v11243_v26 = vmul.f32 %v9712_v32, %v1514_v62  ;;  %v11247_v63 = vadd.f32 %v1959_v10, %v1887_v33  ;;  %v2746_v35 = vmul.f32 %v11059_v17, %v1514_v62  ;;  %v17545_v33 = vld [vmem:[#allocation114_spill] sm:$0xff]  ;;  %v17547_v62 = vld [vmem:[#allocation125_spill] sm:$0xff] }
 0x293   : > { %v11254_v25 = vadd.f32 %v2363_v34, %v2291_v37  ;;  %v2268_v5 = vadd.f32 %v17541_v48, %v2132_v30  ;;  %v17544_v8 = vrot.slane %v17345_v61, 1  ;;  %v2137_v34 = vadd.f32 %v17547_v62, %v10885_v13  ;;  %v17552_v62 = vld [vmem:[#allocation103_spill] sm:$0xff] }
 0x294   : > { %v11249_v57 = vadd.f32 %v1940_v58, %v1868_v42  ;;  %v2542_v42 = vadd.f32 %v2478_v39, %v17545_v33  ;;  %v1873_v58 = vadd.f32 %v17546_v18, %v10656_v52  ;;  %v2481_v61 = vmul.f32 %v9839_v11, %v17548_v50  ;;  %v17550_v39 = vld [vmem:[#allocation119_spill] sm:$0xff]  ;;  %v17551_v52 = vld [vmem:[#allocation70_spill] sm:$0xff] }
 0x295   : > { %17540 = vst [vmem:[#allocation96_spill] sm:$0xff] %v11254_v25  ;;  %v1517_v10 = vsel %vm1505_vm5, %v17544_v8, %v17543_v14  ;;  %v2404_v30 = vadd.f32 %v11047_v19, %v2268_v5  ;;  %v2483_v14 = vmul.f32 %v9839_v11, %v17549_v51  ;;  %v2273_v18 = vadd.f32 %v17551_v52, %v2137_v34  ;;  %v17553_v5 = vld [vmem:[#allocation136_spill] sm:$0xff] }
 0x296   : > { %v1945_v37 = vmul.f32 %v9811_v56, %v1517_v10  ;;  %v11273_v48 = vmul.f32 %v9835_v9, %v1517_v10  ;;  %v2676_v8 = vadd.f32 %v17550_v39, %v2542_v42  ;;  %v2751_v25 = vmul.f32 %v10489_v15, %v1517_v10  ;;  %v17557_v10 = vld [vmem:[#allocation137_spill] sm:$0xff] }
 0x297   : > { %v2540_v13 = vadd.f32 %v2476_v53, %v2404_v30  ;;  %v2547_v19 = vadd.f32 %v2483_v14, %v17552_v62  ;;  %v2753_v6 = vmul.f32 %v10489_v15, %v17553_v5  ;;  %v1258_v59 = vrot.slane %v17554_v24, 7  ;;  %v17560_v30 = vld [vmem:[#allocation105_spill] sm:$0xff] }
 0x298   : > { %v11280_v33 = vadd.f32 %v1945_v37, %v1873_v58  ;;  %v2812_v50 = vadd.f32 %v2748_v31, %v2676_v8  ;;  %v2409_v3 = vadd.f32 %v11080_v28, %v2273_v18  ;;  %v16609_v51 = vrot.slane %v17554_v24, 1  ;;  %v17556_v58 = vld [vmem:[#allocation74_spill] sm:$0xff] }
 0x299   : > { %v11292_v42 = vmul.f32 %v9632_v1, %v17554_v24  ;;  %v2674_v37 = vadd.f32 %v17556_v58, %v2540_v13  ;;  %v2681_v53 = vadd.f32 %v17557_v10, %v2547_v19  ;;  %v11298_v34 = vmul.f32 %v9636_v38, %v17554_v24  ;;  %v17563_v19 = vld [vmem:[#allocation86_spill] sm:$0xff] }
 0x29a   : > { %v11302_v15 = vmul.f32 %v9855_v44, %v17554_v24  ;;  %v2887_v28 = vadd.f32 %v10525_v2, %v2812_v50  ;;  %v2545_v31 = vadd.f32 %v2481_v61, %v2409_v3  ;;  %v1259_v14 = vrot.slane %v17560_v30, 7  ;;  %v17565_v61 = vld [vmem:[#allocation102_spill] sm:$0xff] }
 0x29b   : > { %17555 = vst [vmem:[#allocation72_spill] sm:$0xff] %v11292_v42  ;;  %17558 = vst [vmem:[#allocation123_spill] sm:$0xff] %v11298_v34  ;;  %v2810_v8 = vadd.f32 %v2746_v35, %v2674_v37  ;;  %v2817_v52 = vadd.f32 %v2753_v6, %v2681_v53  ;;  %v11309_v18 = vmul.f32 %v9658_v22, %v17560_v30  ;;  %v1290_v50 = vrot.slane %v17565_v61, 7 }
 0x29c   : > { %17559 = vst [vmem:[#allocation89_spill] sm:$0xff] %v11302_v15  ;;  %v11313_v13 = vmul.f32 %v9662_v23, %v17560_v30  ;;  %v2951_v62 = vmax.f32 %v2887_v28, 0.0  ;;  %v2679_v5 = vadd.f32 %v17563_v19, %v2545_v31  ;;  %v11318_v3 = vmul.f32 %v9872_v60, %v17560_v30 }
 0x29d   : > { %17561 = vst [vmem:[#allocation111_spill] sm:$0xff] %v11309_v18  ;;  %v2885_v35 = vadd.f32 %v10525_v2, %v2810_v8  ;;  %v2892_v6 = vadd.f32 %v10528_v20, %v2817_v52  ;;  %v16610_v58 = vrot.slane %v17565_v61, 1  ;;  %v1826_v37 = vmul.f32 %v9632_v1, %v17565_v61 }
 0x29e   : > { %17562 = vst [vmem:[#allocation121_spill] sm:$0xff] %v11313_v13  ;;  %17564 = vst [vmem:[#allocation71_spill] sm:$0xff] %v11318_v3  ;;  %v2815_v10 = vadd.f32 %v2751_v25, %v2679_v5  ;;  %v11328_v53 = vsel %vm1304_vm4, %v1258_v59, %v1290_v50  ;;  %v1355_v28 = vsel %vm1304_vm4, %v1290_v50, %v1258_v59  ;;  %v17595_v3 = vld [vmem:[#allocation126_spill] sm:$0xff] }
 0x29f   : > { %17566 = vst [vmem:[#allocation67_spill] sm:$0xff] %v11328_v53  ;;  %v2230_v31 = vmul.f32 %v9636_v38, %v17565_v61  ;;  %v2949_v19 = vmax.f32 %v2885_v35, 0.0  ;;  %v2956_v8 = vmax.f32 %v2892_v6, 0.0  ;;  %v11335_v52 = vmul.f32 %v7976_v41, %v1355_v28 }
 0x2a0   : > { %v1556_v25 = vsel %vm1505_vm5, %v16610_v58, %v16609_v51  ;;  %v2890_v5 = vadd.f32 %v10528_v20, %v2815_v10  ;;  %v1692_v59 = vmul.f32 %v9668_v0, %v11328_v53  ;;  %v2094_v50 = vmul.f32 %v9706_v7, %v11328_v53 }
 0x2a1   : > { %17567 = vst [vmem:[#allocation122_spill] sm:$0xff] %v11335_v52  ;;  %v11345_v39 = vmul.f32 %v7993_v47, %v1556_v25  ;;  %v3882_v35 = vpack.c.bf16 %v2951_v62, %v2949_v19  ;;  %v11353_v6 = vmul.f32 %v9668_v0, %v11335_v52  ;;  %v11357_v28 = vmul.f32 %v9706_v7, %v11335_v52  ;;  %v11363_v25 = vpop.f32.mrb[56].mxu0 }
 0x2a2   : > { %v11361_v10 = vmul.f32 %v9855_v44, %v17565_v61  ;;  %17572 = vst [vmem:[#allocation134_spill] sm:$0xff] %v11363_v25  ;;  %v2954_v51 = vmax.f32 %v2890_v5, 0.0  ;;  %v1890_v58 = vadd.f32 %v1826_v37, %v1692_v59  ;;  %v2158_v62 = vadd.f32 %v2094_v50, %v11192_v46  ;;  %v11368_v19 = vpop.f32.mrb[57].mxu0 }
 0x2a3   : > { %17568 = vst [vmem:[#allocation114_spill] sm:$0xff] %v11345_v39  ;;  %17569 = vst [vmem:[#allocation76_spill] sm:$0xff] %v11353_v6  ;;  %v1962_v34 = vmul.f32 %v9701_v40, %v11345_v39  ;;  %4457 = vmatmul.mubr.bf16.gmra.mrb[44].mxu1 %v3882_v35  ;;  %v2366_v13 = vmul.f32 %v9712_v32, %v11345_v39  ;;  %v11376_v5 = vpop.f32.mrb[58].mxu0  ;;  %v17594_v6 = vld [vmem:[#allocation128_spill] sm:$0xff] }
 0x2a4   : > { %17570 = vst [vmem:[#allocation125_spill] sm:$0xff] %v11357_v28  ;;  %17571 = vst [vmem:[#allocation135_spill] sm:$0xff] %v11361_v10  ;;  %v17574_v28 = vld [vmem:[#allocation120_spill] sm:$0xff]  ;;  %v3885_v37 = vpack.c.bf16 %v2956_v8, %v2954_v51  ;;  %v2294_v10 = vadd.f32 %v2230_v31, %v2158_v62  ;;  %v11382_v50 = vpop.f32.mrb[59].mxu0  ;;  %v17584_v62 = vld [vmem:[#allocation97_spill] sm:$0xff] }
 0x2a5   : > { %17573 = vst [vmem:[#allocation119_spill] sm:$0xff] %v11368_v19  ;;  %v1291_v15 = vrot.slane %v17574_v28, 7  ;;  %v1827_v25 = vmul.f32 %v9658_v22, %v17574_v28  ;;  %17575 = vst [vmem:[#allocation70_spill] sm:$0xff] %v11376_v5  ;;  %v11378_v59 = vadd.f32 %v1962_v34, %v1890_v58  ;;  %v2231_v46 = vmul.f32 %v9662_v23, %v17574_v28 }
 0x2a6   : > { %17576 = vst [vmem:[#allocation103_spill] sm:$0xff] %v11382_v50  ;;  %v17578_v19 = vrot.slane %v17560_v30, 1  ;;  %v17579_v5 = vrot.slane %v17574_v28, 1  ;;  %v11398_v34 = vmul.f32 %v9872_v60, %v17574_v28  ;;  %4466 = vmatprep.mubr.bf16.mxu1 %v3885_v37  ;;  %v11400_v58 = vadd.f32 %v2366_v13, %v2294_v10  ;;  %v17588_v10 = vld [vmem:[#allocation26_spill] sm:$0xff] }
 0x2a7   : > { %v11386_v35 = vsel %vm1304_vm4, %v1259_v14, %v1291_v15  ;;  %v1356_v53 = vsel %vm1304_vm4, %v1291_v15, %v1259_v14  ;;  %v17589_v37 = vld [vmem:[#allocation94_spill] sm:$0xff] }
 0x2a8   : > { %17577 = vst [vmem:[#allocation136_spill] sm:$0xff] %v11386_v35  ;;  %v1557_v51 = vsel %vm1505_vm5, %v17579_v5, %v17578_v19  ;;  %17580 = vst [vmem:[#allocation74_spill] sm:$0xff] %v11398_v34  ;;  %v11403_v31 = vmul.f32 %v7976_v41, %v1356_v53  ;;  %v1693_v15 = vmul.f32 %v9775_v4, %v11386_v35  ;;  %v17585_v19 = vrot.slane %v17584_v62, 1  ;;  %v17586_v5 = vld [vmem:[#allocation93_spill] sm:$0xff] }
 0x2a9   : > { %17581 = vst [vmem:[#allocation137_spill] sm:$0xff] %v11400_v58  ;;  %v11406_v8 = vmul.f32 %v7993_v47, %v1557_v51  ;;  %v2095_v14 = vmul.f32 %v9815_v54, %v11386_v35  ;;  %v17587_v50 = vrot.slane %v17586_v5, 1  ;;  %v1872_v53 = vadd.f32 %v17589_v37, %v17588_v10  ;;  %v17590_v58 = vld [vmem:[#allocation124_spill] sm:$0xff] }
 0x2aa   : > { %17582 = vst [vmem:[#allocation105_spill] sm:$0xff] %v11403_v31  ;;  %v2136_v51 = vadd.f32 %v17590_v58, %v11053_v27  ;;  %v11424_v39 = vmul.f32 %v9775_v4, %v11403_v31  ;;  %v1891_v52 = vadd.f32 %v1827_v25, %v1693_v15  ;;  %v11430_v62 = vmul.f32 %v9815_v54, %v11403_v31  ;;  %v17592_v27 = vld [vmem:[#allocation98_spill] sm:$0xff] }
 0x2ab   : > { %17583 = vst [vmem:[#allocation86_spill] sm:$0xff] %v11406_v8  ;;  %v1516_v13 = vsel %vm1505_vm5, %v17587_v50, %v17585_v19  ;;  %v1963_v42 = vmul.f32 %v9811_v56, %v11406_v8  ;;  %v2159_v50 = vadd.f32 %v2095_v14, %v11247_v63  ;;  %v2367_v19 = vmul.f32 %v9835_v9, %v11406_v8  ;;  %v17593_v15 = vld [vmem:[#allocation130_spill] sm:$0xff]  ;;  %v17599_v8 = vld [vmem:[#allocation43_spill] sm:$0xff] }
 0x2ac   : > { %17591 = vst [vmem:[#allocation120_spill] sm:$0xff] %v11430_v62  ;;  %v1944_v5 = vmul.f32 %v9701_v40, %v1516_v13  ;;  %v2272_v58 = vadd.f32 %v17592_v27, %v2136_v51  ;;  %v11440_v25 = vmul.f32 %v9712_v32, %v1516_v13  ;;  %v2480_v37 = vmul.f32 %v17429_v12, %v17593_v15  ;;  %v17597_v27 = vld [vmem:[#allocation54_spill] sm:$0xff] }
 0x2ad   : > { %v11437_v10 = vadd.f32 %v1963_v42, %v1891_v52  ;;  %v2482_v62 = vmul.f32 %v17429_v12, %v17594_v6  ;;  %v2295_v24 = vadd.f32 %v2231_v46, %v2159_v50  ;;  %v2750_v61 = vmul.f32 %v11059_v17, %v1516_v13  ;;  %v17596_v42 = vld [vmem:[#allocation132_spill] sm:$0xff]  ;;  %v17601_v6 = vld [vmem:[#allocation30_spill] sm:$0xff]  ;;  %v17602_v46 = vld [vmem:[#allocation75_spill] sm:$0xff] }
 0x2ae   : > { %v11446_v63 = vadd.f32 %v1944_v5, %v1872_v53  ;;  %v2408_v14 = vadd.f32 %v11243_v26, %v2272_v58  ;;  %v2752_v52 = vmul.f32 %v11059_v17, %v17596_v42  ;;  %v17598_v34 = vrot.slane %v17597_v27, 1  ;;  %v17605_v5 = vld [vmem:[#allocation95_spill] sm:$0xff] }
 0x2af   : > { %v2546_v51 = vadd.f32 %v2482_v62, %v17595_v3  ;;  %v17600_v35 = vrot.slane %v17599_v8, 1  ;;  %v1877_v53 = vadd.f32 %v17602_v46, %v17601_v6  ;;  %v11461_v50 = vadd.f32 %v2367_v19, %v2295_v24  ;;  %v17604_v3 = vld [vmem:[#allocation139_spill] sm:$0xff]  ;;  %v17606_v8 = vld [vmem:[#allocation142_spill] sm:$0xff] }
 0x2b0   : > { %v2544_v26 = vadd.f32 %v2480_v37, %v2408_v14  ;;  %v2141_v62 = vadd.f32 %v17604_v3, %v11087_v45  ;;  %v2485_v27 = vmul.f32 %v9839_v11, %v17606_v8  ;;  %v17608_v6 = vld [vmem:[#allocation19_spill] sm:$0xff]  ;;  %v17609_v37 = vld [vmem:[#allocation104_spill] sm:$0xff]  ;;  %v11481_v45 = vld [vmem:[%s16381_s5 + $0x18] ss:$0 sm:$0xff] }
 0x2b1   : > { %v1519_v15 = vsel %vm1505_vm5, %v17600_v35, %v17598_v34  ;;  %17603 = vst [vmem:[#allocation97_spill] sm:$0xff] %v11461_v50  ;;  %v2680_v58 = vadd.f32 %v17605_v5, %v2546_v51  ;;  %v17607_v35 = vld [vmem:[#allocation140_spill] sm:$0xff]  ;;  %v17610_v3 = vld [vmem:[#allocation87_spill] sm:$0xff] }
 0x2b2   : > { %v1949_v13 = vmul.f32 %v9811_v56, %v1519_v15  ;;  %v11468_v42 = vmul.f32 %v9835_v9, %v1519_v15  ;;  %v2487_v34 = vmul.f32 %v9839_v11, %v17607_v35  ;;  %v2678_v24 = vadd.f32 %v17608_v6, %v2544_v26  ;;  %v17611_v8 = vld [vmem:[#allocation143_spill] sm:$0xff]  ;;  %v17612_v35 = vld [vmem:[#allocation28_spill] sm:$0xff] }
 0x2b3   : > { %v2277_v14 = vadd.f32 %v17609_v37, %v2141_v62  ;;  %v2755_v51 = vmul.f32 %v11481_v45, %v1519_v15  ;;  %v2816_v46 = vadd.f32 %v2752_v52, %v2680_v58  ;;  %v2757_v50 = vmul.f32 %v11481_v45, %v17611_v8  ;;  %v17614_v15 = vld [vmem:[#allocation144_spill] sm:$0xff] }
 0x2b4   : > { %v11475_v19 = vadd.f32 %v1949_v13, %v1877_v53  ;;  %v2551_v5 = vadd.f32 %v2487_v34, %v17610_v3  ;;  %v1260_v31 = vrot.slane %v17612_v35, 7  ;;  %v2814_v26 = vadd.f32 %v2750_v61, %v2678_v24  ;;  %v17617_v24 = vld [vmem:[#allocation127_spill] sm:$0xff]  ;;  %v17620_v13 = vld [vmem:[#allocation38_spill] sm:$0xff] }
 0x2b5   : > { %v2413_v53 = vadd.f32 %v11273_v48, %v2277_v14  ;;  %v11492_v62 = vmul.f32 %v9632_v1, %v17612_v35  ;;  %v2891_v6 = vadd.f32 %v10525_v2, %v2816_v46  ;;  %v11498_v58 = vmul.f32 %v9636_v38, %v17612_v35 }
 0x2b6   : > { %v2685_v52 = vadd.f32 %v17614_v15, %v2551_v5  ;;  %v11502_v34 = vmul.f32 %v9855_v44, %v17612_v35  ;;  %v2889_v48 = vadd.f32 %v10525_v2, %v2814_v26  ;;  %v1261_v37 = vrot.slane %v17617_v24, 7  ;;  %v17622_v26 = vld [vmem:[#allocation129_spill] sm:$0xff] }
 0x2b7   : > { %17613 = vst [vmem:[#allocation93_spill] sm:$0xff] %v11492_v62  ;;  %17615 = vst [vmem:[#allocation26_spill] sm:$0xff] %v11498_v58  ;;  %v2549_v61 = vadd.f32 %v2485_v27, %v2413_v53  ;;  %v2955_v3 = vmax.f32 %v2891_v6, 0.0  ;;  %v11509_v46 = vmul.f32 %v9658_v22, %v17617_v24  ;;  %v11513_v5 = vmul.f32 %v9662_v23, %v17617_v24 }
 0x2b8   : > { %17616 = vst [vmem:[#allocation94_spill] sm:$0xff] %v11502_v34  ;;  %v2821_v8 = vadd.f32 %v2757_v50, %v2685_v52  ;;  %v2953_v15 = vmax.f32 %v2889_v48, 0.0  ;;  %v11518_v27 = vmul.f32 %v9872_v60, %v17617_v24  ;;  %v1292_v53 = vrot.slane %v17622_v26, 7 }
 0x2b9   : > { %17618 = vst [vmem:[#allocation124_spill] sm:$0xff] %v11509_v46  ;;  %17619 = vst [vmem:[#allocation98_spill] sm:$0xff] %v11513_v5  ;;  %v2683_v58 = vadd.f32 %v17620_v13, %v2549_v61  ;;  %v1830_v52 = vmul.f32 %v9632_v1, %v17622_v26  ;;  %v2234_v14 = vmul.f32 %v9636_v38, %v17622_v26  ;;  %v11533_v5 = vpop.f32.mrb[60].mxu0  ;;  %v17626_v62 = vrot.slane %v17612_v35, 1 }
 0x2ba   : > { %17621 = vst [vmem:[#allocation130_spill] sm:$0xff] %v11518_v27  ;;  %v2896_v6 = vadd.f32 %v10528_v20, %v2821_v8  ;;  %v3884_v34 = vpack.c.bf16 %v2955_v3, %v2953_v15  ;;  %v11529_v13 = vsel %vm1304_vm4, %v1260_v31, %v1292_v53  ;;  %v1357_v61 = vsel %vm1304_vm4, %v1292_v53, %v1260_v31  ;;  %v11546_v3 = vpop.f32.mrb[61].mxu0 }
 0x2bb   : > { %v2819_v48 = vadd.f32 %v2755_v51, %v2683_v58  ;;  %17623 = vst [vmem:[#allocation128_spill] sm:$0xff] %v11529_v13  ;;  %17624 = vst [vmem:[#allocation126_spill] sm:$0xff] %v11533_v5  ;;  %v11536_v50 = vmul.f32 %v7976_v41, %v1357_v61  ;;  %v17627_v27 = vrot.slane %v17622_v26, 1  ;;  %v1696_v58 = vmul.f32 %v9668_v0, %v11529_v13  ;;  %v11558_v61 = vpop.f32.mrb[62].mxu0 }
 0x2bc   : > { %v2960_v8 = vmax.f32 %v2896_v6, 0.0  ;;  %17628 = vst [vmem:[#allocation54_spill] sm:$0xff] %v11546_v3  ;;  %4467 = vmatmul.mubr.bf16.gmra.mrb[48].mxu1 %v3884_v34  ;;  %v2098_v53 = vmul.f32 %v9706_v7, %v11529_v13  ;;  %v11556_v6 = vmul.f32 %v9855_v44, %v17622_v26  ;;  %17631 = vst [vmem:[#allocation75_spill] sm:$0xff] %v11558_v61  ;;  %v11569_v3 = vpop.f32.mrb[63].mxu0  ;;  %v17650_v26 = vld [vmem:[#allocation133_spill] sm:$0xff]  ;;  %v17656_v46 = vrot.slane %v17470_v29, 1 }
 0x2bd   : > { %17625 = vst [vmem:[#allocation132_spill] sm:$0xff] %v11536_v50  ;;  %v1558_v51 = vsel %vm1505_vm5, %v17627_v27, %v17626_v62  ;;  %v2894_v31 = vadd.f32 %v10528_v20, %v2819_v48  ;;  %v11562_v62 = vmul.f32 %v9668_v0, %v11536_v50  ;;  %v1894_v27 = vadd.f32 %v1830_v52, %v1696_v58  ;;  %v17634_v48 = vld [vmem:[#allocation131_spill] sm:$0xff]  ;;  %v17661_v29 = vld [vmem:[#allocation108_spill] sm:$0xff] }
 0x2be   : > { %v11550_v15 = vmul.f32 %v7993_v47, %v1558_v51  ;;  %17630 = vst [vmem:[#allocation30_spill] sm:$0xff] %v11556_v6  ;;  %v11566_v34 = vmul.f32 %v9706_v7, %v11536_v50  ;;  %v1293_v51 = vrot.slane %v17634_v48, 7  ;;  %17635 = vst [vmem:[#allocation142_spill] sm:$0xff] %v11569_v3  ;;  %v2162_v6 = vadd.f32 %v2098_v53, %v11378_v59 }
 0x2bf   : > { %17632 = vst [vmem:[#allocation139_spill] sm:$0xff] %v11562_v62  ;;  %v2958_v5 = vmax.f32 %v2894_v31, 0.0  ;;  %v1831_v31 = vmul.f32 %v9658_v22, %v17634_v48  ;;  %v17638_v53 = vrot.slane %v17617_v24, 1  ;;  %v17667_v24 = vld [vmem:[#allocation32_spill] sm:$0xff] }
 0x2c0   : > { %17629 = vst [vmem:[#allocation43_spill] sm:$0xff] %v11550_v15  ;;  %17633 = vst [vmem:[#allocation95_spill] sm:$0xff] %v11566_v34  ;;  %v1966_v13 = vmul.f32 %v9701_v40, %v11550_v15  ;;  %v2370_v61 = vmul.f32 %v9712_v32, %v11550_v15  ;;  %v11578_v52 = vsel %vm1304_vm4, %v1261_v37, %v1293_v51  ;;  %v16630_v34 = vrot.slane %v17634_v48, 1 }
 0x2c1   : > { %17636 = vst [vmem:[#allocation140_spill] sm:$0xff] %v11578_v52  ;;  %v1358_v58 = vsel %vm1304_vm4, %v1293_v51, %v1261_v37  ;;  %v3887_v3 = vpack.c.bf16 %v2960_v8, %v2958_v5  ;;  %v2298_v62 = vadd.f32 %v2234_v14, %v2162_v6  ;;  %v1697_v37 = vmul.f32 %v9775_v4, %v11578_v52 }
 0x2c2   : > { %v11585_v50 = vadd.f32 %v1966_v13, %v1894_v27  ;;  %v11588_v59 = vmul.f32 %v7976_v41, %v1358_v58  ;;  %v1559_v15 = vsel %vm1505_vm5, %v16630_v34, %v17638_v53  ;;  %v2099_v51 = vmul.f32 %v9815_v54, %v11578_v52 }
 0x2c3   : > { %v2235_v5 = vmul.f32 %v9662_v23, %v17634_v48  ;;  %4476 = vmatprep.mubr.bf16.mxu1 %v3887_v3  ;;  %v11602_v14 = vadd.f32 %v2370_v61, %v2298_v62  ;;  %v11605_v13 = vmul.f32 %v7993_v47, %v1559_v15  ;;  %v1895_v27 = vadd.f32 %v1831_v31, %v1697_v37  ;;  %v17644_v3 = vld [vmem:[#allocation35_spill] sm:$0xff]  ;;  %v17646_v62 = vld [vmem:[#allocation88_spill] sm:$0xff]  ;;  %v17649_v37 = vld [vmem:[#allocation57_spill] sm:$0xff] }
 0x2c4   : > { %17637 = vst [vmem:[#allocation19_spill] sm:$0xff] %v11588_v59  ;;  %v11609_v8 = vmul.f32 %v9775_v4, %v11588_v59  ;;  %v11613_v6 = vmul.f32 %v9815_v54, %v11588_v59  ;;  %v2163_v58 = vadd.f32 %v2099_v51, %v11437_v10  ;;  %v11618_v53 = vmul.f32 %v9872_v60, %v17634_v48  ;;  %v17648_v31 = vld [vmem:[#allocation24_spill] sm:$0xff] }
 0x2c5   : > { %17639 = vst [vmem:[#allocation104_spill] sm:$0xff] %v11602_v14  ;;  %17640 = vst [vmem:[#allocation87_spill] sm:$0xff] %v11605_v13  ;;  %v17645_v61 = vrot.slane %v17644_v3, 1  ;;  %v17647_v15 = vrot.slane %v17646_v62, 1  ;;  %v1967_v14 = vmul.f32 %v9811_v56, %v11605_v13  ;;  %v1876_v10 = vadd.f32 %v17649_v37, %v17648_v31 }
 0x2c6   : > { %17641 = vst [vmem:[#allocation143_spill] sm:$0xff] %v11609_v8  ;;  %17642 = vst [vmem:[#allocation144_spill] sm:$0xff] %v11613_v6  ;;  %v2371_v6 = vmul.f32 %v9835_v9, %v11605_v13  ;;  %v2299_v35 = vadd.f32 %v2235_v5, %v2163_v58  ;;  %v2140_v3 = vadd.f32 %v17650_v26, %v11249_v57  ;;  %v17652_v13 = vld [vmem:[#allocation68_spill] sm:$0xff]  ;;  %v17654_v5 = vld [vmem:[#allocation66_spill] sm:$0xff]  ;;  %v1262_v48 = vrot.slane %v17667_v24, 7 }
 0x2c7   : > { %17643 = vst [vmem:[#allocation38_spill] sm:$0xff] %v11618_v53  ;;  %v1518_v34 = vsel %vm1505_vm5, %v17647_v15, %v17645_v61  ;;  %v17651_v53 = vld [vmem:[#allocation53_spill] sm:$0xff]  ;;  %v11640_v15 = vadd.f32 %v1967_v14, %v1895_v27  ;;  %v2486_v59 = vmul.f32 %v17429_v12, %v17652_v13  ;;  %v17655_v57 = vld [vmem:[#allocation39_spill] sm:$0xff]  ;;  %v17658_v27 = vld [vmem:[#allocation138_spill] sm:$0xff] }
 0x2c8   : > { %v1948_v51 = vmul.f32 %v9701_v40, %v1518_v34  ;;  %v11636_v62 = vmul.f32 %v9712_v32, %v1518_v34  ;;  %v2484_v61 = vmul.f32 %v17429_v12, %v17651_v53  ;;  %v2754_v31 = vmul.f32 %v11059_v17, %v1518_v34  ;;  %v17659_v13 = vld [vmem:[#allocation50_spill] sm:$0xff] }
 0x2c9   : > { %v11647_v37 = vadd.f32 %v2371_v6, %v2299_v35  ;;  %v2276_v58 = vadd.f32 %v17654_v5, %v2140_v3  ;;  %v2756_v26 = vmul.f32 %v11059_v17, %v17655_v57  ;;  %v17657_v53 = vrot.slane %v17454_v43, 1  ;;  %v17660_v34 = vld [vmem:[#allocation34_spill] sm:$0xff]  ;;  %v17662_v57 = vld [vmem:[#allocation25_spill] sm:$0xff] }
 0x2ca   : > { %v11642_v52 = vadd.f32 %v1948_v51, %v1876_v10  ;;  %v2550_v10 = vadd.f32 %v2486_v59, %v17658_v27  ;;  %v1881_v51 = vadd.f32 %v17659_v13, %v11031_v21  ;;  %v2145_v6 = vadd.f32 %v17660_v34, %v11280_v33  ;;  %v17663_v59 = vld [vmem:[#allocation79_spill] sm:$0xff]  ;;  %v17664_v21 = vld [vmem:[#allocation22_spill] sm:$0xff] }
 0x2cb   : > { %17653 = vst [vmem:[#allocation35_spill] sm:$0xff] %v11647_v37  ;;  %v1521_v14 = vsel %vm1505_vm5, %v17657_v53, %v17656_v46  ;;  %v2412_v3 = vadd.f32 %v11440_v25, %v2276_v58  ;;  %v2489_v43 = vmul.f32 %v9839_v11, %v17661_v29  ;;  %v2491_v46 = vmul.f32 %v9839_v11, %v17662_v57  ;;  %v17665_v34 = vld [vmem:[#allocation46_spill] sm:$0xff]  ;;  %v17666_v58 = vld [vmem:[#allocation60_spill] sm:$0xff] }
 0x2cc   : > { %v1953_v35 = vmul.f32 %v9811_v56, %v1521_v14  ;;  %v11666_v5 = vmul.f32 %v9835_v9, %v1521_v14  ;;  %v2684_v53 = vadd.f32 %v17663_v59, %v2550_v10  ;;  %v2281_v13 = vadd.f32 %v17664_v21, %v2145_v6 }
 0x2cd   : > { %v2759_v37 = vmul.f32 %v11481_v45, %v1521_v14  ;;  %v2548_v33 = vadd.f32 %v2484_v61, %v2412_v3  ;;  %v2555_v25 = vadd.f32 %v2491_v46, %v17665_v34  ;;  %v2761_v8 = vmul.f32 %v11481_v45, %v17666_v58  ;;  %v17670_v14 = vld [vmem:[#allocation112_spill] sm:$0xff]  ;;  %v17673_v46 = vld [vmem:[#allocation51_spill] sm:$0xff]  ;;  %v17675_v58 = vld [vmem:[#allocation62_spill] sm:$0xff] }
 0x2ce   : > { %v11673_v27 = vadd.f32 %v1953_v35, %v1881_v51  ;;  %v2820_v29 = vadd.f32 %v2756_v26, %v2684_v53  ;;  %v2417_v18 = vadd.f32 %v11468_v42, %v2281_v13  ;;  %v16638_v57 = vrot.slane %v17667_v24, 1  ;;  %v17669_v51 = vld [vmem:[#allocation29_spill] sm:$0xff] }
 0x2cf   : > { %v11685_v10 = vmul.f32 %v9632_v1, %v17667_v24  ;;  %v2682_v35 = vadd.f32 %v17669_v51, %v2548_v33  ;;  %v2689_v61 = vadd.f32 %v17670_v14, %v2555_v25  ;;  %v11691_v6 = vmul.f32 %v9636_v38, %v17667_v24 }
 0x2d0   : > { %v11695_v3 = vmul.f32 %v9855_v44, %v17667_v24  ;;  %v2895_v42 = vadd.f32 %v10525_v2, %v2820_v29  ;;  %v2553_v26 = vadd.f32 %v2489_v43, %v2417_v18  ;;  %v1263_v59 = vrot.slane %v17673_v46, 7  ;;  %v17677_v43 = vld [vmem:[#allocation49_spill] sm:$0xff]  ;;  %v17701_v24 = vld [vmem:[#allocation100_spill] sm:$0xff] }
 0x2d1   : > { %17668 = vst [vmem:[#allocation88_spill] sm:$0xff] %v11685_v10  ;;  %17671 = vst [vmem:[#allocation24_spill] sm:$0xff] %v11691_v6  ;;  %v2818_v21 = vadd.f32 %v2754_v31, %v2682_v35  ;;  %v2825_v13 = vadd.f32 %v2761_v8, %v2689_v61  ;;  %v11702_v33 = vmul.f32 %v9658_v22, %v17673_v46  ;;  %v1294_v29 = vrot.slane %v17677_v43, 7 }
 0x2d2   : > { %17672 = vst [vmem:[#allocation57_spill] sm:$0xff] %v11695_v3  ;;  %v11706_v34 = vmul.f32 %v9662_v23, %v17673_v46  ;;  %v2959_v25 = vmax.f32 %v2895_v42, 0.0  ;;  %v2687_v51 = vadd.f32 %v17675_v58, %v2553_v26  ;;  %v11711_v18 = vmul.f32 %v9872_v60, %v17673_v46 }
 0x2d3   : > { %v2893_v31 = vadd.f32 %v10525_v2, %v2818_v21  ;;  %v2900_v8 = vadd.f32 %v10528_v20, %v2825_v13  ;;  %v16639_v35 = vrot.slane %v17677_v43, 1  ;;  %v1834_v14 = vmul.f32 %v9632_v1, %v17677_v43 }
 0x2d4   : > { %17674 = vst [vmem:[#allocation133_spill] sm:$0xff] %v11706_v34  ;;  %17676 = vst [vmem:[#allocation53_spill] sm:$0xff] %v11711_v18  ;;  %v2823_v61 = vadd.f32 %v2759_v37, %v2687_v51  ;;  %v11721_v42 = vsel %vm1304_vm4, %v1262_v48, %v1294_v29  ;;  %v1359_v26 = vsel %vm1304_vm4, %v1294_v29, %v1262_v48 }
 0x2d5   : > { %17678 = vst [vmem:[#allocation68_spill] sm:$0xff] %v11721_v42  ;;  %v2238_v58 = vmul.f32 %v9636_v38, %v17677_v43  ;;  %v2957_v53 = vmax.f32 %v2893_v31, 0.0  ;;  %v2964_v21 = vmax.f32 %v2900_v8, 0.0  ;;  %v11728_v13 = vmul.f32 %v7976_v41, %v1359_v26 }
 0x2d6   : > { %v1560_v37 = vsel %vm1505_vm5, %v16639_v35, %v16638_v57  ;;  %v2898_v51 = vadd.f32 %v10528_v20, %v2823_v61  ;;  %v1700_v48 = vmul.f32 %v9668_v0, %v11721_v42  ;;  %v2102_v29 = vmul.f32 %v9706_v7, %v11721_v42 }
 0x2d7   : > { %17679 = vst [vmem:[#allocation66_spill] sm:$0xff] %v11728_v13  ;;  %v11738_v6 = vmul.f32 %v7993_v47, %v1560_v37  ;;  %v3886_v31 = vpack.c.bf16 %v2959_v25, %v2957_v53  ;;  %v11746_v8 = vmul.f32 %v9668_v0, %v11728_v13  ;;  %v11750_v26 = vmul.f32 %v9706_v7, %v11728_v13  ;;  %v17684_v25 = vld [vmem:[#allocation27_spill] sm:$0xff] }
 0x2d8   : > { %v11754_v61 = vmul.f32 %v9855_v44, %v17677_v43  ;;  %v2962_v37 = vmax.f32 %v2898_v51, 0.0  ;;  %v1898_v57 = vadd.f32 %v1834_v14, %v1700_v48  ;;  %v2166_v3 = vadd.f32 %v2102_v29, %v11585_v50 }
 0x2d9   : > { %17680 = vst [vmem:[#allocation39_spill] sm:$0xff] %v11738_v6  ;;  %17681 = vst [vmem:[#allocation138_spill] sm:$0xff] %v11746_v8  ;;  %v1970_v35 = vmul.f32 %v9701_v40, %v11738_v6  ;;  %4477 = vmatmul.mubr.bf16.gmra.mrb[52].mxu1 %v3886_v31  ;;  %v2374_v53 = vmul.f32 %v9712_v32, %v11738_v6  ;;  %v1295_v34 = vrot.slane %v17684_v25, 7  ;;  %v16642_v42 = vrot.slane %v17684_v25, 1  ;;  %v17691_v31 = vld [vmem:[#allocation36_spill] sm:$0xff] }
 0x2da   : > { %17682 = vst [vmem:[#allocation50_spill] sm:$0xff] %v11750_v26  ;;  %17683 = vst [vmem:[#allocation34_spill] sm:$0xff] %v11754_v61  ;;  %v1835_v26 = vmul.f32 %v9658_v22, %v17684_v25  ;;  %v3889_v13 = vpack.c.bf16 %v2964_v21, %v2962_v37  ;;  %v2302_v14 = vadd.f32 %v2238_v58, %v2166_v3  ;;  %v17686_v29 = vrot.slane %v17673_v46, 1 }
 0x2db   : > { %v11765_v61 = vadd.f32 %v1970_v35, %v1898_v57  ;;  %v2239_v51 = vmul.f32 %v9662_v23, %v17684_v25  ;;  %v11771_v50 = vsel %vm1304_vm4, %v1263_v59, %v1295_v34  ;;  %v1360_v48 = vsel %vm1304_vm4, %v1295_v34, %v1263_v59 }
 0x2dc   : > { %17685 = vst [vmem:[#allocation108_spill] sm:$0xff] %v11771_v50  ;;  %v1561_v21 = vsel %vm1505_vm5, %v16642_v42, %v17686_v29  ;;  %v11783_v57 = vmul.f32 %v9872_v60, %v17684_v25  ;;  %4486 = vmatprep.mubr.bf16.mxu1 %v3889_v13  ;;  %v11785_v3 = vadd.f32 %v2374_v53, %v2302_v14  ;;  %v17692_v37 = vrot.slane %v17691_v31, 1  ;;  %v17693_v29 = vld [vmem:[#allocation82_spill] sm:$0xff]  ;;  %v17695_v53 = vld [vmem:[#allocation55_spill] sm:$0xff] }
 0x2dd   : > { %v11788_v35 = vmul.f32 %v7976_v41, %v1360_v48  ;;  %v11791_v58 = vmul.f32 %v7993_v47, %v1561_v21  ;;  %v1701_v59 = vmul.f32 %v9775_v4, %v11771_v50  ;;  %v2103_v34 = vmul.f32 %v9815_v54, %v11771_v50  ;;  %v17696_v14 = vld [vmem:[#allocation99_spill] sm:$0xff] }
 0x2de   : > { %17687 = vst [vmem:[#allocation25_spill] sm:$0xff] %v11783_v57  ;;  %17688 = vst [vmem:[#allocation79_spill] sm:$0xff] %v11785_v3  ;;  %v17694_v42 = vrot.slane %v17693_v29, 1  ;;  %v1880_v48 = vadd.f32 %v17696_v14, %v17695_v53  ;;  %v17697_v3 = vld [vmem:[#allocation80_spill] sm:$0xff]  ;;  %v17702_v57 = vld [vmem:[#allocation141_spill] sm:$0xff] }
 0x2df   : > { %17689 = vst [vmem:[#allocation22_spill] sm:$0xff] %v11788_v35  ;;  %17690 = vst [vmem:[#allocation46_spill] sm:$0xff] %v11791_v58  ;;  %v2144_v21 = vadd.f32 %v17697_v3, %v11446_v63  ;;  %v11809_v6 = vmul.f32 %v9775_v4, %v11788_v35  ;;  %v1899_v10 = vadd.f32 %v1835_v26, %v1701_v59  ;;  %v17699_v63 = vld [vmem:[#allocation40_spill] sm:$0xff]  ;;  %v17700_v59 = vld [vmem:[#allocation33_spill] sm:$0xff] }
 0x2e0   : > { %v1520_v13 = vsel %vm1505_vm5, %v17694_v42, %v17692_v37  ;;  %v1971_v8 = vmul.f32 %v9811_v56, %v11791_v58  ;;  %v11815_v31 = vmul.f32 %v9815_v54, %v11788_v35  ;;  %v2167_v42 = vadd.f32 %v2103_v34, %v11640_v15 }
 0x2e1   : > { %v2375_v37 = vmul.f32 %v9835_v9, %v11791_v58  ;;  %v1952_v29 = vmul.f32 %v9701_v40, %v1520_v13  ;;  %v2280_v3 = vadd.f32 %v17699_v63, %v2144_v21  ;;  %v11825_v26 = vmul.f32 %v9712_v32, %v1520_v13 }
 0x2e2   : > { %17698 = vst [vmem:[#allocation60_spill] sm:$0xff] %v11815_v31  ;;  %v11822_v53 = vadd.f32 %v1971_v8, %v1899_v10  ;;  %v2488_v14 = vmul.f32 %v17429_v12, %v17700_v59  ;;  %v2490_v31 = vmul.f32 %v17429_v12, %v17701_v24  ;;  %v2303_v43 = vadd.f32 %v2239_v51, %v2167_v42  ;;  %v17703_v10 = vld [vmem:[#allocation85_spill] sm:$0xff]  ;;  %v17709_v42 = vld [vmem:[#allocation23_spill] sm:$0xff] }
 0x2e3   : > { %v11831_v15 = vadd.f32 %v1952_v29, %v1880_v48  ;;  %v2416_v34 = vadd.f32 %v11636_v62, %v2280_v3  ;;  %v2758_v18 = vmul.f32 %v11059_v17, %v1520_v13  ;;  %v2760_v8 = vmul.f32 %v11059_v17, %v17703_v10  ;;  %v17706_v24 = vld [vmem:[#allocation65_spill] sm:$0xff] }
 0x2e4   : > { %v2554_v21 = vadd.f32 %v2490_v31, %v17702_v57  ;;  %v17704_v63 = vrot.slane %v17520_v49, 1  ;;  %v17705_v58 = vrot.slane %v17507_v16, 1  ;;  %v1885_v51 = vadd.f32 %v17706_v24, %v11216_v55  ;;  %v17708_v57 = vld [vmem:[#allocation118_spill] sm:$0xff]  ;;  %v17712_v55 = vld [vmem:[#allocation56_spill] sm:$0xff] }
 0x2e5   : > { %v11846_v48 = vadd.f32 %v2375_v37, %v2303_v43  ;;  %v2552_v62 = vadd.f32 %v2488_v14, %v2416_v34  ;;  %v2149_v31 = vadd.f32 %v17708_v57, %v11475_v19  ;;  %v17710_v16 = vld [vmem:[#allocation106_spill] sm:$0xff]  ;;  %v17713_v14 = vld [vmem:[#allocation92_spill] sm:$0xff]  ;;  %v17715_v57 = vld [vmem:[#allocation63_spill] sm:$0xff] }
 0x2e6   : > { %v1523_v59 = vsel %vm1505_vm5, %v17705_v58, %v17704_v63  ;;  %v2688_v29 = vadd.f32 %v17709_v42, %v2554_v21  ;;  %v2493_v3 = vmul.f32 %v9839_v11, %v17710_v16  ;;  %v17711_v58 = vld [vmem:[#allocation77_spill] sm:$0xff]  ;;  %v17714_v24 = vld [vmem:[#allocation20_spill] sm:$0xff]  ;;  %v2765_v42 = vmul.f32 %v11481_v45, %v17715_v57 }
 0x2e7   : > { %17707 = vst [vmem:[#allocation29_spill] sm:$0xff] %v11846_v48  ;;  %v1957_v13 = vmul.f32 %v9811_v56, %v1523_v59  ;;  %v11853_v49 = vmul.f32 %v9835_v9, %v1523_v59  ;;  %v2495_v10 = vmul.f32 %v9839_v11, %v17711_v58  ;;  %v2686_v43 = vadd.f32 %v17712_v55, %v2552_v62  ;;  %v17716_v48 = vld [vmem:[#allocation41_spill] sm:$0xff] }
 0x2e8   : > { %v2285_v34 = vadd.f32 %v17713_v14, %v2149_v31  ;;  %v2763_v63 = vmul.f32 %v11481_v45, %v1523_v59  ;;  %v2824_v19 = vadd.f32 %v2760_v8, %v2688_v29  ;;  %v1264_v50 = vrot.slane %v17716_v48, 7  ;;  %v17718_v59 = vld [vmem:[#allocation78_spill] sm:$0xff]  ;;  %v17721_v29 = vld [vmem:[#allocation31_spill] sm:$0xff] }
 0x2e9   : > { %v11860_v37 = vadd.f32 %v1957_v13, %v1885_v51  ;;  %v2559_v21 = vadd.f32 %v2495_v10, %v17714_v24  ;;  %v2822_v16 = vadd.f32 %v2758_v18, %v2686_v43  ;;  %v11872_v51 = vmul.f32 %v9632_v1, %v17716_v48 }
 0x2ea   : > { %v2421_v35 = vadd.f32 %v11666_v5, %v2285_v34  ;;  %v2899_v62 = vadd.f32 %v10525_v2, %v2824_v19  ;;  %v11878_v13 = vmul.f32 %v9636_v38, %v17716_v48  ;;  %v11882_v31 = vmul.f32 %v9855_v44, %v17716_v48 }
 0x2eb   : > { %17717 = vst [vmem:[#allocation112_spill] sm:$0xff] %v11872_v51  ;;  %v2693_v8 = vadd.f32 %v17718_v59, %v2559_v21  ;;  %v2897_v5 = vadd.f32 %v10525_v2, %v2822_v16  ;;  %v1265_v10 = vrot.slane %v17721_v29, 7  ;;  %v11889_v34 = vmul.f32 %v9658_v22, %v17721_v29  ;;  %v17724_v21 = vld [vmem:[#allocation58_spill] sm:$0xff]  ;;  %v17751_v51 = vld [vmem:[#allocation47_spill] sm:$0xff] }
 0x2ec   : > { %17719 = vst [vmem:[#allocation51_spill] sm:$0xff] %v11878_v13  ;;  %17720 = vst [vmem:[#allocation62_spill] sm:$0xff] %v11882_v31  ;;  %v2557_v18 = vadd.f32 %v2493_v3, %v2421_v35  ;;  %v2963_v43 = vmax.f32 %v2899_v62, 0.0  ;;  %v11893_v19 = vmul.f32 %v9662_v23, %v17721_v29  ;;  %v11898_v35 = vmul.f32 %v9872_v60, %v17721_v29  ;;  %v17726_v3 = vld [vmem:[#allocation61_spill] sm:$0xff] }
 0x2ed   : > { %v2829_v14 = vadd.f32 %v2765_v42, %v2693_v8  ;;  %17722 = vst [vmem:[#allocation27_spill] sm:$0xff] %v11889_v34  ;;  %v2961_v24 = vmax.f32 %v2897_v5, 0.0  ;;  %v1296_v16 = vrot.slane %v17726_v3, 7  ;;  %v1838_v59 = vmul.f32 %v9632_v1, %v17726_v3  ;;  %v17823_v34 = vld [vmem:[#allocation134_spill] sm:$0xff] }
 0x2ee   : > { %17723 = vst [vmem:[#allocation36_spill] sm:$0xff] %v11893_v19  ;;  %v2691_v57 = vadd.f32 %v17724_v21, %v2557_v18  ;;  %17725 = vst [vmem:[#allocation82_spill] sm:$0xff] %v11898_v35  ;;  %v2242_v8 = vmul.f32 %v9636_v38, %v17726_v3  ;;  %v17729_v42 = vrot.slane %v17716_v48, 1  ;;  %v17730_v13 = vrot.slane %v17726_v3, 1  ;;  %v17752_v48 = vld [vmem:[#allocation83_spill] sm:$0xff] }
 0x2ef   : > { %v2904_v62 = vadd.f32 %v10528_v20, %v2829_v14  ;;  %v3888_v55 = vpack.c.bf16 %v2963_v43, %v2961_v24  ;;  %v11909_v18 = vsel %vm1304_vm4, %v1264_v50, %v1296_v16  ;;  %v1361_v21 = vsel %vm1304_vm4, %v1296_v16, %v1264_v50 }
 0x2f0   : > { %v2827_v5 = vadd.f32 %v2763_v63, %v2691_v57  ;;  %17727 = vst [vmem:[#allocation55_spill] sm:$0xff] %v11909_v18  ;;  %v11914_v14 = vmul.f32 %v7976_v41, %v1361_v21  ;;  %v1562_v19 = vsel %vm1505_vm5, %v17730_v13, %v17729_v42  ;;  %v1704_v63 = vmul.f32 %v9668_v0, %v11909_v18 }
 0x2f1   : > { %v2968_v58 = vmax.f32 %v2904_v62, 0.0  ;;  %4487 = vmatmul.mubr.bf16.gmra.mrb[56].mxu1 %v3888_v55  ;;  %v11926_v24 = vmul.f32 %v7993_v47, %v1562_v19  ;;  %v2106_v50 = vmul.f32 %v9706_v7, %v11909_v18  ;;  %v11932_v57 = vmul.f32 %v9855_v44, %v17726_v3  ;;  %v17735_v62 = vld [vmem:[#allocation113_spill] sm:$0xff] }
 0x2f2   : > { %17728 = vst [vmem:[#allocation99_spill] sm:$0xff] %v11914_v14  ;;  %v2902_v43 = vadd.f32 %v10528_v20, %v2827_v5  ;;  %v11936_v16 = vmul.f32 %v9668_v0, %v11914_v14  ;;  %v1902_v13 = vadd.f32 %v1838_v59, %v1704_v63  ;;  %v11940_v55 = vmul.f32 %v9706_v7, %v11914_v14 }
 0x2f3   : > { %17731 = vst [vmem:[#allocation80_spill] sm:$0xff] %v11926_v24  ;;  %17732 = vst [vmem:[#allocation40_spill] sm:$0xff] %v11932_v57  ;;  %v1297_v42 = vrot.slane %v17735_v62, 7  ;;  %v1974_v5 = vmul.f32 %v9701_v40, %v11926_v24  ;;  %v2170_v21 = vadd.f32 %v2106_v50, %v11765_v61  ;;  %v2378_v31 = vmul.f32 %v9712_v32, %v11926_v24 }
 0x2f4   : > { %17733 = vst [vmem:[#allocation33_spill] sm:$0xff] %v11936_v16  ;;  %17734 = vst [vmem:[#allocation100_spill] sm:$0xff] %v11940_v55  ;;  %v2966_v19 = vmax.f32 %v2902_v43, 0.0  ;;  %v16651_v63 = vrot.slane %v17735_v62, 1  ;;  %v1839_v43 = vmul.f32 %v9658_v22, %v17735_v62  ;;  %v17738_v50 = vrot.slane %v17721_v29, 1 }
 0x2f5   : > { %v11950_v57 = vsel %vm1304_vm4, %v1265_v10, %v1297_v42  ;;  %v1362_v59 = vsel %vm1304_vm4, %v1297_v42, %v1265_v10  ;;  %v11957_v35 = vadd.f32 %v1974_v5, %v1902_v13  ;;  %v2306_v18 = vadd.f32 %v2242_v8, %v2170_v21 }
 0x2f6   : > { %17736 = vst [vmem:[#allocation141_spill] sm:$0xff] %v11950_v57  ;;  %v3891_v55 = vpack.c.bf16 %v2968_v58, %v2966_v19  ;;  %v11960_v61 = vmul.f32 %v7976_v41, %v1362_v59  ;;  %v1563_v24 = vsel %vm1505_vm5, %v16651_v63, %v17738_v50  ;;  %v1705_v10 = vmul.f32 %v9775_v4, %v11950_v57 }
 0x2f7   : > { %v2107_v42 = vmul.f32 %v9815_v54, %v11950_v57  ;;  %v2243_v58 = vmul.f32 %v9662_v23, %v17735_v62  ;;  %v11974_v8 = vadd.f32 %v2378_v31, %v2306_v18  ;;  %v11977_v13 = vmul.f32 %v7993_v47, %v1563_v24  ;;  %v17744_v31 = vld [vmem:[#allocation73_spill] sm:$0xff]  ;;  %v17769_v57 = vld [vmem:[#allocation59_spill] sm:$0xff] }
 0x2f8   : > { %17737 = vst [vmem:[#allocation85_spill] sm:$0xff] %v11960_v61  ;;  %4496 = vmatprep.mubr.bf16.mxu1 %v3891_v55  ;;  %v11981_v19 = vmul.f32 %v9775_v4, %v11960_v61  ;;  %v11985_v5 = vmul.f32 %v9815_v54, %v11960_v61  ;;  %v1903_v21 = vadd.f32 %v1839_v43, %v1705_v10  ;;  %v17745_v18 = vrot.slane %v17744_v31, 1  ;;  %v17746_v55 = vld [vmem:[#allocation48_spill] sm:$0xff]  ;;  %v17749_v10 = vld [vmem:[#allocation101_spill] sm:$0xff] }
 0x2f9   : > { %17739 = vst [vmem:[#allocation65_spill] sm:$0xff] %v11974_v8  ;;  %17740 = vst [vmem:[#allocation118_spill] sm:$0xff] %v11977_v13  ;;  %v2171_v59 = vadd.f32 %v2107_v42, %v11822_v53  ;;  %v11990_v50 = vmul.f32 %v9872_v60, %v17735_v62  ;;  %v17747_v24 = vrot.slane %v17746_v55, 1  ;;  %v1975_v8 = vmul.f32 %v9811_v56, %v11977_v13  ;;  %v17748_v43 = vld [vmem:[#allocation52_spill] sm:$0xff] }
 0x2fa   : > { %17741 = vst [vmem:[#allocation23_spill] sm:$0xff] %v11981_v19  ;;  %17742 = vst [vmem:[#allocation106_spill] sm:$0xff] %v11985_v5  ;;  %v2379_v5 = vmul.f32 %v9835_v9, %v11977_v13  ;;  %v1884_v53 = vadd.f32 %v17749_v10, %v17748_v43  ;;  %v2494_v3 = vmul.f32 %v17429_v12, %v17752_v48  ;;  %v1268_v19 = vrot.slane %v17823_v34, 7 }
 0x2fb   : > { %17743 = vst [vmem:[#allocation77_spill] sm:$0xff] %v11990_v50  ;;  %v1522_v63 = vsel %vm1505_vm5, %v17747_v24, %v17745_v18  ;;  %v2307_v14 = vadd.f32 %v2243_v58, %v2171_v59  ;;  %v17750_v50 = vld [vmem:[#allocation115_spill] sm:$0xff]  ;;  %v2492_v18 = vmul.f32 %v17429_v12, %v17751_v51  ;;  %v12012_v24 = vadd.f32 %v1975_v8, %v1903_v21 }
 0x2fc   : > { %v1956_v42 = vmul.f32 %v9701_v40, %v1522_v63  ;;  %v2148_v31 = vadd.f32 %v17750_v50, %v11642_v52  ;;  %v12008_v55 = vmul.f32 %v9712_v32, %v1522_v63  ;;  %v2762_v43 = vmul.f32 %v11059_v17, %v1522_v63  ;;  %v17754_v58 = vld [vmem:[#allocation91_spill] sm:$0xff]  ;;  %v12025_v52 = vld [vmem:[%s16381_s5 + $0x10] ss:$0 sm:$0xff] }
 0x2fd   : > { %v12019_v10 = vadd.f32 %v2379_v5, %v2307_v14  ;;  %v17755_v50 = vld [vmem:[#allocation45_spill] sm:$0xff]  ;;  %v17756_v8 = vrot.slane %v17574_v28, 1  ;;  %v17757_v21 = vrot.slane %v17560_v30, 1  ;;  %v17759_v63 = vld [vmem:[#allocation111_spill] sm:$0xff] }
 0x2fe   : > { %v12014_v16 = vadd.f32 %v1956_v42, %v1884_v53  ;;  %v2284_v59 = vadd.f32 %v17754_v58, %v2148_v31  ;;  %v2764_v51 = vmul.f32 %v12025_v52, %v17755_v50  ;;  %v17758_v17 = vld [vmem:[#allocation117_spill] sm:$0xff]  ;;  %v1889_v5 = vadd.f32 %v17759_v63, %v11424_v39 }
 0x2ff   : > { %17753 = vst [vmem:[#allocation56_spill] sm:$0xff] %v12019_v10  ;;  %v1525_v48 = vsel %vm1505_vm5, %v17757_v21, %v17756_v8  ;;  %v2558_v14 = vadd.f32 %v2494_v3, %v17758_v17  ;;  %v17760_v42 = vld [vmem:[#allocation69_spill] sm:$0xff]  ;;  %v17762_v10 = vld [vmem:[#allocation136_spill] sm:$0xff] }
 0x300   : > { %v1961_v53 = vmul.f32 %v9811_v56, %v1525_v48  ;;  %v2153_v31 = vadd.f32 %v17760_v42, %v11673_v27  ;;  %v2420_v58 = vadd.f32 %v11825_v26, %v2284_v59  ;;  %v12043_v50 = vmul.f32 %v9835_v9, %v1525_v48  ;;  %v17761_v28 = vld [vmem:[#allocation105_spill] sm:$0xff]  ;;  %v17763_v3 = vld [vmem:[#allocation64_spill] sm:$0xff] }
 0x301   : > { %v2497_v30 = vmul.f32 %v9839_v11, %v17761_v28  ;;  %v2499_v8 = vmul.f32 %v9839_v11, %v17762_v10  ;;  %v2692_v21 = vadd.f32 %v17763_v3, %v2558_v14  ;;  %v17764_v39 = vld [vmem:[#allocation81_spill] sm:$0xff]  ;;  %v2767_v13 = vmul.f32 %v11481_v45, %v1525_v48  ;;  %v7518_v27 = vld [vmem:[%s16390_s14] ss:$8 sps:$4 sm:$0xff]   ;;  %v7520_v26 = vld [vmem:[%s16390_s14 + $0x4] ss:$8 sps:$4 sm:$0xff]  }
 0x302   : > { %v12050_v17 = vadd.f32 %v1961_v53, %v1889_v5  ;;  %v2289_v63 = vadd.f32 %v17764_v39, %v2153_v31  ;;  %v2556_v59 = vadd.f32 %v2492_v18, %v2420_v58  ;;  %v17765_v42 = vld [vmem:[#allocation96_spill] sm:$0xff]  ;;  %v17766_v10 = vld [vmem:[#allocation86_spill] sm:$0xff]  ;;  %v17767_v5 = vld [vmem:[#allocation107_spill] sm:$0xff]  ;;  %6711 = vmatprep.subr.bf16.mxu0 %v7520_v26 }
 0x303   : > { %v2563_v28 = vadd.f32 %v2499_v8, %v17765_v42  ;;  %v2769_v14 = vmul.f32 %v11481_v45, %v17766_v10  ;;  %v1266_v53 = vrot.slane %v17767_v5, 7  ;;  %v2828_v3 = vadd.f32 %v2764_v51, %v2692_v21  ;;  %v17770_v18 = vld [vmem:[#allocation74_spill] sm:$0xff]  ;;  %6712 = vmatpush1.bf16.msra.mxu0 %v7518_v27  ;;  %v17776_v48 = vld [vmem:[#allocation71_spill] sm:$0xff] }
 0x304   : > { %v2425_v31 = vadd.f32 %v11853_v49, %v2289_v63  ;;  %v12068_v39 = vmul.f32 %v9632_v1, %v17767_v5  ;;  %v2690_v61 = vadd.f32 %v17769_v57, %v2556_v59  ;;  %v12074_v8 = vmul.f32 %v9636_v38, %v17767_v5  ;;  %v17773_v63 = vld [vmem:[#allocation90_spill] sm:$0xff] }
 0x305   : > { %v2697_v58 = vadd.f32 %v17770_v18, %v2563_v28  ;;  %v12078_v51 = vmul.f32 %v9855_v44, %v17767_v5  ;;  %v2903_v49 = vadd.f32 %v10525_v2, %v2828_v3  ;;  %v1267_v42 = vrot.slane %v17773_v63, 7  ;;  %v17778_v3 = vld [vmem:[#allocation116_spill] sm:$0xff] }
 0x306   : > { %17768 = vst [vmem:[#allocation92_spill] sm:$0xff] %v12068_v39  ;;  %17771 = vst [vmem:[#allocation20_spill] sm:$0xff] %v12074_v8  ;;  %v2561_v21 = vadd.f32 %v2497_v30, %v2425_v31  ;;  %v2826_v10 = vadd.f32 %v2762_v43, %v2690_v61  ;;  %v12085_v59 = vmul.f32 %v9658_v22, %v17773_v63  ;;  %v1298_v31 = vrot.slane %v17778_v3, 7 }
 0x307   : > { %17772 = vst [vmem:[#allocation63_spill] sm:$0xff] %v12078_v51  ;;  %v2833_v57 = vadd.f32 %v2769_v14, %v2697_v58  ;;  %v12089_v28 = vmul.f32 %v9662_v23, %v17773_v63  ;;  %v2967_v18 = vmax.f32 %v2903_v49, 0.0  ;;  %v12094_v30 = vmul.f32 %v9872_v60, %v17773_v63  ;;  %v7521_v49 = vld [vmem:[%s16390_s14 + $0x10] ss:$8 sps:$4 sm:$0xff]   ;;  %v7526_v14 = vld [vmem:[%s16390_s14 + $0x24] ss:$8 sps:$4 sm:$0xff]  }
 0x308   : > { %17774 = vst [vmem:[#allocation78_spill] sm:$0xff] %v12085_v59  ;;  %v2695_v27 = vadd.f32 %v17776_v48, %v2561_v21  ;;  %v2901_v61 = vadd.f32 %v10525_v2, %v2826_v10  ;;  %v1842_v58 = vmul.f32 %v9632_v1, %v17778_v3  ;;  %v7523_v48 = vld [vmem:[%s16390_s14 + $0x14] ss:$8 sps:$4 sm:$0xff]   ;;  %v12110_v26 = vsel %vm1304_vm4, %v1266_v53, %v1298_v31  ;;  %v17808_v59 = vld [vmem:[#allocation131_spill] sm:$0xff] }
 0x309   : > { %17775 = vst [vmem:[#allocation31_spill] sm:$0xff] %v12089_v28  ;;  %17777 = vst [vmem:[#allocation58_spill] sm:$0xff] %v12094_v30  ;;  %v2908_v43 = vadd.f32 %v10528_v20, %v2833_v57  ;;  %v1363_v10 = vsel %vm1304_vm4, %v1298_v31, %v1266_v53  ;;  %v2246_v57 = vmul.f32 %v9636_v38, %v17778_v3  ;;  %6713 = vmatprep.subr.bf16.mxu0 %v7523_v48 }
 0x30a   : > { %v2831_v21 = vadd.f32 %v2767_v13, %v2695_v27  ;;  %17779 = vst [vmem:[#allocation113_spill] sm:$0xff] %v12110_v26  ;;  %v2965_v8 = vmax.f32 %v2901_v61, 0.0  ;;  %v12120_v51 = vmul.f32 %v7976_v41, %v1363_v10  ;;  %v17781_v13 = vrot.slane %v17767_v5, 1  ;;  %6714 = vmatpush1.bf16.msra.mxu0 %v7521_v49  ;;  %v7524_v10 = vld [vmem:[%s16390_s14 + $0x20] ss:$8 sps:$4 sm:$0xff]  }
 0x30b   : > { %v2972_v28 = vmax.f32 %v2908_v43, 0.0  ;;  %v17782_v27 = vrot.slane %v17778_v3, 1  ;;  %v1708_v61 = vmul.f32 %v9668_v0, %v12110_v26  ;;  %v2110_v43 = vmul.f32 %v9706_v7, %v12110_v26  ;;  %6715 = vmatprep.subr.bf16.mxu0 %v7526_v14  ;;  %v7529_v49 = vld [vmem:[%s16390_s14 + $0x34] ss:$8 sps:$4 sm:$0xff]   ;;  %v17787_v26 = vld [vmem:[#allocation44_spill] sm:$0xff] }
 0x30c   : > { %17780 = vst [vmem:[#allocation73_spill] sm:$0xff] %v12120_v51  ;;  %v2906_v53 = vadd.f32 %v10528_v20, %v2831_v21  ;;  %v3890_v39 = vpack.c.bf16 %v2967_v18, %v2965_v8  ;;  %v12141_v48 = vmul.f32 %v9668_v0, %v12120_v51  ;;  %v12149_v21 = vmul.f32 %v9855_v44, %v17778_v3 }
 0x30d   : > { %v1564_v30 = vsel %vm1505_vm5, %v17782_v27, %v17781_v13  ;;  %v1906_v27 = vadd.f32 %v1842_v58, %v1708_v61  ;;  %v2174_v18 = vadd.f32 %v2110_v43, %v11957_v35  ;;  %v1843_v14 = vmul.f32 %v9658_v22, %v17787_v26  ;;  %v7527_v35 = vld [vmem:[%s16390_s14 + $0x30] ss:$8 sps:$4 sm:$0xff]  }
 0x30e   : > { %v12130_v31 = vmul.f32 %v7993_v47, %v1564_v30  ;;  %17784 = vst [vmem:[#allocation52_spill] sm:$0xff] %v12141_v48  ;;  %v12145_v30 = vmul.f32 %v9706_v7, %v12120_v51  ;;  %17786 = vst [vmem:[#allocation115_spill] sm:$0xff] %v12149_v21  ;;  %v2970_v13 = vmax.f32 %v2906_v53, 0.0  ;;  %4497 = vmatmul.mubr.bf16.gmra.mrb[60].mxu1 %v3890_v39  ;;  %v1299_v51 = vrot.slane %v17787_v26, 7 }
 0x30f   : > { %v16661_v21 = vrot.slane %v17787_v26, 1  ;;  %v2310_v58 = vadd.f32 %v2246_v57, %v2174_v18  ;;  %v2247_v53 = vmul.f32 %v9662_v23, %v17787_v26  ;;  %6716 = vmatpush1.bf16.msra.mxu0 %v7524_v10  ;;  %v12184_v43 = vmul.f32 %v9872_v60, %v17787_v26  ;;  %v7532_v10 = vld [vmem:[%s16390_s14 + $0x44] ss:$8 sps:$4 sm:$0xff]  }
 0x310   : > { %17783 = vst [vmem:[#allocation48_spill] sm:$0xff] %v12130_v31  ;;  %17785 = vst [vmem:[#allocation101_spill] sm:$0xff] %v12145_v30  ;;  %v1978_v8 = vmul.f32 %v9701_v40, %v12130_v31  ;;  %v2382_v30 = vmul.f32 %v9712_v32, %v12130_v31  ;;  %v3893_v48 = vpack.c.bf16 %v2972_v28, %v2970_v13  ;;  %v17789_v28 = vrot.slane %v17773_v63, 1  ;;  %v17810_v63 = vld [vmem:[#allocation127_spill] sm:$0xff] }
 0x311   : > { %v12172_v39 = vsel %vm1304_vm4, %v1267_v42, %v1299_v51  ;;  %v1364_v61 = vsel %vm1304_vm4, %v1299_v51, %v1267_v42  ;;  %17790 = vst [vmem:[#allocation83_spill] sm:$0xff] %v12184_v43  ;;  %6717 = vmatprep.subr.bf16.mxu0 %v7529_v49  ;;  %v17794_v49 = vld [vmem:[#allocation102_spill] sm:$0xff]  ;;  %v17811_v26 = vrot.slane %v17810_v63, 1  ;;  %v7538_v63 = vld [vmem:[%s16390_s14 + $0x64] ss:$8 sps:$4 sm:$0xff]  }
 0x312   : > { %v12163_v5 = vadd.f32 %v1978_v8, %v1906_v27  ;;  %17788 = vst [vmem:[#allocation47_spill] sm:$0xff] %v12172_v39  ;;  %v1565_v57 = vsel %vm1505_vm5, %v16661_v21, %v17789_v28  ;;  %4506 = vmatprep.mubr.bf16.mxu1 %v3893_v48  ;;  %v12189_v13 = vadd.f32 %v2382_v30, %v2310_v58  ;;  %v17795_v18 = vrot.slane %v17794_v49, 1  ;;  %v17796_v28 = vld [vmem:[#allocation84_spill] sm:$0xff] }
 0x313   : > { %v12192_v51 = vmul.f32 %v7976_v41, %v1364_v61  ;;  %v12195_v42 = vmul.f32 %v7993_v47, %v1565_v57  ;;  %v1709_v27 = vmul.f32 %v9775_v4, %v12172_v39  ;;  %v2111_v8 = vmul.f32 %v9815_v54, %v12172_v39  ;;  %v17798_v30 = vld [vmem:[#allocation76_spill] sm:$0xff]  ;;  %6718 = vmatpush1.bf16.msra.mxu0 %v7527_v35 }
 0x314   : > { %17791 = vst [vmem:[#allocation91_spill] sm:$0xff] %v12189_v13  ;;  %v17797_v21 = vrot.slane %v17796_v28, 1  ;;  %v17799_v58 = vld [vmem:[#allocation72_spill] sm:$0xff]  ;;  %v17800_v13 = vld [vmem:[#allocation110_spill] sm:$0xff]  ;;  %6719 = vmatprep.subr.bf16.mxu0 %v7532_v10 }
 0x315   : > { %17792 = vst [vmem:[#allocation45_spill] sm:$0xff] %v12192_v51  ;;  %17793 = vst [vmem:[#allocation117_spill] sm:$0xff] %v12195_v42  ;;  %v1888_v61 = vadd.f32 %v17799_v58, %v17798_v30  ;;  %v2152_v57 = vadd.f32 %v17800_v13, %v11831_v15  ;;  %v12213_v31 = vmul.f32 %v9775_v4, %v12192_v51  ;;  %v7535_v28 = vld [vmem:[%s16390_s14 + $0x54] ss:$8 sps:$4 sm:$0xff]  }
 0x316   : > { %v1524_v48 = vsel %vm1505_vm5, %v17797_v21, %v17795_v18  ;;  %v1907_v43 = vadd.f32 %v1843_v14, %v1709_v27  ;;  %v1979_v3 = vmul.f32 %v9811_v56, %v12195_v42  ;;  %v12219_v49 = vmul.f32 %v9815_v54, %v12192_v51  ;;  %v7530_v21 = vld [vmem:[%s16390_s14 + $0x40] ss:$8 sps:$4 sm:$0xff]   ;;  %v17803_v14 = vld [vmem:[#allocation21_spill] sm:$0xff]  ;;  %v17804_v58 = vld [vmem:[#allocation122_spill] sm:$0xff] }
 0x317   : > { %17801 = vst [vmem:[#allocation111_spill] sm:$0xff] %v12213_v31  ;;  %v2175_v18 = vadd.f32 %v2111_v8, %v12012_v24  ;;  %v2383_v15 = vmul.f32 %v9835_v9, %v12195_v42  ;;  %v1960_v13 = vmul.f32 %v9701_v40, %v1524_v48  ;;  %v2288_v27 = vadd.f32 %v17803_v14, %v2152_v57  ;;  %v17805_v8 = vld [vmem:[#allocation67_spill] sm:$0xff]  ;;  %v17806_v14 = vld [vmem:[#allocation109_spill] sm:$0xff] }
 0x318   : > { %17802 = vst [vmem:[#allocation69_spill] sm:$0xff] %v12219_v49  ;;  %v12232_v30 = vadd.f32 %v1979_v3, %v1907_v43  ;;  %v12235_v35 = vmul.f32 %v9712_v32, %v1524_v48  ;;  %v2496_v24 = vmul.f32 %v17429_v12, %v17804_v58  ;;  %v2498_v49 = vmul.f32 %v17429_v12, %v17805_v8  ;;  %v17807_v3 = vld [vmem:[#allocation114_spill] sm:$0xff]  ;;  %v17812_v8 = vld [vmem:[#allocation143_spill] sm:$0xff] }
 0x319   : > { %v2311_v42 = vadd.f32 %v2247_v53, %v2175_v18  ;;  %v12241_v39 = vadd.f32 %v1960_v13, %v1888_v61  ;;  %v2424_v10 = vadd.f32 %v12008_v55, %v2288_v27  ;;  %v2766_v57 = vmul.f32 %v12025_v52, %v1524_v48  ;;  %v17813_v53 = vld [vmem:[#allocation124_spill] sm:$0xff]  ;;  %6720 = vmatpush1.bf16.msra.mxu0 %v7530_v21  ;;  %v7533_v55 = vld [vmem:[%s16390_s14 + $0x50] ss:$8 sps:$4 sm:$0xff]   ;;  %v17817_v27 = vld [vmem:[#allocation19_spill] sm:$0xff] }
 0x31a   : > { %v2562_v51 = vadd.f32 %v2498_v49, %v17806_v14  ;;  %v2768_v43 = vmul.f32 %v12025_v52, %v17807_v3  ;;  %v17809_v31 = vrot.slane %v17808_v59, 1  ;;  %v1893_v61 = vadd.f32 %v17813_v53, %v17812_v8  ;;  %v17815_v59 = vld [vmem:[#allocation120_spill] sm:$0xff]  ;;  %6721 = vmatprep.subr.bf16.mxu0 %v7535_v28 }
 0x31b   : > { %v12259_v48 = vadd.f32 %v2383_v15, %v2311_v42  ;;  %v2560_v49 = vadd.f32 %v2496_v24, %v2424_v10  ;;  %v2157_v13 = vadd.f32 %v17815_v59, %v11860_v37  ;;  %v2501_v42 = vmul.f32 %v9839_v11, %v17817_v27  ;;  %v17818_v15 = vld [vmem:[#allocation140_spill] sm:$0xff]  ;;  %v17819_v10 = vld [vmem:[#allocation89_spill] sm:$0xff] }
 0x31c   : > { %v1527_v58 = vsel %vm1505_vm5, %v17811_v26, %v17809_v31  ;;  %v17816_v26 = vld [vmem:[#allocation135_spill] sm:$0xff]  ;;  %v2503_v24 = vmul.f32 %v9839_v11, %v17818_v15  ;;  %v17820_v37 = vld [vmem:[#allocation121_spill] sm:$0xff] }
 0x31d   : > { %17814 = vst [vmem:[#allocation105_spill] sm:$0xff] %v12259_v48  ;;  %v1965_v18 = vmul.f32 %v9811_v56, %v1527_v58  ;;  %v2696_v31 = vadd.f32 %v17816_v26, %v2562_v51  ;;  %v12269_v21 = vmul.f32 %v9835_v9, %v1527_v58  ;;  %v2694_v14 = vadd.f32 %v17819_v10, %v2560_v49  ;;  %v17821_v59 = vld [vmem:[#allocation97_spill] sm:$0xff]  ;;  %v17822_v26 = vld [vmem:[#allocation87_spill] sm:$0xff] }
 0x31e   : > { %v2293_v28 = vadd.f32 %v17820_v37, %v2157_v13  ;;  %v2771_v8 = vmul.f32 %v11481_v45, %v1527_v58  ;;  %v2567_v51 = vadd.f32 %v2503_v24, %v17821_v59  ;;  %v2773_v48 = vmul.f32 %v11481_v45, %v17822_v26  ;;  %6722 = vmatpush1.bf16.msra.mxu0 %v7533_v55  ;;  %v7536_v27 = vld [vmem:[%s16390_s14 + $0x60] ss:$8 sps:$4 sm:$0xff]   ;;  %v7541_v45 = vld [vmem:[%s16390_s14 + $0x74] ss:$8 sps:$4 sm:$0xff]   ;;  %v7539_v59 = vld [vmem:[%s16390_s14 + $0x70] ss:$8 sps:$4 sm:$0xff]  }
 0x31f   : > { %v12276_v3 = vadd.f32 %v1965_v18, %v1893_v61  ;;  %v2832_v53 = vadd.f32 %v2768_v43, %v2696_v31  ;;  %v2830_v49 = vadd.f32 %v2766_v57, %v2694_v14  ;;  %v16669_v18 = vrot.slane %v17823_v34, 1  ;;  %6723 = vmatprep.subr.bf16.mxu0 %v7538_v63  ;;  %v17825_v55 = vld [vmem:[#allocation38_spill] sm:$0xff]  ;;  %v17828_v63 = vld [vmem:[#allocation119_spill] sm:$0xff] }
 0x320   : > { %v2429_v61 = vadd.f32 %v12043_v50, %v2293_v28  ;;  %v12291_v43 = vmul.f32 %v9632_v1, %v17823_v34  ;;  %v2701_v13 = vadd.f32 %v17825_v55, %v2567_v51  ;;  %v12300_v57 = vmul.f32 %v9636_v38, %v17823_v34  ;;  %v17830_v51 = vld [vmem:[#allocation130_spill] sm:$0xff] }
 0x321   : > { %v2907_v58 = vadd.f32 %v10525_v2, %v2832_v53  ;;  %v12304_v50 = vmul.f32 %v9855_v44, %v17823_v34  ;;  %v2905_v31 = vadd.f32 %v10525_v2, %v2830_v49  ;;  %v1269_v24 = vrot.slane %v17828_v63, 7 }
 0x322   : > { %17824 = vst [vmem:[#allocation136_spill] sm:$0xff] %v12291_v43  ;;  %17826 = vst [vmem:[#allocation64_spill] sm:$0xff] %v12300_v57  ;;  %v2565_v15 = vadd.f32 %v2501_v42, %v2429_v61  ;;  %v2837_v37 = vadd.f32 %v2773_v48, %v2701_v13  ;;  %v12311_v28 = vmul.f32 %v9658_v22, %v17828_v63  ;;  %6724 = vmatpush1.bf16.msra.mxu0 %v7536_v27  ;;  %v17832_v48 = vld [vmem:[#allocation70_spill] sm:$0xff] }
 0x323   : > { %17827 = vst [vmem:[#allocation81_spill] sm:$0xff] %v12304_v50  ;;  %v2971_v14 = vmax.f32 %v2907_v58, 0.0  ;;  %v12315_v53 = vmul.f32 %v9662_v23, %v17828_v63  ;;  %v2969_v42 = vmax.f32 %v2905_v31, 0.0  ;;  %v12323_v49 = vmul.f32 %v9872_v60, %v17828_v63  ;;  %6725 = vmatprep.subr.bf16.mxu0 %v7541_v45  ;;  %v7544_v31 = vld [vmem:[%s16390_s14 + $0x84] ss:$8 sps:$4 sm:$0xff]  }
 0x324   : > { %v2699_v26 = vadd.f32 %v17830_v51, %v2565_v15  ;;  %v1300_v61 = vrot.slane %v17832_v48, 7  ;;  %v2912_v58 = vadd.f32 %v10528_v20, %v2837_v37  ;;  %v1846_v27 = vmul.f32 %v9632_v1, %v17832_v48 }
 0x325   : > { %17829 = vst [vmem:[#allocation96_spill] sm:$0xff] %v12315_v53  ;;  %17831 = vst [vmem:[#allocation86_spill] sm:$0xff] %v12323_v49  ;;  %v2250_v13 = vmul.f32 %v9636_v38, %v17832_v48  ;;  %v3892_v15 = vpack.c.bf16 %v2971_v14, %v2969_v42  ;;  %v17835_v1 = vrot.slane %v17832_v48, 1  ;;  %v7542_v14 = vld [vmem:[%s16390_s14 + $0x80] ss:$8 sps:$4 sm:$0xff]   ;;  %v1897_v43 = vadd.f32 %v11702_v33, %v11809_v6  ;;  %v17860_v33 = vld [vmem:[#allocation30_spill] sm:$0xff] }
 0x326   : > { %v2835_v51 = vadd.f32 %v2771_v8, %v2699_v26  ;;  %v12337_v10 = vsel %vm1304_vm4, %v1268_v19, %v1300_v61  ;;  %v1365_v45 = vsel %vm1304_vm4, %v1300_v61, %v1268_v19  ;;  %v2976_v37 = vmax.f32 %v2912_v58, 0.0  ;;  %6726 = vmatpush1.bf16.msra.mxu0 %v7539_v59  ;;  %v7547_v59 = vld [vmem:[%s16390_s14 + $0x94] ss:$8 sps:$4 sm:$0xff]   ;;  %v7551_v6 = vld [vmem:[%s16390_s14 + $0xb0] ss:$8 sps:$4 sm:$0xff]  }
 0x327   : > { %17833 = vst [vmem:[#allocation59_spill] sm:$0xff] %v12337_v10  ;;  %v12342_v55 = vmul.f32 %v7976_v41, %v1365_v45  ;;  %v1566_v50 = vsel %vm1505_vm5, %v17835_v1, %v16669_v18  ;;  %v1712_v8 = vmul.f32 %v9668_v0, %v12337_v10  ;;  %4507 = vmatmul.mubr.bf16.gmra.mrb[64].mxu1 %v3892_v15 }
 0x328   : > { %v2910_v19 = vadd.f32 %v10528_v20, %v2835_v51  ;;  %v12357_v42 = vmul.f32 %v7993_v47, %v1566_v50  ;;  %v2114_v26 = vmul.f32 %v9706_v7, %v12337_v10  ;;  %v12363_v61 = vmul.f32 %v9855_v44, %v17832_v48  ;;  %v17839_v51 = vld [vmem:[#allocation103_spill] sm:$0xff]  ;;  %6727 = vmatprep.subr.bf16.mxu0 %v7544_v31  ;;  %v17848_v10 = vld [vmem:[#allocation93_spill] sm:$0xff]  ;;  %v17867_v48 = vld [vmem:[#allocation94_spill] sm:$0xff] }
 0x329   : > { %17834 = vst [vmem:[#allocation74_spill] sm:$0xff] %v12342_v55  ;;  %v12370_v58 = vmul.f32 %v9668_v0, %v12342_v55  ;;  %v12372_v15 = vadd.f32 %v1846_v27, %v1712_v8  ;;  %v12376_v50 = vmul.f32 %v9706_v7, %v12342_v55  ;;  %v1301_v45 = vrot.slane %v17839_v51, 7 }
 0x32a   : > { %17836 = vst [vmem:[#allocation71_spill] sm:$0xff] %v12363_v61  ;;  %v2974_v1 = vmax.f32 %v2910_v19, 0.0  ;;  %v2178_v18 = vadd.f32 %v2114_v26, %v12163_v5  ;;  %v16670_v57 = vrot.slane %v17839_v51, 1  ;;  %v1847_v61 = vmul.f32 %v9658_v22, %v17839_v51  ;;  %6728 = vmatpush1.bf16.msra.mxu0 %v7542_v14  ;;  %v7545_v5 = vld [vmem:[%s16390_s14 + $0x90] ss:$8 sps:$4 sm:$0xff]  }
 0x32b   : > { %17837 = vst [vmem:[#allocation102_spill] sm:$0xff] %v12370_v58  ;;  %17838 = vst [vmem:[#allocation84_spill] sm:$0xff] %v12376_v50  ;;  %v12385_v0 = vsel %vm1304_vm4, %v1269_v24, %v1301_v45  ;;  %v1366_v27 = vsel %vm1304_vm4, %v1301_v45, %v1269_v24  ;;  %v2251_v8 = vmul.f32 %v9662_v23, %v17839_v51  ;;  %v17841_v24 = vrot.slane %v17828_v63, 1  ;;  %v7550_v14 = vld [vmem:[%s16390_s14 + $0xa4] ss:$8 sps:$4 sm:$0xff]  }
 0x32c   : > { %v12393_v31 = vmul.f32 %v9872_v60, %v17839_v51  ;;  %v3895_v22 = vpack.c.bf16 %v2976_v37, %v2974_v1  ;;  %v12398_v19 = vadd.f32 %v2250_v13, %v2178_v18  ;;  %v12401_v26 = vmul.f32 %v7976_v41, %v1366_v27  ;;  %6729 = vmatprep.subr.bf16.mxu0 %v7547_v59  ;;  %v17842_v37 = vld [vmem:[#allocation129_spill] sm:$0xff]  ;;  %v17844_v27 = vld [vmem:[#allocation28_spill] sm:$0xff] }
 0x32d   : > { %v1567_v45 = vsel %vm1505_vm5, %v16670_v57, %v17841_v24  ;;  %v1713_v18 = vmul.f32 %v9775_v4, %v12385_v0  ;;  %v2115_v13 = vmul.f32 %v9815_v54, %v12385_v0  ;;  %v17843_v1 = vrot.slane %v17842_v37, 1  ;;  %v17847_v57 = vld [vmem:[#allocation139_spill] sm:$0xff]  ;;  %v17859_v58 = vld [vmem:[#allocation108_spill] sm:$0xff] }
 0x32e   : > { %17840 = vst [vmem:[#allocation76_spill] sm:$0xff] %v12393_v31  ;;  %v12413_v50 = vmul.f32 %v7993_v47, %v1567_v45  ;;  %v17845_v53 = vrot.slane %v17844_v27, 1  ;;  %4516 = vmatprep.mubr.bf16.mxu1 %v3895_v22  ;;  %v12427_v24 = vmul.f32 %v9775_v4, %v12401_v26  ;;  %v12431_v45 = vmul.f32 %v9815_v54, %v12401_v26  ;;  %v7548_v4 = vld [vmem:[%s16390_s14 + $0xa0] ss:$8 sps:$4 sm:$0xff]  }
 0x32f   : > { %v1892_v49 = vadd.f32 %v17848_v10, %v17847_v57  ;;  %v12436_v37 = vadd.f32 %v1847_v61, %v1713_v18  ;;  %v2179_v27 = vadd.f32 %v2115_v13, %v12232_v30  ;;  %6730 = vmatpush1.bf16.msra.mxu0 %v7545_v5  ;;  %v17850_v57 = vld [vmem:[#allocation132_spill] sm:$0xff]  ;;  %v17852_v13 = vld [vmem:[#allocation123_spill] sm:$0xff] }
 0x330   : > { %v1526_v59 = vsel %vm1505_vm5, %v17845_v53, %v17843_v1  ;;  %17846 = vst [vmem:[#allocation72_spill] sm:$0xff] %v12431_v45  ;;  %v17849_v53 = vld [vmem:[#allocation125_spill] sm:$0xff]  ;;  %v2500_v10 = vmul.f32 %v17429_v12, %v17850_v57  ;;  %v17851_v61 = vld [vmem:[#allocation128_spill] sm:$0xff]  ;;  %6731 = vmatprep.subr.bf16.mxu0 %v7550_v14  ;;  %v17853_v31 = vld [vmem:[#allocation43_spill] sm:$0xff]  ;;  %v17855_v57 = vrot.slane %v17673_v46, 1 }
 0x331   : > { %v1964_v55 = vmul.f32 %v9701_v40, %v1526_v59  ;;  %v2156_v22 = vadd.f32 %v17849_v53, %v12014_v16  ;;  %v12442_v1 = vmul.f32 %v9712_v32, %v1526_v59  ;;  %v2502_v18 = vmul.f32 %v17429_v12, %v17851_v61  ;;  %v7553_v16 = vld [vmem:[%s16390_s14 + $0xb4] ss:$8 sps:$4 sm:$0xff]  }
 0x332   : > { %v2770_v30 = vmul.f32 %v12025_v52, %v1526_v59  ;;  %v12457_v5 = vadd.f32 %v2251_v8, %v2179_v27  ;;  %v17856_v59 = vld [vmem:[#allocation137_spill] sm:$0xff]  ;;  %v17857_v27 = vld [vmem:[#allocation144_spill] sm:$0xff] }
 0x333   : > { %v12447_v45 = vadd.f32 %v1964_v55, %v1892_v49  ;;  %v2292_v53 = vadd.f32 %v17852_v13, %v2156_v22  ;;  %v2772_v49 = vmul.f32 %v12025_v52, %v17853_v31  ;;  %v17854_v55 = vrot.slane %v17684_v25, 1  ;;  %v17858_v25 = vld [vmem:[#allocation22_spill] sm:$0xff]  ;;  %6732 = vmatpush1.bf16.msra.mxu0 %v7548_v4 }
 0x334   : > { %v2566_v14 = vadd.f32 %v2502_v18, %v17856_v59  ;;  %v2161_v22 = vadd.f32 %v17857_v27, %v12050_v17  ;;  %v2505_v46 = vmul.f32 %v9839_v11, %v17858_v25  ;;  %v17861_v17 = vld [vmem:[#allocation98_spill] sm:$0xff]  ;;  %6733 = vmatprep.subr.bf16.mxu0 %v7553_v16  ;;  %v17862_v27 = vld [vmem:[#allocation35_spill] sm:$0xff] }
 0x335   : > { %v1529_v61 = vsel %vm1505_vm5, %v17855_v57, %v17854_v55  ;;  %v2428_v13 = vadd.f32 %v12235_v35, %v2292_v53  ;;  %v2507_v55 = vmul.f32 %v9839_v11, %v17859_v58  ;;  %v12492_v53 = vld [vmem:[%s16381_s5 + $0x18] ss:$0 sm:$0xff]  ;;  %v7556_v58 = vld [vmem:[%s16390_s14 + $0xc4] ss:$8 sps:$4 sm:$0xff]  }
 0x336   : > { %v1969_v8 = vmul.f32 %v9811_v56, %v1529_v61  ;;  %v12476_v31 = vmul.f32 %v9835_v9, %v1529_v61  ;;  %v2700_v18 = vadd.f32 %v17860_v33, %v2566_v14  ;;  %v2297_v35 = vadd.f32 %v17861_v17, %v2161_v22  ;;  %v17863_v14 = vld [vmem:[#allocation46_spill] sm:$0xff] }
 0x337   : > { %v2775_v59 = vmul.f32 %v12492_v53, %v1529_v61  ;;  %v2564_v4 = vadd.f32 %v2500_v10, %v2428_v13  ;;  %v2571_v25 = vadd.f32 %v2507_v55, %v17862_v27  ;;  %v12508_v61 = vpop.f32.mrb[32].mxu1  ;;  %v17868_v13 = vld [vmem:[#allocation25_spill] sm:$0xff]  ;;  %6734 = vmatpush1.bf16.msra.mxu0 %v7551_v6 }
 0x338   : > { %v12486_v57 = vadd.f32 %v1969_v8, %v1897_v43  ;;  %v2777_v43 = vmul.f32 %v12492_v53, %v17863_v14  ;;  %v17864_v8 = vld [vmem:[#allocation126_spill] sm:$0xff]  ;;  %v2836_v33 = vadd.f32 %v2772_v49, %v2700_v18  ;;  %v2433_v17 = vadd.f32 %v12269_v21, %v2297_v35  ;;  %17866 = vst [vmem:[#allocation21_spill] sm:$0xff] %v12508_v61  ;;  %v12517_v21 = vpop.f32.mrb[33].mxu1  ;;  %v7554_v18 = vld [vmem:[%s16390_s14 + $0xc0] ss:$8 sps:$4 sm:$0xff]  }
 0x339   : > { %v1270_v22 = vrot.slane %v17864_v8, 7  ;;  %v1471_v34 = vrot.slane %v17864_v8, 1  ;;  %v12506_v16 = vmul.f32 %v9636_v38, %v17864_v8  ;;  %v2698_v10 = vadd.f32 %v17867_v48, %v2564_v4  ;;  %v17870_v14 = vld [vmem:[#allocation54_spill] sm:$0xff]  ;;  %17871 = vst [vmem:[#allocation67_spill] sm:$0xff] %v12517_v21  ;;  %6735 = vmatprep.subr.bf16.mxu0 %v7556_v58  ;;  %v17876_v21 = vld [vmem:[#allocation53_spill] sm:$0xff] }
 0x33a   : > { %v2705_v55 = vadd.f32 %v17868_v13, %v2571_v25  ;;  %v12514_v27 = vmul.f32 %v9855_v44, %v17864_v8  ;;  %v2911_v35 = vadd.f32 %v10525_v2, %v2836_v33  ;;  %v2569_v61 = vadd.f32 %v2505_v46, %v2433_v17  ;;  %v12528_v25 = vpop.f32.mrb[34].mxu1  ;;  %v7559_v6 = vld [vmem:[%s16390_s14 + $0xd4] ss:$8 sps:$4 sm:$0xff]   ;;  %v17874_v46 = vld [vmem:[#allocation75_spill] sm:$0xff] }
 0x33b   : > { %17865 = vst [vmem:[#allocation110_spill] sm:$0xff] %v12506_v16  ;;  %v12526_v4 = vmul.f32 %v9662_v23, %v17870_v14  ;;  %17873 = vst [vmem:[#allocation114_spill] sm:$0xff] %v12528_v25  ;;  %v2834_v8 = vadd.f32 %v2770_v30, %v2698_v10  ;;  %v12535_v49 = vmul.f32 %v9872_v60, %v17870_v14  ;;  %v1302_v33 = vrot.slane %v17874_v46, 7  ;;  %v12538_v17 = vpop.f32.mrb[35].mxu1 }
 0x33c   : > { %17869 = vst [vmem:[#allocation122_spill] sm:$0xff] %v12514_v27  ;;  %v2841_v13 = vadd.f32 %v2777_v43, %v2705_v55  ;;  %17875 = vst [vmem:[#allocation131_spill] sm:$0xff] %v12538_v17  ;;  %v2975_v48 = vmax.f32 %v2911_v35, 0.0  ;;  %v2703_v16 = vadd.f32 %v17876_v21, %v2569_v61  ;;  %v1503_v25 = vrot.slane %v17874_v46, 1  ;;  %6736 = vmatpush1.bf16.msra.mxu0 %v7554_v18  ;;  %v7557_v61 = vld [vmem:[%s16390_s14 + $0xd0] ss:$8 sps:$4 sm:$0xff]  }
 0x33d   : > { %17872 = vst [vmem:[#allocation109_spill] sm:$0xff] %v12526_v4  ;;  %v1982_v58 = vmul.f32 %v9701_v40, %v12357_v42  ;;  %v2909_v27 = vadd.f32 %v10525_v2, %v2834_v8  ;;  %v1335_v43 = vsel %vm1304_vm4, %v1270_v22, %v1302_v33  ;;  %v1367_v10 = vsel %vm1304_vm4, %v1302_v33, %v1270_v22  ;;  %v7562_v22 = vld [vmem:[%s16390_s14 + $0xe4] ss:$8 sps:$4 sm:$0xff]  }
 0x33e   : > { %v2916_v30 = vadd.f32 %v10528_v20, %v2841_v13  ;;  %v2839_v55 = vadd.f32 %v2775_v59, %v2703_v16  ;;  %v1437_v21 = vmul.f32 %v7976_v41, %v1367_v10  ;;  %v12556_v35 = vsel %vm1505_vm5, %v1471_v34, %v1503_v25  ;;  %6737 = vmatprep.subr.bf16.mxu0 %v7559_v6 }
 0x33f   : > { %v1568_v8 = vsel %vm1505_vm5, %v1503_v25, %v1471_v34  ;;  %v2973_v18 = vmax.f32 %v2909_v27, 0.0  ;;  %v2046_v59 = vadd.f32 %v1982_v58, %v12372_v15  ;;  %v2118_v17 = vmul.f32 %v9706_v7, %v1335_v43  ;;  %v7560_v58 = vld [vmem:[%s16390_s14 + $0xe0] ss:$8 sps:$4 sm:$0xff]  }
 0x340   : > { %v2980_v13 = vmax.f32 %v2916_v30, 0.0  ;;  %v12564_v33 = vmul.f32 %v7993_v47, %v1568_v8  ;;  %v2914_v16 = vadd.f32 %v10528_v20, %v2839_v55  ;;  %v12569_v10 = vmul.f32 %v9706_v7, %v1437_v21  ;;  %6738 = vmatpush1.bf16.msra.mxu0 %v7557_v61 }
 0x341   : > { %v2254_v34 = vmul.f32 %v9636_v38, %v17874_v46  ;;  %v3894_v25 = vpack.c.bf16 %v2975_v48, %v2973_v18  ;;  %v2386_v27 = vmul.f32 %v9712_v32, %v12357_v42  ;;  %v12578_v6 = vmul.f32 %v9712_v32, %v12556_v35  ;;  %6739 = vmatprep.subr.bf16.mxu0 %v7562_v22  ;;  %v17879_v18 = vld [vmem:[#allocation142_spill] sm:$0xff] }
 0x342   : > { %17877 = vst [vmem:[#allocation127_spill] sm:$0xff] %v12569_v10  ;;  %v2390_v15 = vmul.f32 %v9712_v32, %v12564_v33  ;;  %v2978_v7 = vmax.f32 %v2914_v16, 0.0  ;;  %v2182_v30 = vadd.f32 %v2118_v17, %v2046_v59  ;;  %v12586_v38 = vmul.f32 %v17429_v12, %v1437_v21  ;;  %v7565_v17 = vld [vmem:[%s16390_s14 + $0xf4] ss:$8 sps:$4 sm:$0xff]  }
 0x343   : > { %17878 = vst [vmem:[#allocation143_spill] sm:$0xff] %v12578_v6  ;;  %v2522_v48 = vmul.f32 %v17429_v12, %v1335_v43  ;;  %4517 = vmatmul.mubr.bf16.gmra.mrb[68].mxu1 %v3894_v25  ;;  %v2450_v55 = vadd.f32 %v2386_v27, %v12398_v19  ;;  %v2526_v8 = vmul.f32 0.0, %v17429_v12  ;;  %v2658_v61 = vmul.f32 %v9855_v44, %v17874_v46 }
 0x344   : > { %v1303_v6 = vrot.slane %v17879_v18, 7  ;;  %v3897_v59 = vpack.c.bf16 %v2980_v13, %v2978_v7  ;;  %v2318_v21 = vadd.f32 %v2254_v34, %v2182_v30  ;;  %v1504_v16 = vrot.slane %v17879_v18, 1  ;;  %6740 = vmatpush1.bf16.msra.mxu0 %v7560_v58  ;;  %v7563_v34 = vld [vmem:[%s16390_s14 + $0xf0] ss:$8 sps:$4 sm:$0xff]  }
 0x345   : > { %v1983_v43 = vmul.f32 %v9811_v56, %v12413_v50  ;;  %v2586_v22 = vadd.f32 %v2522_v48, %v2450_v55  ;;  %v17880_v19 = vrot.slane %v17870_v14, 7  ;;  %v2255_v13 = vmul.f32 %v9662_v23, %v17879_v18  ;;  %6741 = vmatprep.subr.bf16.mxu0 %v7565_v17 }
 0x346   : > { %4526 = vmatprep.mubr.bf16.mxu1 %v3897_v59  ;;  %v2454_v7 = vadd.f32 %v2390_v15, %v2318_v21  ;;  %v17882_v48 = vrot.slane %v17870_v14, 1  ;;  %v2387_v14 = vmul.f32 %v9835_v9, %v12413_v50  ;;  %v2527_v17 = vmul.f32 0.0, %v9839_v11 }
 0x347   : > { %v1336_v25 = vsel %vm1304_vm4, %v17880_v19, %v1303_v6  ;;  %v17881_v46 = vmov %v17880_v19  ;;  %v12624_v58 = vadd.f32 %v2658_v61, %v2586_v22  ;;  %v2047_v15 = vadd.f32 %v1983_v43, %v12436_v37 }
 0x348   : > { %v1368_v27 = vsel %vm1304_vm4, %v1303_v6, %v17881_v46  ;;  %v12618_v55 = vsel %vm1505_vm5, %v17882_v48, %v1504_v16  ;;  %v17883_v6 = vmov %v17882_v48  ;;  %v2119_v59 = vmul.f32 %v9815_v54, %v1336_v25  ;;  %6742 = vmatpush1.bf16.msra.mxu0 %v7563_v34  ;;  %v17888_v48 = vld [vmem:[#allocation32_spill] sm:$0xff] }
 0x349   : > { %v1438_v30 = vmul.f32 %v7976_v41, %v1368_v27  ;;  %v1569_v23 = vsel %vm1505_vm5, %v1504_v16, %v17883_v6  ;;  %v12631_v21 = vadd.f32 %v2526_v8, %v2454_v7  ;;  %v12640_v61 = vmul.f32 %v9835_v9, %v12618_v55  ;;  %v17886_v27 = vld [vmem:[#allocation49_spill] sm:$0xff] }
 0x34a   : > { %v12627_v19 = vmul.f32 %v7993_v47, %v1569_v23  ;;  %v2183_v16 = vadd.f32 %v2119_v59, %v2047_v15  ;;  %v2523_v8 = vmul.f32 %v9839_v11, %v1336_v25  ;;  %v2659_v43 = vmul.f32 %v9872_v60, %v17879_v18  ;;  %v17891_v59 = vld [vmem:[#allocation88_spill] sm:$0xff]  ;;  %v17893_v18 = vld [vmem:[#allocation66_spill] sm:$0xff] }
 0x34b   : > { %17884 = vst [vmem:[#allocation124_spill] sm:$0xff] %v12631_v21  ;;  %v12634_v46 = vmul.f32 %v9815_v54, %v1438_v30  ;;  %17885 = vst [vmem:[#allocation120_spill] sm:$0xff] %v12640_v61  ;;  %v12645_v37 = vmul.f32 %v9839_v11, %v1438_v30  ;;  %v2451_v54 = vadd.f32 %v2387_v14, %v12457_v5  ;;  %v17887_v7 = vrot.slane %v17886_v27, 1  ;;  %v17890_v30 = vld [vmem:[#allocation138_spill] sm:$0xff]  ;;  %v17892_v5 = vld [vmem:[#allocation95_spill] sm:$0xff] }
 0x34c   : > { %v2391_v22 = vmul.f32 %v9835_v9, %v12627_v19  ;;  %v17889_v6 = vrot.slane %v17888_v48, 1  ;;  %v2319_v15 = vadd.f32 %v2255_v13, %v2183_v16  ;;  %v1896_v47 = vadd.f32 %v17891_v59, %v17890_v30  ;;  %v17894_v21 = vld [vmem:[#allocation68_spill] sm:$0xff]  ;;  %v17895_v13 = vld [vmem:[#allocation26_spill] sm:$0xff] }
 0x34d   : > { %v2160_v34 = vadd.f32 %v17892_v5, %v12241_v39  ;;  %v2587_v14 = vadd.f32 %v2523_v8, %v2451_v54  ;;  %v2504_v27 = vmul.f32 %v17429_v12, %v17893_v18  ;;  %v2506_v48 = vmul.f32 %v17429_v12, %v17894_v21  ;;  %v17896_v59 = vld [vmem:[#allocation104_spill] sm:$0xff]  ;;  %v17897_v8 = vld [vmem:[#allocation39_spill] sm:$0xff] }
 0x34e   : > { %v1528_v23 = vsel %vm1505_vm5, %v17889_v6, %v17887_v7  ;;  %v2455_v44 = vadd.f32 %v2391_v22, %v2319_v15  ;;  %v2776_v54 = vmul.f32 %v12025_v52, %v17897_v8  ;;  %v17898_v5 = vrot.slane %v17735_v62, 1  ;;  %v17901_v15 = vld [vmem:[#allocation23_spill] sm:$0xff] }
 0x34f   : > { %v1968_v25 = vmul.f32 %v9701_v40, %v1528_v23  ;;  %v2372_v41 = vmul.f32 %v9712_v32, %v1528_v23  ;;  %v2296_v16 = vadd.f32 %v17895_v13, %v2160_v34  ;;  %v2774_v6 = vmul.f32 %v12025_v52, %v1528_v23  ;;  %v17902_v23 = vld [vmem:[#allocation27_spill] sm:$0xff]  ;;  %v17903_v34 = vld [vmem:[#allocation34_spill] sm:$0xff] }
 0x350   : > { %v12672_v30 = vadd.f32 %v2659_v43, %v2587_v14  ;;  %v2570_v39 = vadd.f32 %v2506_v48, %v17896_v59  ;;  %v17899_v18 = vrot.slane %v17721_v29, 1  ;;  %v1901_v43 = vadd.f32 %v17902_v23, %v17901_v15  ;;  %v17904_v48 = vld [vmem:[#allocation60_spill] sm:$0xff]  ;;  %v17905_v29 = vld [vmem:[#allocation85_spill] sm:$0xff] }
 0x351   : > { %v12668_v7 = vadd.f32 %v1968_v25, %v1896_v47  ;;  %v12683_v47 = vadd.f32 %v2527_v17, %v2455_v44  ;;  %v2432_v22 = vadd.f32 %v12442_v1, %v2296_v16  ;;  %v2165_v13 = vadd.f32 %v17904_v48, %v12276_v3  ;;  %v17906_v17 = vld [vmem:[#allocation141_spill] sm:$0xff] }
 0x352   : > { %v1531_v21 = vsel %vm1505_vm5, %v17899_v18, %v17898_v5  ;;  %v2704_v14 = vadd.f32 %v17903_v34, %v2570_v39  ;;  %v2509_v59 = vmul.f32 %v9839_v11, %v17905_v29  ;;  %v2511_v1 = vmul.f32 %v9839_v11, %v17906_v17  ;;  %v17907_v18 = vld [vmem:[#allocation133_spill] sm:$0xff]  ;;  %v17908_v39 = vld [vmem:[#allocation118_spill] sm:$0xff] }
 0x353   : > { %17900 = vst [vmem:[#allocation135_spill] sm:$0xff] %v12683_v47  ;;  %v1973_v25 = vmul.f32 %v9811_v56, %v1531_v21  ;;  %v2377_v62 = vmul.f32 %v9835_v9, %v1531_v21  ;;  %v2568_v8 = vadd.f32 %v2504_v27, %v2432_v22  ;;  %v2779_v16 = vmul.f32 %v12492_v53, %v1531_v21  ;;  %v17909_v3 = vld [vmem:[#allocation61_spill] sm:$0xff]  ;;  %v17916_v47 = vld [vmem:[#allocation112_spill] sm:$0xff] }
 0x354   : > { %v2840_v5 = vadd.f32 %v2776_v54, %v2704_v14  ;;  %v2301_v15 = vadd.f32 %v17907_v18, %v2165_v13  ;;  %v2781_v23 = vmul.f32 %v12492_v53, %v17908_v39  ;;  %v17910_v34 = vrot.slane %v17909_v3, 1  ;;  %v17911_v48 = vld [vmem:[#allocation41_spill] sm:$0xff]  ;;  %v17917_v18 = vld [vmem:[#allocation50_spill] sm:$0xff] }
 0x355   : > { %v12695_v44 = vadd.f32 %v1973_v25, %v1901_v43  ;;  %v17912_v10 = vrot.slane %v17911_v48, 1  ;;  %v17913_v22 = vld [vmem:[#allocation57_spill] sm:$0xff]  ;;  %v2164_v39 = vadd.f32 %v17917_v18, %v12447_v45  ;;  %v17923_v45 = vld [vmem:[#allocation55_spill] sm:$0xff] }
 0x356   : > { %v2702_v43 = vadd.f32 %v17913_v22, %v2568_v8  ;;  %v17914_v25 = vld [vmem:[#allocation29_spill] sm:$0xff]  ;;  %v2915_v14 = vadd.f32 %v10525_v2, %v2840_v5  ;;  %v2437_v13 = vadd.f32 %v12476_v31, %v2301_v15  ;;  %v17922_v15 = vld [vmem:[#allocation24_spill] sm:$0xff]  ;;  %v2510_v18 = vmul.f32 %v17429_v12, %v17923_v45  ;;  %v17931_v45 = vld [vmem:[#allocation90_spill] sm:$0xff] }
 0x357   : > { %v1530_v27 = vsel %vm1505_vm5, %v17912_v10, %v17910_v34  ;;  %v2575_v29 = vadd.f32 %v2511_v1, %v17914_v25  ;;  %v17915_v17 = vld [vmem:[#allocation33_spill] sm:$0xff]  ;;  %v12721_v10 = vpop.f32.mrb[36].mxu1 }
 0x358   : > { %v1900_v21 = vadd.f32 %v17916_v47, %v17915_v17  ;;  %v1972_v54 = vmul.f32 %v9701_v40, %v1530_v27  ;;  %v12719_v3 = vmul.f32 %v9712_v32, %v1530_v27  ;;  %17918 = vst [vmem:[#allocation19_spill] sm:$0xff] %v12721_v10  ;;  %v2838_v8 = vadd.f32 %v2774_v6, %v2702_v43  ;;  %v17919_v34 = vld [vmem:[#allocation77_spill] sm:$0xff]  ;;  %v17920_v47 = vld [vmem:[#allocation99_spill] sm:$0xff]  ;;  %v12728_v25 = vpop.f32.mrb[37].mxu1 }
 0x359   : > { %v2709_v1 = vadd.f32 %v17919_v34, %v2575_v29  ;;  %v2508_v22 = vmul.f32 %v17429_v12, %v17920_v47  ;;  %17921 = vst [vmem:[#allocation140_spill] sm:$0xff] %v12728_v25  ;;  %v2979_v5 = vmax.f32 %v2915_v14, 0.0  ;;  %v2573_v31 = vadd.f32 %v2509_v59, %v2437_v13  ;;  %v12733_v60 = vpop.f32.mrb[38].mxu1  ;;  %v17927_v47 = vld [vmem:[#allocation82_spill] sm:$0xff]  ;;  %v17928_v13 = vld [vmem:[#allocation79_spill] sm:$0xff] }
 0x35a   : > { %v12724_v48 = vadd.f32 %v1972_v54, %v1900_v21  ;;  %v2300_v17 = vadd.f32 %v17922_v15, %v2164_v39  ;;  %17924 = vst [vmem:[#allocation89_spill] sm:$0xff] %v12733_v60  ;;  %v2913_v6 = vadd.f32 %v10525_v2, %v2838_v8  ;;  %v2778_v29 = vmul.f32 %v12025_v52, %v1530_v27  ;;  %v17925_v21 = vld [vmem:[#allocation80_spill] sm:$0xff]  ;;  %v12739_v34 = vpop.f32.mrb[39].mxu1  ;;  %v17934_v60 = vld [vmem:[#allocation78_spill] sm:$0xff] }
 0x35b   : > { %v2845_v43 = vadd.f32 %v2781_v23, %v2709_v1  ;;  %v2780_v54 = vmul.f32 %v12025_v52, %v17925_v21  ;;  %17926 = vst [vmem:[#allocation121_spill] sm:$0xff] %v12739_v34  ;;  %v2707_v14 = vadd.f32 %v17927_v47, %v2573_v31  ;;  %v2574_v39 = vadd.f32 %v2510_v18, %v17928_v13  ;;  %v17929_v15 = vld [vmem:[#allocation44_spill] sm:$0xff]  ;;  %v17933_v1 = vld [vmem:[#allocation111_spill] sm:$0xff]  ;;  %v17936_v18 = vld [vmem:[#allocation106_spill] sm:$0xff] }
 0x35c   : > { %v2436_v59 = vadd.f32 %v2372_v41, %v2300_v17  ;;  %v17930_v25 = vrot.slane %v17929_v15, 1  ;;  %v17932_v10 = vrot.slane %v17931_v45, 1  ;;  %v2977_v23 = vmax.f32 %v2913_v6, 0.0  ;;  %v17935_v41 = vld [vmem:[#allocation40_spill] sm:$0xff]  ;;  %v17937_v6 = vld [vmem:[#allocation62_spill] sm:$0xff] }
 0x35d   : > { %v2920_v27 = vadd.f32 %v10528_v20, %v2845_v43  ;;  %v1905_v21 = vadd.f32 %v17934_v60, %v17933_v1  ;;  %v2843_v61 = vadd.f32 %v2779_v16, %v2707_v14  ;;  %v2708_v17 = vadd.f32 %v17935_v41, %v2574_v39  ;;  %v17938_v1 = vld [vmem:[#allocation36_spill] sm:$0xff]  ;;  %v17939_v16 = vld [vmem:[#allocation45_spill] sm:$0xff]  ;;  %v17940_v14 = vld [vmem:[#allocation47_spill] sm:$0xff] }
 0x35e   : > { %v1533_v8 = vsel %vm1505_vm5, %v17932_v10, %v17930_v25  ;;  %v2572_v31 = vadd.f32 %v2508_v22, %v2436_v59  ;;  %v2169_v47 = vadd.f32 %v17936_v18, %v12486_v57  ;;  %v3896_v13 = vpack.c.bf16 %v2979_v5, %v2977_v23 }
 0x35f   : > { %v1977_v34 = vmul.f32 %v9811_v56, %v1533_v8  ;;  %v2984_v15 = vmax.f32 %v2920_v27, 0.0  ;;  %v2381_v10 = vmul.f32 %v9835_v9, %v1533_v8  ;;  %v2918_v25 = vadd.f32 %v10528_v20, %v2843_v61 }
 0x360   : > { %v2706_v43 = vadd.f32 %v17937_v6, %v2572_v31  ;;  %v2844_v60 = vadd.f32 %v2780_v54, %v2708_v17  ;;  %v2305_v4 = vadd.f32 %v17938_v1, %v2169_v47  ;;  %4527 = vmatmul.mubr.bf16.gmra.mrb[72].mxu1 %v3896_v13  ;;  %v2513_v22 = vmul.f32 %v9839_v11, %v17939_v16  ;;  %v17942_v54 = vld [vmem:[#allocation56_spill] sm:$0xff]  ;;  %v17945_v17 = vld [vmem:[#allocation107_spill] sm:$0xff] }
 0x361   : > { %v12756_v45 = vadd.f32 %v1977_v34, %v1905_v21  ;;  %v2515_v57 = vmul.f32 %v9839_v11, %v17940_v14  ;;  %v2783_v5 = vmul.f32 %v12492_v53, %v1533_v8  ;;  %v17941_v34 = vld [vmem:[#allocation117_spill] sm:$0xff]  ;;  %v2982_v39 = vmax.f32 %v2918_v25, 0.0  ;;  %v17943_v31 = vld [vmem:[#allocation116_spill] sm:$0xff] }
 0x362   : > { %v2785_v59 = vmul.f32 %v12492_v53, %v17941_v34  ;;  %v2842_v23 = vadd.f32 %v2778_v29, %v2706_v43  ;;  %v2919_v61 = vadd.f32 %v10525_v2, %v2844_v60  ;;  %v2441_v27 = vadd.f32 %v2377_v62, %v2305_v4  ;;  %v17947_v13 = vld [vmem:[#allocation52_spill] sm:$0xff]  ;;  %v17950_v62 = vld [vmem:[#allocation83_spill] sm:$0xff] }
 0x363   : > { %v2579_v21 = vadd.f32 %v2515_v57, %v17942_v54  ;;  %v17944_v41 = vrot.slane %v17943_v31, 1  ;;  %v17946_v18 = vrot.slane %v17945_v17, 1  ;;  %v17948_v6 = vld [vmem:[#allocation92_spill] sm:$0xff]  ;;  %v3899_v25 = vpack.c.bf16 %v2984_v15, %v2982_v39  ;;  %v17951_v57 = vld [vmem:[#allocation51_spill] sm:$0xff]  ;;  %v17954_v15 = vld [vmem:[#allocation113_spill] sm:$0xff] }
 0x364   : > { %v1904_v8 = vadd.f32 %v17948_v6, %v17947_v13  ;;  %v17949_v1 = vld [vmem:[#allocation100_spill] sm:$0xff]  ;;  %v2917_v29 = vadd.f32 %v10525_v2, %v2842_v23  ;;  %v2983_v43 = vmax.f32 %v2919_v61, 0.0  ;;  %v2577_v4 = vadd.f32 %v2513_v22, %v2441_v27  ;;  %v17955_v6 = vld [vmem:[#allocation65_spill] sm:$0xff] }
 0x365   : > { %v1532_v47 = vsel %vm1505_vm5, %v17946_v18, %v17944_v41  ;;  %v2168_v16 = vadd.f32 %v17949_v1, %v12668_v7  ;;  %v2713_v60 = vadd.f32 %v17950_v62, %v2579_v21  ;;  %4536 = vmatprep.mubr.bf16.mxu1 %v3899_v25  ;;  %v17952_v41 = vld [vmem:[#allocation58_spill] sm:$0xff]  ;;  %v17953_v18 = vld [vmem:[#allocation73_spill] sm:$0xff]  ;;  %v2514_v39 = vmul.f32 %v17429_v12, %v17954_v15 }
 0x366   : > { %v1976_v14 = vmul.f32 %v9701_v40, %v1532_v47  ;;  %v12786_v54 = vmul.f32 %v9712_v32, %v1532_v47  ;;  %v2981_v31 = vmax.f32 %v2917_v29, 0.0  ;;  %v2711_v17 = vadd.f32 %v17952_v41, %v2577_v4 }
 0x367   : > { %v2304_v34 = vadd.f32 %v17951_v57, %v2168_v16  ;;  %v2512_v7 = vmul.f32 %v17429_v12, %v17953_v18  ;;  %v2849_v22 = vadd.f32 %v2785_v59, %v2713_v60  ;;  %v2782_v27 = vmul.f32 %v12025_v52, %v1532_v47  ;;  %v17956_v16 = vld [vmem:[#allocation48_spill] sm:$0xff]  ;;  %v17959_v47 = vld [vmem:[#allocation115_spill] sm:$0xff] }
 0x368   : > { %v12793_v23 = vadd.f32 %v1976_v14, %v1904_v8  ;;  %v3898_v21 = vpack.c.bf16 %v2983_v43, %v2981_v31  ;;  %v2847_v13 = vadd.f32 %v2783_v5, %v2711_v17  ;;  %v2578_v1 = vadd.f32 %v2514_v39, %v17955_v6  ;;  %v17960_v14 = vld [vmem:[#allocation69_spill] sm:$0xff]  ;;  %v17962_v18 = vld [vmem:[#allocation31_spill] sm:$0xff] }
 0x369   : > { %v2440_v61 = vadd.f32 %v12719_v3, %v2304_v34  ;;  %v2784_v25 = vmul.f32 %v12025_v52, %v17956_v16  ;;  %v2924_v29 = vadd.f32 %v10528_v20, %v2849_v22  ;;  %v17957_v62 = vrot.slane %v17839_v51, 1  ;;  %v17961_v51 = vld [vmem:[#allocation63_spill] sm:$0xff]  ;;  %v17967_v16 = vld [vmem:[#allocation105_spill] sm:$0xff] }
 0x36a   : > { %v17958_v59 = vrot.slane %v17828_v63, 1  ;;  %v1909_v3 = vadd.f32 %v12311_v28, %v12427_v24  ;;  %4537 = vmatmul.mubr.bf16.gmra.mrb[76].mxu1 %v3898_v21  ;;  %v2922_v5 = vadd.f32 %v10528_v20, %v2847_v13  ;;  %v2712_v43 = vadd.f32 %v17959_v47, %v2578_v1  ;;  %v17963_v21 = vld [vmem:[#allocation70_spill] sm:$0xff] }
 0x36b   : > { %v2576_v4 = vadd.f32 %v2512_v7, %v2440_v61  ;;  %v2173_v57 = vadd.f32 %v17960_v14, %v12695_v44  ;;  %v2988_v34 = vmax.f32 %v2924_v29, 0.0  ;;  %v2517_v41 = vmul.f32 %v9839_v11, %v12401_v26  ;;  %v17965_v13 = vld [vmem:[#allocation134_spill] sm:$0xff]  ;;  %v17971_v14 = vld [vmem:[#allocation76_spill] sm:$0xff] }
 0x36c   : > { %v1535_v8 = vsel %vm1505_vm5, %v17958_v59, %v17957_v62  ;;  %v2986_v17 = vmax.f32 %v2922_v5, 0.0  ;;  %v2848_v28 = vadd.f32 %v2784_v25, %v2712_v43  ;;  %v2789_v44 = vmul.f32 %v12492_v53, %v12413_v50  ;;  %v17968_v29 = vld [vmem:[#allocation102_spill] sm:$0xff] }
 0x36d   : > { %v1981_v60 = vmul.f32 %v9811_v56, %v1535_v8  ;;  %v2710_v31 = vadd.f32 %v17961_v51, %v2576_v4  ;;  %v2385_v63 = vmul.f32 %v9835_v9, %v1535_v8  ;;  %v2309_v7 = vadd.f32 %v17962_v18, %v2173_v57  ;;  %v17969_v4 = vld [vmem:[#allocation136_spill] sm:$0xff]  ;;  %v17972_v51 = vld [vmem:[#allocation74_spill] sm:$0xff] }
 0x36e   : > { %v2519_v56 = vmul.f32 %v9839_v11, %v12385_v0  ;;  %v2787_v39 = vmul.f32 %v12492_v53, %v1535_v8  ;;  %v3901_v22 = vpack.c.bf16 %v2988_v34, %v2986_v17  ;;  %v2923_v9 = vadd.f32 %v10525_v2, %v2848_v28  ;;  %v17973_v17 = vld [vmem:[#allocation86_spill] sm:$0xff] }
 0x36f   : > { %v2045_v24 = vadd.f32 %v1981_v60, %v1909_v3  ;;  %v2846_v15 = vadd.f32 %v2782_v27, %v2710_v31  ;;  %v2445_v61 = vadd.f32 %v2381_v10, %v2309_v7  ;;  %v17964_v26 = vrot.slane %v17963_v21, 1  ;;  %v12831_v27 = vpop.f32.mrb[40].mxu1  ;;  %v17970_v3 = vld [vmem:[#allocation101_spill] sm:$0xff]  ;;  %v17975_v7 = vld [vmem:[#allocation59_spill] sm:$0xff] }
 0x370   : > { %v17966_v6 = vrot.slane %v17965_v13, 1  ;;  %v2583_v25 = vadd.f32 %v2519_v56, %v17967_v16  ;;  %v1908_v50 = vadd.f32 %v17969_v4, %v17968_v29  ;;  %v12838_v59 = vpop.f32.mrb[41].mxu1  ;;  %4546 = vmatprep.mubr.bf16.mxu1 %v3901_v22  ;;  %v2987_v10 = vmax.f32 %v2923_v9, 0.0  ;;  %v12860_v22 = vld [vmem:[%s16381_s5 + $0x10] ss:$0 sm:$0xff] }
 0x371   : > { %v2921_v0 = vadd.f32 %v10525_v2, %v2846_v15  ;;  %v2581_v8 = vadd.f32 %v2517_v41, %v2445_v61  ;;  %v2172_v5 = vadd.f32 %v17970_v3, %v12724_v48  ;;  %v12843_v43 = vpop.f32.mrb[42].mxu1  ;;  %v17974_v41 = vld [vmem:[#allocation20_spill] sm:$0xff]  ;;  %v2518_v48 = vmul.f32 %v17429_v12, %v17975_v7 }
 0x372   : > { %v1534_v1 = vsel %vm1505_vm5, %v17966_v6, %v17964_v26  ;;  %v2717_v57 = vadd.f32 %v17971_v14, %v2583_v25  ;;  %v12850_v31 = vpop.f32.mrb[43].mxu1  ;;  %v2788_v9 = vmul.f32 %v12860_v22, %v12357_v42  ;;  %v17976_v61 = vld [vmem:[#allocation72_spill] sm:$0xff]  ;;  %v17977_v6 = vld [vmem:[#allocation91_spill] sm:$0xff]  ;;  %v2793_v25 = vmul.f32 %v12492_v53, %v12627_v19 }
 0x373   : > { %v1980_v62 = vmul.f32 %v9701_v40, %v1534_v1  ;;  %v2384_v47 = vmul.f32 %v9712_v32, %v1534_v1  ;;  %v2985_v60 = vmax.f32 %v2921_v0, 0.0  ;;  %v2516_v40 = vmul.f32 %v17429_v12, %v17972_v51  ;;  %v17979_v42 = vld [vmem:[#allocation84_spill] sm:$0xff] }
 0x374   : > { %v2715_v28 = vadd.f32 %v17973_v17, %v2581_v8  ;;  %v2308_v18 = vadd.f32 %v17974_v41, %v2172_v5  ;;  %v2786_v32 = vmul.f32 %v12025_v52, %v1534_v1  ;;  %v2853_v56 = vadd.f32 %v2789_v44, %v2717_v57  ;;  %v17978_v1 = vld [vmem:[#allocation96_spill] sm:$0xff] }
 0x375   : > { %v12846_v34 = vadd.f32 %v1980_v62, %v1908_v50  ;;  %v3900_v15 = vpack.c.bf16 %v2987_v10, %v2985_v60  ;;  %v2177_v21 = vadd.f32 %v17976_v61, %v12756_v45  ;;  %v2582_v0 = vadd.f32 %v2518_v48, %v17977_v6  ;;  %v17981_v8 = vld [vmem:[#allocation64_spill] sm:$0xff]  ;;  %v17982_v60 = vld [vmem:[#allocation81_spill] sm:$0xff] }
 0x376   : > { %v2851_v26 = vadd.f32 %v2787_v39, %v2715_v28  ;;  %v2444_v13 = vadd.f32 %v12786_v54, %v2308_v18  ;;  %v2791_v52 = vmul.f32 %v12492_v53, %v12618_v55  ;;  %v2928_v44 = vadd.f32 %v10528_v20, %v2853_v56  ;;  %v17980_v54 = vld [vmem:[#allocation71_spill] sm:$0xff]  ;;  %v17983_v48 = vld [vmem:[#allocation109_spill] sm:$0xff]  ;;  %v17985_v56 = vld [vmem:[#allocation122_spill] sm:$0xff] }
 0x377   : > { %4547 = vmatmul.mubr.bf16.gmra.mrb[80].mxu1 %v3900_v15  ;;  %v2313_v16 = vadd.f32 %v17978_v1, %v2177_v21  ;;  %v2176_v29 = vadd.f32 %v17979_v42, %v12793_v23  ;;  %v2716_v4 = vadd.f32 %v17980_v54, %v2582_v0  ;;  %v2790_v50 = vmul.f32 %v12860_v22, %v12556_v35  ;;  %v17988_v6 = vld [vmem:[#allocation13_spill] sm:$0xff]  ;;  %v17990_v42 = vld [vmem:[#allocation127_spill] sm:$0xff] }
 0x378   : > { %v2926_v45 = vadd.f32 %v10528_v20, %v2851_v26  ;;  %v2580_v39 = vadd.f32 %v2516_v40, %v2444_v13  ;;  %v2992_v55 = vmax.f32 %v2928_v44, 0.0  ;;  %v2857_v10 = vadd.f32 %v2793_v25, %v12672_v30  ;;  %v17989_v25 = vld [vmem:[#allocation135_spill] sm:$0xff] }
 0x379   : > { %v2449_v62 = vadd.f32 %v2385_v63, %v2313_v16  ;;  %v2312_v3 = vadd.f32 %v17981_v8, %v2176_v29  ;;  %v2852_v14 = vadd.f32 %v2788_v9, %v2716_v4  ;;  %v2792_v23 = vmul.f32 %v12860_v22, %v12564_v33 }
 0x37a   : > { %v2990_v5 = vmax.f32 %v2926_v45, 0.0  ;;  %v2714_v19 = vadd.f32 %v17982_v60, %v2580_v39  ;;  %v2932_v51 = vadd.f32 %v10528_v20, %v2857_v10  ;;  %v2181_v35 = vadd.f32 %v12634_v46, %v2045_v24  ;;  %v17984_v46 = vld [vmem:[#allocation11_spill] sm:$0xff]  ;;  %v17991_v39 = vld [vmem:[#allocation37_spill] sm:$0xff] }
 0x37b   : > { %v2585_v57 = vadd.f32 %v12645_v37, %v2449_v62  ;;  %v2448_v40 = vadd.f32 %v2384_v47, %v2312_v3  ;;  %v2927_v30 = vadd.f32 %v10525_v2, %v2852_v14  ;;  %v2856_v28 = vadd.f32 %v2792_v23, %v12624_v58  ;;  %v17986_v58 = vld [vmem:[#allocation120_spill] sm:$0xff]  ;;  %v12917_v10 = vld [vmem:[%s16388_s12] sm:$0xff] }
 0x37c   : > { %v3903_v17 = vpack.c.bf16 %v2992_v55, %v2990_v5  ;;  %v2850_v63 = vadd.f32 %v2786_v32, %v2714_v19  ;;  %v2996_v18 = vmax.f32 %v2932_v51, 0.0  ;;  %v2317_v33 = vadd.f32 %v17983_v48, %v2181_v35  ;;  %v17994_v51 = vld [vmem:[#allocation143_spill] sm:$0xff]  ;;  %v17997_v48 = vld [vmem:[#allocation14_spill] sm:$0xff] }
 0x37d   : > { %v2719_v41 = vadd.f32 %v12535_v49, %v2585_v57  ;;  %v2584_v7 = vadd.f32 %v12586_v38, %v2448_v40  ;;  %v2991_v15 = vmax.f32 %v2927_v30, 0.0  ;;  %v2931_v47 = vadd.f32 %v10525_v2, %v2856_v28  ;;  %v17987_v49 = vld [vmem:[#allocation42_spill] sm:$0xff]  ;;  %v17996_v30 = vld [vmem:[#allocation8_spill] sm:$0xff] }
 0x37e   : > { %4556 = vmatprep.mubr.bf16.mxu1 %v3903_v17  ;;  %v2925_v37 = vadd.f32 %v10525_v2, %v2850_v63  ;;  %v2525_v24 = vmul.f32 %v9839_v11, %v17984_v46  ;;  %v2453_v61 = vadd.f32 %v17986_v58, %v2317_v33  ;;  %v2661_v21 = vmul.f32 0.0, %v17987_v49  ;;  %v17995_v17 = vld [vmem:[#allocation7_spill] sm:$0xff]  ;;  %v17999_v58 = vld [vmem:[#allocation114_spill] sm:$0xff] }
 0x37f   : > { %v2855_v32 = vadd.f32 %v2791_v52, %v2719_v41  ;;  %v2718_v9 = vadd.f32 %v17985_v56, %v2584_v7  ;;  %v2995_v38 = vmax.f32 %v2931_v47, 0.0  ;;  %v2795_v13 = vmul.f32 0.0, %v12492_v53  ;;  %v12936_v41 = vld [vmem:[%s16388_s12 + $0x8] sm:$0xff]  ;;  %v17998_v47 = vld [vmem:[#allocation21_spill] sm:$0xff] }
 0x380   : > { %v2989_v26 = vmax.f32 %v2925_v37, 0.0  ;;  %v2797_v0 = vmul.f32 %v12492_v53, %v17988_v6  ;;  %v2589_v16 = vadd.f32 %v2525_v24, %v2453_v61  ;;  %v2725_v11 = vadd.f32 %v2661_v21, %v17989_v25  ;;  %v12966_v25 = vpop.f32.mrb[44].mxu1 }
 0x381   : > { %v2930_v44 = vadd.f32 %v10528_v20, %v2855_v32  ;;  %v2854_v1 = vadd.f32 %v2790_v50, %v2718_v9  ;;  %v2180_v29 = vadd.f32 %v17990_v42, %v12846_v34  ;;  %v2524_v45 = vmul.f32 %v17429_v12, %v17984_v46  ;;  %v4587_v50 = vld [vmem:[%s16387_s11] sm:$0x3]  ;;  %v17992_v34 = vld [vmem:[#allocation110_spill] sm:$0xff]  ;;  %v17993_v12 = vld [vmem:[#allocation124_spill] sm:$0xff] }
 0x382   : > { %v3902_v52 = vpack.c.bf16 %v2991_v15, %v2989_v26  ;;  %v2660_v54 = vmul.f32 0.0, %v17991_v39  ;;  %v2723_v62 = vadd.f32 %v2661_v21, %v2589_v16  ;;  %v2861_v53 = vadd.f32 %v2797_v0, %v2725_v11 }
 0x383   : > { %v2994_v4 = vmax.f32 %v2930_v44, 0.0  ;;  %v2929_v55 = vadd.f32 %v10525_v2, %v2854_v1  ;;  %v2316_v8 = vadd.f32 %v17992_v34, %v2180_v29  ;;  %v2794_v5 = vmul.f32 0.0, %v12860_v22 }
 0x384   : > { %4557 = vmatmul.mubr.bf16.gmra.mrb[84].mxu1 %v3902_v52  ;;  %v2724_v3 = vadd.f32 %v2660_v54, %v17993_v12  ;;  %v2796_v60 = vmul.f32 %v12860_v22, %v17988_v6  ;;  %v2859_v23 = vadd.f32 %v2795_v13, %v2723_v62  ;;  %v2936_v57 = vadd.f32 %v10528_v20, %v2861_v53 }
 0x385   : > { %v3905_v19 = vpack.c.bf16 %v2996_v18, %v2994_v4  ;;  %v2993_v14 = vmax.f32 %v2929_v55, 0.0  ;;  %v2452_v40 = vadd.f32 %v17994_v51, %v2316_v8  ;;  %v12927_v63 = vrot.slane %v4587_v50, %v17995_v17  ;;  %v18002_v51 = vld [vmem:[#allocation9_spill] sm:$0xff] }
 0x386   : > { %v2860_v35 = vadd.f32 %v2796_v60, %v2724_v3  ;;  %v12931_v28 = vrot.slane %v12917_v10, %v17996_v30  ;;  %v2934_v18 = vadd.f32 %v10528_v20, %v2859_v23  ;;  %v3000_v7 = vmax.f32 %v2936_v57, 0.0 }
 0x387   : > { %4566 = vmatprep.mubr.bf16.mxu1 %v3905_v19  ;;  %v3904_v22 = vpack.c.bf16 %v2995_v38, %v2993_v14  ;;  %v12941_v33 = vrot.slane %v12917_v10, %v17997_v48  ;;  %v2588_v37 = vadd.f32 %v2524_v45, %v2452_v40  ;;  %v4599_v24 = vadd.f32 %v12927_v63, %v17998_v47  ;;  %v18000_v38 = vld [vmem:[#allocation67_spill] sm:$0xff]  ;;  %v12969_v45 = vpop.f32.mrb[45].mxu1  ;;  %v18004_v47 = vld [vmem:[#allocation10_spill] sm:$0xff] }
 0x388   : > { %v2935_v15 = vadd.f32 %v10525_v2, %v2860_v35  ;;  %v12947_v32 = vrot.slane %v4587_v50, %v17996_v30  ;;  %v2998_v56 = vmax.f32 %v2934_v18, 0.0  ;;  %v12951_v9 = vrot.slane %v12936_v41, %v17996_v30  ;;  %v12974_v62 = vpop.f32.mrb[46].mxu1 }
 0x389   : > { %v12955_v20 = vrot.slane %v12936_v41, %v17997_v48  ;;  %v4601_v61 = vadd.f32 %v12927_v63, %v17999_v58  ;;  %v2722_v49 = vadd.f32 %v2660_v54, %v2588_v37  ;;  %v4663_v26 = vmax.f32 %v4599_v24, 0.0  ;;  %v12981_v12 = vpop.f32.mrb[47].mxu1  ;;  %v18003_v48 = vld [vmem:[#allocation12_spill] sm:$0xff] }
 0x38a   : > { %v2999_v21 = vmax.f32 %v2935_v15, 0.0  ;;  %v4600_v13 = vadd.f32 %v12947_v32, %v18000_v38  ;;  %v3907_v0 = vpack.c.bf16 %v3000_v7, %v2998_v56  ;;  %v12963_v1 = vrot.slane %v12917_v10, %v17995_v17 }
 0x38b   : > { %v4665_v44 = vmax.f32 %v4601_v61, 0.0  ;;  %v5260_v16 = vmul.f32 0.0, %v12931_v28  ;;  %v2858_v11 = vadd.f32 %v2794_v5, %v2722_v49  ;;  %v4732_v52 = vrot.slane %v4663_v26, 7  ;;  %v18006_v61 = vld [vmem:[#allocation16_spill] sm:$0xff] }
 0x38c   : > { %4567 = vmatmul.mubr.bf16.gmra.mrb[88].mxu1 %v3904_v22  ;;  %v4924_v42 = vrot.slane %v4663_v26, 1  ;;  %v5262_v29 = vmul.f32 %v12931_v28, %v4663_v26  ;;  %v5666_v39 = vmul.f32 %v12941_v33, %v4663_v26  ;;  %v12972_v54 = vmax.f32 %v4600_v13, 0.0 }
 0x38d   : > { %4576 = vmatprep.mubr.bf16.mxu1 %v3907_v0  ;;  %v4764_v4 = vrot.slane %v4665_v44, 7  ;;  %v4956_v55 = vrot.slane %v4665_v44, 1  ;;  %v2933_v53 = vadd.f32 %v10525_v2, %v2858_v11  ;;  %v5124_v50 = vmul.f32 %v12963_v1, %v17984_v46 }
 0x38e   : > { %v5126_v34 = vmul.f32 0.0, %v12963_v1  ;;  %v5264_v8 = vmul.f32 %v12931_v28, %v4665_v44  ;;  %v4733_v3 = vrot.slane %v12972_v54, 7  ;;  %v4925_v5 = vrot.slane %v12972_v54, 1 }
 0x38f   : > { %v12987_v60 = vmul.f32 %v12951_v9, %v12972_v54  ;;  %v12991_v2 = vmul.f32 %v12955_v20, %v12972_v54  ;;  %v2997_v19 = vmax.f32 %v2933_v53, 0.0  ;;  %v4796_v14 = vsel %vm1304_vm4, %v4732_v52, %v4764_v4  ;;  %v18009_v53 = vld [vmem:[#allocation18_spill] sm:$0xff] }
 0x390   : > { %v4828_v23 = vsel %vm1304_vm4, %v4764_v4, %v4732_v52  ;;  %v4988_v57 = vsel %vm1505_vm5, %v4924_v42, %v4956_v55  ;;  %v5020_v35 = vsel %vm1505_vm5, %v4956_v55, %v4924_v42  ;;  %v5130_v22 = vmul.f32 %v12963_v1, %v4796_v14  ;;  %v18007_v42 = vld [vmem:[#allocation17_spill] sm:$0xff] }
 0x391   : > { %18001 = vst [vmem:[#allocation97_spill] sm:$0xff] %v12991_v2  ;;  %v4860_v40 = vmul.f32 %v18002_v51, %v4828_v23  ;;  %v5322_v18 = vadd.f32 %v5260_v16, %v5124_v50  ;;  %v3906_v7 = vpack.c.bf16 %v2999_v21, %v2997_v19  ;;  %v5054_v37 = vmul.f32 %v18003_v48, %v5020_v35  ;;  %v18011_v19 = vld [vmem:[#allocation131_spill] sm:$0xff] }
 0x392   : > { %v5324_v15 = vadd.f32 %v5260_v16, %v5126_v34  ;;  %v13006_v24 = vrot.slane %v12917_v10, %v18004_v47  ;;  %v5328_v58 = vadd.f32 %v5264_v8, %v5130_v22  ;;  %v13011_v49 = vrot.slane %v12917_v10, %v18006_v61 }
 0x393   : > { %v5128_v56 = vmul.f32 %v12963_v1, %v4860_v40  ;;  %v5668_v26 = vmul.f32 %v12941_v33, %v4665_v44  ;;  %v13023_v54 = vrot.slane %v12917_v10, %v18007_v42  ;;  %v13029_v50 = vrot.slane %v12917_v10, %v18009_v53 }
 0x394   : > { %18005 = vst [vmem:[#allocation87_spill] sm:$0xff] %v13006_v24  ;;  %4577 = vmatmul.mubr.bf16.gmra.mrb[92].mxu1 %v3906_v7  ;;  %v5394_v38 = vmul.f32 0.0, %v13006_v24  ;;  %v5396_v21 = vmul.f32 %v13006_v24, %v17988_v6  ;;  %v5398_v13 = vmul.f32 %v13006_v24, %v4988_v57  ;;  %v5400_v0 = vmul.f32 %v13006_v24, %v5054_v37 }
 0x395   : > { %v5326_v16 = vadd.f32 %v5262_v29, %v5128_v56  ;;  %v5530_v11 = vmul.f32 %v13011_v49, %v4860_v40  ;;  %v5532_v52 = vmul.f32 %v13011_v49, %v4796_v14  ;;  %18008 = vst [vmem:[#allocation38_spill] sm:$0xff] %v13023_v54  ;;  %v5802_v29 = vmul.f32 %v13023_v54, %v4988_v57 }
 0x396   : > { %v5458_v44 = vadd.f32 %v5394_v38, %v5322_v18  ;;  %v5460_v4 = vadd.f32 %v5396_v21, %v5324_v15  ;;  %v13025_v55 = vadd.f32 %v5400_v0, %v5328_v58  ;;  %v5804_v8 = vmul.f32 %v13023_v54, %v5054_v37 }
 0x397   : > { %v13031_v34 = vadd.f32 %v5398_v13, %v5326_v16  ;;  %v4602_v14 = vadd.f32 %v12947_v32, %v18011_v19  ;;  %v13039_v35 = vrot.slane %v12936_v41, %v17995_v17  ;;  %v5261_v22 = vmul.f32 0.0, %v12951_v9 }
 0x398   : > { %v5594_v23 = vadd.f32 %v5530_v11, %v5458_v44  ;;  %v5596_v40 = vadd.f32 %v5532_v52, %v5460_v4  ;;  %v13044_v7 = vrot.slane %v12936_v41, %v18004_v47  ;;  %v13048_v57 = vrot.slane %v12936_v41, %v18006_v61 }
 0x399   : > { %18010 = vst [vmem:[#allocation119_spill] sm:$0xff] %v13031_v34  ;;  %v4666_v18 = vmax.f32 %v4602_v14, 0.0  ;;  %v13052_v37 = vrot.slane %v12936_v41, %v18007_v42  ;;  %v5125_v58 = vmul.f32 %v13039_v35, %v17984_v46  ;;  %v5127_v38 = vmul.f32 0.0, %v13039_v35 }
 0x39a   : > { %v5730_v15 = vadd.f32 %v5666_v39, %v5594_v23  ;;  %v5732_v56 = vadd.f32 %v5668_v26, %v5596_v40  ;;  %v5397_v0 = vmul.f32 %v13044_v7, %v17988_v6 }
 0x39b   : > { %v4765_v21 = vrot.slane %v4666_v18, 7  ;;  %v4957_v13 = vrot.slane %v4666_v18, 1  ;;  %v5265_v47 = vmul.f32 %v12951_v9, %v4666_v18  ;;  %v13064_v11 = vadd.f32 %v5261_v22, %v5125_v58 }
 0x39c   : > { %v13060_v61 = vadd.f32 %v5802_v29, %v5730_v15  ;;  %v13062_v16 = vadd.f32 %v5804_v8, %v5732_v56  ;;  %v5325_v39 = vadd.f32 %v5261_v22, %v5127_v38  ;;  %v5669_v40 = vmul.f32 %v12955_v20, %v4666_v18 }
 0x39d   : > { %v4797_v26 = vsel %vm1304_vm4, %v4733_v3, %v4765_v21  ;;  %v4829_v52 = vsel %vm1304_vm4, %v4765_v21, %v4733_v3  ;;  %v4989_v42 = vsel %vm1505_vm5, %v4925_v5, %v4957_v13  ;;  %v5021_v44 = vsel %vm1505_vm5, %v4957_v13, %v4925_v5  ;;  %v18014_v13 = vld [vmem:[#allocation19_spill] sm:$0xff] }
 0x39e   : > { %18012 = vst [vmem:[#allocation130_spill] sm:$0xff] %v13060_v61  ;;  %v4861_v4 = vmul.f32 %v18002_v51, %v4829_v52  ;;  %v5055_v29 = vmul.f32 %v18003_v48, %v5021_v44  ;;  %v5131_v8 = vmul.f32 %v13039_v35, %v4797_v26  ;;  %v5399_v19 = vmul.f32 %v13044_v7, %v4989_v42 }
 0x39f   : > { %v5461_v14 = vadd.f32 %v5397_v0, %v5325_v39  ;;  %v5533_v23 = vmul.f32 %v13048_v57, %v4797_v26  ;;  %v13081_v3 = vmul.f32 %v13052_v37, %v4989_v42  ;;  %v13091_v21 = vrot.slane %v12936_v41, %v18009_v53  ;;  %v13095_v0 = vpop.f32.mrb[48].mxu1  ;;  %v18015_v26 = vld [vmem:[#allocation15_spill] sm:$0xff]  ;;  %v18017_v42 = vld [vmem:[#allocation140_spill] sm:$0xff] }
 0x3a0   : > { %v5129_v22 = vmul.f32 %v13039_v35, %v4861_v4  ;;  %v5329_v15 = vadd.f32 %v5265_v47, %v5131_v8  ;;  %v5401_v5 = vmul.f32 %v13044_v7, %v5055_v29  ;;  %v13086_v56 = vmul.f32 %v13048_v57, %v4861_v4  ;;  %v13106_v4 = vpop.f32.mrb[49].mxu1  ;;  %v18018_v8 = vld [vmem:[#allocation89_spill] sm:$0xff] }
 0x3a1   : > { %18013 = vst [vmem:[#allocation103_spill] sm:$0xff] %v13081_v3  ;;  %v5597_v58 = vadd.f32 %v5533_v23, %v5461_v14  ;;  %v5805_v38 = vmul.f32 %v13052_v37, %v5055_v29  ;;  %v4603_v18 = vadd.f32 %v12927_v63, %v18014_v13  ;;  %v13102_v52 = vrot.slane %v12917_v10, %v18015_v26  ;;  %v18019_v23 = vld [vmem:[#allocation121_spill] sm:$0xff] }
 0x3a2   : > { %v5327_v39 = vadd.f32 %v12987_v60, %v5129_v22  ;;  %v13098_v47 = vadd.f32 %v5401_v5, %v5329_v15  ;;  %v4604_v44 = vadd.f32 %v12947_v32, %v18017_v42  ;;  %v4605_v14 = vadd.f32 %v12927_v63, %v18018_v8  ;;  %v13112_v60 = vpop.f32.mrb[50].mxu1 }
 0x3a3   : > { %18016 = vst [vmem:[#allocation129_spill] sm:$0xff] %v13102_v52  ;;  %v5733_v53 = vadd.f32 %v5669_v40, %v5597_v58  ;;  %v4667_v29 = vmax.f32 %v4603_v18, 0.0  ;;  %v4606_v13 = vadd.f32 %v12947_v32, %v18019_v23  ;;  %v4607_v10 = vadd.f32 %v12927_v63, %v12831_v27  ;;  %v13122_v40 = vpop.f32.mrb[51].mxu1 }
 0x3a4   : > { %v13114_v22 = vadd.f32 %v5399_v19, %v5327_v39  ;;  %v13116_v15 = vmax.f32 %v4604_v44, 0.0  ;;  %v4608_v5 = vadd.f32 %v12947_v32, %v12838_v59  ;;  %v4610_v44 = vadd.f32 %v12947_v32, %v12850_v31 }
 0x3a5   : > { %v13124_v58 = vadd.f32 %v5805_v38, %v5733_v53  ;;  %v4734_v18 = vrot.slane %v4667_v29, 7  ;;  %v4926_v42 = vrot.slane %v4667_v29, 1  ;;  %v13127_v8 = vmul.f32 %v12931_v28, %v4667_v29 }
 0x3a6   : > { %18020 = vst [vmem:[#allocation28_spill] sm:$0xff] %v13114_v22  ;;  %v13130_v19 = vmul.f32 %v12941_v33, %v4667_v29  ;;  %v13133_v39 = vmul.f32 %v13102_v52, %v4667_v29  ;;  %v4735_v27 = vrot.slane %v13116_v15, 7  ;;  %v13139_v59 = vmul.f32 %v12951_v9, %v13116_v15 }
 0x3a7   : > { %18021 = vst [vmem:[#allocation139_spill] sm:$0xff] %v13127_v8  ;;  %v13143_v38 = vmul.f32 %v12955_v20, %v13116_v15  ;;  %v4669_v53 = vmax.f32 %v4605_v14, 0.0  ;;  %v13145_v23 = vmax.f32 %v4606_v13, 0.0  ;;  %v13147_v6 = vmax.f32 %v4607_v10, 0.0 }
 0x3a8   : > { %18022 = vst [vmem:[#allocation93_spill] sm:$0xff] %v13130_v19  ;;  %18023 = vst [vmem:[#allocation125_spill] sm:$0xff] %v13133_v39  ;;  %v13149_v46 = vmax.f32 %v4608_v5, 0.0  ;;  %v4609_v29 = vadd.f32 %v12927_v63, %v12843_v43 }
 0x3a9   : > { %18024 = vst [vmem:[#allocation132_spill] sm:$0xff] %v13143_v38  ;;  %18025 = vst [vmem:[#allocation128_spill] sm:$0xff] %v13147_v6  ;;  %v4766_v8 = vrot.slane %v4669_v53, 7  ;;  %v4958_v19 = vrot.slane %v4669_v53, 1  ;;  %v5268_v34 = vmul.f32 %v12931_v28, %v4669_v53  ;;  %v5672_v54 = vmul.f32 %v12941_v33, %v4669_v53 }
 0x3aa   : > { %v6076_v14 = vmul.f32 %v13102_v52, %v4669_v53  ;;  %v4767_v13 = vrot.slane %v13145_v23, 7  ;;  %v5269_v5 = vmul.f32 %v12951_v9, %v13145_v23 }
 0x3ab   : > { %v4798_v43 = vsel %vm1304_vm4, %v4734_v18, %v4766_v8  ;;  %v4830_v31 = vsel %vm1304_vm4, %v4766_v8, %v4734_v18  ;;  %v13168_v38 = vsel %vm1505_vm5, %v4926_v42, %v4958_v19  ;;  %v5022_v53 = vsel %vm1505_vm5, %v4958_v19, %v4926_v42 }
 0x3ac   : > { %18026 = vst [vmem:[#allocation123_spill] sm:$0xff] %v13168_v38  ;;  %v13173_v52 = vmul.f32 %v18002_v51, %v4830_v31  ;;  %v13176_v10 = vmul.f32 %v18003_v48, %v5022_v53  ;;  %v5134_v22 = vmul.f32 %v12963_v1, %v4798_v43  ;;  %v13181_v39 = vmul.f32 %v13006_v24, %v13168_v38 }
 0x3ad   : > { %v5536_v18 = vmul.f32 %v13011_v49, %v4798_v43  ;;  %v5940_v8 = vmul.f32 %v13029_v50, %v4798_v43  ;;  %v13187_v3 = vsel %vm1304_vm4, %v4735_v27, %v4767_v13  ;;  %v13191_v42 = vsel %vm1304_vm4, %v4767_v13, %v4735_v27 }
 0x3ae   : > { %18027 = vst [vmem:[#allocation43_spill] sm:$0xff] %v13181_v39  ;;  %v13195_v19 = vmul.f32 %v12963_v1, %v13173_v52  ;;  %v5332_v31 = vadd.f32 %v5268_v34, %v5134_v22  ;;  %v5404_v53 = vmul.f32 %v13006_v24, %v13176_v10  ;;  %v5135_v39 = vmul.f32 %v13039_v35, %v13187_v3 }
 0x3af   : > { %v5600_v43 = vadd.f32 %v5536_v18, %v13025_v55  ;;  %v6004_v61 = vadd.f32 %v5940_v8, %v13062_v16  ;;  %v5537_v38 = vmul.f32 %v13048_v57, %v13187_v3  ;;  %v5673_v27 = vmul.f32 %v12955_v20, %v13145_v23 }
 0x3b0   : > { %18028 = vst [vmem:[#allocation137_spill] sm:$0xff] %v13195_v19  ;;  %v5468_v13 = vadd.f32 %v5404_v53, %v5332_v31  ;;  %v13207_v2 = vadd.f32 %v5269_v5, %v5135_v39  ;;  %v4736_v34 = vrot.slane %v13147_v6, 7  ;;  %v13218_v16 = vmul.f32 %v12931_v28, %v13147_v6 }
 0x3b1   : > { %v13211_v19 = vadd.f32 %v5672_v54, %v5600_v43  ;;  %v13213_v24 = vadd.f32 %v6076_v14, %v6004_v61  ;;  %v5601_v55 = vadd.f32 %v5537_v38, %v13098_v47  ;;  %v13222_v18 = vmul.f32 %v12941_v33, %v13147_v6 }
 0x3b2   : > { %18029 = vst [vmem:[#allocation144_spill] sm:$0xff] %v13207_v2  ;;  %18031 = vst [vmem:[#allocation108_spill] sm:$0xff] %v13218_v16  ;;  %v4737_v39 = vrot.slane %v13149_v46, 7  ;;  %v13228_v54 = vmul.f32 %v12951_v9, %v13149_v46  ;;  %v13234_v47 = vmul.f32 %v12955_v20, %v13149_v46  ;;  %v13236_v38 = vmax.f32 %v4609_v29, 0.0 }
 0x3b3   : > { %18030 = vst [vmem:[#allocation22_spill] sm:$0xff] %v13211_v19  ;;  %18032 = vst [vmem:[#allocation30_spill] sm:$0xff] %v13222_v18  ;;  %v13230_v61 = vadd.f32 %v5673_v27, %v5601_v55  ;;  %v13238_v14 = vmax.f32 %v4610_v44, 0.0  ;;  %v4611_v8 = vadd.f32 %v12927_v63, %v12966_v25  ;;  %v4612_v31 = vadd.f32 %v12947_v32, %v12969_v45 }
 0x3b4   : > { %18033 = vst [vmem:[#allocation98_spill] sm:$0xff] %v13234_v47  ;;  %v4613_v53 = vadd.f32 %v12927_v63, %v12974_v62  ;;  %v4614_v43 = vadd.f32 %v12947_v32, %v12981_v12  ;;  %v4768_v27 = vrot.slane %v13236_v38, 7  ;;  %v5272_v44 = vmul.f32 %v12931_v28, %v13236_v38 }
 0x3b5   : > { %v5676_v29 = vmul.f32 %v12941_v33, %v13236_v38  ;;  %v4769_v25 = vrot.slane %v13238_v14, 7  ;;  %v5273_v62 = vmul.f32 %v12951_v9, %v13238_v14  ;;  %v13260_v12 = vmul.f32 %v12955_v20, %v13238_v14 }
 0x3b6   : > { %v13264_v22 = vsel %vm1304_vm4, %v4736_v34, %v4768_v27  ;;  %v13268_v55 = vsel %vm1304_vm4, %v4768_v27, %v4736_v34  ;;  %v13270_v5 = vmax.f32 %v4611_v8, 0.0  ;;  %v13272_v18 = vmax.f32 %v4612_v31, 0.0 }
 0x3b7   : > { %18034 = vst [vmem:[#allocation35_spill] sm:$0xff] %v13260_v12  ;;  %18035 = vst [vmem:[#allocation46_spill] sm:$0xff] %v13264_v22  ;;  %v5138_v45 = vmul.f32 %v12963_v1, %v13264_v22  ;;  %v5540_v47 = vmul.f32 %v13011_v49, %v13264_v22  ;;  %v13280_v12 = vsel %vm1304_vm4, %v4737_v39, %v4769_v25 }
 0x3b8   : > { %18036 = vst [vmem:[#allocation126_spill] sm:$0xff] %v13270_v5  ;;  %18037 = vst [vmem:[#allocation94_spill] sm:$0xff] %v13272_v18  ;;  %v13284_v2 = vsel %vm1304_vm4, %v4769_v25, %v4737_v39  ;;  %v5139_v34 = vmul.f32 %v13039_v35, %v13280_v12  ;;  %v13290_v8 = vmul.f32 %v13048_v57, %v13280_v12  ;;  %v4738_v31 = vrot.slane %v13270_v5, 7 }
 0x3b9   : > { %v13294_v22 = vadd.f32 %v5272_v44, %v5138_v45  ;;  %v5604_v19 = vadd.f32 %v5540_v47, %v5468_v13  ;;  %v13298_v16 = vmul.f32 %v12931_v28, %v13270_v5  ;;  %v13302_v39 = vmul.f32 %v12941_v33, %v13270_v5 }
 0x3ba   : > { %18038 = vst [vmem:[#allocation25_spill] sm:$0xff] %v13290_v8  ;;  %v13304_v25 = vadd.f32 %v5273_v62, %v5139_v34  ;;  %v4739_v6 = vrot.slane %v13272_v18, 7  ;;  %v13310_v27 = vmul.f32 %v12951_v9, %v13272_v18  ;;  %v13316_v13 = vmul.f32 %v12955_v20, %v13272_v18  ;;  %v13322_v62 = vpop.f32.mrb[52].mxu1 }
 0x3bb   : > { %18039 = vst [vmem:[#allocation54_spill] sm:$0xff] %v13294_v22  ;;  %18040 = vst [vmem:[#allocation75_spill] sm:$0xff] %v13298_v16  ;;  %v13312_v44 = vadd.f32 %v5676_v29, %v5604_v19  ;;  %v13318_v47 = vmax.f32 %v4613_v53, 0.0  ;;  %v13320_v45 = vmax.f32 %v4614_v43, 0.0  ;;  %v4615_v34 = vadd.f32 %v12927_v63, %v13095_v0 }
 0x3bc   : > { %18041 = vst [vmem:[#allocation53_spill] sm:$0xff] %v13302_v39  ;;  %18042 = vst [vmem:[#allocation142_spill] sm:$0xff] %v13304_v25  ;;  %v4616_v8 = vadd.f32 %v12947_v32, %v13106_v4  ;;  %v4617_v19 = vadd.f32 %v12927_v63, %v13112_v60  ;;  %v4618_v29 = vadd.f32 %v12947_v32, %v13122_v40  ;;  %v13332_v39 = vpop.f32.mrb[53].mxu1 }
 0x3bd   : > { %18043 = vst [vmem:[#allocation49_spill] sm:$0xff] %v13310_v27  ;;  %18044 = vst [vmem:[#allocation32_spill] sm:$0xff] %v13312_v44  ;;  %v4770_v53 = vrot.slane %v13318_v47, 7  ;;  %v5276_v22 = vmul.f32 %v12931_v28, %v13318_v47  ;;  %v13340_v0 = vmul.f32 %v12941_v33, %v13318_v47  ;;  %v13342_v4 = vpop.f32.mrb[54].mxu1  ;;  %v4771_v60 = vrot.slane %v13320_v45, 7 }
 0x3be   : > { %18045 = vst [vmem:[#allocation138_spill] sm:$0xff] %v13316_v13  ;;  %18046 = vst [vmem:[#allocation88_spill] sm:$0xff] %v13318_v47  ;;  %v5277_v40 = vmul.f32 %v12951_v9, %v13320_v45  ;;  %v13350_v25 = vmul.f32 %v12955_v20, %v13320_v45  ;;  %v13352_v43 = vpop.f32.mrb[55].mxu1  ;;  %v13362_v16 = vmax.f32 %v4615_v34, 0.0  ;;  %v13364_v13 = vmax.f32 %v4616_v8, 0.0 }
 0x3bf   : > { %18047 = vst [vmem:[#allocation95_spill] sm:$0xff] %v13320_v45  ;;  %18048 = vst [vmem:[#allocation66_spill] sm:$0xff] %v13340_v0  ;;  %v13356_v44 = vsel %vm1304_vm4, %v4738_v31, %v4770_v53  ;;  %v13360_v0 = vsel %vm1304_vm4, %v4770_v53, %v4738_v31  ;;  %v13374_v47 = vsel %vm1304_vm4, %v4739_v6, %v4771_v60  ;;  %v13412_v53 = vmax.f32 %v4618_v29, 0.0 }
 0x3c0   : > { %18049 = vst [vmem:[#allocation68_spill] sm:$0xff] %v13350_v25  ;;  %18050 = vst [vmem:[#allocation26_spill] sm:$0xff] %v13356_v44  ;;  %v5142_v5 = vmul.f32 %v12963_v1, %v13356_v44  ;;  %v13370_v25 = vmul.f32 %v13011_v49, %v13356_v44  ;;  %v13378_v27 = vsel %vm1304_vm4, %v4771_v60, %v4739_v6  ;;  %v4740_v34 = vrot.slane %v13362_v16, 7 }
 0x3c1   : > { %18051 = vst [vmem:[#allocation104_spill] sm:$0xff] %v13360_v0  ;;  %18052 = vst [vmem:[#allocation39_spill] sm:$0xff] %v13362_v16  ;;  %v5143_v31 = vmul.f32 %v13039_v35, %v13374_v47  ;;  %v13384_v8 = vmul.f32 %v13048_v57, %v13374_v47  ;;  %v13392_v44 = vmul.f32 %v12931_v28, %v13362_v16  ;;  %v4741_v60 = vrot.slane %v13364_v13, 7 }
 0x3c2   : > { %18053 = vst [vmem:[#allocation23_spill] sm:$0xff] %v13364_v13  ;;  %18054 = vst [vmem:[#allocation27_spill] sm:$0xff] %v13370_v25  ;;  %v13388_v25 = vadd.f32 %v5276_v22, %v5142_v5  ;;  %v13396_v6 = vmul.f32 %v12941_v33, %v13362_v16  ;;  %v13408_v22 = vmul.f32 %v12955_v20, %v13364_v13  ;;  %v13410_v5 = vmax.f32 %v4617_v19, 0.0 }
 0x3c3   : > { %18055 = vst [vmem:[#allocation34_spill] sm:$0xff] %v13374_v47  ;;  %18056 = vst [vmem:[#allocation60_spill] sm:$0xff] %v13378_v27  ;;  %v13399_v0 = vadd.f32 %v5277_v40, %v5143_v31  ;;  %v13404_v47 = vmul.f32 %v12951_v9, %v13364_v13  ;;  %v18066_v40 = vrot.slane %v13145_v23, 1  ;;  %v18067_v31 = vrot.slane %v13116_v15, 1 }
 0x3c4   : > { %18057 = vst [vmem:[#allocation85_spill] sm:$0xff] %v13384_v8  ;;  %18058 = vst [vmem:[#allocation141_spill] sm:$0xff] %v13388_v25  ;;  %v5395_v29 = vmul.f32 0.0, %v13044_v7  ;;  %v13449_v13 = vmul.f32 %v12955_v20, %v13412_v53 }
 0x3c5   : > { %18059 = vst [vmem:[#allocation133_spill] sm:$0xff] %v13392_v44  ;;  %18060 = vst [vmem:[#allocation118_spill] sm:$0xff] %v13396_v6  ;;  %v13416_v6 = vmul.f32 %v18002_v51, %v13191_v42  ;;  %v4991_v8 = vsel %vm1505_vm5, %v18067_v31, %v18066_v40  ;;  %v18068_v25 = vmov %v18067_v31  ;;  %v4772_v44 = vrot.slane %v13410_v5, 7 }
 0x3c6   : > { %18061 = vst [vmem:[#allocation61_spill] sm:$0xff] %v13399_v0  ;;  %18062 = vst [vmem:[#allocation41_spill] sm:$0xff] %v13404_v47  ;;  %v18069_v0 = vmov %v18066_v40  ;;  %v13433_v42 = vmul.f32 %v13052_v37, %v4991_v8  ;;  %v5280_v40 = vmul.f32 %v12931_v28, %v13410_v5  ;;  %v13441_v31 = vmul.f32 %v12941_v33, %v13410_v5 }
 0x3c7   : > { %18063 = vst [vmem:[#allocation57_spill] sm:$0xff] %v13408_v22  ;;  %18064 = vst [vmem:[#allocation29_spill] sm:$0xff] %v13410_v5  ;;  %v5023_v19 = vsel %vm1505_vm5, %v18069_v0, %v18068_v25  ;;  %v5403_v22 = vmul.f32 %v13044_v7, %v4991_v8  ;;  %v4773_v25 = vrot.slane %v13412_v53, 7  ;;  %v5281_v47 = vmul.f32 %v12951_v9, %v13412_v53 }
 0x3c8   : > { %18065 = vst [vmem:[#allocation33_spill] sm:$0xff] %v13412_v53  ;;  %18070 = vst [vmem:[#allocation112_spill] sm:$0xff] %v13441_v31  ;;  %v13453_v16 = vsel %vm1304_vm4, %v4740_v34, %v4772_v44  ;;  %v13457_v18 = vsel %vm1304_vm4, %v4772_v44, %v4740_v34  ;;  %v13460_v31 = vmul.f32 %v18003_v48, %v5023_v19  ;;  %v13481_v34 = vld [vmem:[%s16388_s12 + $0x18] ss:$0 sm:$0xff] }
 0x3c9   : > { %18071 = vst [vmem:[#allocation50_spill] sm:$0xff] %v13449_v13  ;;  %18072 = vst [vmem:[#allocation77_spill] sm:$0xff] %v13453_v16  ;;  %v5133_v0 = vmul.f32 %v13039_v35, %v13416_v6  ;;  %v5146_v5 = vmul.f32 %v12963_v1, %v13453_v16  ;;  %v13468_v13 = vmul.f32 %v13011_v49, %v13453_v16 }
 0x3ca   : > { %18073 = vst [vmem:[#allocation99_spill] sm:$0xff] %v13457_v18  ;;  %v13472_v53 = vsel %vm1304_vm4, %v4741_v60, %v4773_v25  ;;  %v13476_v44 = vsel %vm1304_vm4, %v4773_v25, %v4741_v60  ;;  %18077 = vst [vmem:[#allocation82_spill] sm:$0xff] %v13481_v34  ;;  %v13495_v60 = vmul.f32 %v13044_v7, %v13460_v31 }
 0x3cb   : > { %18074 = vst [vmem:[#allocation24_spill] sm:$0xff] %v13468_v13  ;;  %18075 = vst [vmem:[#allocation55_spill] sm:$0xff] %v13472_v53  ;;  %v5147_v19 = vmul.f32 %v13039_v35, %v13472_v53  ;;  %v13487_v16 = vmul.f32 %v13048_v57, %v13472_v53  ;;  %v4731_v13 = vld [vmem:[%s16389_s13] sm:$0x3]  ;;  %v5331_v18 = vadd.f32 %v13139_v59, %v5133_v0 }
 0x3cc   : > { %18076 = vst [vmem:[#allocation80_spill] sm:$0xff] %v13476_v44  ;;  %v13497_v25 = vadd.f32 %v5280_v40, %v5146_v5  ;;  %v5459_v44 = vadd.f32 %v5395_v29, %v13064_v11  ;;  %v5939_v45 = vmul.f32 %v13091_v21, %v13416_v6  ;;  %v13510_v59 = vrot.slane %v12936_v41, %v18015_v26  ;;  %v13516_v11 = vld [vmem:[%s16388_s12 + $0x10] ss:$0 sm:$0xff] }
 0x3cd   : > { %18078 = vst [vmem:[#allocation79_spill] sm:$0xff] %v13487_v16  ;;  %v5941_v16 = vmul.f32 %v13091_v21, %v13187_v3  ;;  %v13504_v53 = vadd.f32 %v5281_v47, %v5147_v19  ;;  %v13506_v27 = vadd.f32 %v5403_v22, %v5331_v18  ;;  %v6209_v0 = vmul.f32 %v13481_v34, %v4991_v8  ;;  %v18082_v8 = vld [vmem:[#allocation97_spill] sm:$0xff]  ;;  %v18084_v19 = vld [vmem:[#allocation130_spill] sm:$0xff] }
 0x3ce   : > { %18079 = vst [vmem:[#allocation44_spill] sm:$0xff] %v13497_v25  ;;  %v5595_v5 = vadd.f32 %v13086_v56, %v5459_v44  ;;  %v6211_v3 = vmul.f32 %v13481_v34, %v13460_v31  ;;  %v13523_v18 = vrot.slane %v4731_v13, %v17995_v17  ;;  %v6075_v41 = vmul.f32 %v13510_v59, %v13116_v15  ;;  %v18085_v17 = vld [vmem:[#allocation103_spill] sm:$0xff] }
 0x3cf   : > { %18080 = vst [vmem:[#allocation90_spill] sm:$0xff] %v13504_v53  ;;  %18081 = vst [vmem:[#allocation111_spill] sm:$0xff] %v13506_v27  ;;  %v6005_v29 = vadd.f32 %v5941_v16, %v13124_v58  ;;  %v6077_v26 = vmul.f32 %v13510_v59, %v13145_v23  ;;  %v13530_v47 = vrot.slane %v4731_v13, %v17996_v30  ;;  %v18083_v16 = vld [vmem:[#allocation123_spill] sm:$0xff]  ;;  %v13552_v27 = vpop.f32.mrb[56].mxu1 }
 0x3d0   : > { %v5938_v56 = vmul.f32 %v13029_v50, %v13173_v52  ;;  %v5731_v58 = vadd.f32 %v18082_v8, %v5595_v5  ;;  %v6208_v22 = vmul.f32 %v13516_v11, %v18083_v16  ;;  %v6210_v40 = vmul.f32 %v13516_v11, %v13176_v10 }
 0x3d1   : > { %v4619_v15 = vadd.f32 %v12927_v63, %v13322_v62  ;;  %v6139_v44 = vadd.f32 %v6077_v26, %v6005_v29  ;;  %v4620_v13 = vadd.f32 %v12947_v32, %v13332_v39  ;;  %v4621_v30 = vadd.f32 %v12927_v63, %v13342_v4  ;;  %v18087_v29 = vld [vmem:[#allocation125_spill] sm:$0xff] }
 0x3d2   : > { %v6002_v23 = vadd.f32 %v5938_v56, %v18084_v19  ;;  %v5867_v5 = vadd.f32 %v18085_v17, %v5731_v58  ;;  %v6274_v8 = vadd.f32 %v6210_v40, %v13213_v24  ;;  %v4622_v53 = vadd.f32 %v12947_v32, %v13352_v43  ;;  %v13559_v19 = vpop.f32.mrb[57].mxu1 }
 0x3d3   : > { %v13548_v25 = vmax.f32 %v4619_v15, 0.0  ;;  %v6275_v62 = vadd.f32 %v6211_v3, %v6139_v44  ;;  %v13555_v56 = vmax.f32 %v4620_v13, 0.0  ;;  %v13557_v39 = vmax.f32 %v4621_v30, 0.0  ;;  %v13564_v40 = vpop.f32.mrb[58].mxu1 }
 0x3d4   : > { %v6136_v26 = vadd.f32 %v18087_v29, %v6002_v23  ;;  %v6003_v4 = vadd.f32 %v5939_v45, %v5867_v5  ;;  %v6349_v17 = vadd.f32 %v13523_v18, %v6274_v8  ;;  %v13575_v45 = vpop.f32.mrb[59].mxu1  ;;  %v13600_v5 = vmul.f32 %v18002_v51, %v13284_v2 }
 0x3d5   : > { %18086 = vst [vmem:[#allocation78_spill] sm:$0xff] %v13548_v25  ;;  %18088 = vst [vmem:[#allocation40_spill] sm:$0xff] %v13555_v56  ;;  %v4742_v24 = vrot.slane %v13548_v25, 7  ;;  %v6350_v43 = vadd.f32 %v13530_v47, %v6275_v62  ;;  %v13569_v15 = vmul.f32 %v12931_v28, %v13548_v25  ;;  %v13573_v30 = vmul.f32 %v12941_v33, %v13548_v25 }
 0x3d6   : > { %18089 = vst [vmem:[#allocation106_spill] sm:$0xff] %v13557_v39  ;;  %v6272_v3 = vadd.f32 %v6208_v22, %v6136_v26  ;;  %v6137_v44 = vadd.f32 %v6075_v41, %v6003_v4  ;;  %v6413_v23 = vmax.f32 %v6349_v17, 0.0  ;;  %v4743_v13 = vrot.slane %v13555_v56, 7 }
 0x3d7   : > { %18090 = vst [vmem:[#allocation62_spill] sm:$0xff] %v13569_v15  ;;  %18091 = vst [vmem:[#allocation36_spill] sm:$0xff] %v13573_v30  ;;  %v6414_v8 = vmax.f32 %v6350_v43, 0.0  ;;  %v13582_v22 = vmul.f32 %v12951_v9, %v13555_v56  ;;  %v13586_v29 = vmul.f32 %v12955_v20, %v13555_v56  ;;  %v4774_v58 = vrot.slane %v13557_v39, 7  ;;  %v18121_v56 = vld [vmem:[#allocation22_spill] sm:$0xff] }
 0x3d8   : > { %v6347_v62 = vadd.f32 %v13523_v18, %v6272_v3  ;;  %v6273_v26 = vadd.f32 %v6209_v0, %v6137_v44  ;;  %v5284_v4 = vmul.f32 %v12931_v28, %v13557_v39  ;;  %v13594_v43 = vmul.f32 %v12941_v33, %v13557_v39 }
 0x3d9   : > { %18092 = vst [vmem:[#allocation45_spill] sm:$0xff] %v13582_v22  ;;  %18093 = vst [vmem:[#allocation47_spill] sm:$0xff] %v13586_v29  ;;  %v13596_v3 = vmax.f32 %v4622_v53, 0.0  ;;  %v13605_v44 = vsel %vm1304_vm4, %v4742_v24, %v4774_v58  ;;  %v13609_v41 = vsel %vm1304_vm4, %v4774_v58, %v4742_v24  ;;  %v18099_v30 = vrot.slane %v13149_v46, 1 }
 0x3da   : > { %v6411_v17 = vmax.f32 %v6347_v62, 0.0  ;;  %18094 = vst [vmem:[#allocation117_spill] sm:$0xff] %v13594_v43  ;;  %v6348_v0 = vadd.f32 %v13530_v47, %v6273_v26  ;;  %18096 = vst [vmem:[#allocation116_spill] sm:$0xff] %v13605_v44  ;;  %v18098_v62 = vrot.slane %v13238_v14, 1  ;;  %v5150_v2 = vmul.f32 %v12963_v1, %v13605_v44 }
 0x3db   : > { %18095 = vst [vmem:[#allocation56_spill] sm:$0xff] %v13596_v3  ;;  %18097 = vst [vmem:[#allocation107_spill] sm:$0xff] %v13609_v41  ;;  %v13621_v26 = vmul.f32 %v13011_v49, %v13605_v44  ;;  %v4775_v29 = vrot.slane %v13596_v3, 7  ;;  %v5285_v58 = vmul.f32 %v12951_v9, %v13596_v3  ;;  %v13629_v25 = vmul.f32 %v12955_v20, %v13596_v3 }
 0x3dc   : > { %v4993_v53 = vsel %vm1505_vm5, %v18099_v30, %v18098_v62  ;;  %v6475_v43 = vpack.c.bf16 %v6413_v23, %v6411_v17  ;;  %v6412_v15 = vmax.f32 %v6348_v0, 0.0  ;;  %v13631_v30 = vadd.f32 %v5284_v4, %v5150_v2 }
 0x3dd   : > { %18100 = vst [vmem:[#allocation52_spill] sm:$0xff] %v13621_v26  ;;  %18101 = vst [vmem:[#allocation92_spill] sm:$0xff] %v13629_v25  ;;  %v13635_v23 = vsel %vm1304_vm4, %v4743_v13, %v4775_v29  ;;  %v13639_v17 = vsel %vm1304_vm4, %v4775_v29, %v4743_v13  ;;  %v18105_v0 = vrot.slane %v13149_v46, 1  ;;  %v5137_v13 = vmul.f32 %v13039_v35, %v13600_v5 }
 0x3de   : > { %18102 = vst [vmem:[#allocation100_spill] sm:$0xff] %v13631_v30  ;;  %18103 = vst [vmem:[#allocation83_spill] sm:$0xff] %v13635_v23  ;;  %v6476_v26 = vpack.c.bf16 %v6414_v8, %v6412_v15  ;;  %v5151_v4 = vmul.f32 %v13039_v35, %v13635_v23  ;;  %v13651_v2 = vmul.f32 %v13048_v57, %v13635_v23  ;;  %v18117_v23 = vld [vmem:[#allocation119_spill] sm:$0xff] }
 0x3df   : > { %18104 = vst [vmem:[#allocation51_spill] sm:$0xff] %v13639_v17  ;;  %v5025_v24 = vsel %vm1505_vm5, %v18098_v62, %v18105_v0  ;;  %v5407_v29 = vmul.f32 %v13044_v7, %v4993_v53  ;;  %v5535_v25 = vmul.f32 %v13048_v57, %v13416_v6  ;;  %v5809_v15 = vmul.f32 %v13052_v37, %v13460_v31  ;;  %v18108_v6 = vld [vmem:[#allocation28_spill] sm:$0xff] }
 0x3e0   : > { %18106 = vst [vmem:[#allocation58_spill] sm:$0xff] %v13651_v2  ;;  %v13654_v30 = vmul.f32 %v18003_v48, %v5025_v24  ;;  %6743 = vmatprep.mubr.bf16.mxu0 %v6476_v26  ;;  %v13663_v8 = vadd.f32 %v5285_v58, %v5151_v4  ;;  %v13670_v24 = vmul.f32 %v13052_v37, %v4993_v53 }
 0x3e1   : > { %v5943_v62 = vmul.f32 %v13091_v21, %v13600_v5  ;;  %6744 = vmatmul.mubr.bf16.vlgmr.msra.gmra.mrb[64].mxu0 %v6475_v43  ;;  %v5335_v2 = vadd.f32 %v13228_v54, %v5137_v13  ;;  %v5599_v44 = vadd.f32 %v5535_v25, %v18108_v6  ;;  %v5873_v31 = vadd.f32 %v5809_v15, %v13230_v61  ;;  %v18109_v54 = vld [vmem:[#allocation132_spill] sm:$0xff] }
 0x3e2   : > { %18107 = vst [vmem:[#allocation73_spill] sm:$0xff] %v13663_v8  ;;  %v13667_v0 = vmul.f32 %v13044_v7, %v13654_v30  ;;  %v5945_v26 = vmul.f32 %v13091_v21, %v13280_v12  ;;  %v6079_v58 = vmul.f32 %v13510_v59, %v13149_v46  ;;  %v6081_v4 = vmul.f32 %v13510_v59, %v13238_v14  ;;  %v18111_v46 = vld [vmem:[#allocation128_spill] sm:$0xff] }
 0x3e3   : > { %v6213_v8 = vmul.f32 %v13481_v34, %v4993_v53  ;;  %v6215_v43 = vmul.f32 %v13481_v34, %v13654_v30  ;;  %v13686_v39 = vadd.f32 %v5407_v29, %v5335_v2  ;;  %v5735_v25 = vadd.f32 %v18109_v54, %v5599_v44 }
 0x3e4   : > { %v6009_v13 = vadd.f32 %v5945_v26, %v5873_v31  ;;  %v13691_v61 = vmul.f32 %v18002_v51, %v13268_v55  ;;  %v18110_v12 = vrot.slane %v13236_v38, 1  ;;  %v18112_v15 = vrot.slane %v18111_v46, 1  ;;  %v18115_v55 = vld [vmem:[#allocation38_spill] sm:$0xff] }
 0x3e5   : > { %v5534_v44 = vmul.f32 %v13011_v49, %v13173_v52  ;;  %v5806_v29 = vmul.f32 %v18115_v55, %v18083_v16  ;;  %v5871_v31 = vadd.f32 %v13433_v42, %v5735_v25  ;;  %v18118_v42 = vld [vmem:[#allocation108_spill] sm:$0xff] }
 0x3e6   : > { %v4992_v14 = vsel %vm1505_vm5, %v18112_v15, %v18110_v12  ;;  %v18113_v53 = vmov %v18112_v15  ;;  %v18114_v6 = vmov %v18110_v12  ;;  %v6143_v26 = vadd.f32 %v6081_v4, %v6009_v13  ;;  %v18116_v15 = vld [vmem:[#allocation87_spill] sm:$0xff]  ;;  %v18120_v13 = vld [vmem:[#allocation93_spill] sm:$0xff] }
 0x3e7   : > { %v5024_v2 = vsel %vm1505_vm5, %v18114_v6, %v18113_v53  ;;  %v5136_v12 = vmul.f32 %v12963_v1, %v13691_v61  ;;  %v5406_v41 = vmul.f32 %v18116_v15, %v4992_v14  ;;  %v5598_v22 = vadd.f32 %v5534_v44, %v18117_v23  ;;  %v18122_v44 = vld [vmem:[#allocation46_spill] sm:$0xff] }
 0x3e8   : > { %v13711_v54 = vmul.f32 %v18003_v48, %v5024_v2  ;;  %v5808_v53 = vmul.f32 %v18115_v55, %v13176_v10  ;;  %v13720_v52 = vmul.f32 %v18115_v55, %v4992_v14  ;;  %v6007_v16 = vadd.f32 %v5943_v62, %v5871_v31  ;;  %v18124_v31 = vld [vmem:[#allocation129_spill] sm:$0xff] }
 0x3e9   : > { %v6279_v6 = vadd.f32 %v6215_v43, %v6143_v26  ;;  %v5334_v4 = vadd.f32 %v18118_v42, %v5136_v12  ;;  %v5734_v2 = vadd.f32 %v18120_v13, %v5598_v22  ;;  %v5942_v23 = vmul.f32 %v13029_v50, %v13691_v61 }
 0x3ea   : > { %v13725_v25 = vmul.f32 %v18116_v15, %v13711_v54  ;;  %v5872_v3 = vadd.f32 %v5808_v53, %v18121_v56  ;;  %v5944_v10 = vmul.f32 %v13029_v50, %v18122_v44  ;;  %v6141_v17 = vadd.f32 %v6079_v58, %v6007_v16 }
 0x3eb   : > { %v6354_v62 = vadd.f32 %v13530_v47, %v6279_v6  ;;  %v13734_v43 = vadd.f32 %v5406_v41, %v5334_v4  ;;  %v6078_v26 = vmul.f32 %v18124_v31, %v18111_v46  ;;  %v5870_v12 = vadd.f32 %v5806_v29, %v5734_v2 }
 0x3ec   : > { %18119 = vst [vmem:[#allocation113_spill] sm:$0xff] %v13725_v25  ;;  %v6008_v42 = vadd.f32 %v5944_v10, %v5872_v3  ;;  %v6080_v22 = vmul.f32 %v18124_v31, %v13236_v38  ;;  %v6212_v56 = vmul.f32 %v13516_v11, %v4992_v14  ;;  %v6277_v53 = vadd.f32 %v6213_v8, %v6141_v17  ;;  %v18126_v8 = vld [vmem:[#allocation60_spill] sm:$0xff]  ;;  %v18171_v25 = vld [vmem:[#allocation43_spill] sm:$0xff] }
 0x3ed   : > { %18123 = vst [vmem:[#allocation65_spill] sm:$0xff] %v13734_v43  ;;  %v6418_v13 = vmax.f32 %v6354_v62, 0.0  ;;  %v6214_v44 = vmul.f32 %v13516_v11, %v13711_v54  ;;  %v4623_v58 = vadd.f32 %v12927_v63, %v13552_v27  ;;  %v6006_v41 = vadd.f32 %v5942_v23, %v5870_v12  ;;  %v13758_v27 = vpop.f32.mrb[60].mxu1 }
 0x3ee   : > { %v6142_v16 = vadd.f32 %v6080_v22, %v6008_v42  ;;  %v4624_v46 = vadd.f32 %v12947_v32, %v13559_v19  ;;  %v4625_v3 = vadd.f32 %v12927_v63, %v13564_v40  ;;  %v6352_v38 = vadd.f32 %v13530_v47, %v6277_v53  ;;  %v13764_v40 = vpop.f32.mrb[61].mxu1 }
 0x3ef   : > { %v13750_v29 = vmax.f32 %v4623_v58, 0.0  ;;  %v4626_v17 = vadd.f32 %v12947_v32, %v13575_v45  ;;  %v13756_v14 = vmul.f32 %v18002_v51, %v18126_v8  ;;  %v6140_v6 = vadd.f32 %v6078_v26, %v6006_v41  ;;  %v13772_v12 = vpop.f32.mrb[62].mxu1  ;;  %v18137_v41 = vld [vmem:[#allocation94_spill] sm:$0xff] }
 0x3f0   : > { %v6278_v4 = vadd.f32 %v6214_v44, %v6142_v16  ;;  %v13760_v2 = vmax.f32 %v4624_v46, 0.0  ;;  %v13762_v19 = vmax.f32 %v4625_v3, 0.0  ;;  %v6416_v23 = vmax.f32 %v6352_v38, 0.0  ;;  %v13780_v44 = vpop.f32.mrb[63].mxu1 }
 0x3f1   : > { %18125 = vst [vmem:[#allocation48_spill] sm:$0xff] %v13750_v29  ;;  %v4744_v10 = vrot.slane %v13750_v29, 7  ;;  %v13770_v45 = vmul.f32 %v12931_v28, %v13750_v29  ;;  %v6276_v42 = vadd.f32 %v6212_v56, %v6140_v6  ;;  %v13777_v22 = vmul.f32 %v12941_v33, %v13750_v29 }
 0x3f2   : > { %18127 = vst [vmem:[#allocation115_spill] sm:$0xff] %v13760_v2  ;;  %18128 = vst [vmem:[#allocation69_spill] sm:$0xff] %v13762_v19  ;;  %v6353_v26 = vadd.f32 %v13523_v18, %v6278_v4  ;;  %v4745_v53 = vrot.slane %v13760_v2, 7  ;;  %v6478_v58 = vpack.c.bf16 %v6418_v13, %v6416_v23  ;;  %v13785_v16 = vmul.f32 %v12951_v9, %v13760_v2  ;;  %v18135_v23 = vld [vmem:[#allocation95_spill] sm:$0xff] }
 0x3f3   : > { %18129 = vst [vmem:[#allocation63_spill] sm:$0xff] %v13770_v45  ;;  %18130 = vst [vmem:[#allocation31_spill] sm:$0xff] %v13777_v22  ;;  %v13789_v56 = vmul.f32 %v12955_v20, %v13760_v2  ;;  %v6351_v46 = vadd.f32 %v13523_v18, %v6276_v42  ;;  %v4776_v38 = vrot.slane %v13762_v19, 7  ;;  %v5288_v13 = vmul.f32 %v12931_v28, %v13762_v19  ;;  %v18158_v2 = vld [vmem:[#allocation104_spill] sm:$0xff] }
 0x3f4   : > { %18131 = vst [vmem:[#allocation70_spill] sm:$0xff] %v13785_v16  ;;  %v6417_v3 = vmax.f32 %v6353_v26, 0.0  ;;  %6753 = vmatprep.mubr.bf16.mxu0 %v6478_v58  ;;  %v13798_v6 = vmul.f32 %v12941_v33, %v13762_v19  ;;  %v13800_v4 = vmax.f32 %v4626_v17, 0.0  ;;  %v18136_v62 = vrot.slane %v18135_v23, 1  ;;  %v18154_v16 = vld [vmem:[#allocation34_spill] sm:$0xff] }
 0x3f5   : > { %18132 = vst [vmem:[#allocation134_spill] sm:$0xff] %v13789_v56  ;;  %v18138_v22 = vrot.slane %v18137_v41, 1  ;;  %v6415_v26 = vmax.f32 %v6351_v46, 0.0  ;;  %v13810_v58 = vsel %vm1304_vm4, %v4744_v10, %v4776_v38  ;;  %v13814_v8 = vsel %vm1304_vm4, %v4776_v38, %v4744_v10 }
 0x3f6   : > { %18133 = vst [vmem:[#allocation105_spill] sm:$0xff] %v13798_v6  ;;  %18134 = vst [vmem:[#allocation102_spill] sm:$0xff] %v13800_v4  ;;  %v18142_v17 = vmov %v18136_v62  ;;  %v5154_v45 = vmul.f32 %v12963_v1, %v13810_v58  ;;  %v5289_v38 = vmul.f32 %v12951_v9, %v13800_v4  ;;  %v13834_v29 = vmul.f32 %v12955_v20, %v13800_v4 }
 0x3f7   : > { %v4995_v42 = vsel %vm1505_vm5, %v18138_v22, %v18136_v62  ;;  %18139 = vst [vmem:[#allocation136_spill] sm:$0xff] %v13810_v58  ;;  %18140 = vst [vmem:[#allocation101_spill] sm:$0xff] %v13814_v8  ;;  %v18141_v6 = vmov %v18138_v22  ;;  %v13826_v62 = vmul.f32 %v13011_v49, %v13810_v58  ;;  %v4777_v22 = vrot.slane %v13800_v4, 7  ;;  %v18163_v4 = vld [vmem:[#allocation126_spill] sm:$0xff] }
 0x3f8   : > { %v5027_v56 = vsel %vm1505_vm5, %v18142_v17, %v18141_v6  ;;  %v6477_v10 = vpack.c.bf16 %v6417_v3, %v6415_v26  ;;  %18144 = vst [vmem:[#allocation74_spill] sm:$0xff] %v13834_v29  ;;  %v13839_v17 = vadd.f32 %v5288_v13, %v5154_v45  ;;  %v5141_v3 = vmul.f32 %v13039_v35, %v13756_v14 }
 0x3f9   : > { %18143 = vst [vmem:[#allocation76_spill] sm:$0xff] %v13826_v62  ;;  %v13837_v6 = vmul.f32 %v18003_v48, %v5027_v56  ;;  %v13843_v62 = vsel %vm1304_vm4, %v4745_v53, %v4777_v22  ;;  %v13847_v46 = vsel %vm1304_vm4, %v4777_v22, %v4745_v53  ;;  %v5411_v45 = vmul.f32 %v13044_v7, %v4995_v42  ;;  %v18151_v22 = vld [vmem:[#allocation144_spill] sm:$0xff] }
 0x3fa   : > { %18145 = vst [vmem:[#allocation86_spill] sm:$0xff] %v13839_v17  ;;  %18146 = vst [vmem:[#allocation20_spill] sm:$0xff] %v13843_v62  ;;  %6754 = vmatmul.mubr.bf16.gmra.mrb[68].mxu0 %v6477_v10  ;;  %v5155_v26 = vmul.f32 %v13039_v35, %v13843_v62  ;;  %v13855_v56 = vmul.f32 %v13048_v57, %v13843_v62  ;;  %v18150_v17 = vld [vmem:[#allocation49_spill] sm:$0xff]  ;;  %v5469_v29 = vadd.f32 %v13495_v60, %v18151_v22  ;;  %v18156_v60 = vld [vmem:[#allocation111_spill] sm:$0xff] }
 0x3fb   : > { %18147 = vst [vmem:[#allocation59_spill] sm:$0xff] %v13847_v46  ;;  %v13860_v13 = vmul.f32 %v13044_v7, %v13837_v6  ;;  %v5339_v53 = vadd.f32 %v18150_v17, %v5141_v3  ;;  %v5539_v10 = vmul.f32 %v13048_v57, %v13600_v5  ;;  %v5813_v58 = vmul.f32 %v13052_v37, %v13654_v30  ;;  %v18157_v62 = vld [vmem:[#allocation25_spill] sm:$0xff] }
 0x3fc   : > { %18148 = vst [vmem:[#allocation72_spill] sm:$0xff] %v13855_v56  ;;  %v13869_v19 = vadd.f32 %v5289_v38, %v5155_v26  ;;  %v13872_v56 = vmul.f32 %v13052_v37, %v4995_v42  ;;  %v5947_v8 = vmul.f32 %v13091_v21, %v13756_v14  ;;  %v5949_v17 = vmul.f32 %v13091_v21, %v18154_v16 }
 0x3fd   : > { %18149 = vst [vmem:[#allocation91_spill] sm:$0xff] %v13860_v13  ;;  %v13878_v3 = vadd.f32 %v5411_v45, %v5339_v53  ;;  %v5603_v22 = vadd.f32 %v5539_v10, %v18156_v60  ;;  %v5605_v5 = vadd.f32 %v18157_v62, %v5469_v29  ;;  %v6083_v30 = vmul.f32 %v13510_v59, %v18137_v41  ;;  %v18159_v45 = vld [vmem:[#allocation98_spill] sm:$0xff]  ;;  %v18160_v10 = vld [vmem:[#allocation35_spill] sm:$0xff]  ;;  %v18161_v29 = vld [vmem:[#allocation88_spill] sm:$0xff] }
 0x3fe   : > { %18152 = vst [vmem:[#allocation96_spill] sm:$0xff] %v13869_v19  ;;  %18153 = vst [vmem:[#allocation84_spill] sm:$0xff] %v13872_v56  ;;  %v6085_v38 = vmul.f32 %v13510_v59, %v18135_v23  ;;  %v6217_v26 = vmul.f32 %v13481_v34, %v4995_v42  ;;  %v6219_v19 = vmul.f32 %v13481_v34, %v13837_v6  ;;  %v18162_v62 = vrot.slane %v18161_v29, 1 }
 0x3ff   : > { %18155 = vst [vmem:[#allocation71_spill] sm:$0xff] %v13878_v3  ;;  %v13891_v16 = vmul.f32 %v18002_v51, %v18158_v2  ;;  %v5739_v53 = vadd.f32 %v18159_v45, %v5603_v22  ;;  %v5741_v60 = vadd.f32 %v18160_v10, %v5605_v5  ;;  %v18164_v41 = vrot.slane %v18163_v4, 1  ;;  %v18167_v5 = vld [vmem:[#allocation137_spill] sm:$0xff]  ;;  %v18168_v45 = vld [vmem:[#allocation139_spill] sm:$0xff] }
 0x400   : > { %v18166_v46 = vmov %v18162_v62  ;;  %v5330_v10 = vadd.f32 %v18168_v45, %v18167_v5  ;;  %v5538_v43 = vmul.f32 %v13011_v49, %v13691_v61 }
 0x401   : > { %v4994_v23 = vsel %vm1505_vm5, %v18164_v41, %v18162_v62  ;;  %v18165_v42 = vmov %v18164_v41  ;;  %v5140_v22 = vmul.f32 %v12963_v1, %v13891_v16  ;;  %v5875_v62 = vadd.f32 %v13670_v24, %v5739_v53 }
 0x402   : > { %v5026_v3 = vsel %vm1505_vm5, %v18166_v46, %v18165_v42  ;;  %v5410_v13 = vmul.f32 %v18116_v15, %v4994_v23  ;;  %v5877_v41 = vadd.f32 %v5813_v58, %v5741_v60  ;;  %v5812_v46 = vmul.f32 %v18115_v55, %v13711_v54  ;;  %v18169_v42 = vld [vmem:[#allocation75_spill] sm:$0xff]  ;;  %v18172_v58 = vld [vmem:[#allocation32_spill] sm:$0xff] }
 0x403   : > { %v13908_v2 = vmul.f32 %v18003_v48, %v5026_v3  ;;  %v5338_v3 = vadd.f32 %v18169_v42, %v5140_v22  ;;  %v5466_v34 = vadd.f32 %v18171_v25, %v5330_v10  ;;  %v13927_v5 = vmul.f32 %v18115_v55, %v4994_v23  ;;  %v18174_v22 = vld [vmem:[#allocation26_spill] sm:$0xff] }
 0x404   : > { %v6011_v45 = vadd.f32 %v5947_v8, %v5875_v62  ;;  %v6013_v24 = vadd.f32 %v5949_v17, %v5877_v41  ;;  %v5876_v53 = vadd.f32 %v5812_v46, %v18172_v58  ;;  %v5946_v61 = vmul.f32 %v13029_v50, %v13891_v16  ;;  %v13941_v62 = vpop.f32.mrb[64].mxu1  ;;  %v18175_v41 = vld [vmem:[#allocation30_spill] sm:$0xff] }
 0x405   : > { %v13923_v56 = vmul.f32 %v18116_v15, %v13908_v2  ;;  %v13932_v60 = vadd.f32 %v5410_v13, %v5338_v3  ;;  %v5602_v54 = vadd.f32 %v5538_v43, %v5466_v34  ;;  %v5948_v42 = vmul.f32 %v13029_v50, %v18174_v22  ;;  %v13948_v3 = vpop.f32.mrb[65].mxu1 }
 0x406   : > { %v6145_v25 = vadd.f32 %v6083_v30, %v6011_v45  ;;  %v6147_v10 = vadd.f32 %v6085_v38, %v6013_v24  ;;  %v6084_v8 = vmul.f32 %v18124_v31, %v18161_v29  ;;  %v6216_v17 = vmul.f32 %v13516_v11, %v4994_v23  ;;  %v13954_v23 = vpop.f32.mrb[66].mxu1 }
 0x407   : > { %18170 = vst [vmem:[#allocation64_spill] sm:$0xff] %v13923_v56  ;;  %18173 = vst [vmem:[#allocation81_spill] sm:$0xff] %v13932_v60  ;;  %v6082_v56 = vmul.f32 %v18124_v31, %v18163_v4  ;;  %v5738_v46 = vadd.f32 %v18175_v41, %v5602_v54  ;;  %v6012_v13 = vadd.f32 %v5948_v42, %v5876_v53  ;;  %v13961_v53 = vpop.f32.mrb[67].mxu1  ;;  %v18191_v42 = vld [vmem:[#allocation33_spill] sm:$0xff] }
 0x408   : > { %v6218_v34 = vmul.f32 %v13516_v11, %v13908_v2  ;;  %v4627_v43 = vadd.f32 %v12927_v63, %v13758_v27  ;;  %v6281_v4 = vadd.f32 %v6217_v26, %v6145_v25  ;;  %v6283_v30 = vadd.f32 %v6219_v19, %v6147_v10 }
 0x409   : > { %v4628_v38 = vadd.f32 %v12947_v32, %v13764_v40  ;;  %v4629_v29 = vadd.f32 %v12927_v63, %v13772_v12  ;;  %v5874_v45 = vadd.f32 %v13720_v52, %v5738_v46  ;;  %v6146_v24 = vadd.f32 %v6084_v8, %v6012_v13  ;;  %v18193_v13 = vld [vmem:[#allocation23_spill] sm:$0xff] }
 0x40a   : > { %v13957_v58 = vmax.f32 %v4627_v43, 0.0  ;;  %v4630_v27 = vadd.f32 %v12947_v32, %v13780_v44  ;;  %v6356_v19 = vadd.f32 %v13530_v47, %v6281_v4  ;;  %v6358_v26 = vadd.f32 %v13530_v47, %v6283_v30 }
 0x40b   : > { %v13965_v40 = vmax.f32 %v4628_v38, 0.0  ;;  %v13967_v54 = vmax.f32 %v4629_v29, 0.0  ;;  %v6010_v12 = vadd.f32 %v5946_v61, %v5874_v45  ;;  %v6282_v22 = vadd.f32 %v6218_v34, %v6146_v24 }
 0x40c   : > { %18176 = vst [vmem:[#allocation109_spill] sm:$0xff] %v13957_v58  ;;  %v4746_v52 = vrot.slane %v13957_v58, 7  ;;  %v6420_v25 = vmax.f32 %v6356_v19, 0.0  ;;  %v6422_v10 = vmax.f32 %v6358_v26, 0.0  ;;  %v13973_v44 = vmul.f32 %v12931_v28, %v13957_v58 }
 0x40d   : > { %18177 = vst [vmem:[#allocation122_spill] sm:$0xff] %v13965_v40  ;;  %18178 = vst [vmem:[#allocation120_spill] sm:$0xff] %v13967_v54  ;;  %v13977_v8 = vmul.f32 %v12941_v33, %v13957_v58  ;;  %v6144_v41 = vadd.f32 %v6082_v56, %v6010_v12  ;;  %v6357_v46 = vadd.f32 %v13523_v18, %v6282_v22  ;;  %v4747_v61 = vrot.slane %v13965_v40, 7  ;;  %v18207_v58 = vld [vmem:[#allocation55_spill] sm:$0xff] }
 0x40e   : > { %18179 = vst [vmem:[#allocation42_spill] sm:$0xff] %v13973_v44  ;;  %v6480_v34 = vpack.c.bf16 %v6422_v10, %v6420_v25  ;;  %v13984_v43 = vmul.f32 %v12951_v9, %v13965_v40  ;;  %v13988_v4 = vmul.f32 %v12955_v20, %v13965_v40  ;;  %v4778_v30 = vrot.slane %v13967_v54, 7  ;;  %v18188_v10 = vld [vmem:[#allocation80_spill] sm:$0xff] }
 0x40f   : > { %18180 = vst [vmem:[#allocation135_spill] sm:$0xff] %v13977_v8  ;;  %v6280_v38 = vadd.f32 %v6216_v17, %v6144_v41  ;;  %v6421_v29 = vmax.f32 %v6357_v46, 0.0  ;;  %v5292_v45 = vmul.f32 %v12931_v28, %v13967_v54  ;;  %v14004_v26 = vmul.f32 %v12941_v33, %v13967_v54  ;;  %v18210_v54 = vld [vmem:[#allocation68_spill] sm:$0xff] }
 0x410   : > { %18181 = vst [vmem:[#allocation127_spill] sm:$0xff] %v13984_v43  ;;  %18182 = vst [vmem:[#allocation37_spill] sm:$0xff] %v13988_v4  ;;  %6763 = vmatprep.mubr.bf16.mxu0 %v6480_v34  ;;  %v13996_v24 = vsel %vm1304_vm4, %v4746_v52, %v4778_v30  ;;  %v14000_v19 = vsel %vm1304_vm4, %v4778_v30, %v4746_v52  ;;  %v14006_v17 = vmax.f32 %v4630_v27, 0.0  ;;  %v18192_v56 = vrot.slane %v18191_v42, 1  ;;  %v18220_v40 = vld [vmem:[#allocation84_spill] sm:$0xff] }
 0x411   : > { %18183 = vst [vmem:[#allocation110_spill] sm:$0xff] %v13996_v24  ;;  %18184 = vst [vmem:[#allocation124_spill] sm:$0xff] %v14000_v19  ;;  %v6355_v12 = vadd.f32 %v13523_v18, %v6280_v38  ;;  %v5158_v22 = vmul.f32 %v12963_v1, %v13996_v24  ;;  %v14013_v25 = vmul.f32 %v13011_v49, %v13996_v24  ;;  %v18194_v8 = vrot.slane %v18193_v13, 1  ;;  %v18214_v19 = vld [vmem:[#allocation39_spill] sm:$0xff] }
 0x412   : > { %18185 = vst [vmem:[#allocation143_spill] sm:$0xff] %v14004_v26  ;;  %18186 = vst [vmem:[#allocation14_spill] sm:$0xff] %v14006_v17  ;;  %v14017_v41 = vmul.f32 %v18002_v51, %v18188_v10  ;;  %v4779_v52 = vrot.slane %v14006_v17, 7  ;;  %v5293_v27 = vmul.f32 %v12951_v9, %v14006_v17  ;;  %v14025_v34 = vmul.f32 %v12955_v20, %v14006_v17 }
 0x413   : > { %18187 = vst [vmem:[#allocation21_spill] sm:$0xff] %v14013_v25  ;;  %v6419_v30 = vmax.f32 %v6355_v12, 0.0  ;;  %v14027_v38 = vadd.f32 %v5292_v45, %v5158_v22  ;;  %v4997_v10 = vsel %vm1505_vm5, %v18194_v8, %v18192_v56  ;;  %v18195_v26 = vmov %v18194_v8 }
 0x414   : > { %18189 = vst [vmem:[#allocation114_spill] sm:$0xff] %v14025_v34  ;;  %v18196_v46 = vmov %v18192_v56  ;;  %v14043_v4 = vsel %vm1304_vm4, %v4747_v61, %v4779_v52  ;;  %v14047_v45 = vsel %vm1304_vm4, %v4779_v52, %v4747_v61  ;;  %v5145_v8 = vmul.f32 %v13039_v35, %v14017_v41 }
 0x415   : > { %18190 = vst [vmem:[#allocation67_spill] sm:$0xff] %v14027_v38  ;;  %v5029_v25 = vsel %vm1505_vm5, %v18196_v46, %v18195_v26  ;;  %18197 = vst [vmem:[#allocation9_spill] sm:$0xff] %v14043_v4  ;;  %v6479_v56 = vpack.c.bf16 %v6421_v29, %v6419_v30  ;;  %v5159_v22 = vmul.f32 %v13039_v35, %v14043_v4  ;;  %v18200_v38 = vld [vmem:[#allocation41_spill] sm:$0xff] }
 0x416   : > { %18198 = vst [vmem:[#allocation12_spill] sm:$0xff] %v14047_v45  ;;  %v14050_v12 = vmul.f32 %v18003_v48, %v5029_v25  ;;  %v14058_v26 = vmul.f32 %v13048_v57, %v14043_v4  ;;  %v5415_v46 = vmul.f32 %v13044_v7, %v4997_v10  ;;  %v5343_v34 = vadd.f32 %v18200_v38, %v5145_v8  ;;  %v18202_v25 = vld [vmem:[#allocation142_spill] sm:$0xff] }
 0x417   : > { %v5473_v52 = vadd.f32 %v13667_v0, %v18202_v25  ;;  %v5543_v29 = vmul.f32 %v13048_v57, %v13756_v14  ;;  %6764 = vmatmul.mubr.bf16.gmra.mrb[72].mxu0 %v6479_v56  ;;  %v14070_v30 = vadd.f32 %v5293_v27, %v5159_v22  ;;  %v14075_v24 = vmul.f32 %v13052_v37, %v4997_v10  ;;  %v18206_v0 = vld [vmem:[#allocation85_spill] sm:$0xff]  ;;  %v18208_v56 = vld [vmem:[#allocation82_spill] sm:$0xff] }
 0x418   : > { %18199 = vst [vmem:[#allocation10_spill] sm:$0xff] %v14058_v26  ;;  %v14064_v61 = vmul.f32 %v13044_v7, %v14050_v12  ;;  %v5817_v26 = vmul.f32 %v13052_v37, %v13837_v6  ;;  %v5951_v38 = vmul.f32 %v13091_v21, %v14017_v41  ;;  %v14079_v8 = vadd.f32 %v5415_v46, %v5343_v34  ;;  %v18209_v34 = vld [vmem:[#allocation138_spill] sm:$0xff] }
 0x419   : > { %18203 = vst [vmem:[#allocation17_spill] sm:$0xff] %v14070_v30  ;;  %18204 = vst [vmem:[#allocation18_spill] sm:$0xff] %v14075_v24  ;;  %v5607_v44 = vadd.f32 %v5543_v29, %v13686_v39  ;;  %v5609_v25 = vadd.f32 %v18206_v0, %v5473_v52  ;;  %v5953_v14 = vmul.f32 %v13091_v21, %v18207_v58  ;;  %v18211_v29 = vld [vmem:[#allocation99_spill] sm:$0xff]  ;;  %v18212_v58 = vld [vmem:[#allocation29_spill] sm:$0xff] }
 0x41a   : > { %18201 = vst [vmem:[#allocation16_spill] sm:$0xff] %v14064_v61  ;;  %18205 = vst [vmem:[#allocation131_spill] sm:$0xff] %v14079_v8  ;;  %v6087_v27 = vmul.f32 %v13510_v59, %v18193_v13  ;;  %v6089_v6 = vmul.f32 %v13510_v59, %v18191_v42  ;;  %v6221_v22 = vmul.f32 %v18208_v56, %v4997_v10  ;;  %v18213_v0 = vrot.slane %v18212_v58, 1  ;;  %v18221_v8 = vld [vmem:[#allocation65_spill] sm:$0xff]  ;;  %v18225_v24 = vld [vmem:[#allocation66_spill] sm:$0xff] }
 0x41b   : > { %v6223_v30 = vmul.f32 %v18208_v56, %v14050_v12  ;;  %v5743_v46 = vadd.f32 %v18209_v34, %v5607_v44  ;;  %v5745_v39 = vadd.f32 %v18210_v54, %v5609_v25  ;;  %v14096_v52 = vmul.f32 %v18002_v51, %v18211_v29  ;;  %v18218_v25 = vld [vmem:[#allocation54_spill] sm:$0xff]  ;;  %v18219_v34 = vld [vmem:[#allocation113_spill] sm:$0xff] }
 0x41c   : > { %v18215_v13 = vrot.slane %v18214_v19, 1  ;;  %v18217_v4 = vmov %v18213_v0  ;;  %v5472_v29 = vadd.f32 %v18219_v34, %v18218_v25  ;;  %v5542_v43 = vmul.f32 %v13011_v49, %v13891_v16 }
 0x41d   : > { %v5879_v17 = vadd.f32 %v18220_v40, %v5743_v46  ;;  %v5881_v45 = vadd.f32 %v5817_v26, %v5745_v39  ;;  %v5816_v60 = vmul.f32 %v18115_v55, %v13908_v2  ;;  %v18223_v40 = vld [vmem:[#allocation133_spill] sm:$0xff] }
 0x41e   : > { %v4996_v42 = vsel %vm1505_vm5, %v18215_v13, %v18213_v0  ;;  %v18216_v10 = vmov %v18215_v13  ;;  %v5144_v13 = vmul.f32 %v12963_v1, %v14096_v52  ;;  %v5606_v61 = vadd.f32 %v5542_v43, %v18221_v8  ;;  %v18224_v39 = vld [vmem:[#allocation53_spill] sm:$0xff] }
 0x41f   : > { %v5028_v44 = vsel %vm1505_vm5, %v18217_v4, %v18216_v10  ;;  %v5414_v54 = vmul.f32 %v18116_v15, %v4996_v42  ;;  %v18222_v4 = vld [vmem:[#allocation27_spill] sm:$0xff]  ;;  %v14126_v25 = vmul.f32 %v18115_v55, %v4996_v42  ;;  %v6015_v16 = vadd.f32 %v5951_v38, %v5879_v17 }
 0x420   : > { %v14117_v0 = vmul.f32 %v18003_v48, %v5028_v44  ;;  %v5608_v10 = vadd.f32 %v18222_v4, %v5472_v29  ;;  %v6017_v34 = vadd.f32 %v5953_v14, %v5881_v45  ;;  %v5342_v26 = vadd.f32 %v18223_v40, %v5144_v13  ;;  %v18226_v29 = vld [vmem:[#allocation77_spill] sm:$0xff]  ;;  %v14139_v4 = vpop.f32.mrb[68].mxu1 }
 0x421   : > { %v5742_v44 = vadd.f32 %v18224_v39, %v5606_v61  ;;  %v5950_v8 = vmul.f32 %v13029_v50, %v14096_v52  ;;  %v5952_v2 = vmul.f32 %v13029_v50, %v18226_v29  ;;  %v6149_v17 = vadd.f32 %v6087_v27, %v6015_v16  ;;  %v14145_v13 = vpop.f32.mrb[69].mxu1 }
 0x422   : > { %v14131_v46 = vmul.f32 %v18116_v15, %v14117_v0  ;;  %v5744_v43 = vadd.f32 %v18225_v24, %v5608_v10  ;;  %v6151_v45 = vadd.f32 %v6089_v6, %v6017_v34  ;;  %v14141_v38 = vadd.f32 %v5414_v54, %v5342_v26  ;;  %v14151_v39 = vpop.f32.mrb[70].mxu1 }
 0x423   : > { %v6086_v14 = vmul.f32 %v18124_v31, %v18214_v19  ;;  %v5878_v61 = vadd.f32 %v13927_v5, %v5742_v44  ;;  %v6088_v10 = vmul.f32 %v18124_v31, %v18212_v58  ;;  %v6220_v40 = vmul.f32 %v13516_v11, %v4996_v42  ;;  %v14157_v54 = vpop.f32.mrb[71].mxu1 }
 0x424   : > { %18227 = vst [vmem:[#allocation19_spill] sm:$0xff] %v14141_v38  ;;  %v5880_v24 = vadd.f32 %v5816_v60, %v5744_v43  ;;  %v6285_v29 = vadd.f32 %v6221_v22, %v6149_v17  ;;  %v6287_v27 = vadd.f32 %v6223_v30, %v6151_v45  ;;  %v6222_v6 = vmul.f32 %v13516_v11, %v14117_v0  ;;  %v18277_v38 = vld [vmem:[#allocation112_spill] sm:$0xff] }
 0x425   : > { %v4631_v19 = vadd.f32 %v12927_v63, %v13941_v62  ;;  %v6014_v16 = vadd.f32 %v5950_v8, %v5878_v61  ;;  %v4632_v60 = vadd.f32 %v12947_v32, %v13948_v3  ;;  %v4633_v58 = vadd.f32 %v12927_v63, %v13954_v23 }
 0x426   : > { %v6016_v5 = vadd.f32 %v5952_v2, %v5880_v24  ;;  %v6360_v42 = vadd.f32 %v13530_v47, %v6285_v29  ;;  %v6362_v30 = vadd.f32 %v13530_v47, %v6287_v27  ;;  %v4634_v34 = vadd.f32 %v12947_v32, %v13961_v53 }
 0x427   : > { %v14165_v22 = vmax.f32 %v4631_v19, 0.0  ;;  %v6148_v62 = vadd.f32 %v6086_v14, %v6014_v16  ;;  %v14169_v44 = vmax.f32 %v4632_v60, 0.0  ;;  %v14171_v43 = vmax.f32 %v4633_v58, 0.0 }
 0x428   : > { %v6150_v26 = vadd.f32 %v6088_v10, %v6016_v5  ;;  %v6424_v8 = vmax.f32 %v6360_v42, 0.0  ;;  %v6426_v3 = vmax.f32 %v6362_v30, 0.0  ;;  %v14203_v58 = vmax.f32 %v4634_v34, 0.0  ;;  %v18247_v10 = vld [vmem:[#allocation40_spill] sm:$0xff] }
 0x429   : > { %18228 = vst [vmem:[#allocation15_spill] sm:$0xff] %v14165_v22  ;;  %18229 = vst [vmem:[#allocation140_spill] sm:$0xff] %v14169_v44  ;;  %v4748_v2 = vrot.slane %v14165_v22, 7  ;;  %v6284_v17 = vadd.f32 %v6220_v40, %v6148_v62  ;;  %v14177_v61 = vmul.f32 %v12931_v28, %v14165_v22  ;;  %v14181_v53 = vmul.f32 %v12941_v33, %v14165_v22 }
 0x42a   : > { %18230 = vst [vmem:[#allocation89_spill] sm:$0xff] %v14171_v43  ;;  %v6286_v45 = vadd.f32 %v6222_v6, %v6150_v26  ;;  %v6482_v14 = vpack.c.bf16 %v6426_v3, %v6424_v8  ;;  %v4749_v24 = vrot.slane %v14169_v44, 7  ;;  %v14187_v29 = vmul.f32 %v12951_v9, %v14169_v44  ;;  %18236 = vst [vmem:[#allocation125_spill] sm:$0xff] %v14203_v58 }
 0x42b   : > { %18231 = vst [vmem:[#allocation121_spill] sm:$0xff] %v14177_v61  ;;  %18232 = vst [vmem:[#allocation97_spill] sm:$0xff] %v14181_v53  ;;  %v6359_v40 = vadd.f32 %v13523_v18, %v6284_v17  ;;  %v14193_v6 = vmul.f32 %v12955_v20, %v14169_v44  ;;  %v4780_v19 = vrot.slane %v14171_v43, 7  ;;  %v5296_v5 = vmul.f32 %v12931_v28, %v14171_v43  ;;  %v18257_v61 = vld [vmem:[#allocation71_spill] sm:$0xff] }
 0x42c   : > { %18233 = vst [vmem:[#allocation123_spill] sm:$0xff] %v14187_v29  ;;  %v6361_v27 = vadd.f32 %v13523_v18, %v6286_v45  ;;  %6773 = vmatprep.mubr.bf16.mxu0 %v6482_v14  ;;  %v14201_v60 = vmul.f32 %v12941_v33, %v14171_v43  ;;  %v4781_v34 = vrot.slane %v14203_v58, 7  ;;  %v5297_v14 = vmul.f32 %v12951_v9, %v14203_v58  ;;  %v18266_v29 = vld [vmem:[#allocation78_spill] sm:$0xff] }
 0x42d   : > { %18234 = vst [vmem:[#allocation130_spill] sm:$0xff] %v14193_v6  ;;  %v6423_v42 = vmax.f32 %v6359_v40, 0.0  ;;  %v14207_v62 = vsel %vm1304_vm4, %v4748_v2, %v4780_v19  ;;  %v14211_v26 = vsel %vm1304_vm4, %v4780_v19, %v4748_v2  ;;  %v14225_v40 = vmul.f32 %v12955_v20, %v14203_v58  ;;  %v18241_v2 = vld [vmem:[#allocation51_spill] sm:$0xff] }
 0x42e   : > { %18235 = vst [vmem:[#allocation103_spill] sm:$0xff] %v14201_v60  ;;  %v6425_v30 = vmax.f32 %v6361_v27, 0.0  ;;  %18237 = vst [vmem:[#allocation28_spill] sm:$0xff] %v14207_v62  ;;  %v5162_v8 = vmul.f32 %v12963_v1, %v14207_v62  ;;  %v14217_v3 = vmul.f32 %v13011_v49, %v14207_v62  ;;  %v14229_v27 = vmul.f32 %v18002_v51, %v18241_v2  ;;  %v18253_v60 = vld [vmem:[#allocation91_spill] sm:$0xff] }
 0x42f   : > { %18238 = vst [vmem:[#allocation132_spill] sm:$0xff] %v14211_v26  ;;  %18240 = vst [vmem:[#allocation38_spill] sm:$0xff] %v14225_v40  ;;  %v14235_v23 = vsel %vm1304_vm4, %v4749_v24, %v4781_v34  ;;  %v18248_v17 = vrot.slane %v18247_v10, 1  ;;  %v5547_v40 = vmul.f32 %v13048_v57, %v14017_v41  ;;  %v18262_v26 = vld [vmem:[#allocation50_spill] sm:$0xff] }
 0x430   : > { %18239 = vst [vmem:[#allocation128_spill] sm:$0xff] %v14217_v3  ;;  %v6481_v45 = vpack.c.bf16 %v6425_v30, %v6423_v42  ;;  %v14231_v19 = vadd.f32 %v5296_v5, %v5162_v8  ;;  %18243 = vst [vmem:[#allocation119_spill] sm:$0xff] %v14235_v23  ;;  %v14239_v42 = vsel %vm1304_vm4, %v4781_v34, %v4749_v24  ;;  %v18245_v30 = vld [vmem:[#allocation56_spill] sm:$0xff] }
 0x431   : > { %18244 = vst [vmem:[#allocation108_spill] sm:$0xff] %v14239_v42  ;;  %v18246_v16 = vrot.slane %v18245_v30, 1  ;;  %v5163_v5 = vmul.f32 %v13039_v35, %v14235_v23  ;;  %v14251_v8 = vmul.f32 %v13048_v57, %v14235_v23  ;;  %v18250_v2 = vmov %v18248_v17  ;;  %v18272_v23 = vld [vmem:[#allocation18_spill] sm:$0xff] }
 0x432   : > { %18242 = vst [vmem:[#allocation87_spill] sm:$0xff] %v14231_v19  ;;  %6774 = vmatmul.mubr.bf16.gmra.mrb[76].mxu0 %v6481_v45  ;;  %v5149_v19 = vmul.f32 %v13039_v35, %v14229_v27  ;;  %v18252_v45 = vld [vmem:[#allocation61_spill] sm:$0xff]  ;;  %v5611_v22 = vadd.f32 %v5547_v40, %v18257_v61  ;;  %v5955_v41 = vmul.f32 %v13091_v21, %v14229_v27 }
 0x433   : > { %v4999_v53 = vsel %vm1505_vm5, %v18248_v17, %v18246_v16  ;;  %18249 = vst [vmem:[#allocation93_spill] sm:$0xff] %v14251_v8  ;;  %v18251_v24 = vmov %v18246_v16  ;;  %v5477_v3 = vadd.f32 %v18253_v60, %v18252_v45  ;;  %v14269_v6 = vadd.f32 %v5297_v14, %v5163_v5  ;;  %v18255_v8 = vld [vmem:[#allocation45_spill] sm:$0xff]  ;;  %v18258_v60 = vld [vmem:[#allocation79_spill] sm:$0xff] }
 0x434   : > { %v5031_v34 = vsel %vm1505_vm5, %v18251_v24, %v18250_v2  ;;  %v5419_v17 = vmul.f32 %v13044_v7, %v4999_v53  ;;  %v5347_v62 = vadd.f32 %v18255_v8, %v5149_v19  ;;  %v5821_v2 = vmul.f32 %v13052_v37, %v14050_v12  ;;  %v18260_v19 = vld [vmem:[#allocation83_spill] sm:$0xff] }
 0x435   : > { %v14262_v16 = vmul.f32 %v18003_v48, %v5031_v34  ;;  %18254 = vst [vmem:[#allocation22_spill] sm:$0xff] %v14269_v6  ;;  %v14275_v24 = vmul.f32 %v13052_v37, %v4999_v53  ;;  %v5613_v45 = vadd.f32 %v18258_v60, %v5477_v3  ;;  %v5957_v5 = vmul.f32 %v13091_v21, %v18260_v19  ;;  %v18261_v6 = vld [vmem:[#allocation57_spill] sm:$0xff]  ;;  %v18264_v60 = vld [vmem:[#allocation106_spill] sm:$0xff] }
 0x436   : > { %v14285_v14 = vadd.f32 %v5419_v17, %v5347_v62  ;;  %v6091_v12 = vmul.f32 %v13510_v59, %v18247_v10  ;;  %v6093_v8 = vmul.f32 %v13510_v59, %v18245_v30  ;;  %v5747_v43 = vadd.f32 %v18261_v6, %v5611_v22  ;;  %v18263_v62 = vld [vmem:[#allocation107_spill] sm:$0xff] }
 0x437   : > { %v14279_v34 = vmul.f32 %v13044_v7, %v14262_v16  ;;  %v5749_v61 = vadd.f32 %v18262_v26, %v5613_v45  ;;  %v6225_v3 = vmul.f32 %v18208_v56, %v4999_v53  ;;  %v6227_v40 = vmul.f32 %v18208_v56, %v14262_v16  ;;  %v18270_v26 = vld [vmem:[#allocation141_spill] sm:$0xff]  ;;  %v18271_v56 = vld [vmem:[#allocation64_spill] sm:$0xff] }
 0x438   : > { %18259 = vst [vmem:[#allocation129_spill] sm:$0xff] %v14285_v14  ;;  %v14300_v17 = vmul.f32 %v18002_v51, %v18263_v62  ;;  %v18265_v19 = vrot.slane %v18264_v60, 1  ;;  %v18267_v10 = vrot.slane %v18266_v29, 1  ;;  %v5476_v45 = vadd.f32 %v18271_v56, %v18270_v26  ;;  %v18273_v14 = vld [vmem:[#allocation24_spill] sm:$0xff] }
 0x439   : > { %18256 = vst [vmem:[#allocation46_spill] sm:$0xff] %v14279_v34  ;;  %v5883_v62 = vadd.f32 %v18272_v23, %v5747_v43  ;;  %v5885_v44 = vadd.f32 %v5821_v2, %v5749_v61  ;;  %v18275_v2 = vld [vmem:[#allocation62_spill] sm:$0xff] }
 0x43a   : > { %v4998_v30 = vsel %vm1505_vm5, %v18267_v10, %v18265_v19  ;;  %v18268_v22 = vmov %v18267_v10  ;;  %v18269_v6 = vmov %v18265_v19  ;;  %v5148_v19 = vmul.f32 %v12963_v1, %v14300_v17 }
 0x43b   : > { %v5030_v53 = vsel %vm1505_vm5, %v18269_v6, %v18268_v22  ;;  %v5418_v42 = vmul.f32 %v18116_v15, %v4998_v30  ;;  %v5546_v10 = vmul.f32 %v13011_v49, %v14096_v52  ;;  %v5612_v34 = vadd.f32 %v18273_v14, %v5476_v45  ;;  %v14340_v45 = vpop.f32.mrb[72].mxu1 }
 0x43c   : > { %v14318_v58 = vmul.f32 %v18003_v48, %v5030_v53  ;;  %v5820_v22 = vmul.f32 %v18115_v55, %v14117_v0  ;;  %v6019_v6 = vadd.f32 %v5955_v41, %v5883_v62  ;;  %v6021_v26 = vadd.f32 %v5957_v5, %v5885_v44  ;;  %v18276_v53 = vld [vmem:[#allocation81_spill] sm:$0xff]  ;;  %v18278_v41 = vld [vmem:[#allocation116_spill] sm:$0xff] }
 0x43d   : > { %v14333_v23 = vmul.f32 %v18115_v55, %v4998_v30  ;;  %v5346_v61 = vadd.f32 %v18275_v2, %v5148_v19  ;;  %v5610_v56 = vadd.f32 %v5546_v10, %v18276_v53  ;;  %v5748_v52 = vadd.f32 %v18277_v38, %v5612_v34  ;;  %v18279_v10 = vld [vmem:[#allocation118_spill] sm:$0xff] }
 0x43e   : > { %v14330_v43 = vmul.f32 %v18116_v15, %v14318_v58  ;;  %v5954_v14 = vmul.f32 %v13029_v50, %v14300_v17  ;;  %v6153_v0 = vadd.f32 %v6091_v12, %v6019_v6  ;;  %v6155_v44 = vadd.f32 %v6093_v8, %v6021_v26 }
 0x43f   : > { %v5956_v5 = vmul.f32 %v13029_v50, %v18278_v41  ;;  %v6090_v62 = vmul.f32 %v18124_v31, %v18266_v29  ;;  %v14348_v19 = vadd.f32 %v5418_v42, %v5346_v61  ;;  %v5746_v2 = vadd.f32 %v18279_v10, %v5610_v56 }
 0x440   : > { %18274 = vst [vmem:[#allocation60_spill] sm:$0xff] %v14330_v43  ;;  %v14346_v43 = vpop.f32.mrb[73].mxu1  ;;  %v5884_v38 = vadd.f32 %v5820_v22, %v5748_v52  ;;  %v6092_v34 = vmul.f32 %v18124_v31, %v18264_v60  ;;  %v6289_v12 = vadd.f32 %v6225_v3, %v6153_v0  ;;  %v6291_v8 = vadd.f32 %v6227_v40, %v6155_v44 }
 0x441   : > { %v14353_v53 = vpop.f32.mrb[74].mxu1  ;;  %v6224_v6 = vmul.f32 %v13516_v11, %v4998_v30  ;;  %v6226_v26 = vmul.f32 %v13516_v11, %v14318_v58  ;;  %v5882_v42 = vadd.f32 %v14126_v25, %v5746_v2  ;;  %v4635_v22 = vadd.f32 %v12927_v63, %v14139_v4 }
 0x442   : > { %v14358_v29 = vpop.f32.mrb[75].mxu1  ;;  %v6020_v61 = vadd.f32 %v5956_v5, %v5884_v38  ;;  %v4636_v60 = vadd.f32 %v12947_v32, %v14145_v13  ;;  %v6364_v56 = vadd.f32 %v13530_v47, %v6289_v12  ;;  %v6366_v3 = vadd.f32 %v13530_v47, %v6291_v8 }
 0x443   : > { %v4637_v40 = vadd.f32 %v12927_v63, %v14151_v39  ;;  %v4638_v11 = vadd.f32 %v12947_v32, %v14157_v54  ;;  %v6018_v30 = vadd.f32 %v5954_v14, %v5882_v42  ;;  %v14371_v25 = vmax.f32 %v4635_v22, 0.0  ;;  %v14390_v12 = vpop.f32.mrb[76].mxu1 }
 0x444   : > { %v6154_v52 = vadd.f32 %v6092_v34, %v6020_v61  ;;  %v14373_v0 = vmax.f32 %v4636_v60, 0.0  ;;  %v6428_v4 = vmax.f32 %v6364_v56, 0.0  ;;  %v6430_v44 = vmax.f32 %v6366_v3, 0.0  ;;  %18286 = vst [vmem:[#allocation25_spill] sm:$0xff] %v14390_v12  ;;  %v14398_v61 = vpop.f32.mrb[77].mxu1 }
 0x445   : > { %18280 = vst [vmem:[#allocation95_spill] sm:$0xff] %v14371_v25  ;;  %v14375_v41 = vmax.f32 %v4637_v40, 0.0  ;;  %v14377_v13 = vmax.f32 %v4638_v11, 0.0  ;;  %v6152_v5 = vadd.f32 %v6090_v62, %v6018_v30  ;;  %v4750_v2 = vrot.slane %v14371_v25, 7  ;;  %18288 = vst [vmem:[#allocation98_spill] sm:$0xff] %v14398_v61  ;;  %v14408_v3 = vpop.f32.mrb[78].mxu1 }
 0x446   : > { %18281 = vst [vmem:[#allocation94_spill] sm:$0xff] %v14373_v0  ;;  %v6290_v10 = vadd.f32 %v6226_v26, %v6154_v52  ;;  %v6484_v38 = vpack.c.bf16 %v6430_v44, %v6428_v4  ;;  %v14383_v54 = vmul.f32 %v12931_v28, %v14371_v25  ;;  %v14387_v14 = vmul.f32 %v12941_v33, %v14371_v25  ;;  %v14416_v4 = vpop.f32.mrb[79].mxu1 }
 0x447   : > { %18282 = vst [vmem:[#allocation49_spill] sm:$0xff] %v14375_v41  ;;  %18283 = vst [vmem:[#allocation144_spill] sm:$0xff] %v14377_v13  ;;  %v4751_v34 = vrot.slane %v14373_v0, 7  ;;  %v6288_v8 = vadd.f32 %v6224_v6, %v6152_v5  ;;  %v14396_v42 = vmul.f32 %v12951_v9, %v14373_v0  ;;  %v14402_v22 = vmul.f32 %v12955_v20, %v14373_v0 }
 0x448   : > { %18284 = vst [vmem:[#allocation34_spill] sm:$0xff] %v14383_v54  ;;  %18285 = vst [vmem:[#allocation111_spill] sm:$0xff] %v14387_v14  ;;  %v6365_v62 = vadd.f32 %v13523_v18, %v6290_v10  ;;  %6783 = vmatprep.mubr.bf16.mxu0 %v6484_v38  ;;  %v4782_v60 = vrot.slane %v14375_v41, 7  ;;  %v5300_v6 = vmul.f32 %v12931_v28, %v14375_v41  ;;  %v4783_v52 = vrot.slane %v14377_v13, 7 }
 0x449   : > { %18287 = vst [vmem:[#allocation104_spill] sm:$0xff] %v14396_v42  ;;  %18289 = vst [vmem:[#allocation35_spill] sm:$0xff] %v14402_v22  ;;  %v6363_v40 = vadd.f32 %v13523_v18, %v6288_v8  ;;  %v14413_v30 = vmul.f32 %v12941_v33, %v14375_v41  ;;  %v5301_v38 = vmul.f32 %v12951_v9, %v14377_v13  ;;  %v18304_v22 = vld [vmem:[#allocation115_spill] sm:$0xff] }
 0x44a   : > { %18290 = vst [vmem:[#allocation88_spill] sm:$0xff] %v14408_v3  ;;  %v6429_v11 = vmax.f32 %v6365_v62, 0.0  ;;  %18292 = vst [vmem:[#allocation137_spill] sm:$0xff] %v14416_v4  ;;  %v14420_v44 = vsel %vm1304_vm4, %v4750_v2, %v4782_v60  ;;  %v14424_v5 = vsel %vm1304_vm4, %v4782_v60, %v4750_v2  ;;  %v14437_v56 = vsel %vm1304_vm4, %v4751_v34, %v4783_v52 }
 0x44b   : > { %18291 = vst [vmem:[#allocation126_spill] sm:$0xff] %v14413_v30  ;;  %18293 = vst [vmem:[#allocation139_spill] sm:$0xff] %v14420_v44  ;;  %v6427_v8 = vmax.f32 %v6363_v40, 0.0  ;;  %v5166_v62 = vmul.f32 %v12963_v1, %v14420_v44  ;;  %v14433_v39 = vmul.f32 %v13011_v49, %v14420_v44  ;;  %v14441_v2 = vsel %vm1304_vm4, %v4783_v52, %v4751_v34  ;;  %v18301_v30 = vld [vmem:[#allocation59_spill] sm:$0xff]  ;;  %v18302_v34 = vld [vmem:[#allocation102_spill] sm:$0xff] }
 0x44c   : > { %18294 = vst [vmem:[#allocation75_spill] sm:$0xff] %v14424_v5  ;;  %18296 = vst [vmem:[#allocation32_spill] sm:$0xff] %v14437_v56  ;;  %v5167_v60 = vmul.f32 %v13039_v35, %v14437_v56  ;;  %v14447_v40 = vmul.f32 %v13048_v57, %v14437_v56  ;;  %v14451_v26 = vmul.f32 %v12955_v20, %v14377_v13  ;;  %v18303_v52 = vrot.slane %v18302_v34, 1 }
 0x44d   : > { %18295 = vst [vmem:[#allocation43_spill] sm:$0xff] %v14433_v39  ;;  %18297 = vst [vmem:[#allocation26_spill] sm:$0xff] %v14441_v2  ;;  %v6483_v10 = vpack.c.bf16 %v6429_v11, %v6427_v8  ;;  %v14453_v14 = vadd.f32 %v5300_v6, %v5166_v62  ;;  %v14457_v39 = vmul.f32 %v18002_v51, %v18301_v30  ;;  %v18305_v44 = vrot.slane %v18304_v22, 1  ;;  %v18309_v30 = vld [vmem:[#allocation90_spill] sm:$0xff]  ;;  %v18310_v8 = vld [vmem:[#allocation16_spill] sm:$0xff] }
 0x44e   : > { %18298 = vst [vmem:[#allocation30_spill] sm:$0xff] %v14447_v40  ;;  %18299 = vst [vmem:[#allocation80_spill] sm:$0xff] %v14451_v26  ;;  %v14465_v25 = vadd.f32 %v5301_v38, %v5167_v60  ;;  %v18308_v26 = vmov %v18303_v52  ;;  %v5481_v62 = vadd.f32 %v18310_v8, %v18309_v30  ;;  %v5551_v38 = vmul.f32 %v13048_v57, %v14229_v27  ;;  %v18312_v30 = vld [vmem:[#allocation20_spill] sm:$0xff]  ;;  %v18313_v8 = vld [vmem:[#allocation70_spill] sm:$0xff] }
 0x44f   : > { %18300 = vst [vmem:[#allocation33_spill] sm:$0xff] %v14453_v14  ;;  %v5001_v54 = vsel %vm1505_vm5, %v18305_v44, %v18303_v52  ;;  %v18307_v40 = vmov %v18305_v44  ;;  %6784 = vmatmul.mubr.bf16.gmra.mrb[80].mxu0 %v6483_v10  ;;  %v5153_v44 = vmul.f32 %v13039_v35, %v14457_v39  ;;  %v5825_v60 = vmul.f32 %v13052_v37, %v14262_v16  ;;  %v18311_v52 = vld [vmem:[#allocation58_spill] sm:$0xff]  ;;  %v18315_v27 = vld [vmem:[#allocation131_spill] sm:$0xff]  ;;  %v18324_v2 = vld [vmem:[#allocation48_spill] sm:$0xff] }
 0x450   : > { %18306 = vst [vmem:[#allocation23_spill] sm:$0xff] %v14465_v25  ;;  %v5033_v6 = vsel %vm1505_vm5, %v18308_v26, %v18307_v40  ;;  %v5423_v11 = vmul.f32 %v13044_v7, %v5001_v54  ;;  %v5617_v26 = vadd.f32 %v18311_v52, %v5481_v62  ;;  %v14487_v40 = vmul.f32 %v13052_v37, %v5001_v54  ;;  %v14501_v62 = vpop.f32.mrb[80].mxu1  ;;  %v18317_v52 = vld [vmem:[#allocation92_spill] sm:$0xff] }
 0x451   : > { %v14477_v14 = vmul.f32 %v18003_v48, %v5033_v6  ;;  %v5959_v10 = vmul.f32 %v13091_v21, %v14457_v39  ;;  %v5961_v6 = vmul.f32 %v13091_v21, %v18312_v30  ;;  %v5351_v25 = vadd.f32 %v18313_v8, %v5153_v44  ;;  %18316 = vst [vmem:[#allocation142_spill] sm:$0xff] %v14501_v62  ;;  %v14509_v44 = vld [vmem:[%s16388_s12 + $0x18] ss:$0 sm:$0xff]  ;;  %v14514_v8 = vpop.f32.mrb[81].mxu1 }
 0x452   : > { %v5615_v5 = vadd.f32 %v5551_v38, %v18315_v27  ;;  %v6095_v16 = vmul.f32 %v13510_v59, %v18304_v22  ;;  %v5753_v56 = vadd.f32 %v18317_v52, %v5617_v26  ;;  %v6097_v42 = vmul.f32 %v13510_v59, %v18302_v34  ;;  %18318 = vst [vmem:[#allocation85_spill] sm:$0xff] %v14514_v8  ;;  %v18320_v27 = vld [vmem:[#allocation47_spill] sm:$0xff]  ;;  %v18321_v26 = vld [vmem:[#allocation101_spill] sm:$0xff] }
 0x453   : > { %v14496_v41 = vmul.f32 %v13044_v7, %v14477_v14  ;;  %v6229_v30 = vmul.f32 %v14509_v44, %v5001_v54  ;;  %v6231_v38 = vmul.f32 %v14509_v44, %v14477_v14  ;;  %v14516_v22 = vadd.f32 %v5423_v11, %v5351_v25  ;;  %v18322_v34 = vld [vmem:[#allocation69_spill] sm:$0xff] }
 0x454   : > { %v5751_v0 = vadd.f32 %v18320_v27, %v5615_v5  ;;  %v14521_v52 = vmul.f32 %v18002_v51, %v18321_v26  ;;  %v18323_v13 = vrot.slane %v18322_v34, 1  ;;  %v18325_v62 = vrot.slane %v18324_v2, 1  ;;  %v18329_v27 = vld [vmem:[#allocation44_spill] sm:$0xff] }
 0x455   : > { %18314 = vst [vmem:[#allocation41_spill] sm:$0xff] %v14496_v41  ;;  %18319 = vst [vmem:[#allocation55_spill] sm:$0xff] %v14516_v22  ;;  %v14529_v41 = vpop.f32.mrb[82].mxu1  ;;  %v5889_v4 = vadd.f32 %v5825_v60, %v5753_v56  ;;  %v5480_v26 = vadd.f32 %v14131_v46, %v18329_v27  ;;  %v5550_v60 = vmul.f32 %v13011_v49, %v14300_v17  ;;  %v18336_v17 = vld [vmem:[#allocation117_spill] sm:$0xff] }
 0x456   : > { %v5000_v54 = vsel %vm1505_vm5, %v18325_v62, %v18323_v13  ;;  %18326 = vst [vmem:[#allocation82_spill] sm:$0xff] %v14529_v41  ;;  %v18327_v8 = vmov %v18325_v62  ;;  %v18328_v25 = vmov %v18323_v13  ;;  %v14540_v22 = vpop.f32.mrb[83].mxu1  ;;  %v5887_v3 = vadd.f32 %v14275_v24, %v5751_v0  ;;  %v18333_v24 = vld [vmem:[#allocation63_spill] sm:$0xff] }
 0x457   : > { %v5032_v5 = vsel %vm1505_vm5, %v18328_v25, %v18327_v8  ;;  %v5422_v11 = vmul.f32 %v18116_v15, %v5000_v54  ;;  %18330 = vst [vmem:[#allocation138_spill] sm:$0xff] %v14540_v22  ;;  %v5152_v56 = vmul.f32 %v12963_v1, %v14521_v52  ;;  %v6025_v62 = vadd.f32 %v5961_v6, %v5889_v4  ;;  %v18331_v8 = vld [vmem:[#allocation52_spill] sm:$0xff]  ;;  %v18335_v22 = vld [vmem:[#allocation19_spill] sm:$0xff] }
 0x458   : > { %v14544_v13 = vmul.f32 %v18003_v48, %v5032_v5  ;;  %v5616_v25 = vadd.f32 %v18331_v8, %v5480_v26  ;;  %v5824_v41 = vmul.f32 %v18115_v55, %v14318_v58  ;;  %v14554_v46 = vmul.f32 %v18115_v55, %v5000_v54  ;;  %v18337_v26 = vld [vmem:[#allocation136_spill] sm:$0xff] }
 0x459   : > { %v6023_v27 = vadd.f32 %v5959_v10, %v5887_v3  ;;  %v5350_v0 = vadd.f32 %v18333_v24, %v5152_v56  ;;  %v5614_v61 = vadd.f32 %v5550_v60, %v18335_v22  ;;  %v6159_v12 = vadd.f32 %v6097_v42, %v6025_v62  ;;  %v18338_v3 = vld [vmem:[#allocation36_spill] sm:$0xff]  ;;  %v14577_v22 = vld [vmem:[%s16388_s12 + $0x10] ss:$0 sm:$0xff] }
 0x45a   : > { %18332 = vst [vmem:[#allocation68_spill] sm:$0xff] %v14554_v46  ;;  %v14559_v5 = vmul.f32 %v18116_v15, %v14544_v13  ;;  %v5752_v4 = vadd.f32 %v18336_v17, %v5616_v25  ;;  %v5958_v6 = vmul.f32 %v13029_v50, %v14521_v52  ;;  %v5960_v58 = vmul.f32 %v13029_v50, %v18337_v26 }
 0x45b   : > { %v6157_v8 = vadd.f32 %v6095_v16, %v6023_v27  ;;  %v14567_v46 = vadd.f32 %v5422_v11, %v5350_v0  ;;  %v5750_v10 = vadd.f32 %v18338_v3, %v5614_v61  ;;  %v6094_v56 = vmul.f32 %v18124_v31, %v18324_v2 }
 0x45c   : > { %18334 = vst [vmem:[#allocation99_spill] sm:$0xff] %v14559_v5  ;;  %v6295_v24 = vadd.f32 %v6231_v38, %v6159_v12  ;;  %v5888_v5 = vadd.f32 %v5824_v41, %v5752_v4  ;;  %v6096_v42 = vmul.f32 %v18124_v31, %v18322_v34  ;;  %v6228_v60 = vmul.f32 %v14577_v22, %v5000_v54 }
 0x45d   : > { %v6293_v16 = vadd.f32 %v6229_v30, %v6157_v8  ;;  %v5886_v11 = vadd.f32 %v14333_v23, %v5750_v10  ;;  %v6230_v61 = vmul.f32 %v14577_v22, %v14544_v13  ;;  %v4639_v12 = vadd.f32 %v12927_v63, %v14340_v45 }
 0x45e   : > { %v6370_v41 = vadd.f32 %v13530_v47, %v6295_v24  ;;  %v6024_v2 = vadd.f32 %v5960_v58, %v5888_v5  ;;  %v4640_v38 = vadd.f32 %v12947_v32, %v14346_v43  ;;  %v4641_v34 = vadd.f32 %v12927_v63, %v14353_v53  ;;  %v14599_v5 = vpop.f32.mrb[84].mxu1 }
 0x45f   : > { %v6368_v54 = vadd.f32 %v13530_v47, %v6293_v16  ;;  %v6022_v30 = vadd.f32 %v5958_v6, %v5886_v11  ;;  %v14591_v62 = vmax.f32 %v4639_v12, 0.0  ;;  %v4642_v23 = vadd.f32 %v12947_v32, %v14358_v29  ;;  %18342 = vst [vmem:[#allocation113_spill] sm:$0xff] %v14599_v5  ;;  %v14603_v6 = vpop.f32.mrb[85].mxu1 }
 0x460   : > { %v6434_v25 = vmax.f32 %v6370_v41, 0.0  ;;  %v6158_v27 = vadd.f32 %v6096_v42, %v6024_v2  ;;  %v14595_v45 = vmax.f32 %v4640_v38, 0.0  ;;  %v14597_v0 = vmax.f32 %v4641_v34, 0.0  ;;  %18343 = vst [vmem:[#allocation84_spill] sm:$0xff] %v14603_v6  ;;  %v14614_v3 = vpop.f32.mrb[86].mxu1 }
 0x461   : > { %18339 = vst [vmem:[#allocation29_spill] sm:$0xff] %v14591_v62  ;;  %v6432_v43 = vmax.f32 %v6368_v54, 0.0  ;;  %v6156_v17 = vadd.f32 %v6094_v56, %v6022_v30  ;;  %v4752_v53 = vrot.slane %v14591_v62, 7  ;;  %v14607_v29 = vmul.f32 %v12931_v28, %v14591_v62  ;;  %18346 = vst [vmem:[#allocation133_spill] sm:$0xff] %v14614_v3  ;;  %v14621_v16 = vpop.f32.mrb[87].mxu1 }
 0x462   : > { %18340 = vst [vmem:[#allocation39_spill] sm:$0xff] %v14595_v45  ;;  %18341 = vst [vmem:[#allocation54_spill] sm:$0xff] %v14597_v0  ;;  %v6294_v26 = vadd.f32 %v6230_v61, %v6158_v27  ;;  %v14611_v58 = vmul.f32 %v12941_v33, %v14591_v62  ;;  %v4753_v8 = vrot.slane %v14595_v45, 7  ;;  %v14619_v42 = vmul.f32 %v12951_v9, %v14595_v45  ;;  %v18354_v27 = vld [vmem:[#allocation12_spill] sm:$0xff]  ;;  %v14671_v24 = vpop.f32.mrb[88].mxu1 }
 0x463   : > { %18344 = vst [vmem:[#allocation65_spill] sm:$0xff] %v14607_v29  ;;  %v6486_v10 = vpack.c.bf16 %v6434_v25, %v6432_v43  ;;  %v6292_v56 = vadd.f32 %v6228_v60, %v6156_v17  ;;  %18348 = vst [vmem:[#allocation66_spill] sm:$0xff] %v14621_v16  ;;  %v14626_v61 = vmul.f32 %v12955_v20, %v14595_v45  ;;  %v4784_v12 = vrot.slane %v14597_v0, 7  ;;  %v18376_v62 = vld [vmem:[#allocation72_spill] sm:$0xff] }
 0x464   : > { %18345 = vst [vmem:[#allocation27_spill] sm:$0xff] %v14611_v58  ;;  %18347 = vst [vmem:[#allocation53_spill] sm:$0xff] %v14619_v42  ;;  %v6369_v11 = vadd.f32 %v13523_v18, %v6294_v26  ;;  %v5304_v2 = vmul.f32 %v12931_v28, %v14597_v0  ;;  %v14635_v38 = vmul.f32 %v12941_v33, %v14597_v0  ;;  %v14637_v34 = vmax.f32 %v4642_v23, 0.0  ;;  %v18383_v42 = vld [vmem:[#allocation109_spill] sm:$0xff] }
 0x465   : > { %18349 = vst [vmem:[#allocation77_spill] sm:$0xff] %v14626_v61  ;;  %6793 = vmatprep.mubr.bf16.mxu0 %v6486_v10  ;;  %v6367_v60 = vadd.f32 %v13523_v18, %v6292_v56  ;;  %v14641_v30 = vsel %vm1304_vm4, %v4752_v53, %v4784_v12  ;;  %v14645_v25 = vsel %vm1304_vm4, %v4784_v12, %v4752_v53  ;;  %v18357_v12 = vld [vmem:[#allocation14_spill] sm:$0xff]  ;;  %18361 = vst [vmem:[#allocation71_spill] sm:$0xff] %v14671_v24 }
 0x466   : > { %18350 = vst [vmem:[#allocation51_spill] sm:$0xff] %v14635_v38  ;;  %18351 = vst [vmem:[#allocation56_spill] sm:$0xff] %v14637_v34  ;;  %v6433_v54 = vmax.f32 %v6369_v11, 0.0  ;;  %v14649_v43 = vmul.f32 %v18002_v51, %v18354_v27  ;;  %v5170_v26 = vmul.f32 %v12963_v1, %v14641_v30  ;;  %v14655_v23 = vmul.f32 %v13011_v49, %v14641_v30  ;;  %v18359_v27 = vld [vmem:[#allocation122_spill] sm:$0xff] }
 0x467   : > { %18352 = vst [vmem:[#allocation40_spill] sm:$0xff] %v14641_v30  ;;  %18353 = vst [vmem:[#allocation61_spill] sm:$0xff] %v14645_v25  ;;  %v6431_v17 = vmax.f32 %v6367_v60, 0.0  ;;  %v4785_v10 = vrot.slane %v14637_v34, 7  ;;  %v5305_v53 = vmul.f32 %v12951_v9, %v14637_v34  ;;  %v14663_v11 = vmul.f32 %v12955_v20, %v14637_v34  ;;  %v18379_v25 = vld [vmem:[#allocation74_spill] sm:$0xff] }
 0x468   : > { %18355 = vst [vmem:[#allocation91_spill] sm:$0xff] %v14655_v23  ;;  %v18358_v60 = vrot.slane %v18357_v12, 1  ;;  %v18360_v4 = vrot.slane %v18359_v27, 1  ;;  %v14673_v38 = vadd.f32 %v5304_v2, %v5170_v26  ;;  %v18367_v2 = vrot.slane %v18359_v27, 1 }
 0x469   : > { %18356 = vst [vmem:[#allocation45_spill] sm:$0xff] %v14663_v11  ;;  %v6485_v58 = vpack.c.bf16 %v6433_v54, %v6431_v17  ;;  %v14677_v56 = vsel %vm1304_vm4, %v4753_v8, %v4785_v10  ;;  %v14681_v23 = vsel %vm1304_vm4, %v4785_v10, %v4753_v8  ;;  %v14683_v11 = vpop.f32.mrb[89].mxu1  ;;  %v5157_v8 = vmul.f32 %v13039_v35, %v14649_v43 }
 0x46a   : > { %v5003_v41 = vsel %vm1505_vm5, %v18360_v4, %v18358_v60  ;;  %18362 = vst [vmem:[#allocation79_spill] sm:$0xff] %v14673_v38  ;;  %18363 = vst [vmem:[#allocation83_spill] sm:$0xff] %v14677_v56  ;;  %v5171_v61 = vmul.f32 %v13039_v35, %v14677_v56  ;;  %v14689_v4 = vmul.f32 %v13048_v57, %v14677_v56  ;;  %v18368_v54 = vmov %v18358_v60  ;;  %v14699_v26 = vpop.f32.mrb[90].mxu1  ;;  %v18370_v38 = vld [vmem:[#allocation73_spill] sm:$0xff] }
 0x46b   : > { %18364 = vst [vmem:[#allocation57_spill] sm:$0xff] %v14681_v23  ;;  %18365 = vst [vmem:[#allocation50_spill] sm:$0xff] %v14683_v11  ;;  %v5035_v17 = vsel %vm1505_vm5, %v18368_v54, %v18367_v2  ;;  %6794 = vmatmul.mubr.bf16.gmra.mrb[84].mxu0 %v6485_v58  ;;  %v5427_v60 = vmul.f32 %v13044_v7, %v5003_v41  ;;  %v5555_v24 = vmul.f32 %v13048_v57, %v14457_v39  ;;  %v14709_v30 = vpop.f32.mrb[91].mxu1  ;;  %v18374_v54 = vld [vmem:[#allocation127_spill] sm:$0xff] }
 0x46c   : > { %18366 = vst [vmem:[#allocation107_spill] sm:$0xff] %v14689_v4  ;;  %18369 = vst [vmem:[#allocation106_spill] sm:$0xff] %v14699_v26  ;;  %v14702_v10 = vmul.f32 %v18003_v48, %v5035_v17  ;;  %v18371_v4 = vld [vmem:[#allocation46_spill] sm:$0xff]  ;;  %v14711_v2 = vadd.f32 %v5305_v53, %v5171_v61  ;;  %v5355_v29 = vadd.f32 %v18374_v54, %v5157_v8  ;;  %v18377_v8 = vld [vmem:[#allocation9_spill] sm:$0xff]  ;;  %v14763_v16 = vpop.f32.mrb[92].mxu1 }
 0x46d   : > { %v5485_v11 = vadd.f32 %v18371_v4, %v18370_v38  ;;  %18372 = vst [vmem:[#allocation78_spill] sm:$0xff] %v14709_v30  ;;  %v5829_v58 = vmul.f32 %v13052_v37, %v14477_v14  ;;  %v14717_v17 = vmul.f32 %v13052_v37, %v5003_v41  ;;  %v18375_v38 = vld [vmem:[#allocation129_spill] sm:$0xff]  ;;  %v5963_v61 = vmul.f32 %v13091_v21, %v14649_v43  ;;  %v18378_v30 = vld [vmem:[#allocation134_spill] sm:$0xff] }
 0x46e   : > { %18373 = vst [vmem:[#allocation141_spill] sm:$0xff] %v14711_v2  ;;  %v14721_v26 = vmul.f32 %v13044_v7, %v14702_v10  ;;  %v5619_v4 = vadd.f32 %v5555_v24, %v18375_v38  ;;  %v14727_v53 = vadd.f32 %v5427_v60, %v5355_v29  ;;  %v5965_v54 = vmul.f32 %v13091_v21, %v18377_v8  ;;  %v18380_v29 = vld [vmem:[#allocation124_spill] sm:$0xff] }
 0x46f   : > { %v5621_v39 = vadd.f32 %v18376_v62, %v5485_v11  ;;  %v6099_v14 = vmul.f32 %v13510_v59, %v18359_v27  ;;  %v6101_v2 = vmul.f32 %v13510_v59, %v18357_v12  ;;  %v6233_v62 = vmul.f32 %v14509_v44, %v5003_v41  ;;  %v18381_v38 = vld [vmem:[#allocation120_spill] sm:$0xff]  ;;  %18389 = vst [vmem:[#allocation64_spill] sm:$0xff] %v14763_v16  ;;  %v18393_v16 = vld [vmem:[#allocation42_spill] sm:$0xff] }
 0x470   : > { %v5755_v0 = vadd.f32 %v18378_v30, %v5619_v4  ;;  %v6235_v11 = vmul.f32 %v14509_v44, %v14702_v10  ;;  %v14742_v60 = vmul.f32 %v18002_v51, %v18380_v29  ;;  %v18382_v8 = vrot.slane %v18381_v38, 1  ;;  %v18387_v4 = vld [vmem:[#allocation100_spill] sm:$0xff] }
 0x471   : > { %v5757_v24 = vadd.f32 %v18379_v25, %v5621_v39  ;;  %v18384_v27 = vrot.slane %v18383_v42, 1  ;;  %v18388_v39 = vld [vmem:[#allocation60_spill] sm:$0xff]  ;;  %v6098_v6 = vmul.f32 %v18124_v31, %v18383_v42 }
 0x472   : > { %v18386_v25 = vmov %v18382_v8  ;;  %v5484_v56 = vadd.f32 %v18388_v39, %v18387_v4  ;;  %v5891_v29 = vadd.f32 %v14487_v40, %v5755_v0  ;;  %v5828_v4 = vmul.f32 %v18115_v55, %v14544_v13  ;;  %v14772_v40 = vpop.f32.mrb[93].mxu1 }
 0x473   : > { %v5002_v12 = vsel %vm1505_vm5, %v18384_v27, %v18382_v8  ;;  %v18385_v30 = vmov %v18384_v27  ;;  %v5893_v45 = vadd.f32 %v5829_v58, %v5757_v24  ;;  %v5156_v8 = vmul.f32 %v12963_v1, %v14742_v60  ;;  %18391 = vst [vmem:[#allocation18_spill] sm:$0xff] %v14772_v40  ;;  %v14781_v39 = vpop.f32.mrb[94].mxu1 }
 0x474   : > { %v5034_v41 = vsel %vm1505_vm5, %v18386_v25, %v18385_v30  ;;  %v5426_v23 = vmul.f32 %v18116_v15, %v5002_v12  ;;  %v5554_v27 = vmul.f32 %v13011_v49, %v14521_v52  ;;  %v18390_v30 = vld [vmem:[#allocation76_spill] sm:$0xff]  ;;  %v6027_v0 = vadd.f32 %v5963_v61, %v5891_v29  ;;  %18392 = vst [vmem:[#allocation24_spill] sm:$0xff] %v14781_v39  ;;  %v14788_v61 = vpop.f32.mrb[95].mxu1  ;;  %v18396_v29 = vld [vmem:[#allocation110_spill] sm:$0xff] }
 0x475   : > { %v14760_v34 = vmul.f32 %v18003_v48, %v5034_v41  ;;  %v5620_v25 = vadd.f32 %v18390_v30, %v5484_v56  ;;  %v6029_v58 = vadd.f32 %v5965_v54, %v5893_v45  ;;  %v14779_v41 = vmul.f32 %v18115_v55, %v5002_v12  ;;  %v18394_v30 = vld [vmem:[#allocation105_spill] sm:$0xff]  ;;  %18395 = vst [vmem:[#allocation62_spill] sm:$0xff] %v14788_v61 }
 0x476   : > { %v5354_v52 = vadd.f32 %v18393_v16, %v5156_v8  ;;  %v5618_v56 = vadd.f32 %v5554_v27, %v14348_v19  ;;  %v5962_v13 = vmul.f32 %v13029_v50, %v14742_v60  ;;  %v6161_v45 = vadd.f32 %v6099_v14, %v6027_v0  ;;  %v18397_v16 = vld [vmem:[#allocation31_spill] sm:$0xff]  ;;  %v18398_v14 = vld [vmem:[#allocation68_spill] sm:$0xff] }
 0x477   : > { %v14776_v24 = vmul.f32 %v18116_v15, %v14760_v34  ;;  %v5756_v3 = vadd.f32 %v18394_v30, %v5620_v25  ;;  %v6163_v54 = vadd.f32 %v6101_v2, %v6029_v58  ;;  %v5964_v40 = vmul.f32 %v13029_v50, %v18396_v29  ;;  %v18399_v29 = vld [vmem:[#allocation25_spill] sm:$0xff] }
 0x478   : > { %v14794_v39 = vadd.f32 %v5426_v23, %v5354_v52  ;;  %v5754_v8 = vadd.f32 %v18397_v16, %v5618_v56  ;;  %v6100_v27 = vmul.f32 %v18124_v31, %v18381_v38  ;;  %v6297_v25 = vadd.f32 %v6233_v62, %v6161_v45  ;;  %v18400_v23 = vld [vmem:[#allocation98_spill] sm:$0xff]  ;;  %v18401_v62 = vld [vmem:[#allocation88_spill] sm:$0xff] }
 0x479   : > { %v5892_v19 = vadd.f32 %v5828_v4, %v5756_v3  ;;  %v6299_v30 = vadd.f32 %v6235_v11, %v6163_v54  ;;  %v6232_v61 = vmul.f32 %v14577_v22, %v5002_v12  ;;  %v6234_v2 = vmul.f32 %v14577_v22, %v14760_v34  ;;  %v18402_v12 = vld [vmem:[#allocation137_spill] sm:$0xff] }
 0x47a   : > { %v5890_v0 = vadd.f32 %v18398_v14, %v5754_v8  ;;  %v4643_v42 = vadd.f32 %v12927_v63, %v18399_v29  ;;  %v4644_v52 = vadd.f32 %v12947_v32, %v18400_v23  ;;  %v6372_v3 = vadd.f32 %v13530_v47, %v6297_v25 }
 0x47b   : > { %v6028_v58 = vadd.f32 %v5964_v40, %v5892_v19  ;;  %v6374_v38 = vadd.f32 %v13530_v47, %v6299_v30  ;;  %v4645_v11 = vadd.f32 %v12927_v63, %v18401_v62  ;;  %v4646_v4 = vadd.f32 %v12947_v32, %v18402_v12 }
 0x47c   : > { %v6026_v56 = vadd.f32 %v5962_v13, %v5890_v0  ;;  %v14813_v54 = vmax.f32 %v4643_v42, 0.0  ;;  %v14815_v40 = vmax.f32 %v4644_v52, 0.0  ;;  %v6436_v16 = vmax.f32 %v6372_v3, 0.0 }
 0x47d   : > { %v6162_v45 = vadd.f32 %v6100_v27, %v6028_v58  ;;  %v6438_v8 = vmax.f32 %v6374_v38, 0.0  ;;  %v14817_v19 = vmax.f32 %v4645_v11, 0.0  ;;  %v14819_v14 = vmax.f32 %v4646_v4, 0.0 }
 0x47e   : > { %18403 = vst [vmem:[#allocation81_spill] sm:$0xff] %v14813_v54  ;;  %18404 = vst [vmem:[#allocation112_spill] sm:$0xff] %v14815_v40  ;;  %v6160_v25 = vadd.f32 %v6098_v6, %v6026_v56  ;;  %v4754_v29 = vrot.slane %v14813_v54, 7  ;;  %v14825_v13 = vmul.f32 %v12931_v28, %v14813_v54  ;;  %v14829_v27 = vmul.f32 %v12941_v33, %v14813_v54 }
 0x47f   : > { %18405 = vst [vmem:[#allocation116_spill] sm:$0xff] %v14817_v19  ;;  %18406 = vst [vmem:[#allocation118_spill] sm:$0xff] %v14819_v14  ;;  %v6298_v30 = vadd.f32 %v6234_v2, %v6162_v45  ;;  %v6488_v62 = vpack.c.bf16 %v6438_v8, %v6436_v16  ;;  %v4755_v0 = vrot.slane %v14815_v40, 7  ;;  %v14836_v2 = vmul.f32 %v12951_v9, %v14815_v40  ;;  %v18420_v8 = vld [vmem:[#allocation108_spill] sm:$0xff] }
 0x480   : > { %18407 = vst [vmem:[#allocation59_spill] sm:$0xff] %v14825_v13  ;;  %18408 = vst [vmem:[#allocation102_spill] sm:$0xff] %v14829_v27  ;;  %v6296_v58 = vadd.f32 %v6232_v61, %v6160_v25  ;;  %v14840_v52 = vmul.f32 %v12955_v20, %v14815_v40  ;;  %v4786_v3 = vrot.slane %v14817_v19, 7  ;;  %v5308_v61 = vmul.f32 %v12931_v28, %v14817_v19  ;;  %v18423_v27 = vld [vmem:[#allocation140_spill] sm:$0xff]  ;;  %v18441_v40 = vld [vmem:[#allocation15_spill] sm:$0xff] }
 0x481   : > { %v6373_v42 = vadd.f32 %v13523_v18, %v6298_v30  ;;  %18409 = vst [vmem:[#allocation115_spill] sm:$0xff] %v14836_v2  ;;  %6803 = vmatprep.mubr.bf16.mxu0 %v6488_v62  ;;  %v14849_v4 = vmul.f32 %v12941_v33, %v14817_v19  ;;  %v4787_v56 = vrot.slane %v14819_v14, 7  ;;  %v5309_v25 = vmul.f32 %v12951_v9, %v14819_v14  ;;  %v18438_v2 = vld [vmem:[#allocation132_spill] sm:$0xff] }
 0x482   : > { %18410 = vst [vmem:[#allocation90_spill] sm:$0xff] %v14840_v52  ;;  %v6371_v11 = vadd.f32 %v13523_v18, %v6296_v58  ;;  %v14854_v45 = vsel %vm1304_vm4, %v4754_v29, %v4786_v3  ;;  %v14858_v16 = vsel %vm1304_vm4, %v4786_v3, %v4754_v29  ;;  %v14885_v23 = vmul.f32 %v12955_v20, %v14819_v14 }
 0x483   : > { %v6437_v12 = vmax.f32 %v6373_v42, 0.0  ;;  %18411 = vst [vmem:[#allocation16_spill] sm:$0xff] %v14849_v4  ;;  %18412 = vst [vmem:[#allocation58_spill] sm:$0xff] %v14854_v45  ;;  %v5174_v62 = vmul.f32 %v12963_v1, %v14854_v45  ;;  %v14867_v58 = vmul.f32 %v13011_v49, %v14854_v45  ;;  %v14871_v42 = vsel %vm1304_vm4, %v4755_v0, %v4787_v56 }
 0x484   : > { %18413 = vst [vmem:[#allocation20_spill] sm:$0xff] %v14858_v16  ;;  %v6435_v30 = vmax.f32 %v6371_v11, 0.0  ;;  %18415 = vst [vmem:[#allocation131_spill] sm:$0xff] %v14871_v42  ;;  %v14875_v29 = vsel %vm1304_vm4, %v4787_v56, %v4755_v0  ;;  %v5175_v3 = vmul.f32 %v13039_v35, %v14871_v42  ;;  %v14881_v11 = vmul.f32 %v13048_v57, %v14871_v42  ;;  %v18421_v0 = vld [vmem:[#allocation125_spill] sm:$0xff] }
 0x485   : > { %18414 = vst [vmem:[#allocation70_spill] sm:$0xff] %v14867_v58  ;;  %18416 = vst [vmem:[#allocation92_spill] sm:$0xff] %v14875_v29  ;;  %v14887_v6 = vadd.f32 %v5308_v61, %v5174_v62  ;;  %v14891_v4 = vmul.f32 %v18002_v51, %v18420_v8  ;;  %v18422_v56 = vrot.slane %v18421_v0, 1  ;;  %v18424_v58 = vrot.slane %v18423_v27, 1  ;;  %v18428_v8 = vld [vmem:[#allocation96_spill] sm:$0xff] }
 0x486   : > { %18417 = vst [vmem:[#allocation47_spill] sm:$0xff] %v14881_v11  ;;  %18418 = vst [vmem:[#allocation101_spill] sm:$0xff] %v14885_v23  ;;  %v6487_v38 = vpack.c.bf16 %v6437_v12, %v6435_v30  ;;  %v14899_v45 = vadd.f32 %v5309_v25, %v5175_v3  ;;  %v18429_v30 = vld [vmem:[#allocation41_spill] sm:$0xff]  ;;  %v5833_v3 = vmul.f32 %v13052_v37, %v14702_v10 }
 0x487   : > { %18419 = vst [vmem:[#allocation69_spill] sm:$0xff] %v14887_v6  ;;  %v5005_v52 = vsel %vm1505_vm5, %v18424_v58, %v18422_v56  ;;  %v18426_v11 = vmov %v18424_v58  ;;  %v18427_v23 = vmov %v18422_v56  ;;  %v5489_v62 = vadd.f32 %v18429_v30, %v18428_v8  ;;  %v18430_v56 = vld [vmem:[#allocation10_spill] sm:$0xff]  ;;  %v18431_v8 = vld [vmem:[#allocation119_spill] sm:$0xff] }
 0x488   : > { %18425 = vst [vmem:[#allocation48_spill] sm:$0xff] %v14899_v45  ;;  %v5037_v61 = vsel %vm1505_vm5, %v18427_v23, %v18426_v11  ;;  %v5431_v12 = vmul.f32 %v13044_v7, %v5005_v52  ;;  %6804 = vmatmul.mubr.bf16.gmra.mrb[88].mxu0 %v6487_v38  ;;  %v5161_v25 = vmul.f32 %v13039_v35, %v14891_v4  ;;  %v18432_v30 = vld [vmem:[#allocation123_spill] sm:$0xff] }
 0x489   : > { %v14911_v6 = vmul.f32 %v18003_v48, %v5037_v61  ;;  %v5559_v58 = vmul.f32 %v13048_v57, %v14649_v43  ;;  %v5625_v23 = vadd.f32 %v18430_v56, %v5489_v62  ;;  %v14921_v11 = vmul.f32 %v13052_v37, %v5005_v52  ;;  %v18434_v43 = vld [vmem:[#allocation55_spill] sm:$0xff]  ;;  %v18435_v62 = vld [vmem:[#allocation114_spill] sm:$0xff] }
 0x48a   : > { %v5967_v38 = vmul.f32 %v13091_v21, %v14891_v4  ;;  %v5969_v61 = vmul.f32 %v13091_v21, %v18431_v8  ;;  %v5359_v45 = vadd.f32 %v18432_v30, %v5161_v25  ;;  %v6103_v10 = vmul.f32 %v13510_v59, %v18423_v27  ;;  %v18437_v30 = vld [vmem:[#allocation37_spill] sm:$0xff] }
 0x48b   : > { %v14930_v13 = vmul.f32 %v13044_v7, %v14911_v6  ;;  %v5623_v54 = vadd.f32 %v5559_v58, %v18434_v43  ;;  %v5761_v56 = vadd.f32 %v18435_v62, %v5625_v23  ;;  %v6105_v19 = vmul.f32 %v13510_v59, %v18421_v0  ;;  %v18439_v43 = vld [vmem:[#allocation89_spill] sm:$0xff] }
 0x48c   : > { %v6237_v16 = vmul.f32 %v14509_v44, %v5005_v52  ;;  %v6239_v8 = vmul.f32 %v14509_v44, %v14911_v6  ;;  %v14941_v25 = vadd.f32 %v5431_v12, %v5359_v45  ;;  %v14946_v58 = vmul.f32 %v18002_v51, %v18438_v2  ;;  %v18445_v12 = vld [vmem:[#allocation86_spill] sm:$0xff]  ;;  %v18446_v2 = vld [vmem:[#allocation99_spill] sm:$0xff] }
 0x48d   : > { %18433 = vst [vmem:[#allocation44_spill] sm:$0xff] %v14930_v13  ;;  %v5759_v42 = vadd.f32 %v18437_v30, %v5623_v54  ;;  %v18440_v27 = vrot.slane %v18439_v43, 1  ;;  %v18442_v23 = vrot.slane %v18441_v40, 1  ;;  %v5897_v62 = vadd.f32 %v5833_v3, %v5761_v56 }
 0x48e   : > { %18436 = vst [vmem:[#allocation52_spill] sm:$0xff] %v14941_v25  ;;  %v5488_v30 = vadd.f32 %v18446_v2, %v18445_v12  ;;  %v5160_v3 = vmul.f32 %v12963_v1, %v14946_v58  ;;  %v5558_v56 = vmul.f32 %v13011_v49, %v14742_v60  ;;  %v18451_v60 = vld [vmem:[#allocation143_spill] sm:$0xff] }
 0x48f   : > { %v5004_v0 = vsel %vm1505_vm5, %v18442_v23, %v18440_v27  ;;  %v18443_v52 = vmov %v18442_v23  ;;  %v18444_v14 = vmov %v18440_v27  ;;  %v5895_v29 = vadd.f32 %v14717_v17, %v5759_v42  ;;  %v18447_v23 = vld [vmem:[#allocation21_spill] sm:$0xff] }
 0x490   : > { %v5036_v45 = vsel %vm1505_vm5, %v18444_v14, %v18443_v52  ;;  %v5430_v54 = vmul.f32 %v18116_v15, %v5004_v0  ;;  %v6033_v27 = vadd.f32 %v5969_v61, %v5897_v62  ;;  %v5624_v13 = vadd.f32 %v18447_v23, %v5488_v30  ;;  %v18449_v17 = vld [vmem:[#allocation121_spill] sm:$0xff]  ;;  %v18452_v30 = vld [vmem:[#allocation28_spill] sm:$0xff] }
 0x491   : > { %v14965_v25 = vmul.f32 %v18003_v48, %v5036_v45  ;;  %v5832_v14 = vmul.f32 %v18115_v55, %v14760_v34  ;;  %v14975_v52 = vmul.f32 %v18115_v55, %v5004_v0  ;;  %v6031_v12 = vadd.f32 %v5967_v38, %v5895_v29  ;;  %v18453_v29 = vld [vmem:[#allocation135_spill] sm:$0xff] }
 0x492   : > { %v5358_v42 = vadd.f32 %v18449_v17, %v5160_v3  ;;  %v5622_v2 = vadd.f32 %v5558_v56, %v14567_v46  ;;  %v6167_v5 = vadd.f32 %v6105_v19, %v6033_v27  ;;  %v5760_v61 = vadd.f32 %v18451_v60, %v5624_v13 }
 0x493   : > { %18448 = vst [vmem:[#allocation63_spill] sm:$0xff] %v14975_v52  ;;  %v14980_v45 = vmul.f32 %v18116_v15, %v14965_v25  ;;  %v5966_v62 = vmul.f32 %v13029_v50, %v14946_v58  ;;  %v5968_v34 = vmul.f32 %v13029_v50, %v18452_v30  ;;  %v6165_v23 = vadd.f32 %v6103_v10, %v6031_v12 }
 0x494   : > { %v14988_v52 = vadd.f32 %v5430_v54, %v5358_v42  ;;  %v5758_v38 = vadd.f32 %v18453_v29, %v5622_v2  ;;  %v6102_v3 = vmul.f32 %v18124_v31, %v18441_v40  ;;  %v6303_v17 = vadd.f32 %v6239_v8, %v6167_v5  ;;  %v18454_v54 = vld [vmem:[#allocation142_spill] sm:$0xff]  ;;  %v18455_v40 = vld [vmem:[#allocation85_spill] sm:$0xff] }
 0x495   : > { %18450 = vst [vmem:[#allocation19_spill] sm:$0xff] %v14980_v45  ;;  %v5896_v45 = vadd.f32 %v5832_v14, %v5760_v61  ;;  %v6104_v46 = vmul.f32 %v18124_v31, %v18439_v43  ;;  %v6236_v19 = vmul.f32 %v14577_v22, %v5004_v0  ;;  %v6301_v13 = vadd.f32 %v6237_v16, %v6165_v23  ;;  %v18456_v8 = vld [vmem:[#allocation82_spill] sm:$0xff] }
 0x496   : > { %v5894_v56 = vadd.f32 %v14779_v41, %v5758_v38  ;;  %v6238_v10 = vmul.f32 %v14577_v22, %v14965_v25  ;;  %v4647_v27 = vadd.f32 %v12927_v63, %v18454_v54  ;;  %v6378_v12 = vadd.f32 %v13530_v47, %v6303_v17  ;;  %v18458_v41 = vld [vmem:[#allocation138_spill] sm:$0xff] }
 0x497   : > { %v6032_v42 = vadd.f32 %v5968_v34, %v5896_v45  ;;  %v4648_v5 = vadd.f32 %v12947_v32, %v18455_v40  ;;  %v4649_v43 = vadd.f32 %v12927_v63, %v18456_v8  ;;  %v6376_v0 = vadd.f32 %v13530_v47, %v6301_v13 }
 0x498   : > { %v6030_v16 = vadd.f32 %v5966_v62, %v5894_v56  ;;  %v15007_v14 = vmax.f32 %v4647_v27, 0.0  ;;  %v4650_v2 = vadd.f32 %v12947_v32, %v18458_v41  ;;  %v6442_v60 = vmax.f32 %v6378_v12, 0.0 }
 0x499   : > { %v6166_v61 = vadd.f32 %v6104_v46, %v6032_v42  ;;  %v15011_v30 = vmax.f32 %v4648_v5, 0.0  ;;  %v15013_v23 = vmax.f32 %v4649_v43, 0.0  ;;  %v6440_v45 = vmax.f32 %v6376_v0, 0.0 }
 0x49a   : > { %18457 = vst [vmem:[#allocation117_spill] sm:$0xff] %v15007_v14  ;;  %v6164_v34 = vadd.f32 %v6102_v3, %v6030_v16  ;;  %v4756_v29 = vrot.slane %v15007_v14, 7  ;;  %v15019_v62 = vmul.f32 %v12931_v28, %v15007_v14  ;;  %v15023_v13 = vmul.f32 %v12941_v33, %v15007_v14  ;;  %v18492_v14 = vld [vmem:[#allocation95_spill] sm:$0xff] }
 0x49b   : > { %18459 = vst [vmem:[#allocation136_spill] sm:$0xff] %v15011_v30  ;;  %18460 = vst [vmem:[#allocation36_spill] sm:$0xff] %v15013_v23  ;;  %v6302_v17 = vadd.f32 %v6238_v10, %v6166_v61  ;;  %v4757_v46 = vrot.slane %v15011_v30, 7  ;;  %v6490_v56 = vpack.c.bf16 %v6442_v60, %v6440_v45  ;;  %v15029_v3 = vmul.f32 %v12951_v9, %v15011_v30  ;;  %v18469_v60 = vld [vmem:[#allocation26_spill] sm:$0xff] }
 0x49c   : > { %18461 = vst [vmem:[#allocation12_spill] sm:$0xff] %v15019_v62  ;;  %18462 = vst [vmem:[#allocation14_spill] sm:$0xff] %v15023_v13  ;;  %v6300_v54 = vadd.f32 %v6236_v19, %v6164_v34  ;;  %v15034_v12 = vmul.f32 %v12955_v20, %v15011_v30  ;;  %v4788_v42 = vrot.slane %v15013_v23, 7  ;;  %v5312_v19 = vmul.f32 %v12931_v28, %v15013_v23  ;;  %v18488_v62 = vld [vmem:[#allocation38_spill] sm:$0xff] }
 0x49d   : > { %18463 = vst [vmem:[#allocation122_spill] sm:$0xff] %v15029_v3  ;;  %v6377_v10 = vadd.f32 %v13523_v18, %v6302_v17  ;;  %6813 = vmatprep.mubr.bf16.mxu0 %v6490_v56  ;;  %v15043_v8 = vmul.f32 %v12941_v33, %v15013_v23  ;;  %v15045_v43 = vmax.f32 %v4650_v2, 0.0  ;;  %v15057_v61 = vmul.f32 %v18002_v51, %v18469_v60  ;;  %v18497_v3 = vld [vmem:[#allocation128_spill] sm:$0xff] }
 0x49e   : > { %18464 = vst [vmem:[#allocation73_spill] sm:$0xff] %v15034_v12  ;;  %v6375_v5 = vadd.f32 %v13523_v18, %v6300_v54  ;;  %v15049_v16 = vsel %vm1304_vm4, %v4756_v29, %v4788_v42  ;;  %v15053_v41 = vsel %vm1304_vm4, %v4788_v42, %v4756_v29 }
 0x49f   : > { %18465 = vst [vmem:[#allocation46_spill] sm:$0xff] %v15043_v8  ;;  %18466 = vst [vmem:[#allocation127_spill] sm:$0xff] %v15045_v43  ;;  %v6441_v0 = vmax.f32 %v6377_v10, 0.0  ;;  %v5178_v34 = vmul.f32 %v12963_v1, %v15049_v16  ;;  %v15063_v2 = vmul.f32 %v13011_v49, %v15049_v16  ;;  %v4789_v17 = vrot.slane %v15045_v43, 7  ;;  %v18472_v10 = vld [vmem:[#allocation144_spill] sm:$0xff] }
 0x4a0   : > { %18467 = vst [vmem:[#allocation129_spill] sm:$0xff] %v15049_v16  ;;  %18468 = vst [vmem:[#allocation72_spill] sm:$0xff] %v15053_v41  ;;  %v6439_v45 = vmax.f32 %v6375_v5, 0.0  ;;  %v5313_v29 = vmul.f32 %v12951_v9, %v15045_v43  ;;  %v15071_v54 = vmul.f32 %v12955_v20, %v15045_v43  ;;  %v18473_v42 = vrot.slane %v18472_v10, 1  ;;  %v18474_v5 = vld [vmem:[#allocation94_spill] sm:$0xff]  ;;  %v18501_v43 = vld [vmem:[#allocation97_spill] sm:$0xff] }
 0x4a1   : > { %18470 = vst [vmem:[#allocation9_spill] sm:$0xff] %v15063_v2  ;;  %v18475_v60 = vrot.slane %v18474_v5, 1  ;;  %v15079_v27 = vadd.f32 %v5312_v19, %v5178_v34  ;;  %v15083_v56 = vsel %vm1304_vm4, %v4757_v46, %v4789_v17  ;;  %v15087_v13 = vsel %vm1304_vm4, %v4789_v17, %v4757_v46  ;;  %v18482_v17 = vld [vmem:[#allocation17_spill] sm:$0xff] }
 0x4a2   : > { %18471 = vst [vmem:[#allocation134_spill] sm:$0xff] %v15071_v54  ;;  %v6489_v40 = vpack.c.bf16 %v6441_v0, %v6439_v45  ;;  %18477 = vst [vmem:[#allocation124_spill] sm:$0xff] %v15083_v56  ;;  %v5179_v8 = vmul.f32 %v13039_v35, %v15083_v56  ;;  %v15093_v2 = vmul.f32 %v13048_v57, %v15083_v56  ;;  %v18481_v19 = vrot.slane %v18472_v10, 1  ;;  %v18484_v54 = vld [vmem:[#allocation104_spill] sm:$0xff] }
 0x4a3   : > { %v5007_v38 = vsel %vm1505_vm5, %v18475_v60, %v18473_v42  ;;  %18476 = vst [vmem:[#allocation74_spill] sm:$0xff] %v15079_v27  ;;  %18478 = vst [vmem:[#allocation120_spill] sm:$0xff] %v15087_v13  ;;  %v18480_v42 = vmov %v18475_v60  ;;  %v5165_v45 = vmul.f32 %v13039_v35, %v15057_v61  ;;  %v5493_v60 = vadd.f32 %v14721_v26, %v18482_v17  ;;  %v18485_v26 = vld [vmem:[#allocation93_spill] sm:$0xff] }
 0x4a4   : > { %18479 = vst [vmem:[#allocation109_spill] sm:$0xff] %v15093_v2  ;;  %v5039_v0 = vsel %vm1505_vm5, %v18481_v19, %v18480_v42  ;;  %6814 = vmatmul.mubr.bf16.gmra.mrb[92].mxu0 %v6489_v40  ;;  %v5435_v34 = vmul.f32 %v13044_v7, %v5007_v38  ;;  %v5563_v27 = vmul.f32 %v13048_v57, %v14891_v4 }
 0x4a5   : > { %v15104_v46 = vmul.f32 %v18003_v48, %v5039_v0  ;;  %v15111_v12 = vadd.f32 %v5313_v29, %v5179_v8  ;;  %v5363_v2 = vadd.f32 %v18484_v54, %v5165_v45  ;;  %v5837_v42 = vmul.f32 %v13052_v37, %v14911_v6  ;;  %v18486_v29 = vld [vmem:[#allocation32_spill] sm:$0xff] }
 0x4a6   : > { %v15117_v40 = vmul.f32 %v13052_v37, %v5007_v38  ;;  %v5627_v0 = vadd.f32 %v5563_v27, %v14727_v53  ;;  %v5629_v17 = vadd.f32 %v18485_v26, %v5493_v60  ;;  %v5971_v4 = vmul.f32 %v13091_v21, %v15057_v61  ;;  %v18490_v26 = vld [vmem:[#allocation49_spill] sm:$0xff] }
 0x4a7   : > { %18483 = vst [vmem:[#allocation100_spill] sm:$0xff] %v15111_v12  ;;  %v15121_v19 = vmul.f32 %v13044_v7, %v15104_v46  ;;  %v15127_v8 = vadd.f32 %v5435_v34, %v5363_v2  ;;  %v5973_v54 = vmul.f32 %v13091_v21, %v18486_v29  ;;  %v6107_v6 = vmul.f32 %v13510_v59, %v18474_v5  ;;  %v18487_v12 = vld [vmem:[#allocation130_spill] sm:$0xff]  ;;  %v18489_v2 = vld [vmem:[#allocation75_spill] sm:$0xff] }
 0x4a8   : > { %v6109_v45 = vmul.f32 %v13510_v59, %v18472_v10  ;;  %v5763_v16 = vadd.f32 %v18487_v12, %v5627_v0  ;;  %v5765_v53 = vadd.f32 %v18488_v62, %v5629_v17  ;;  %v6241_v27 = vmul.f32 %v14509_v44, %v5007_v38  ;;  %v18496_v0 = vld [vmem:[#allocation67_spill] sm:$0xff] }
 0x4a9   : > { %v6243_v60 = vmul.f32 %v14509_v44, %v15104_v46  ;;  %v15142_v34 = vmul.f32 %v18002_v51, %v18489_v2  ;;  %v18491_v29 = vrot.slane %v18490_v26, 1  ;;  %v18493_v5 = vrot.slane %v18492_v14, 1 }
 0x4aa   : > { %v5492_v17 = vadd.f32 %v14776_v24, %v18496_v0  ;;  %v5899_v2 = vadd.f32 %v14921_v11, %v5763_v16  ;;  %v5901_v23 = vadd.f32 %v5837_v42, %v5765_v53  ;;  %v18498_v42 = vld [vmem:[#allocation34_spill] sm:$0xff]  ;;  %v18499_v0 = vld [vmem:[#allocation103_spill] sm:$0xff] }
 0x4ab   : > { %v5006_v10 = vsel %vm1505_vm5, %v18493_v5, %v18491_v29  ;;  %v18494_v12 = vmov %v18493_v5  ;;  %v18495_v62 = vmov %v18491_v29  ;;  %v5164_v29 = vmul.f32 %v12963_v1, %v15142_v34 }
 0x4ac   : > { %v5038_v38 = vsel %vm1505_vm5, %v18495_v62, %v18494_v12  ;;  %v5434_v56 = vmul.f32 %v18116_v15, %v5006_v10  ;;  %v5562_v5 = vmul.f32 %v13011_v49, %v14946_v58  ;;  %v5628_v30 = vadd.f32 %v18497_v3, %v5492_v17 }
 0x4ad   : > { %v15160_v41 = vmul.f32 %v18003_v48, %v5038_v38  ;;  %v5836_v12 = vmul.f32 %v18115_v55, %v14965_v25  ;;  %v6035_v24 = vadd.f32 %v5971_v4, %v5899_v2  ;;  %v6037_v62 = vadd.f32 %v5973_v54, %v5901_v23  ;;  %v18500_v4 = vld [vmem:[#allocation139_spill] sm:$0xff] }
 0x4ae   : > { %v15175_v16 = vmul.f32 %v18115_v55, %v5006_v10  ;;  %v5362_v53 = vadd.f32 %v18498_v42, %v5164_v29  ;;  %v5626_v38 = vadd.f32 %v5562_v5, %v14794_v39  ;;  %v5764_v58 = vadd.f32 %v18499_v0, %v5628_v30  ;;  %v18503_v0 = vld [vmem:[#allocation113_spill] sm:$0xff] }
 0x4af   : > { %v15172_v11 = vmul.f32 %v18116_v15, %v15160_v41  ;;  %v5970_v3 = vmul.f32 %v13029_v50, %v15142_v34  ;;  %v6169_v17 = vadd.f32 %v6107_v6, %v6035_v24  ;;  %v6171_v25 = vadd.f32 %v6109_v45, %v6037_v62  ;;  %v18502_v45 = vld [vmem:[#allocation63_spill] sm:$0xff] }
 0x4b0   : > { %v5972_v23 = vmul.f32 %v13029_v50, %v18500_v4  ;;  %v6106_v54 = vmul.f32 %v18124_v31, %v18492_v14  ;;  %v15186_v2 = vadd.f32 %v5434_v56, %v5362_v53  ;;  %v5762_v13 = vadd.f32 %v18501_v43, %v5626_v38  ;;  %v18504_v56 = vld [vmem:[#allocation84_spill] sm:$0xff] }
 0x4b1   : > { %v5900_v29 = vadd.f32 %v5836_v12, %v5764_v58  ;;  %v6108_v39 = vmul.f32 %v18124_v31, %v18490_v26  ;;  %v6305_v30 = vadd.f32 %v6241_v27, %v6169_v17  ;;  %v6307_v5 = vadd.f32 %v6243_v60, %v6171_v25  ;;  %v18505_v27 = vld [vmem:[#allocation133_spill] sm:$0xff] }
 0x4b2   : > { %v6240_v42 = vmul.f32 %v14577_v22, %v5006_v10  ;;  %v6242_v6 = vmul.f32 %v14577_v22, %v15160_v41  ;;  %v5898_v24 = vadd.f32 %v18502_v45, %v5762_v13  ;;  %v4651_v14 = vadd.f32 %v12927_v63, %v18503_v0  ;;  %v18506_v10 = vld [vmem:[#allocation66_spill] sm:$0xff] }
 0x4b3   : > { %v6036_v62 = vadd.f32 %v5972_v23, %v5900_v29  ;;  %v4652_v43 = vadd.f32 %v12947_v32, %v18504_v56  ;;  %v6380_v12 = vadd.f32 %v13530_v47, %v6305_v30  ;;  %v6382_v26 = vadd.f32 %v13530_v47, %v6307_v5 }
 0x4b4   : > { %v4653_v60 = vadd.f32 %v12927_v63, %v18505_v27  ;;  %v4654_v53 = vadd.f32 %v12947_v32, %v18506_v10  ;;  %v6034_v38 = vadd.f32 %v5970_v3, %v5898_v24  ;;  %v15205_v13 = vmax.f32 %v4651_v14, 0.0 }
 0x4b5   : > { %v6170_v58 = vadd.f32 %v6108_v39, %v6036_v62  ;;  %v15207_v17 = vmax.f32 %v4652_v43, 0.0  ;;  %v6444_v25 = vmax.f32 %v6380_v12, 0.0  ;;  %v6446_v4 = vmax.f32 %v6382_v26, 0.0 }
 0x4b6   : > { %18507 = vst [vmem:[#allocation60_spill] sm:$0xff] %v15205_v13  ;;  %v15209_v23 = vmax.f32 %v4653_v60, 0.0  ;;  %v15211_v29 = vmax.f32 %v4654_v53, 0.0  ;;  %v6168_v30 = vadd.f32 %v6106_v54, %v6034_v38  ;;  %v4758_v45 = vrot.slane %v15205_v13, 7  ;;  %v18524_v54 = vld [vmem:[#allocation57_spill] sm:$0xff] }
 0x4b7   : > { %18508 = vst [vmem:[#allocation76_spill] sm:$0xff] %v15207_v17  ;;  %v6306_v5 = vadd.f32 %v6242_v6, %v6170_v58  ;;  %v6492_v56 = vpack.c.bf16 %v6446_v4, %v6444_v25  ;;  %v15217_v3 = vmul.f32 %v12931_v28, %v15205_v13  ;;  %v15221_v39 = vmul.f32 %v12941_v33, %v15205_v13 }
 0x4b8   : > { %18509 = vst [vmem:[#allocation42_spill] sm:$0xff] %v15209_v23  ;;  %18510 = vst [vmem:[#allocation105_spill] sm:$0xff] %v15211_v29  ;;  %v4759_v24 = vrot.slane %v15207_v17, 7  ;;  %v6304_v62 = vadd.f32 %v6240_v42, %v6168_v30  ;;  %v15228_v6 = vmul.f32 %v12951_v9, %v15207_v17  ;;  %v15232_v43 = vmul.f32 %v12955_v20, %v15207_v17 }
 0x4b9   : > { %18511 = vst [vmem:[#allocation110_spill] sm:$0xff] %v15217_v3  ;;  %18512 = vst [vmem:[#allocation31_spill] sm:$0xff] %v15221_v39  ;;  %v6381_v14 = vadd.f32 %v13523_v18, %v6306_v5  ;;  %6823 = vmatprep.mubr.bf16.mxu0 %v6492_v56  ;;  %v4790_v12 = vrot.slane %v15209_v23, 7  ;;  %v5316_v42 = vmul.f32 %v12931_v28, %v15209_v23  ;;  %v4791_v53 = vrot.slane %v15211_v29, 7  ;;  %v18527_v39 = vld [vmem:[#allocation39_spill] sm:$0xff] }
 0x4ba   : > { %18513 = vst [vmem:[#allocation68_spill] sm:$0xff] %v15228_v6  ;;  %18514 = vst [vmem:[#allocation25_spill] sm:$0xff] %v15232_v43  ;;  %v6379_v27 = vadd.f32 %v13523_v18, %v6304_v62  ;;  %v15241_v10 = vmul.f32 %v12941_v33, %v15209_v23  ;;  %v5317_v4 = vmul.f32 %v12951_v9, %v15211_v29  ;;  %v18545_v6 = vld [vmem:[#allocation29_spill] sm:$0xff] }
 0x4bb   : > { %v6445_v60 = vmax.f32 %v6381_v14, 0.0  ;;  %v15246_v38 = vsel %vm1304_vm4, %v4758_v45, %v4790_v12  ;;  %v15250_v58 = vsel %vm1304_vm4, %v4790_v12, %v4758_v45  ;;  %v15263_v62 = vsel %vm1304_vm4, %v4759_v24, %v4791_v53 }
 0x4bc   : > { %18515 = vst [vmem:[#allocation98_spill] sm:$0xff] %v15241_v10  ;;  %18516 = vst [vmem:[#allocation88_spill] sm:$0xff] %v15246_v38  ;;  %v6443_v30 = vmax.f32 %v6379_v27, 0.0  ;;  %v5182_v5 = vmul.f32 %v12963_v1, %v15246_v38  ;;  %v15259_v56 = vmul.f32 %v13011_v49, %v15246_v38  ;;  %v15267_v45 = vsel %vm1304_vm4, %v4791_v53, %v4759_v24  ;;  %v18525_v24 = vld [vmem:[#allocation56_spill] sm:$0xff] }
 0x4bd   : > { %18517 = vst [vmem:[#allocation137_spill] sm:$0xff] %v15250_v58  ;;  %18519 = vst [vmem:[#allocation125_spill] sm:$0xff] %v15263_v62  ;;  %v5183_v14 = vmul.f32 %v13039_v35, %v15263_v62  ;;  %v15273_v12 = vmul.f32 %v13048_v57, %v15263_v62  ;;  %v15277_v27 = vmul.f32 %v12955_v20, %v15211_v29  ;;  %v18526_v53 = vrot.slane %v18525_v24, 1  ;;  %v18542_v62 = vld [vmem:[#allocation61_spill] sm:$0xff] }
 0x4be   : > { %18518 = vst [vmem:[#allocation108_spill] sm:$0xff] %v15259_v56  ;;  %18520 = vst [vmem:[#allocation140_spill] sm:$0xff] %v15267_v45  ;;  %v6491_v0 = vpack.c.bf16 %v6445_v60, %v6443_v30  ;;  %v15279_v26 = vadd.f32 %v5316_v42, %v5182_v5  ;;  %v15283_v25 = vmul.f32 %v18002_v51, %v18524_v54  ;;  %v18528_v10 = vrot.slane %v18527_v39, 1  ;;  %v18532_v54 = vld [vmem:[#allocation22_spill] sm:$0xff]  ;;  %v18533_v30 = vld [vmem:[#allocation44_spill] sm:$0xff] }
 0x4bf   : > { %18521 = vst [vmem:[#allocation96_spill] sm:$0xff] %v15273_v12  ;;  %18522 = vst [vmem:[#allocation41_spill] sm:$0xff] %v15277_v27  ;;  %v15291_v43 = vadd.f32 %v5317_v4, %v5183_v14  ;;  %v18531_v27 = vmov %v18526_v53  ;;  %v5497_v5 = vadd.f32 %v18533_v30, %v18532_v54  ;;  %v5567_v4 = vmul.f32 %v13048_v57, %v15057_v61  ;;  %v18535_v54 = vld [vmem:[#allocation83_spill] sm:$0xff]  ;;  %v18536_v30 = vld [vmem:[#allocation53_spill] sm:$0xff] }
 0x4c0   : > { %18523 = vst [vmem:[#allocation10_spill] sm:$0xff] %v15279_v26  ;;  %v5009_v56 = vsel %vm1505_vm5, %v18528_v10, %v18526_v53  ;;  %v18530_v12 = vmov %v18528_v10  ;;  %6824 = vmatmul.mubr.bf16.gmra.mrb[96].mxu0 %v6491_v0  ;;  %v5169_v10 = vmul.f32 %v13039_v35, %v15283_v25  ;;  %v5841_v14 = vmul.f32 %v13052_v37, %v15104_v46  ;;  %v18534_v53 = vld [vmem:[#allocation30_spill] sm:$0xff]  ;;  %v18538_v61 = vld [vmem:[#allocation52_spill] sm:$0xff] }
 0x4c1   : > { %18529 = vst [vmem:[#allocation119_spill] sm:$0xff] %v15291_v43  ;;  %v5041_v42 = vsel %vm1505_vm5, %v18531_v27, %v18530_v12  ;;  %v5439_v60 = vmul.f32 %v13044_v7, %v5009_v56  ;;  %v5633_v12 = vadd.f32 %v18534_v53, %v5497_v5  ;;  %v15313_v27 = vmul.f32 %v13052_v37, %v5009_v56  ;;  %v18539_v5 = vld [vmem:[#allocation80_spill] sm:$0xff] }
 0x4c2   : > { %v15303_v26 = vmul.f32 %v18003_v48, %v5041_v42  ;;  %v5975_v0 = vmul.f32 %v13091_v21, %v15283_v25  ;;  %v5977_v42 = vmul.f32 %v13091_v21, %v18535_v54  ;;  %v5367_v43 = vadd.f32 %v18536_v30, %v5169_v10  ;;  %v18541_v30 = vld [vmem:[#allocation35_spill] sm:$0xff] }
 0x4c3   : > { %v5631_v3 = vadd.f32 %v5567_v4, %v18538_v61  ;;  %v6111_v46 = vmul.f32 %v13510_v59, %v18527_v39  ;;  %v5769_v53 = vadd.f32 %v18539_v5, %v5633_v12  ;;  %v6113_v13 = vmul.f32 %v13510_v59, %v18525_v24  ;;  %v18543_v61 = vld [vmem:[#allocation54_spill] sm:$0xff] }
 0x4c4   : > { %v15322_v38 = vmul.f32 %v13044_v7, %v15303_v26  ;;  %v6245_v23 = vmul.f32 %v14509_v44, %v5009_v56  ;;  %v6247_v54 = vmul.f32 %v14509_v44, %v15303_v26  ;;  %v15333_v10 = vadd.f32 %v5439_v60, %v5367_v43  ;;  %v18549_v60 = vld [vmem:[#allocation87_spill] sm:$0xff] }
 0x4c5   : > { %v5767_v58 = vadd.f32 %v18541_v30, %v5631_v3  ;;  %v15338_v4 = vmul.f32 %v18002_v51, %v18542_v62  ;;  %v18544_v39 = vrot.slane %v18543_v61, 1  ;;  %v18546_v12 = vrot.slane %v18545_v6, 1  ;;  %v18550_v62 = vld [vmem:[#allocation19_spill] sm:$0xff] }
 0x4c6   : > { %18537 = vst [vmem:[#allocation123_spill] sm:$0xff] %v15322_v38  ;;  %18540 = vst [vmem:[#allocation55_spill] sm:$0xff] %v15333_v10  ;;  %v5905_v5 = vadd.f32 %v5841_v14, %v5769_v53  ;;  %v5496_v30 = vadd.f32 %v18550_v62, %v18549_v60  ;;  %v5566_v53 = vmul.f32 %v13011_v49, %v15142_v34  ;;  %v18554_v34 = vld [vmem:[#allocation126_spill] sm:$0xff] }
 0x4c7   : > { %v5008_v24 = vsel %vm1505_vm5, %v18546_v12, %v18544_v39  ;;  %v18547_v56 = vmov %v18546_v12  ;;  %v18548_v44 = vmov %v18544_v39  ;;  %v5903_v17 = vadd.f32 %v15117_v40, %v5767_v58  ;;  %v18551_v12 = vld [vmem:[#allocation43_spill] sm:$0xff]  ;;  %v18552_v40 = vld [vmem:[#allocation65_spill] sm:$0xff] }
 0x4c8   : > { %v5040_v43 = vsel %vm1505_vm5, %v18548_v44, %v18547_v56  ;;  %v5438_v3 = vmul.f32 %v18116_v15, %v5008_v24  ;;  %v5168_v14 = vmul.f32 %v12963_v1, %v15338_v4  ;;  %v6041_v39 = vadd.f32 %v5977_v42, %v5905_v5 }
 0x4c9   : > { %v15357_v29 = vmul.f32 %v18003_v48, %v5040_v43  ;;  %v5632_v45 = vadd.f32 %v18551_v12, %v5496_v30  ;;  %v5840_v56 = vmul.f32 %v18115_v55, %v15160_v41  ;;  %v15367_v44 = vmul.f32 %v18115_v55, %v5008_v24  ;;  %v18555_v30 = vld [vmem:[#allocation40_spill] sm:$0xff] }
 0x4ca   : > { %v6039_v60 = vadd.f32 %v5975_v0, %v5903_v17  ;;  %v5366_v58 = vadd.f32 %v18552_v40, %v5168_v14  ;;  %v5630_v62 = vadd.f32 %v5566_v53, %v14988_v52  ;;  %v6175_v10 = vadd.f32 %v6113_v13, %v6041_v39  ;;  %v18556_v17 = vld [vmem:[#allocation111_spill] sm:$0xff] }
 0x4cb   : > { %v15372_v43 = vmul.f32 %v18116_v15, %v15357_v29  ;;  %v5768_v42 = vadd.f32 %v18554_v34, %v5632_v45  ;;  %v5974_v5 = vmul.f32 %v13029_v50, %v15338_v4  ;;  %v5976_v41 = vmul.f32 %v13029_v50, %v18555_v30 }
 0x4cc   : > { %v6173_v12 = vadd.f32 %v6111_v46, %v6039_v60  ;;  %v15380_v38 = vadd.f32 %v5438_v3, %v5366_v58  ;;  %v5766_v0 = vadd.f32 %v18556_v17, %v5630_v62  ;;  %v6110_v14 = vmul.f32 %v18124_v31, %v18545_v6  ;;  %v18557_v3 = vld [vmem:[#allocation71_spill] sm:$0xff]  ;;  %v15393_v60 = vpop.f32.mrb[64].mxu0  ;;  %v18563_v62 = vld [vmem:[#allocation78_spill] sm:$0xff] }
 0x4cd   : > { %18553 = vst [vmem:[#allocation114_spill] sm:$0xff] %v15372_v43  ;;  %v6311_v40 = vadd.f32 %v6247_v54, %v6175_v10  ;;  %v5904_v43 = vadd.f32 %v5840_v56, %v5768_v42  ;;  %v6112_v52 = vmul.f32 %v18124_v31, %v18543_v61  ;;  %v6244_v13 = vmul.f32 %v14577_v22, %v5008_v24  ;;  %v18559_v10 = vld [vmem:[#allocation50_spill] sm:$0xff] }
 0x4ce   : > { %v6309_v45 = vadd.f32 %v6245_v23, %v6173_v12  ;;  %v5902_v53 = vadd.f32 %v15175_v16, %v5766_v0  ;;  %v6246_v46 = vmul.f32 %v14577_v22, %v15357_v29  ;;  %v4655_v39 = vadd.f32 %v12927_v63, %v18557_v3  ;;  %18558 = vst [vmem:[#allocation37_spill] sm:$0xff] %v15393_v60  ;;  %v18560_v61 = vld [vmem:[#allocation106_spill] sm:$0xff]  ;;  %v15400_v23 = vpop.f32.mrb[65].mxu0 }
 0x4cf   : > { %v6386_v6 = vadd.f32 %v13530_v47, %v6311_v40  ;;  %v6040_v54 = vadd.f32 %v5976_v41, %v5904_v43  ;;  %v4656_v56 = vadd.f32 %v12947_v32, %v18559_v10  ;;  %v4657_v24 = vadd.f32 %v12927_v63, %v18560_v61  ;;  %18561 = vst [vmem:[#allocation132_spill] sm:$0xff] %v15400_v23  ;;  %v15407_v42 = vpop.f32.mrb[66].mxu0  ;;  %v18579_v10 = vld [vmem:[#allocation118_spill] sm:$0xff]  ;;  %v18581_v23 = vld [vmem:[#allocation112_spill] sm:$0xff] }
 0x4d0   : > { %v6384_v16 = vadd.f32 %v13530_v47, %v6309_v45  ;;  %v6038_v58 = vadd.f32 %v5974_v5, %v5902_v53  ;;  %v15403_v22 = vmax.f32 %v4655_v39, 0.0  ;;  %v4658_v34 = vadd.f32 %v12947_v32, %v18563_v62  ;;  %18564 = vst [vmem:[#allocation15_spill] sm:$0xff] %v15407_v42  ;;  %v15413_v17 = vpop.f32.mrb[67].mxu0 }
 0x4d1   : > { %v6450_v30 = vmax.f32 %v6386_v6, 0.0  ;;  %v6174_v43 = vadd.f32 %v6112_v52, %v6040_v54  ;;  %v15409_v41 = vmax.f32 %v4656_v56, 0.0  ;;  %v15411_v12 = vmax.f32 %v4657_v24, 0.0  ;;  %18567 = vst [vmem:[#allocation21_spill] sm:$0xff] %v15413_v17 }
 0x4d2   : > { %18562 = vst [vmem:[#allocation89_spill] sm:$0xff] %v15403_v22  ;;  %v6448_v0 = vmax.f32 %v6384_v16, 0.0  ;;  %v6172_v40 = vadd.f32 %v6110_v14, %v6038_v58  ;;  %v4760_v45 = vrot.slane %v15403_v22, 7  ;;  %v16808_v5 = vrot.slane %v15403_v22, 1 }
 0x4d3   : > { %18565 = vst [vmem:[#allocation86_spill] sm:$0xff] %v15409_v41  ;;  %18566 = vst [vmem:[#allocation99_spill] sm:$0xff] %v15411_v12  ;;  %v6310_v53 = vadd.f32 %v6246_v46, %v6174_v43  ;;  %v15419_v3 = vmul.f32 %v12931_v28, %v15403_v22  ;;  %v15423_v52 = vmul.f32 %v12941_v33, %v15403_v22  ;;  %v4761_v39 = vrot.slane %v15409_v41, 7 }
 0x4d4   : > { %v6494_v6 = vpack.c.bf16 %v6450_v30, %v6448_v0  ;;  %v6308_v54 = vadd.f32 %v6244_v13, %v6172_v40  ;;  %v15429_v14 = vmul.f32 %v12951_v9, %v15409_v41  ;;  %v15434_v56 = vmul.f32 %v12955_v20, %v15409_v41 }
 0x4d5   : > { %18568 = vst [vmem:[#allocation121_spill] sm:$0xff] %v15419_v3  ;;  %18569 = vst [vmem:[#allocation143_spill] sm:$0xff] %v15423_v52  ;;  %v6385_v46 = vadd.f32 %v13523_v18, %v6310_v53  ;;  %v4792_v61 = vrot.slane %v15411_v12, 7  ;;  %v16809_v24 = vrot.slane %v15411_v12, 1  ;;  %v5320_v13 = vmul.f32 %v12931_v28, %v15411_v12 }
 0x4d6   : > { %18570 = vst [vmem:[#allocation28_spill] sm:$0xff] %v15429_v14  ;;  %18571 = vst [vmem:[#allocation135_spill] sm:$0xff] %v15434_v56  ;;  %6833 = vmatprep.mubr.bf16.mxu0 %v6494_v6  ;;  %v6383_v16 = vadd.f32 %v13523_v18, %v6308_v54  ;;  %v15443_v58 = vmul.f32 %v12941_v33, %v15411_v12  ;;  %v15445_v62 = vmax.f32 %v4658_v34, 0.0  ;;  %v18580_v17 = vrot.slane %v18579_v10, 1 }
 0x4d7   : > { %v6449_v30 = vmax.f32 %v6385_v46, 0.0  ;;  %v15449_v43 = vsel %vm1304_vm4, %v4760_v45, %v4792_v61  ;;  %v15453_v0 = vsel %vm1304_vm4, %v4792_v61, %v4760_v45  ;;  %v5048_v28 = vsel %vm1505_vm5, %v16809_v24, %v16808_v5  ;;  %v18578_v5 = vld [vmem:[#allocation92_spill] sm:$0xff] }
 0x4d8   : > { %18572 = vst [vmem:[#allocation142_spill] sm:$0xff] %v15443_v58  ;;  %18573 = vst [vmem:[#allocation85_spill] sm:$0xff] %v15445_v62  ;;  %v6447_v40 = vmax.f32 %v6383_v16, 0.0  ;;  %v15462_v34 = vmul.f32 %v18003_v48, %v5048_v28  ;;  %v5186_v53 = vmul.f32 %v12963_v1, %v15449_v43  ;;  %v15468_v6 = vmul.f32 %v13011_v49, %v15449_v43 }
 0x4d9   : > { %18574 = vst [vmem:[#allocation82_spill] sm:$0xff] %v15449_v43  ;;  %18575 = vst [vmem:[#allocation138_spill] sm:$0xff] %v15453_v0  ;;  %v4793_v45 = vrot.slane %v15445_v62, 7  ;;  %v5321_v46 = vmul.f32 %v12951_v9, %v15445_v62  ;;  %v15476_v61 = vmul.f32 %v12955_v20, %v15445_v62  ;;  %v15482_v24 = vmul.f32 %v18002_v51, %v18578_v5  ;;  %v18604_v0 = vld [vmem:[#allocation81_spill] sm:$0xff] }
 0x4da   : > { %18576 = vst [vmem:[#allocation26_spill] sm:$0xff] %v15468_v6  ;;  %v6493_v16 = vpack.c.bf16 %v6449_v30, %v6447_v40  ;;  %v15478_v28 = vadd.f32 %v5320_v13, %v5186_v53  ;;  %v18582_v42 = vrot.slane %v18581_v23, 1  ;;  %v18585_v13 = vrot.slane %v15409_v41, 1 }
 0x4db   : > { %18577 = vst [vmem:[#allocation144_spill] sm:$0xff] %v15476_v61  ;;  %v15492_v9 = vsel %vm1304_vm4, %v4761_v39, %v4793_v45  ;;  %v15496_v30 = vsel %vm1304_vm4, %v4793_v45, %v4761_v39  ;;  %v18586_v5 = vrot.slane %v15445_v62, 1  ;;  %v18588_v60 = vmov %v18580_v17  ;;  %v18609_v62 = vld [vmem:[#allocation91_spill] sm:$0xff] }
 0x4dc   : > { %v5011_v54 = vsel %vm1505_vm5, %v18582_v42, %v18580_v17  ;;  %18583 = vst [vmem:[#allocation94_spill] sm:$0xff] %v15492_v9  ;;  %18584 = vst [vmem:[#allocation17_spill] sm:$0xff] %v15496_v30  ;;  %v18587_v53 = vmov %v18582_v42  ;;  %v15510_v17 = vpop.f32.mrb[68].mxu0  ;;  %6834 = vmatmul.mubr.bf16.gmra.mrb[100].mxu0 %v6493_v16  ;;  %v5187_v45 = vmul.f32 %v13039_v35, %v15492_v9 }
 0x4dd   : > { %v5049_v40 = vsel %vm1505_vm5, %v18586_v5, %v18585_v13  ;;  %v5043_v42 = vsel %vm1505_vm5, %v18588_v60, %v18587_v53  ;;  %18589 = vst [vmem:[#allocation104_spill] sm:$0xff] %v15510_v17  ;;  %v15519_v52 = vmul.f32 %v13048_v57, %v15492_v9  ;;  %v15524_v5 = vpop.f32.mrb[69].mxu0  ;;  %v5173_v60 = vmul.f32 %v13039_v35, %v15482_v24  ;;  %v18592_v53 = vld [vmem:[#allocation23_spill] sm:$0xff] }
 0x4de   : > { %v15513_v39 = vmul.f32 %v18003_v48, %v5049_v40  ;;  %v15522_v13 = vmul.f32 %v18003_v48, %v5043_v42  ;;  %18591 = vst [vmem:[#allocation32_spill] sm:$0xff] %v15524_v5  ;;  %v5443_v16 = vmul.f32 %v13044_v7, %v5011_v54  ;;  %v5501_v40 = vadd.f32 %v15121_v19, %v18592_v53  ;;  %v15533_v58 = vpop.f32.mrb[70].mxu0  ;;  %v18595_v19 = vld [vmem:[#allocation115_spill] sm:$0xff] }
 0x4df   : > { %18590 = vst [vmem:[#allocation93_spill] sm:$0xff] %v15519_v52  ;;  %v5571_v17 = vmul.f32 %v13048_v57, %v15283_v25  ;;  %18593 = vst [vmem:[#allocation130_spill] sm:$0xff] %v15533_v58  ;;  %v15535_v6 = vadd.f32 %v5321_v46, %v5187_v45  ;;  %v5845_v5 = vmul.f32 %v13052_v37, %v15303_v26  ;;  %v15546_v61 = vpop.f32.mrb[71].mxu0  ;;  %v18596_v52 = vld [vmem:[#allocation107_spill] sm:$0xff]  ;;  %v18605_v9 = vrot.slane %v18604_v0, 1 }
 0x4e0   : > { %v15539_v42 = vmul.f32 %v13044_v7, %v15522_v13  ;;  %v15544_v56 = vmul.f32 %v13052_v37, %v5011_v54  ;;  %18594 = vst [vmem:[#allocation38_spill] sm:$0xff] %v15546_v61  ;;  %v5371_v53 = vadd.f32 %v18595_v19, %v5173_v60  ;;  %v5637_v58 = vadd.f32 %v18596_v52, %v5501_v40  ;;  %v18597_v45 = vld [vmem:[#allocation131_spill] sm:$0xff]  ;;  %v15562_v60 = vld [vmem:[%s16388_s12 + $0x18] ss:$0 sm:$0xff]  ;;  %v18600_v19 = vld [vmem:[#allocation45_spill] sm:$0xff] }
 0x4e1   : > { %v5635_v25 = vadd.f32 %v5571_v17, %v15127_v8  ;;  %v5979_v46 = vmul.f32 %v13091_v21, %v15482_v24  ;;  %v5981_v43 = vmul.f32 %v13091_v21, %v18597_v45  ;;  %v6115_v26 = vmul.f32 %v13510_v59, %v18581_v23  ;;  %v18599_v17 = vld [vmem:[#allocation77_spill] sm:$0xff]  ;;  %v18601_v23 = vld [vmem:[#allocation20_spill] sm:$0xff] }
 0x4e2   : > { %v6117_v3 = vmul.f32 %v13510_v59, %v18579_v10  ;;  %v6249_v8 = vmul.f32 %v15562_v60, %v5011_v54  ;;  %v15565_v52 = vadd.f32 %v5443_v16, %v5371_v53  ;;  %v5773_v61 = vadd.f32 %v18600_v19, %v5637_v58  ;;  %v18602_v10 = vld [vmem:[#allocation116_spill] sm:$0xff] }
 0x4e3   : > { %v5771_v40 = vadd.f32 %v18599_v17, %v5635_v25  ;;  %v6251_v45 = vmul.f32 %v15562_v60, %v15522_v13  ;;  %v15573_v22 = vmul.f32 %v18002_v51, %v18601_v23  ;;  %v18603_v12 = vrot.slane %v18602_v10, 1  ;;  %v18608_v25 = vld [vmem:[#allocation33_spill] sm:$0xff] }
 0x4e4   : > { %18598 = vst [vmem:[#allocation75_spill] sm:$0xff] %v15565_v52  ;;  %v18606_v16 = vmov %v18605_v9  ;;  %v5500_v17 = vadd.f32 %v15172_v11, %v18608_v25  ;;  %v5909_v23 = vadd.f32 %v5845_v5, %v5773_v61  ;;  %v18611_v5 = vld [vmem:[#allocation59_spill] sm:$0xff] }
 0x4e5   : > { %v5010_v54 = vsel %vm1505_vm5, %v18605_v9, %v18603_v12  ;;  %v18607_v53 = vmov %v18603_v12  ;;  %v5907_v19 = vadd.f32 %v15313_v27, %v5771_v40  ;;  %v5172_v12 = vmul.f32 %v12963_v1, %v15573_v22  ;;  %v18612_v25 = vld [vmem:[#allocation51_spill] sm:$0xff] }
 0x4e6   : > { %v5042_v58 = vsel %vm1505_vm5, %v18607_v53, %v18606_v16  ;;  %v5442_v41 = vmul.f32 %v18116_v15, %v5010_v54  ;;  %v5570_v9 = vmul.f32 %v13011_v49, %v15338_v4  ;;  %v5636_v30 = vadd.f32 %v18609_v62, %v5500_v17 }
 0x4e7   : > { %v15591_v14 = vmul.f32 %v18003_v48, %v5042_v58  ;;  %v5844_v16 = vmul.f32 %v18115_v55, %v15357_v29  ;;  %v6043_v11 = vadd.f32 %v5979_v46, %v5907_v19  ;;  %v6045_v53 = vadd.f32 %v5981_v43, %v5909_v23  ;;  %v18613_v46 = vld [vmem:[#allocation58_spill] sm:$0xff] }
 0x4e8   : > { %v15606_v61 = vmul.f32 %v18115_v55, %v5010_v54  ;;  %v5370_v40 = vadd.f32 %v18611_v5, %v5172_v12  ;;  %v5634_v58 = vadd.f32 %v5570_v9, %v15186_v2  ;;  %v5772_v4 = vadd.f32 %v18612_v25, %v5636_v30  ;;  %v18617_v5 = vld [vmem:[#allocation24_spill] sm:$0xff] }
 0x4e9   : > { %v15603_v27 = vmul.f32 %v18116_v15, %v15591_v14  ;;  %v5978_v62 = vmul.f32 %v13029_v50, %v15573_v22  ;;  %v6177_v17 = vadd.f32 %v6115_v26, %v6043_v11  ;;  %v6179_v29 = vadd.f32 %v6117_v3, %v6045_v53  ;;  %v15625_v3 = vld [vmem:[%s16388_s12 + $0x10] ss:$0 sm:$0xff]  ;;  %v18615_v53 = vld [vmem:[#allocation64_spill] sm:$0xff] }
 0x4ea   : > { %v5980_v43 = vmul.f32 %v13029_v50, %v18613_v46  ;;  %v6114_v19 = vmul.f32 %v18124_v31, %v18604_v0  ;;  %v15617_v23 = vadd.f32 %v5442_v41, %v5370_v40  ;;  %v5908_v12 = vadd.f32 %v5844_v16, %v5772_v4 }
 0x4eb   : > { %18610 = vst [vmem:[#allocation49_spill] sm:$0xff] %v15603_v27  ;;  %v18614_v27 = vld [vmem:[#allocation27_spill] sm:$0xff]  ;;  %v6116_v2 = vmul.f32 %v18124_v31, %v18602_v10  ;;  %v6313_v30 = vadd.f32 %v6249_v8, %v6177_v17  ;;  %v6315_v9 = vadd.f32 %v6251_v45, %v6179_v29  ;;  %v6248_v26 = vmul.f32 %v15625_v3, %v5010_v54 }
 0x4ec   : > { %v5770_v52 = vadd.f32 %v18614_v27, %v5634_v58  ;;  %v6250_v0 = vmul.f32 %v15625_v3, %v15591_v14  ;;  %v6044_v11 = vadd.f32 %v5980_v43, %v5908_v12  ;;  %v4659_v16 = vadd.f32 %v12927_v63, %v18615_v53  ;;  %v18616_v27 = vld [vmem:[#allocation18_spill] sm:$0xff] }
 0x4ed   : > { %v4660_v8 = vadd.f32 %v12947_v32, %v18616_v27  ;;  %v6388_v45 = vadd.f32 %v13530_v47, %v6313_v30  ;;  %v6390_v10 = vadd.f32 %v13530_v47, %v6315_v9  ;;  %v4661_v40 = vadd.f32 %v12927_v63, %v18617_v5  ;;  %v18625_v5 = vld [vmem:[#allocation62_spill] sm:$0xff] }
 0x4ee   : > { %v5906_v41 = vadd.f32 %v15367_v44, %v5770_v52  ;;  %v5456_v54 = vmul.f32 %v18116_v15, %v15462_v34  ;;  %v6178_v25 = vadd.f32 %v6116_v2, %v6044_v11  ;;  %v15641_v44 = vmax.f32 %v4659_v16, 0.0 }
 0x4ef   : > { %v15643_v52 = vmax.f32 %v4660_v8, 0.0  ;;  %v6452_v4 = vmax.f32 %v6388_v45, 0.0  ;;  %v6454_v17 = vmax.f32 %v6390_v10, 0.0  ;;  %v15645_v29 = vmax.f32 %v4661_v40, 0.0 }
 0x4f0   : > { %v6042_v58 = vadd.f32 %v5978_v62, %v5906_v41  ;;  %18618 = vst [vmem:[#allocation95_spill] sm:$0xff] %v15641_v44  ;;  %v5520_v46 = vadd.f32 %v5456_v54, %v15478_v28  ;;  %v6314_v12 = vadd.f32 %v6250_v0, %v6178_v25  ;;  %v4762_v30 = vrot.slane %v15641_v44, 7  ;;  %v18627_v25 = vld [vmem:[#allocation120_spill] sm:$0xff] }
 0x4f1   : > { %18619 = vst [vmem:[#allocation67_spill] sm:$0xff] %v15645_v29  ;;  %v6496_v9 = vpack.c.bf16 %v6454_v17, %v6452_v4  ;;  %v15652_v62 = vmul.f32 %v12941_v33, %v15641_v44  ;;  %v15656_v2 = vmul.f32 %v18124_v31, %v15641_v44  ;;  %v4763_v41 = vrot.slane %v15643_v52, 7 }
 0x4f2   : > { %v6176_v43 = vadd.f32 %v6114_v19, %v6042_v58  ;;  %v6389_v28 = vadd.f32 %v13523_v18, %v6314_v12  ;;  %v15663_v0 = vmul.f32 %v12955_v20, %v15643_v52  ;;  %v15667_v53 = vmul.f32 %v13510_v59, %v15643_v52 }
 0x4f3   : > { %18620 = vst [vmem:[#allocation128_spill] sm:$0xff] %v15652_v62  ;;  %18621 = vst [vmem:[#allocation34_spill] sm:$0xff] %v15656_v2  ;;  %6843 = vmatprep.mubr.bf16.mxu0 %v6496_v9  ;;  %v4794_v16 = vrot.slane %v15645_v29, 7  ;;  %v15676_v10 = vmul.f32 %v18124_v31, %v15645_v29  ;;  %v4662_v40 = vadd.f32 %v12947_v32, %v18625_v5  ;;  %v18649_v2 = vld [vmem:[#allocation47_spill] sm:$0xff] }
 0x4f4   : > { %v6312_v11 = vadd.f32 %v6248_v26, %v6176_v43  ;;  %18622 = vst [vmem:[#allocation103_spill] sm:$0xff] %v15663_v0  ;;  %18623 = vst [vmem:[#allocation139_spill] sm:$0xff] %v15667_v53  ;;  %v5728_v26 = vmul.f32 %v12941_v33, %v15645_v29  ;;  %v6453_v45 = vmax.f32 %v6389_v28, 0.0  ;;  %v5457_v33 = vmul.f32 %v13044_v7, %v15513_v39  ;;  %v18631_v28 = vld [vmem:[#allocation136_spill] sm:$0xff] }
 0x4f5   : > { %18624 = vst [vmem:[#allocation97_spill] sm:$0xff] %v15676_v10  ;;  %v15682_v54 = vsel %vm1304_vm4, %v4762_v30, %v4794_v16  ;;  %v4858_v58 = vsel %vm1304_vm4, %v4794_v16, %v4762_v30  ;;  %v15690_v4 = vmul.f32 %v18002_v51, %v18627_v25  ;;  %v15697_v12 = vmax.f32 %v4662_v40, 0.0 }
 0x4f6   : > { %v6387_v8 = vadd.f32 %v13523_v18, %v6312_v11  ;;  %18626 = vst [vmem:[#allocation63_spill] sm:$0xff] %v15682_v54  ;;  %v15693_v43 = vmul.f32 %v18002_v51, %v4858_v58  ;;  %v5592_v32 = vmul.f32 %v13011_v49, %v15682_v54  ;;  %v5521_v9 = vadd.f32 %v5457_v33, %v15535_v6  ;;  %v18629_v11 = vld [vmem:[#allocation127_spill] sm:$0xff] }
 0x4f7   : > { %v18630_v30 = vrot.slane %v18629_v11, 1  ;;  %v18632_v16 = vrot.slane %v18631_v28, 1  ;;  %v5177_v40 = vmul.f32 %v13039_v35, %v15690_v4  ;;  %v4795_v27 = vrot.slane %v15697_v12, 7 }
 0x4f8   : > { %v6451_v17 = vmax.f32 %v6387_v8, 0.0  ;;  %18628 = vst [vmem:[#allocation113_spill] sm:$0xff] %v15693_v43  ;;  %v15716_v6 = vmul.f32 %v13011_v49, %v15693_v43  ;;  %v5656_v33 = vadd.f32 %v5592_v32, %v5520_v46  ;;  %v15724_v19 = vmul.f32 %v13510_v59, %v15697_v12 }
 0x4f9   : > { %v5013_v5 = vsel %vm1505_vm5, %v18632_v16, %v18630_v30  ;;  %v18633_v25 = vmov %v18632_v16  ;;  %v18634_v8 = vmov %v18630_v30  ;;  %v5729_v16 = vmul.f32 %v12955_v20, %v15697_v12  ;;  %v18640_v20 = vld [vmem:[#allocation122_spill] sm:$0xff] }
 0x4fa   : > { %v5045_v58 = vsel %vm1505_vm5, %v18634_v8, %v18633_v25  ;;  %v6495_v63 = vpack.c.bf16 %v6453_v45, %v6451_v17  ;;  %18635 = vst [vmem:[#allocation84_spill] sm:$0xff] %v15716_v6  ;;  %18636 = vst [vmem:[#allocation133_spill] sm:$0xff] %v15724_v19  ;;  %v15729_v45 = vpop.f32.mrb[72].mxu0  ;;  %v15731_v17 = vadd.f32 %v5728_v26, %v5656_v33 }
 0x4fb   : > { %v15727_v25 = vmul.f32 %v18003_v48, %v5045_v58  ;;  %18637 = vst [vmem:[#allocation66_spill] sm:$0xff] %v15729_v45  ;;  %v15735_v46 = vsel %vm1304_vm4, %v4763_v41, %v4795_v27  ;;  %v4859_v32 = vsel %vm1304_vm4, %v4795_v27, %v4763_v41  ;;  %v5375_v8 = vadd.f32 %v18640_v20, %v5177_v40  ;;  %v15740_v30 = vpop.f32.mrb[73].mxu0  ;;  %v18644_v45 = vld [vmem:[#allocation141_spill] sm:$0xff]  ;;  %v18645_v41 = vld [vmem:[#allocation123_spill] sm:$0xff] }
 0x4fc   : > { %6844 = vmatmul.mubr.bf16.gmra.mrb[104].mxu0 %v6495_v63  ;;  %18638 = vst [vmem:[#allocation57_spill] sm:$0xff] %v15731_v17  ;;  %18639 = vst [vmem:[#allocation56_spill] sm:$0xff] %v15735_v46  ;;  %v15743_v62 = vmul.f32 %v18002_v51, %v4859_v32  ;;  %v5593_v58 = vmul.f32 %v13048_v57, %v15735_v46  ;;  %v5447_v63 = vmul.f32 %v13044_v7, %v5013_v5  ;;  %v15752_v33 = vpop.f32.mrb[74].mxu0  ;;  %v18666_v46 = vld [vmem:[#allocation16_spill] sm:$0xff] }
 0x4fd   : > { %18641 = vst [vmem:[#allocation39_spill] sm:$0xff] %v15740_v30  ;;  %v15750_v26 = vmul.f32 %v13044_v7, %v15727_v25  ;;  %18643 = vst [vmem:[#allocation44_spill] sm:$0xff] %v15752_v33  ;;  %v5505_v27 = vadd.f32 %v18645_v41, %v18644_v45  ;;  %v5575_v40 = vmul.f32 %v13048_v57, %v15482_v24  ;;  %v15763_v30 = vpop.f32.mrb[75].mxu0  ;;  %v18648_v41 = vld [vmem:[#allocation55_spill] sm:$0xff] }
 0x4fe   : > { %18642 = vst [vmem:[#allocation22_spill] sm:$0xff] %v15743_v62  ;;  %v5849_v32 = vmul.f32 %v13052_v37, %v15522_v13  ;;  %v15761_v20 = vmul.f32 %v13052_v37, %v5013_v5  ;;  %18646 = vst [vmem:[#allocation30_spill] sm:$0xff] %v15763_v30  ;;  %v15767_v17 = vmul.f32 %v13048_v57, %v15743_v62  ;;  %v18650_v13 = vld [vmem:[#allocation124_spill] sm:$0xff] }
 0x4ff   : > { %v5657_v6 = vadd.f32 %v5593_v58, %v5521_v9  ;;  %v15769_v33 = vadd.f32 %v5447_v63, %v5375_v8  ;;  %v5983_v45 = vmul.f32 %v13091_v21, %v15690_v4  ;;  %v5639_v24 = vadd.f32 %v5575_v40, %v18648_v41  ;;  %v18652_v63 = vld [vmem:[#allocation90_spill] sm:$0xff]  ;;  %v18653_v41 = vld [vmem:[#allocation101_spill] sm:$0xff] }
 0x500   : > { %18647 = vst [vmem:[#allocation83_spill] sm:$0xff] %v15767_v17  ;;  %v5641_v10 = vadd.f32 %v18649_v2, %v5505_v27  ;;  %v5985_v0 = vmul.f32 %v13091_v21, %v18650_v13  ;;  %v6119_v30 = vmul.f32 %v13510_v59, %v18631_v28  ;;  %v6121_v9 = vmul.f32 %v13510_v59, %v18629_v11  ;;  %v18654_v27 = vld [vmem:[#allocation72_spill] sm:$0xff] }
 0x501   : > { %v15779_v54 = vadd.f32 %v5729_v16, %v5657_v6  ;;  %v6253_v8 = vmul.f32 %v15562_v60, %v5013_v5  ;;  %v6255_v58 = vmul.f32 %v15562_v60, %v15727_v25  ;;  %v5775_v40 = vadd.f32 %v18652_v63, %v5639_v24  ;;  %v18655_v17 = vld [vmem:[#allocation36_spill] sm:$0xff]  ;;  %v18657_v6 = vld [vmem:[#allocation117_spill] sm:$0xff]  ;;  %v18661_v63 = vld [vmem:[#allocation79_spill] sm:$0xff] }
 0x502   : > { %v5777_v2 = vadd.f32 %v18653_v41, %v5641_v10  ;;  %v15790_v13 = vmul.f32 %v18002_v51, %v18654_v27  ;;  %v18656_v28 = vrot.slane %v18655_v17, 1  ;;  %v18658_v16 = vrot.slane %v18657_v6, 1  ;;  %v18662_v41 = vld [vmem:[#allocation114_spill] sm:$0xff] }
 0x503   : > { %18651 = vst [vmem:[#allocation53_spill] sm:$0xff] %v15779_v54  ;;  %v5504_v27 = vadd.f32 %v18662_v41, %v18661_v63  ;;  %v5574_v53 = vmul.f32 %v13011_v49, %v15573_v22  ;;  %v5911_v43 = vadd.f32 %v15544_v56, %v5775_v40  ;;  %v5848_v29 = vmul.f32 %v18115_v55, %v15591_v14  ;;  %v18664_v56 = vld [vmem:[#allocation12_spill] sm:$0xff] }
 0x504   : > { %v5012_v11 = vsel %vm1505_vm5, %v18658_v16, %v18656_v28  ;;  %v18659_v5 = vmov %v18658_v16  ;;  %v18660_v54 = vmov %v18656_v28  ;;  %v5913_v19 = vadd.f32 %v5849_v32, %v5777_v2  ;;  %v18665_v2 = vld [vmem:[#allocation102_spill] sm:$0xff] }
 0x505   : > { %v5044_v24 = vsel %vm1505_vm5, %v18660_v54, %v18659_v5  ;;  %v5446_v10 = vmul.f32 %v18116_v15, %v5012_v11  ;;  %v5176_v16 = vmul.f32 %v12963_v1, %v15790_v13  ;;  %v5638_v44 = vadd.f32 %v5574_v53, %v15380_v38  ;;  %v18663_v54 = vld [vmem:[#allocation70_spill] sm:$0xff] }
 0x506   : > { %v15811_v28 = vmul.f32 %v18003_v48, %v5044_v24  ;;  %v5640_v5 = vadd.f32 %v18663_v54, %v5504_v27  ;;  %v15820_v63 = vmul.f32 %v18115_v55, %v5012_v11  ;;  %v6047_v22 = vadd.f32 %v5983_v45, %v5911_v43  ;;  %v18667_v27 = vld [vmem:[#allocation129_spill] sm:$0xff] }
 0x507   : > { %v6049_v41 = vadd.f32 %v5985_v0, %v5913_v19  ;;  %v5374_v32 = vadd.f32 %v18664_v56, %v5176_v16  ;;  %v5774_v24 = vadd.f32 %v18665_v2, %v5638_v44  ;;  %v5982_v53 = vmul.f32 %v13029_v50, %v15790_v13 }
 0x508   : > { %v15825_v40 = vmul.f32 %v18116_v15, %v15811_v28  ;;  %v5776_v38 = vadd.f32 %v18666_v46, %v5640_v5  ;;  %v5984_v14 = vmul.f32 %v13029_v50, %v18667_v27  ;;  %v6181_v54 = vadd.f32 %v6119_v30, %v6047_v22  ;;  %v18668_v30 = vld [vmem:[#allocation140_spill] sm:$0xff] }
 0x509   : > { %v6183_v62 = vadd.f32 %v6121_v9, %v6049_v41  ;;  %v15833_v43 = vadd.f32 %v5446_v10, %v5374_v32  ;;  %v6118_v19 = vmul.f32 %v18124_v31, %v18657_v6  ;;  %v5910_v0 = vadd.f32 %v15606_v61, %v5774_v24  ;;  %v18669_v6 = vld [vmem:[#allocation105_spill] sm:$0xff]  ;;  %v18671_v61 = vld [vmem:[#allocation76_spill] sm:$0xff] }
 0x50a   : > { %v5912_v45 = vadd.f32 %v5848_v29, %v5776_v38  ;;  %v6120_v44 = vmul.f32 %v18124_v31, %v18655_v17  ;;  %v6252_v46 = vmul.f32 %v15625_v3, %v5012_v11  ;;  %v6317_v16 = vadd.f32 %v6253_v8, %v6181_v54 }
 0x50b   : > { %v6319_v5 = vadd.f32 %v6255_v58, %v6183_v62  ;;  %v6254_v56 = vmul.f32 %v15625_v3, %v15811_v28  ;;  %v15845_v9 = vmul.f32 %v18002_v51, %v18668_v30  ;;  %v6046_v10 = vadd.f32 %v5982_v53, %v5910_v0  ;;  %v18676_v30 = vld [vmem:[#allocation68_spill] sm:$0xff] }
 0x50c   : > { %v6048_v22 = vadd.f32 %v5984_v14, %v5912_v45  ;;  %v18670_v41 = vrot.slane %v18669_v6, 1  ;;  %v18672_v29 = vrot.slane %v18671_v61, 1  ;;  %v6392_v58 = vadd.f32 %v13530_v47, %v6317_v16  ;;  %v18675_v14 = vld [vmem:[#allocation48_spill] sm:$0xff] }
 0x50d   : > { %v6394_v32 = vadd.f32 %v13530_v47, %v6319_v5  ;;  %v5181_v24 = vmul.f32 %v13039_v35, %v15845_v9  ;;  %v6180_v38 = vadd.f32 %v6118_v19, %v6046_v10  ;;  %v5509_v54 = vadd.f32 %v15539_v42, %v18675_v14  ;;  %v18677_v19 = vld [vmem:[#allocation109_spill] sm:$0xff] }
 0x50e   : > { %v5015_v17 = vsel %vm1505_vm5, %v18672_v29, %v18670_v41  ;;  %v18673_v11 = vmov %v18672_v29  ;;  %v18674_v62 = vmov %v18670_v41  ;;  %v6182_v53 = vadd.f32 %v6120_v44, %v6048_v22 }
 0x50f   : > { %v5047_v8 = vsel %vm1505_vm5, %v18674_v62, %v18673_v11  ;;  %v5451_v27 = vmul.f32 %v13044_v7, %v5015_v17  ;;  %v6456_v0 = vmax.f32 %v6392_v58, 0.0  ;;  %v6458_v45 = vmax.f32 %v6394_v32, 0.0  ;;  %v18679_v32 = vld [vmem:[#allocation134_spill] sm:$0xff] }
 0x510   : > { %v15862_v2 = vmul.f32 %v18003_v48, %v5047_v8  ;;  %v5379_v41 = vadd.f32 %v18676_v30, %v5181_v24  ;;  %v6316_v5 = vadd.f32 %v6252_v46, %v6180_v38  ;;  %v6318_v29 = vadd.f32 %v6254_v56, %v6182_v53  ;;  %v18678_v46 = vld [vmem:[#allocation75_spill] sm:$0xff]  ;;  %v18680_v38 = vld [vmem:[#allocation125_spill] sm:$0xff] }
 0x511   : > { %v5579_v11 = vmul.f32 %v13048_v57, %v15690_v4  ;;  %v5645_v44 = vadd.f32 %v18677_v19, %v5509_v54  ;;  %v6498_v10 = vpack.c.bf16 %v6458_v45, %v6456_v0  ;;  %v5853_v42 = vmul.f32 %v13052_v37, %v15727_v25  ;;  %v18681_v0 = vld [vmem:[#allocation73_spill] sm:$0xff] }
 0x512   : > { %v15872_v16 = vmul.f32 %v13044_v7, %v15862_v2  ;;  %v15877_v22 = vadd.f32 %v5451_v27, %v5379_v41  ;;  %v15882_v62 = vmul.f32 %v13052_v37, %v5015_v17  ;;  %v6391_v8 = vadd.f32 %v13523_v18, %v6316_v5  ;;  %v15897_v41 = vpop.f32.mrb[76].mxu0 }
 0x513   : > { %v6393_v58 = vadd.f32 %v13523_v18, %v6318_v29  ;;  %v5643_v56 = vadd.f32 %v5579_v11, %v18678_v46  ;;  %v5781_v24 = vadd.f32 %v18679_v32, %v5645_v44  ;;  %6853 = vmatprep.mubr.bf16.mxu0 %v6498_v10  ;;  %v5987_v4 = vmul.f32 %v13091_v21, %v15845_v9  ;;  %v18683_v11 = vld [vmem:[#allocation137_spill] sm:$0xff]  ;;  %v18686_v10 = vld [vmem:[#allocation60_spill] sm:$0xff] }
 0x514   : > { %v5989_v53 = vmul.f32 %v13091_v21, %v18680_v38  ;;  %v6123_v25 = vmul.f32 %v13510_v59, %v18671_v61  ;;  %v6125_v27 = vmul.f32 %v13510_v59, %v18669_v6  ;;  %v6455_v14 = vmax.f32 %v6391_v8, 0.0  ;;  %18682 = vst [vmem:[#allocation52_spill] sm:$0xff] %v15897_v41  ;;  %v18684_v61 = vld [vmem:[#allocation42_spill] sm:$0xff] }
 0x515   : > { %v6457_v54 = vmax.f32 %v6393_v58, 0.0  ;;  %v5779_v45 = vadd.f32 %v18681_v0, %v5643_v56  ;;  %v5917_v30 = vadd.f32 %v5853_v42, %v5781_v24  ;;  %v6257_v5 = vmul.f32 %v15562_v60, %v5015_v17  ;;  %v15912_v58 = vpop.f32.mrb[77].mxu0 }
 0x516   : > { %v6259_v29 = vmul.f32 %v15562_v60, %v15862_v2  ;;  %v15904_v19 = vmul.f32 %v18002_v51, %v18683_v11  ;;  %v18685_v44 = vrot.slane %v18684_v61, 1  ;;  %v18687_v6 = vrot.slane %v18686_v10, 1  ;;  %18688 = vst [vmem:[#allocation80_spill] sm:$0xff] %v15912_v58  ;;  %v15921_v38 = vpop.f32.mrb[78].mxu0  ;;  %v18696_v58 = vld [vmem:[#allocation9_spill] sm:$0xff] }
 0x517   : > { %v6497_v42 = vpack.c.bf16 %v6457_v54, %v6455_v14  ;;  %v5915_v46 = vadd.f32 %v15761_v20, %v5779_v45  ;;  %v6053_v17 = vadd.f32 %v5989_v53, %v5917_v30  ;;  %18691 = vst [vmem:[#allocation35_spill] sm:$0xff] %v15921_v38  ;;  %v18692_v54 = vld [vmem:[#allocation69_spill] sm:$0xff]  ;;  %v15931_v45 = vpop.f32.mrb[79].mxu0 }
 0x518   : > { %v5014_v8 = vsel %vm1505_vm5, %v18687_v6, %v18685_v44  ;;  %v18689_v56 = vmov %v18687_v6  ;;  %v18690_v32 = vmov %v18685_v44  ;;  %v5180_v11 = vmul.f32 %v12963_v1, %v15904_v19  ;;  %v18693_v20 = vld [vmem:[#allocation49_spill] sm:$0xff]  ;;  %18694 = vst [vmem:[#allocation61_spill] sm:$0xff] %v15931_v45  ;;  %v18706_v45 = vld [vmem:[#allocation28_spill] sm:$0xff] }
 0x519   : > { %v5046_v24 = vsel %vm1505_vm5, %v18690_v32, %v18689_v56  ;;  %v5450_v14 = vmul.f32 %v18116_v15, %v5014_v8  ;;  %v5508_v53 = vadd.f32 %v18693_v20, %v18692_v54  ;;  %6854 = vmatmul.mubr.bf16.gmra.mrb[108].mxu0 %v6497_v42  ;;  %v6051_v30 = vadd.f32 %v5987_v4, %v5915_v46  ;;  %v18695_v32 = vld [vmem:[#allocation110_spill] sm:$0xff] }
 0x51a   : > { %v15924_v0 = vmul.f32 %v18003_v48, %v5046_v24  ;;  %v6187_v44 = vadd.f32 %v6125_v27, %v6053_v17  ;;  %v5578_v6 = vmul.f32 %v13011_v49, %v15790_v13  ;;  %v5852_v56 = vmul.f32 %v18115_v55, %v15811_v28  ;;  %v18697_v28 = vld [vmem:[#allocation46_spill] sm:$0xff] }
 0x51b   : > { %v5378_v24 = vadd.f32 %v18695_v32, %v5180_v11  ;;  %v5644_v41 = vadd.f32 %v18696_v58, %v5508_v53  ;;  %v15944_v54 = vmul.f32 %v18115_v55, %v5014_v8  ;;  %v6185_v42 = vadd.f32 %v6123_v25, %v6051_v30  ;;  %v18698_v11 = vld [vmem:[#allocation88_spill] sm:$0xff]  ;;  %v18699_v25 = vld [vmem:[#allocation14_spill] sm:$0xff] }
 0x51c   : > { %v15940_v38 = vmul.f32 %v18116_v15, %v15924_v0  ;;  %v6323_v4 = vadd.f32 %v6259_v29, %v6187_v44  ;;  %v5642_v27 = vadd.f32 %v5578_v6, %v15617_v23  ;;  %v5986_v13 = vmul.f32 %v13029_v50, %v15904_v19  ;;  %v18700_v44 = vld [vmem:[#allocation17_spill] sm:$0xff] }
 0x51d   : > { %v15949_v46 = vadd.f32 %v5450_v14, %v5378_v24  ;;  %v5780_v17 = vadd.f32 %v18697_v28, %v5644_v41  ;;  %v5988_v20 = vmul.f32 %v13029_v50, %v18698_v11  ;;  %v6122_v58 = vmul.f32 %v18124_v31, %v18686_v10  ;;  %v18705_v11 = vld [vmem:[#allocation100_spill] sm:$0xff] }
 0x51e   : > { %v6321_v53 = vadd.f32 %v6257_v5, %v6185_v42  ;;  %v6398_v32 = vadd.f32 %v13530_v47, %v6323_v4  ;;  %v5778_v29 = vadd.f32 %v18699_v25, %v5642_v27  ;;  %v6124_v23 = vmul.f32 %v18124_v31, %v18684_v61  ;;  %v18701_v42 = vld [vmem:[#allocation85_spill] sm:$0xff]  ;;  %v18703_v27 = vld [vmem:[#allocation86_spill] sm:$0xff] }
 0x51f   : > { %v5916_v30 = vadd.f32 %v5852_v56, %v5780_v17  ;;  %v6256_v14 = vmul.f32 %v15625_v3, %v5014_v8  ;;  %v6258_v41 = vmul.f32 %v15625_v3, %v15924_v0  ;;  %v15965_v6 = vmul.f32 %v18002_v51, %v18700_v44 }
 0x520   : > { %v6396_v10 = vadd.f32 %v13530_v47, %v6321_v53  ;;  %v6462_v5 = vmax.f32 %v6398_v32, 0.0  ;;  %v5914_v24 = vadd.f32 %v15820_v63, %v5778_v29  ;;  %v18702_v4 = vrot.slane %v18701_v42, 1 }
 0x521   : > { %v18704_v28 = vrot.slane %v18703_v27, 1  ;;  %v6052_v8 = vadd.f32 %v5988_v20, %v5916_v30  ;;  %v5185_v56 = vmul.f32 %v13039_v35, %v15965_v6  ;;  %v5513_v25 = vadd.f32 %v15750_v26, %v18705_v11  ;;  %v18707_v20 = vld [vmem:[#allocation96_spill] sm:$0xff] }
 0x522   : > { %v6460_v53 = vmax.f32 %v6396_v10, 0.0  ;;  %v6050_v32 = vadd.f32 %v5986_v13, %v5914_v24  ;;  %v5583_v63 = vmul.f32 %v13048_v57, %v15845_v9  ;;  %v5857_v29 = vmul.f32 %v13052_v37, %v15862_v2  ;;  %v18708_v24 = vld [vmem:[#allocation41_spill] sm:$0xff] }
 0x523   : > { %v5017_v61 = vsel %vm1505_vm5, %v18704_v28, %v18702_v4  ;;  %v6186_v44 = vadd.f32 %v6124_v23, %v6052_v8  ;;  %v5383_v4 = vadd.f32 %v18706_v45, %v5185_v56  ;;  %v5649_v30 = vadd.f32 %v18707_v20, %v5513_v25  ;;  %v18709_v23 = vld [vmem:[#allocation94_spill] sm:$0xff]  ;;  %v18710_v56 = vld [vmem:[#allocation25_spill] sm:$0xff] }
 0x524   : > { %v5455_v17 = vmul.f32 %v13044_v7, %v5017_v61  ;;  %v15987_v35 = vmul.f32 %v13052_v37, %v5017_v61  ;;  %v6500_v7 = vpack.c.bf16 %v6462_v5, %v6460_v53  ;;  %v6184_v28 = vadd.f32 %v6122_v58, %v6050_v32  ;;  %v18711_v32 = vld [vmem:[#allocation138_spill] sm:$0xff] }
 0x525   : > { %v5647_v26 = vadd.f32 %v5583_v63, %v15769_v33  ;;  %v5991_v13 = vmul.f32 %v13091_v21, %v15965_v6  ;;  %v6322_v10 = vadd.f32 %v6258_v41, %v6186_v44  ;;  %v5785_v2 = vadd.f32 %v18708_v24, %v5649_v30 }
 0x526   : > { %v15992_v9 = vadd.f32 %v5455_v17, %v5383_v4  ;;  %v5993_v45 = vmul.f32 %v13091_v21, %v18709_v23  ;;  %6863 = vmatprep.mubr.bf16.mxu0 %v6500_v7  ;;  %v6320_v8 = vadd.f32 %v6256_v14, %v6184_v28  ;;  %v6127_v58 = vmul.f32 %v13510_v59, %v18703_v27  ;;  %v18712_v27 = vld [vmem:[#allocation99_spill] sm:$0xff]  ;;  %v18714_v4 = vld [vmem:[#allocation89_spill] sm:$0xff]  ;;  %v18716_v7 = vld [vmem:[#allocation74_spill] sm:$0xff] }
 0x527   : > { %v5783_v11 = vadd.f32 %v18710_v56, %v5647_v26  ;;  %v6129_v33 = vmul.f32 %v13510_v59, %v18701_v42  ;;  %v6397_v5 = vadd.f32 %v13523_v18, %v6322_v10  ;;  %v5921_v41 = vadd.f32 %v5857_v29, %v5785_v2  ;;  %v18717_v2 = vld [vmem:[#allocation108_spill] sm:$0xff] }
 0x528   : > { %v6261_v17 = vmul.f32 %v15562_v60, %v5017_v61  ;;  %v6263_v25 = vmul.f32 %v15562_v60, %v15513_v39  ;;  %v6395_v53 = vadd.f32 %v13523_v18, %v6320_v8  ;;  %v16010_v63 = vmul.f32 %v18002_v51, %v18711_v32  ;;  %v18721_v32 = vld [vmem:[#allocation31_spill] sm:$0xff] }
 0x529   : > { %v5919_v14 = vadd.f32 %v15882_v62, %v5783_v11  ;;  %v18713_v44 = vrot.slane %v18712_v27, 1  ;;  %v18715_v42 = vrot.slane %v18714_v4, 1  ;;  %v6461_v20 = vmax.f32 %v6397_v5, 0.0 }
 0x52a   : > { %v6057_v61 = vadd.f32 %v5993_v45, %v5921_v41  ;;  %v5512_v28 = vadd.f32 %v15825_v40, %v18716_v7  ;;  %v6459_v26 = vmax.f32 %v6395_v53, 0.0  ;;  %v5184_v51 = vmul.f32 %v12963_v1, %v16010_v63  ;;  %v18718_v40 = vld [vmem:[#allocation121_spill] sm:$0xff]  ;;  %v18719_v1 = vld [vmem:[#allocation98_spill] sm:$0xff] }
 0x52b   : > { %v5016_v29 = vsel %vm1505_vm5, %v18715_v42, %v18713_v44  ;;  %v6055_v62 = vadd.f32 %v5991_v13, %v5919_v14  ;;  %v5582_v10 = vmul.f32 %v13011_v49, %v15904_v19  ;;  %v5856_v8 = vmul.f32 %v18115_v55, %v15924_v0 }
 0x52c   : > { %v5454_v30 = vmul.f32 %v18116_v15, %v5016_v29  ;;  %v6191_v24 = vadd.f32 %v6129_v33, %v6057_v61  ;;  %v5648_v23 = vadd.f32 %v18717_v2, %v5512_v28  ;;  %v16029_v45 = vmul.f32 %v18115_v55, %v5016_v29  ;;  %v18720_v33 = vld [vmem:[#allocation82_spill] sm:$0xff] }
 0x52d   : > { %v6499_v15 = vpack.c.bf16 %v6461_v20, %v6459_v26  ;;  %v6189_v56 = vadd.f32 %v6127_v58, %v6055_v62  ;;  %v5382_v11 = vadd.f32 %v18718_v40, %v5184_v51  ;;  %v5646_v13 = vadd.f32 %v5582_v10, %v15833_v43  ;;  %v18727_v40 = vld [vmem:[#allocation93_spill] sm:$0xff] }
 0x52e   : > { %v6327_v5 = vadd.f32 %v6263_v25, %v6191_v24  ;;  %v5784_v41 = vadd.f32 %v18719_v1, %v5648_v23  ;;  %v5990_v19 = vmul.f32 %v13029_v50, %v16010_v63  ;;  %v5992_v53 = vmul.f32 %v13029_v50, %v18720_v33 }
 0x52f   : > { %6864 = vmatmul.mubr.bf16.gmra.mrb[112].mxu0 %v6499_v15  ;;  %v6325_v0 = vadd.f32 %v6261_v17, %v6189_v56  ;;  %v16038_v14 = vadd.f32 %v5454_v30, %v5382_v11  ;;  %v5782_v44 = vadd.f32 %v18721_v32, %v5646_v13  ;;  %v6126_v58 = vmul.f32 %v18124_v31, %v18714_v4  ;;  %v16068_v15 = vpop.f32.mrb[80].mxu0 }
 0x530   : > { %v6402_v43 = vadd.f32 %v13530_v47, %v6327_v5  ;;  %v5920_v25 = vadd.f32 %v5856_v8, %v5784_v41  ;;  %v6128_v42 = vmul.f32 %v18124_v31, %v18712_v27  ;;  %v6260_v20 = vmul.f32 %v15625_v3, %v5016_v29  ;;  %v16076_v13 = vpop.f32.mrb[81].mxu0 }
 0x531   : > { %v6400_v61 = vadd.f32 %v13530_v47, %v6325_v0  ;;  %v5918_v7 = vadd.f32 %v15944_v54, %v5782_v44  ;;  %v6262_v17 = vmul.f32 %v15625_v3, %v15462_v34  ;;  %v18722_v30 = vrot.slane %v15697_v12, 1  ;;  %v18726_v54 = vld [vmem:[#allocation119_spill] sm:$0xff] }
 0x532   : > { %v18723_v28 = vrot.slane %v15643_v52, 1  ;;  %v6466_v26 = vmax.f32 %v6402_v43, 0.0  ;;  %v6056_v62 = vadd.f32 %v5992_v53, %v5920_v25  ;;  %v5517_v10 = vadd.f32 %v15872_v16, %v18726_v54  ;;  %v18729_v53 = vld [vmem:[#allocation22_spill] sm:$0xff] }
 0x533   : > { %v18725_v29 = vmov %v18722_v30  ;;  %v6464_v24 = vmax.f32 %v6400_v61, 0.0  ;;  %v6054_v2 = vadd.f32 %v5990_v19, %v5918_v7  ;;  %v5587_v8 = vmul.f32 %v13048_v57, %v15965_v6  ;;  %v16080_v57 = vpop.f32.mrb[82].mxu0  ;;  %v18728_v19 = vld [vmem:[#allocation144_spill] sm:$0xff]  ;;  %v18732_v7 = vld [vmem:[#allocation67_spill] sm:$0xff]  ;;  %v18738_v54 = vld [vmem:[#allocation10_spill] sm:$0xff] }
 0x534   : > { %v5019_v4 = vsel %vm1505_vm5, %v18723_v28, %v18722_v30  ;;  %v18724_v27 = vmov %v18723_v28  ;;  %v6190_v56 = vadd.f32 %v6128_v42, %v6056_v62  ;;  %v5653_v52 = vadd.f32 %v18727_v40, %v5517_v10  ;;  %v16087_v44 = vpop.f32.mrb[83].mxu0  ;;  %v18734_v30 = vld [vmem:[#allocation95_spill] sm:$0xff]  ;;  %v18739_v40 = vld [vmem:[#allocation26_spill] sm:$0xff] }
 0x535   : > { %v5051_v51 = vsel %vm1505_vm5, %v18725_v29, %v18724_v27  ;;  %v5861_v12 = vmul.f32 %v13052_v37, %v15513_v39  ;;  %v16074_v11 = vmul.f32 %v13052_v37, %v5019_v4  ;;  %v6502_v16 = vpack.c.bf16 %v6466_v26, %v6464_v24  ;;  %v18730_v39 = vld [vmem:[#allocation56_spill] sm:$0xff] }
 0x536   : > { %v5115_v23 = vmul.f32 %v18003_v48, %v5051_v51  ;;  %v6188_v5 = vadd.f32 %v6126_v58, %v6054_v2  ;;  %v5651_v1 = vadd.f32 %v5587_v8, %v15877_v22  ;;  %v6326_v6 = vadd.f32 %v6262_v17, %v6190_v56  ;;  %v18731_v58 = vld [vmem:[#allocation135_spill] sm:$0xff] }
 0x537   : > { %v5789_v33 = vadd.f32 %v18728_v19, %v5653_v52  ;;  %v5995_v0 = vmul.f32 %v13091_v21, %v18729_v53  ;;  %v5997_v32 = vmul.f32 %v13091_v21, %v18730_v39  ;;  %6873 = vmatprep.mubr.bf16.mxu0 %v6502_v16  ;;  %v6265_v22 = vmul.f32 %v15562_v60, %v5019_v4  ;;  %v18743_v19 = vld [vmem:[#allocation142_spill] sm:$0xff]  ;;  %v18745_v39 = vld [vmem:[#allocation143_spill] sm:$0xff] }
 0x538   : > { %v5865_v41 = vmul.f32 %v13052_v37, %v5115_v23  ;;  %v6324_v43 = vadd.f32 %v6260_v20, %v6188_v5  ;;  %v5787_v25 = vadd.f32 %v18731_v58, %v5651_v1  ;;  %v6267_v37 = vmul.f32 %v15562_v60, %v5115_v23  ;;  %v18741_v5 = vld [vmem:[#allocation113_spill] sm:$0xff] }
 0x539   : > { %v6401_v42 = vadd.f32 %v13523_v18, %v6326_v6  ;;  %v5925_v61 = vadd.f32 %v5861_v12, %v5789_v33  ;;  %v18733_v17 = vrot.slane %v18732_v7, 1  ;;  %v18735_v28 = vrot.slane %v18734_v30, 1  ;;  %v18744_v33 = vld [vmem:[#allocation63_spill] sm:$0xff] }
 0x53a   : > { %v6399_v4 = vadd.f32 %v13523_v18, %v6324_v43  ;;  %v5923_v29 = vadd.f32 %v15987_v35, %v5787_v25  ;;  %v5516_v10 = vadd.f32 %v15940_v38, %v18738_v54  ;;  %v5586_v23 = vmul.f32 %v13011_v49, %v16010_v63  ;;  %v18740_v35 = vld [vmem:[#allocation133_spill] sm:$0xff]  ;;  %v18742_v49 = vld [vmem:[#allocation139_spill] sm:$0xff] }
 0x53b   : > { %v5018_v26 = vsel %vm1505_vm5, %v18735_v28, %v18733_v17  ;;  %v18736_v62 = vmov %v18735_v28  ;;  %v18737_v20 = vmov %v18733_v17  ;;  %v6465_v24 = vmax.f32 %v6401_v42, 0.0  ;;  %v18746_v25 = vld [vmem:[#allocation83_spill] sm:$0xff] }
 0x53c   : > { %v5050_v27 = vsel %vm1505_vm5, %v18737_v20, %v18736_v62  ;;  %v6061_v2 = vadd.f32 %v5997_v32, %v5925_v61  ;;  %v5860_v8 = vmul.f32 %v18115_v55, %v15462_v34  ;;  %v6463_v56 = vmax.f32 %v6399_v4, 0.0  ;;  %v18747_v61 = vld [vmem:[#allocation53_spill] sm:$0xff]  ;;  %v18748_v28 = vld [vmem:[#allocation11_spill] sm:$0xff] }
 0x53d   : > { %v5114_v51 = vmul.f32 %v18003_v48, %v5050_v27  ;;  %v6059_v36 = vadd.f32 %v5995_v0, %v5923_v29  ;;  %v5652_v52 = vadd.f32 %v18739_v40, %v5516_v10  ;;  %v5862_v12 = vmul.f32 %v18115_v55, %v5018_v26  ;;  %v18749_v27 = vld [vmem:[#allocation103_spill] sm:$0xff]  ;;  %v18750_v10 = vld [vmem:[#allocation97_spill] sm:$0xff] }
 0x53e   : > { %v6195_v16 = vadd.f32 %v18740_v35, %v6061_v2  ;;  %v5650_v48 = vadd.f32 %v5586_v23, %v15949_v46  ;;  %v5994_v1 = vmul.f32 %v13029_v50, %v18741_v5  ;;  %v6501_v6 = vpack.c.bf16 %v6465_v24, %v6463_v56  ;;  %v18751_v2 = vld [vmem:[#allocation13_spill] sm:$0xff]  ;;  %v18752_v23 = vld [vmem:[#allocation34_spill] sm:$0xff] }
 0x53f   : > { %v5864_v38 = vmul.f32 %v18115_v55, %v5114_v51  ;;  %v6193_v63 = vadd.f32 %v18742_v49, %v6059_v36  ;;  %v5788_v34 = vadd.f32 %v18743_v19, %v5652_v52  ;;  %v5996_v53 = vmul.f32 %v13029_v50, %v18744_v33  ;;  %v18753_v36 = vld [vmem:[#allocation84_spill] sm:$0xff]  ;;  %v18754_v40 = vld [vmem:[#allocation57_spill] sm:$0xff] }
 0x540   : > { %v6331_v0 = vadd.f32 %v6267_v37, %v6195_v16  ;;  %v5786_v32 = vadd.f32 %v18745_v39, %v5650_v48  ;;  %v6264_v43 = vmul.f32 %v15625_v3, %v5018_v26  ;;  %v6266_v46 = vmul.f32 %v15625_v3, %v5114_v51  ;;  %6874 = vmatmul.mubr.bf16.gmra.mrb[116].mxu0 %v6501_v6 }
 0x541   : > { %v6329_v55 = vadd.f32 %v6265_v22, %v6193_v63  ;;  %v5924_v58 = vadd.f32 %v5860_v8, %v5788_v34  ;;  %v5655_v42 = vadd.f32 %v18746_v25, %v15992_v9  ;;  %v5929_v7 = vadd.f32 %v5865_v41, %v18747_v61 }
 0x542   : > { %v6406_v17 = vadd.f32 %v13530_v47, %v6331_v0  ;;  %v5922_v30 = vadd.f32 %v16029_v45, %v5786_v32  ;;  %v5999_v37 = vmul.f32 %v13091_v21, %v18748_v28  ;;  %v6001_v62 = vmul.f32 0.0, %v13091_v21 }
 0x543   : > { %v6404_v26 = vadd.f32 %v13530_v47, %v6329_v55  ;;  %v6060_v20 = vadd.f32 %v5996_v53, %v5924_v58  ;;  %v5791_v22 = vadd.f32 %v18749_v27, %v5655_v42  ;;  %v6135_v4 = vmul.f32 0.0, %v13510_v59 }
 0x544   : > { %v6470_v29 = vmax.f32 %v6406_v17, 0.0  ;;  %v6058_v9 = vadd.f32 %v5994_v1, %v5922_v30  ;;  %v6065_v51 = vadd.f32 %v6001_v62, %v5929_v7  ;;  %v6269_v41 = vmul.f32 0.0, %v15562_v60  ;;  %v18757_v7 = vld [vmem:[#allocation37_spill] sm:$0xff]  ;;  %v18758_v17 = vld [vmem:[#allocation8_spill] sm:$0xff] }
 0x545   : > { %v6468_v54 = vmax.f32 %v6404_v26, 0.0  ;;  %v6194_v45 = vadd.f32 %v18750_v10, %v6060_v20  ;;  %v5927_v24 = vadd.f32 %v16074_v11, %v5791_v22  ;;  %v6271_v21 = vmul.f32 %v15562_v60, %v18751_v2  ;;  %v18755_v11 = vld [vmem:[#allocation128_spill] sm:$0xff]  ;;  %v18762_v10 = vld [vmem:[#allocation21_spill] sm:$0xff] }
 0x546   : > { %v6192_v8 = vadd.f32 %v18752_v23, %v6058_v9  ;;  %v6199_v56 = vadd.f32 %v6135_v4, %v6065_v51  ;;  %v5654_v59 = vadd.f32 %v18753_v36, %v16038_v14  ;;  %v5928_v52 = vadd.f32 %v5864_v38, %v18754_v40  ;;  %v6539_v14 = vld [vmem:[%s16391_s15] sm:$0x3]  ;;  %v18760_v20 = vld [vmem:[#allocation104_spill] sm:$0xff]  ;;  %v6795_v51 = vpop.f32.mrb[84].mxu0  ;;  %v18764_v36 = vld [vmem:[#allocation130_spill] sm:$0xff] }
 0x547   : > { %v6504_v35 = vpack.c.bf16 %v6470_v29, %v6468_v54  ;;  %v6330_v16 = vadd.f32 %v6266_v46, %v6194_v45  ;;  %v6063_v48 = vadd.f32 %v5999_v37, %v5927_v24  ;;  %v5998_v5 = vmul.f32 %v13029_v50, %v18748_v28  ;;  %v18756_v46 = vld [vmem:[#allocation7_spill] sm:$0xff]  ;;  %v18761_v29 = vld [vmem:[#allocation132_spill] sm:$0xff] }
 0x548   : > { %v6328_v1 = vadd.f32 %v6264_v43, %v6192_v8  ;;  %v6335_v6 = vadd.f32 %v6271_v21, %v6199_v56  ;;  %v5790_v49 = vadd.f32 %v18755_v11, %v5654_v59  ;;  %v6000_v60 = vmul.f32 0.0, %v13029_v50  ;;  %v18759_v28 = vld [vmem:[#allocation15_spill] sm:$0xff]  ;;  %v18763_v8 = vld [vmem:[#allocation32_spill] sm:$0xff] }
 0x549   : > { %6883 = vmatprep.mubr.bf16.mxu0 %v6504_v35  ;;  %v6405_v38 = vadd.f32 %v13523_v18, %v6330_v16  ;;  %v6197_v63 = vadd.f32 %v6135_v4, %v6063_v48  ;;  %v6134_v19 = vmul.f32 0.0, %v18124_v31  ;;  %v6268_v34 = vmul.f32 0.0, %v15625_v3  ;;  %v18765_v48 = vld [vmem:[#allocation38_spill] sm:$0xff] }
 0x54a   : > { %v6403_v33 = vadd.f32 %v13523_v18, %v6328_v1  ;;  %v6410_v53 = vadd.f32 %v13530_v47, %v6335_v6  ;;  %v5926_v0 = vadd.f32 %v5862_v12, %v5790_v49  ;;  %v6064_v39 = vadd.f32 %v6000_v60, %v5928_v52  ;;  %v18766_v49 = vld [vmem:[#allocation66_spill] sm:$0xff] }
 0x54b   : > { %v6469_v50 = vmax.f32 %v6405_v38, 0.0  ;;  %v6333_v32 = vadd.f32 %v6269_v41, %v6197_v63  ;;  %v6270_v43 = vmul.f32 %v15625_v3, %v18751_v2  ;;  %v16166_v55 = vrot.slane %v6539_v14, %v18756_v46  ;;  %v6797_v2 = vpop.f32.mrb[85].mxu0 }
 0x54c   : > { %v6467_v58 = vmax.f32 %v6403_v33, 0.0  ;;  %v6474_v31 = vmax.f32 %v6410_v53, 0.0  ;;  %v6062_v25 = vadd.f32 %v5998_v5, %v5926_v0  ;;  %v6198_v42 = vadd.f32 %v6134_v19, %v6064_v39  ;;  %v6799_v40 = vpop.f32.mrb[86].mxu0  ;;  %v18769_v33 = vld [vmem:[#allocation30_spill] sm:$0xff] }
 0x54d   : > { %v6408_v61 = vadd.f32 %v13530_v47, %v6333_v32  ;;  %v6746_v12 = vadd.f32 %v18757_v7, %v16166_v55  ;;  %v16172_v30 = vrot.slane %v6539_v14, %v18758_v17  ;;  %v6750_v3 = vadd.f32 %v18759_v28, %v16166_v55  ;;  %v6801_v1 = vpop.f32.mrb[87].mxu0  ;;  %v18767_v14 = vld [vmem:[#allocation39_spill] sm:$0xff]  ;;  %v18773_v17 = vld [vmem:[#allocation61_spill] sm:$0xff] }
 0x54e   : > { %v6503_v37 = vpack.c.bf16 %v6469_v50, %v6467_v58  ;;  %v6196_v62 = vadd.f32 %v6134_v19, %v6062_v25  ;;  %v6334_v26 = vadd.f32 %v6270_v43, %v6198_v42  ;;  %v6756_v27 = vadd.f32 %v18760_v20, %v16166_v55  ;;  %v18768_v19 = vld [vmem:[#allocation44_spill] sm:$0xff]  ;;  %v18772_v42 = vld [vmem:[#allocation35_spill] sm:$0xff] }
 0x54f   : > { %v6472_v22 = vmax.f32 %v6408_v61, 0.0  ;;  %v6904_v4 = vmax.f32 %v6746_v12, 0.0  ;;  %v6748_v47 = vadd.f32 %v18761_v29, %v16172_v30  ;;  %v6906_v9 = vmax.f32 %v6750_v3, 0.0  ;;  %v18770_v50 = vld [vmem:[#allocation52_spill] sm:$0xff] }
 0x550   : > { %6884 = vmatmul.mubr.bf16.gmra.mrb[120].mxu0 %v6503_v37  ;;  %v6332_v41 = vadd.f32 %v6268_v34, %v6196_v62  ;;  %v6409_v54 = vadd.f32 %v13523_v18, %v6334_v26  ;;  %v6752_v45 = vadd.f32 %v18762_v10, %v16172_v30  ;;  %v6908_v24 = vmax.f32 %v6756_v27, 0.0  ;;  %v18771_v43 = vld [vmem:[#allocation80_spill] sm:$0xff] }
 0x551   : > { %v6506_v21 = vpack.c.bf16 %v6474_v31, %v6472_v22  ;;  %6968 = vst [vmem:[%s16183_s19] sm:$0xff] %v6904_v4  ;;  %v6905_v23 = vmax.f32 %v6748_v47, 0.0  ;;  %6970 = vst [vmem:[%s16183_s19 + $0x10] sm:$0xff] %v6906_v9  ;;  %v6758_v56 = vadd.f32 %v18763_v8, %v16172_v30  ;;  %v6760_v59 = vadd.f32 %v18764_v36, %v16166_v55 }
 0x552   : > { %v6407_v52 = vadd.f32 %v13523_v18, %v6332_v41  ;;  %v6473_v35 = vmax.f32 %v6409_v54, 0.0  ;;  %v6907_v16 = vmax.f32 %v6752_v45, 0.0  ;;  %6972 = vst [vmem:[%s16183_s19 + $0x20] sm:$0xff] %v6908_v24  ;;  %v6762_v5 = vadd.f32 %v18765_v48, %v16172_v30 }
 0x553   : > { %6893 = vmatprep.mubr.bf16.mxu0 %v6506_v21  ;;  %6969 = vst [vmem:[%s16183_s19 + $0x8] sm:$0xff] %v6905_v23  ;;  %v6909_v6 = vmax.f32 %v6758_v56, 0.0  ;;  %v6910_v11 = vmax.f32 %v6760_v59, 0.0  ;;  %v6766_v60 = vadd.f32 %v18766_v49, %v16166_v55  ;;  %v6768_v18 = vadd.f32 %v18767_v14, %v16172_v30 }
 0x554   : > { %v6471_v38 = vmax.f32 %v6407_v52, 0.0  ;;  %6971 = vst [vmem:[%s16183_s19 + $0x18] sm:$0xff] %v6907_v16  ;;  %v6911_v63 = vmax.f32 %v6762_v5, 0.0  ;;  %v6770_v34 = vadd.f32 %v18768_v19, %v16166_v55  ;;  %v6772_v53 = vadd.f32 %v18769_v33, %v16172_v30 }
 0x555   : > { %6973 = vst [vmem:[%s16183_s19 + $0x28] sm:$0xff] %v6909_v6  ;;  %6974 = vst [vmem:[%s16183_s19 + $0x30] sm:$0xff] %v6910_v11  ;;  %v6912_v0 = vmax.f32 %v6766_v60, 0.0  ;;  %v6913_v39 = vmax.f32 %v6768_v18, 0.0  ;;  %v6776_v32 = vadd.f32 %v18770_v50, %v16166_v55  ;;  %v6778_v46 = vadd.f32 %v18771_v43, %v16172_v30 }
 0x556   : > { %v6505_v58 = vpack.c.bf16 %v6473_v35, %v6471_v38  ;;  %6975 = vst [vmem:[%s16183_s19 + $0x38] sm:$0xff] %v6911_v63  ;;  %v6914_v31 = vmax.f32 %v6770_v34, 0.0  ;;  %v6915_v25 = vmax.f32 %v6772_v53, 0.0  ;;  %v6780_v61 = vadd.f32 %v18772_v42, %v16166_v55 }
 0x557   : > { %6976 = vst [vmem:[%s16183_s19 + $0x40] sm:$0xff] %v6912_v0  ;;  %6977 = vst [vmem:[%s16183_s19 + $0x48] sm:$0xff] %v6913_v39  ;;  %v6916_v7 = vmax.f32 %v6776_v32, 0.0  ;;  %v6917_v12 = vmax.f32 %v6778_v46, 0.0  ;;  %v6782_v28 = vadd.f32 %v18773_v17, %v16172_v30  ;;  %v6786_v3 = vadd.f32 %v16068_v15, %v16166_v55 }
 0x558   : > { %6894 = vmatmul.mubr.bf16.gmra.mrb[124].mxu0 %v6505_v58  ;;  %6978 = vst [vmem:[%s16183_s19 + $0x50] sm:$0xff] %v6914_v31  ;;  %6979 = vst [vmem:[%s16183_s19 + $0x58] sm:$0xff] %v6915_v25  ;;  %v6918_v37 = vmax.f32 %v6780_v61, 0.0  ;;  %v6788_v62 = vadd.f32 %v16076_v13, %v16172_v30  ;;  %v6790_v26 = vadd.f32 %v16080_v57, %v16166_v55 }
 0x559   : > { %v6792_v20 = vadd.f32 %v16087_v44, %v16172_v30  ;;  %6980 = vst [vmem:[%s16183_s19 + $0x60] sm:$0xff] %v6916_v7  ;;  %6981 = vst [vmem:[%s16183_s19 + $0x68] sm:$0xff] %v6917_v12  ;;  %v6919_v15 = vmax.f32 %v6782_v28, 0.0  ;;  %v6920_v27 = vmax.f32 %v6786_v3, 0.0  ;;  %v6796_v22 = vadd.f32 %v6795_v51, %v16166_v55 }
 0x55a   : > { %v6798_v4 = vadd.f32 %v6797_v2, %v16172_v30  ;;  %6982 = vst [vmem:[%s16183_s19 + $0x70] sm:$0xff] %v6918_v37  ;;  %v6921_v13 = vmax.f32 %v6788_v62, 0.0  ;;  %v6922_v57 = vmax.f32 %v6790_v26, 0.0  ;;  %v6800_v44 = vadd.f32 %v6799_v40, %v16166_v55 }
 0x55b   : > { %v6923_v29 = vmax.f32 %v6792_v20, 0.0  ;;  %6983 = vst [vmem:[%s16183_s19 + $0x78] sm:$0xff] %v6919_v15  ;;  %6984 = vst [vmem:[%s16183_s19 + $0x80] sm:$0xff] %v6920_v27  ;;  %v6924_v47 = vmax.f32 %v6796_v22, 0.0  ;;  %v6802_v41 = vadd.f32 %v6801_v1, %v16172_v30  ;;  %v6805_v10 = vpop.f32.mrb[88].mxu0 }
 0x55c   : > { %v6925_v9 = vmax.f32 %v6798_v4, 0.0  ;;  %6985 = vst [vmem:[%s16183_s19 + $0x88] sm:$0xff] %v6921_v13  ;;  %6986 = vst [vmem:[%s16183_s19 + $0x90] sm:$0xff] %v6922_v57  ;;  %v6926_v51 = vmax.f32 %v6800_v44, 0.0  ;;  %v6806_v45 = vadd.f32 %v6805_v10, %v16166_v55  ;;  %v6807_v24 = vpop.f32.mrb[89].mxu0 }
 0x55d   : > { %6987 = vst [vmem:[%s16183_s19 + $0x98] sm:$0xff] %v6923_v29  ;;  %6988 = vst [vmem:[%s16183_s19 + $0xa0] sm:$0xff] %v6924_v47  ;;  %v6927_v54 = vmax.f32 %v6802_v41, 0.0  ;;  %v6808_v2 = vadd.f32 %v6807_v24, %v16172_v30  ;;  %v6809_v21 = vpop.f32.mrb[90].mxu0 }
 0x55e   : > { %6989 = vst [vmem:[%s16183_s19 + $0xa8] sm:$0xff] %v6925_v9  ;;  %6990 = vst [vmem:[%s16183_s19 + $0xb0] sm:$0xff] %v6926_v51  ;;  %v6928_v23 = vmax.f32 %v6806_v45, 0.0  ;;  %v6810_v8 = vadd.f32 %v6809_v21, %v16166_v55  ;;  %v6811_v56 = vpop.f32.mrb[91].mxu0 }
 0x55f   : > { %6991 = vst [vmem:[%s16183_s19 + $0xb8] sm:$0xff] %v6927_v54  ;;  %v6929_v36 = vmax.f32 %v6808_v2, 0.0  ;;  %v6812_v59 = vadd.f32 %v6811_v56, %v16172_v30 }
 0x560   : > { %6992 = vst [vmem:[%s16183_s19 + $0xc0] sm:$0xff] %v6928_v23  ;;  %v6930_v40 = vmax.f32 %v6810_v8, 0.0 }
 0x561   : > { %6993 = vst [vmem:[%s16183_s19 + $0xc8] sm:$0xff] %v6929_v36  ;;  %v6931_v52 = vmax.f32 %v6812_v59, 0.0 }
 0x562   : > { %6994 = vst [vmem:[%s16183_s19 + $0xd0] sm:$0xff] %v6930_v40 }
 0x563   : > { %6995 = vst [vmem:[%s16183_s19 + $0xd8] sm:$0xff] %v6931_v52 }
 0x577   : > { %v6815_v35 = vpop.f32.mrb[92].mxu0 }
 0x578   : > { %v6816_v16 = vadd.f32 %v6815_v35, %v16166_v55  ;;  %v6817_v48 = vpop.f32.mrb[93].mxu0 }
 0x579   : > { %v6818_v5 = vadd.f32 %v6817_v48, %v16172_v30  ;;  %v6819_v1 = vpop.f32.mrb[94].mxu0 }
 0x57a   : > { %v6932_v6 = vmax.f32 %v6816_v16, 0.0  ;;  %v6820_v11 = vadd.f32 %v6819_v1, %v16166_v55  ;;  %v6821_v49 = vpop.f32.mrb[95].mxu0 }
 0x57b   : > { %v6933_v60 = vmax.f32 %v6818_v5, 0.0  ;;  %v6822_v14 = vadd.f32 %v6821_v49, %v16172_v30 }
 0x57c   : > { %6996 = vst [vmem:[%s16183_s19 + $0xe0] sm:$0xff] %v6932_v6  ;;  %v6934_v18 = vmax.f32 %v6820_v11, 0.0 }
 0x57d   : > { %6997 = vst [vmem:[%s16183_s19 + $0xe8] sm:$0xff] %v6933_v60  ;;  %v6935_v38 = vmax.f32 %v6822_v14, 0.0 }
 0x57e   : > { %6998 = vst [vmem:[%s16183_s19 + $0xf0] sm:$0xff] %v6934_v18 }
 0x57f   : > { %6999 = vst [vmem:[%s16183_s19 + $0xf8] sm:$0xff] %v6935_v38 }
 0x593   : > { %v6825_v63 = vpop.f32.mrb[96].mxu0 }
 0x594   : > { %v6826_v19 = vadd.f32 %v6825_v63, %v16166_v55  ;;  %v6827_v34 = vpop.f32.mrb[97].mxu0 }
 0x595   : > { %v6828_v33 = vadd.f32 %v6827_v34, %v16172_v30  ;;  %v6829_v53 = vpop.f32.mrb[98].mxu0 }
 0x596   : > { %v6936_v0 = vmax.f32 %v6826_v19, 0.0  ;;  %v6830_v39 = vadd.f32 %v6829_v53, %v16166_v55  ;;  %v6831_v50 = vpop.f32.mrb[99].mxu0 }
 0x597   : > { %v6937_v32 = vmax.f32 %v6828_v33, 0.0  ;;  %v6832_v43 = vadd.f32 %v6831_v50, %v16172_v30 }
 0x598   : > { %7000 = vst [vmem:[%s16183_s19 + $0x100] sm:$0xff] %v6936_v0  ;;  %v6938_v46 = vmax.f32 %v6830_v39, 0.0 }
 0x599   : > { %7001 = vst [vmem:[%s16183_s19 + $0x108] sm:$0xff] %v6937_v32  ;;  %v6939_v58 = vmax.f32 %v6832_v43, 0.0 }
 0x59a   : > { %7002 = vst [vmem:[%s16183_s19 + $0x110] sm:$0xff] %v6938_v46 }
 0x59b   : > { %7003 = vst [vmem:[%s16183_s19 + $0x118] sm:$0xff] %v6939_v58 }
 0x5af   : > { %v6835_v31 = vpop.f32.mrb[100].mxu0 }
 0x5b0   : > { %v6836_v25 = vadd.f32 %v6835_v31, %v16166_v55  ;;  %v6837_v42 = vpop.f32.mrb[101].mxu0 }
 0x5b1   : > { %v6838_v61 = vadd.f32 %v6837_v42, %v16172_v30  ;;  %v6839_v7 = vpop.f32.mrb[102].mxu0 }
 0x5b2   : > { %v6940_v12 = vmax.f32 %v6836_v25, 0.0  ;;  %v6840_v17 = vadd.f32 %v6839_v7, %v16166_v55  ;;  %v6841_v28 = vpop.f32.mrb[103].mxu0 }
 0x5b3   : > { %v6941_v3 = vmax.f32 %v6838_v61, 0.0  ;;  %v6842_v37 = vadd.f32 %v6841_v28, %v16172_v30 }
 0x5b4   : > { %7004 = vst [vmem:[%s16183_s19 + $0x120] sm:$0xff] %v6940_v12  ;;  %v6942_v62 = vmax.f32 %v6840_v17, 0.0 }
 0x5b5   : > { %7005 = vst [vmem:[%s16183_s19 + $0x128] sm:$0xff] %v6941_v3  ;;  %v6943_v26 = vmax.f32 %v6842_v37, 0.0 }
 0x5b6   : > { %7006 = vst [vmem:[%s16183_s19 + $0x130] sm:$0xff] %v6942_v62 }
 0x5b7   : > { %7007 = vst [vmem:[%s16183_s19 + $0x138] sm:$0xff] %v6943_v26 }
 0x5cf   : > { %v6845_v20 = vpop.f32.mrb[104].mxu0 }
 0x5d0   : > { %v6846_v15 = vadd.f32 %v6845_v20, %v16166_v55  ;;  %v6847_v27 = vpop.f32.mrb[105].mxu0 }
 0x5d1   : > { %v6848_v22 = vadd.f32 %v6847_v27, %v16172_v30  ;;  %v6849_v4 = vpop.f32.mrb[106].mxu0 }
 0x5d2   : > { %v6944_v13 = vmax.f32 %v6846_v15, 0.0  ;;  %v6850_v57 = vadd.f32 %v6849_v4, %v16166_v55  ;;  %v6851_v29 = vpop.f32.mrb[107].mxu0 }
 0x5d3   : > { %v6945_v44 = vmax.f32 %v6848_v22, 0.0  ;;  %v6852_v47 = vadd.f32 %v6851_v29, %v16172_v30 }
 0x5d4   : > { %7008 = vst [vmem:[%s16183_s19 + $0x140] sm:$0xff] %v6944_v13  ;;  %v6946_v9 = vmax.f32 %v6850_v57, 0.0 }
 0x5d5   : > { %7009 = vst [vmem:[%s16183_s19 + $0x148] sm:$0xff] %v6945_v44  ;;  %v6947_v41 = vmax.f32 %v6852_v47, 0.0 }
 0x5d6   : > { %7010 = vst [vmem:[%s16183_s19 + $0x150] sm:$0xff] %v6946_v9 }
 0x5d7   : > { %7011 = vst [vmem:[%s16183_s19 + $0x158] sm:$0xff] %v6947_v41 }
 0x5ec   : > { %v6855_v51 = vpop.f32.mrb[108].mxu0 }
 0x5ed   : > { %v6856_v54 = vadd.f32 %v6855_v51, %v16166_v55  ;;  %v6857_v10 = vpop.f32.mrb[109].mxu0 }
 0x5ee   : > { %v6858_v45 = vadd.f32 %v6857_v10, %v16172_v30  ;;  %v6859_v24 = vpop.f32.mrb[110].mxu0 }
 0x5ef   : > { %v6948_v2 = vmax.f32 %v6856_v54, 0.0  ;;  %v6860_v21 = vadd.f32 %v6859_v24, %v16166_v55  ;;  %v6861_v23 = vpop.f32.mrb[111].mxu0 }
 0x5f0   : > { %v6949_v8 = vmax.f32 %v6858_v45, 0.0  ;;  %v6862_v56 = vadd.f32 %v6861_v23, %v16172_v30 }
 0x5f1   : > { %7012 = vst [vmem:[%s16183_s19 + $0x160] sm:$0xff] %v6948_v2  ;;  %v6950_v36 = vmax.f32 %v6860_v21, 0.0 }
 0x5f2   : > { %7013 = vst [vmem:[%s16183_s19 + $0x168] sm:$0xff] %v6949_v8  ;;  %v6951_v59 = vmax.f32 %v6862_v56, 0.0 }
 0x5f3   : > { %7014 = vst [vmem:[%s16183_s19 + $0x170] sm:$0xff] %v6950_v36 }
 0x5f4   : > { %7015 = vst [vmem:[%s16183_s19 + $0x178] sm:$0xff] %v6951_v59 }
 0x602   : > { %v6865_v40 = vpop.f32.mrb[112].mxu0 }
 0x603   : > { %v6866_v52 = vadd.f32 %v6865_v40, %v16166_v55  ;;  %v6867_v35 = vpop.f32.mrb[113].mxu0 }
 0x604   : > { %v6868_v16 = vadd.f32 %v6867_v35, %v16172_v30  ;;  %v6869_v48 = vpop.f32.mrb[114].mxu0 }
 0x605   : > { %v6952_v5 = vmax.f32 %v6866_v52, 0.0  ;;  %v6870_v1 = vadd.f32 %v6869_v48, %v16166_v55  ;;  %v6871_v6 = vpop.f32.mrb[115].mxu0 }
 0x606   : > { %v6953_v11 = vmax.f32 %v6868_v16, 0.0  ;;  %v6872_v49 = vadd.f32 %v6871_v6, %v16172_v30 }
 0x607   : > { %7016 = vst [vmem:[%s16183_s19 + $0x180] sm:$0xff] %v6952_v5  ;;  %v6954_v60 = vmax.f32 %v6870_v1, 0.0 }
 0x608   : > { %7017 = vst [vmem:[%s16183_s19 + $0x188] sm:$0xff] %v6953_v11  ;;  %v6955_v14 = vmax.f32 %v6872_v49, 0.0 }
 0x609   : > { %7018 = vst [vmem:[%s16183_s19 + $0x190] sm:$0xff] %v6954_v60 }
 0x60a   : > { %7019 = vst [vmem:[%s16183_s19 + $0x198] sm:$0xff] %v6955_v14 }
 0x613   : > { %v6875_v18 = vpop.f32.mrb[116].mxu0 }
 0x614   : > { %v6876_v38 = vadd.f32 %v6875_v18, %v16166_v55  ;;  %v6877_v63 = vpop.f32.mrb[117].mxu0 }
 0x615   : > { %v6878_v19 = vadd.f32 %v6877_v63, %v16172_v30  ;;  %v6879_v34 = vpop.f32.mrb[118].mxu0 }
 0x616   : > { %v6956_v33 = vmax.f32 %v6876_v38, 0.0  ;;  %v6880_v53 = vadd.f32 %v6879_v34, %v16166_v55  ;;  %v6881_v0 = vpop.f32.mrb[119].mxu0 }
 0x617   : > { %v6957_v39 = vmax.f32 %v6878_v19, 0.0  ;;  %v6882_v50 = vadd.f32 %v6881_v0, %v16172_v30 }
 0x618   : > { %7020 = vst [vmem:[%s16183_s19 + $0x1a0] sm:$0xff] %v6956_v33  ;;  %v6958_v32 = vmax.f32 %v6880_v53, 0.0 }
 0x619   : > { %7021 = vst [vmem:[%s16183_s19 + $0x1a8] sm:$0xff] %v6957_v39  ;;  %v6959_v43 = vmax.f32 %v6882_v50, 0.0 }
 0x61a   : > { %7022 = vst [vmem:[%s16183_s19 + $0x1b0] sm:$0xff] %v6958_v32 }
 0x61b   : > { %7023 = vst [vmem:[%s16183_s19 + $0x1b8] sm:$0xff] %v6959_v43 }
 0x623   : > { %v6885_v46 = vpop.f32.mrb[120].mxu0 }
 0x624   : > { %v6886_v58 = vadd.f32 %v6885_v46, %v16166_v55  ;;  %v6887_v31 = vpop.f32.mrb[121].mxu0 }
 0x625   : > { %v6888_v25 = vadd.f32 %v6887_v31, %v16172_v30  ;;  %v6889_v42 = vpop.f32.mrb[122].mxu0 }
 0x626   : > { %v6960_v61 = vmax.f32 %v6886_v58, 0.0  ;;  %v6890_v7 = vadd.f32 %v6889_v42, %v16166_v55  ;;  %v6891_v12 = vpop.f32.mrb[123].mxu0 }
 0x627   : > { %v6961_v17 = vmax.f32 %v6888_v25, 0.0  ;;  %v6892_v28 = vadd.f32 %v6891_v12, %v16172_v30 }
 0x628   : > { %7024 = vst [vmem:[%s16183_s19 + $0x1c0] sm:$0xff] %v6960_v61  ;;  %v6962_v3 = vmax.f32 %v6890_v7, 0.0 }
 0x629   : > { %7025 = vst [vmem:[%s16183_s19 + $0x1c8] sm:$0xff] %v6961_v17  ;;  %v6963_v37 = vmax.f32 %v6892_v28, 0.0 }
 0x62a   : > { %7026 = vst [vmem:[%s16183_s19 + $0x1d0] sm:$0xff] %v6962_v3 }
 0x62b   : > { %7027 = vst [vmem:[%s16183_s19 + $0x1d8] sm:$0xff] %v6963_v37  ;;  %v6895_v62 = vpop.f32.mrb[124].mxu0 }
 0x62c   : > { %v6896_v26 = vadd.f32 %v6895_v62, %v16166_v55  ;;  %v6897_v20 = vpop.f32.mrb[125].mxu0 }
 0x62d   : > { %v6898_v15 = vadd.f32 %v6897_v20, %v16172_v30  ;;  %v6899_v27 = vpop.f32.mrb[126].mxu0 }
 0x62e   : > { %v6964_v22 = vmax.f32 %v6896_v26, 0.0  ;;  %v6900_v4 = vadd.f32 %v6899_v27, %v16166_v55  ;;  %v6901_v13 = vpop.f32.mrb[127].mxu0 }
 0x62f   : > { %v6965_v57 = vmax.f32 %v6898_v15, 0.0  ;;  %v6902_v29 = vadd.f32 %v6901_v13, %v16172_v30 }
 0x630   : > { %7028 = vst [vmem:[%s16183_s19 + $0x1e0] sm:$0xff] %v6964_v22  ;;  %v6966_v44 = vmax.f32 %v6900_v4, 0.0 }
 0x631   : > { %7029 = vst [vmem:[%s16183_s19 + $0x1e8] sm:$0xff] %v6965_v57  ;;  %v6967_v47 = vmax.f32 %v6902_v29, 0.0 }
 0x632   : > { %7030 = vst [vmem:[%s16183_s19 + $0x1f0] sm:$0xff] %v6966_v44 }
 0x633   : > { %7031 = vst [vmem:[%s16183_s19 + $0x1f8] sm:$0xff] %v6967_v47 }
 0x634   : > { %7593 = shalt.err (!%p7590_p3)
}
 0x635   : > { %s7594_s28 = scalar_lea.hbm %s16326_s23, 8192  ;;  %s7598_s26 = scalar_lea.hbm %s16392_s16, 16384 }
 0x636   : > { %p7595_p4 = scmp.ne.s32.totalorder %s16326_s23, %s7594_s28  ;;  %p7599_p9 = scmp.lt.u32.totalorder %s16326_s23, %s16392_s16 }
 0x637   : > { %p7600_p10 = scmp.lt.u32.totalorder %s7598_s26, %s7594_s28  ;;  %p7602_p12 = scmp.lt.u32.totalorder %s7594_s28, %s16326_s23 }
 0x638   : > { %p7596_p7 = pnand %p7595_p4, %p7772_p5 }
 0x639   : > { %p7601_p11 = por %p7600_p10, %p7599_p9 }
 0x63a   : > { %p7597_p8 = pneg %p7596_p7 }
 0x63b   : > { %p7603_p13 = por %p7602_p12, %p7601_p11 }
 0x63d   : > { %p7604_p0 = pnand %p7603_p13, %p7597_p8 }
 0x63f   : > { %7607 = shalt.err (!%p7604_p0)
}
 0x640   : > { %s7647_s30 = smov 256   ;;  %s7648_s29 = smov 16  }
 0x641   : > { %7400 = dma.vmem_to_hbm [thread:$0]  (%p7772_p5), %s16328_s18, 8192, %s16326_s23, %s16335_s25, %s7647_s30, %s7647_s30, %s7648_s29  }
 0x642 PF: > { %p7406_p1 = scmp.ge.s32.totalorder %s7642_s24, 2  ;;  %s7061_s1 = sand.u32 1, %s7630_s21  }
 0x643   : > { %s7062_s2 = scalar_lea.sflag [#allocation3], %s7061_s1 }
 0x644   : > { %p7403_p2 = pnand %p7406_p1, %p7776_p6 }
 0x646   : > { %7625 = dma.done.wait (!%p7403_p2), %s7062_s2, 8192  }
 0x647   : > { %7627 = vsyncadd (!%p7403_p2), %s7062_s2, 4294959104  ;;  %s18774_s28 = sld [smem:[#allocation5_spill]]  ;;  %s18775_s23 = sld [smem:[#allocation6_spill]] }
 0x648   : > { %p26_p3 = scmp.ge.s32.totalorder %s7759_s27, 4   ;;  %s18776_s21 = smov %s7634_s22 }
 0x649   : > { %s18778_s24 = smov %s7759_s27 }
 0x64a   :  { %28 = sbr.rel (!%p26_p3) target bundleno = 7 (0x7), region = 122 }
 0x64d   : > { %s18777_s22 = smov %s18774_s28 }
 0x651   :  { %7067 = vsyncpa [#allocation3], 1 }
 0x652   :  { %7069 = vsyncpa [#allocation3 + $0x1], 1 }

</bundles_post_ra>
